<compile_context>
chip_gen: v6e
topology: v6e:2x2x1
jax: 0.10.0
libtpu: 0.0.40
codegen_flags: <defaults>
</compile_context>

<pallas_src>
import functools

import jax
import jax.numpy as jnp
from jax.experimental import pallas as pl
from jax.experimental.pallas import tpu as pltpu


def _mlp_kernel(x_ref,
                w1_ref, b1_ref,
                w2_ref, b2_ref,
                w3_ref, b3_ref,
                w4_ref, b4_ref,
                w5_ref, b5_ref,
                o_ref,
                *, small_in, scalar_out):
    """Whole 5-layer MLP forward for one batch tile."""
    x = x_ref[...].astype(jnp.float32)                      # (tile_n, in_dim)

    # ---- fc1 + ReLU ----
    if small_in:
        # K = in_dim is tiny: broadcast multiply-adds on the VPU (an MXU pass with K=3
        # would be ~1-2% utilized).  w1 is (in_dim, 128) f32, b1 is (1, 128) f32.
        h = x[:, 0:1] * w1_ref[0:1, :]
        for k in range(1, x.shape[1]):
            h = h + x[:, k:k + 1] * w1_ref[k:k + 1, :]
    else:
        h = jnp.dot(x.astype(jnp.bfloat16), w1_ref[...],
                    preferred_element_type=jnp.float32)
    h = jnp.maximum(h + b1_ref[...], 0.0)                   # f32 epilogue (v5e-safe)

    # ---- fc2..fc4: bf16 MXU matmuls, f32 accumulation, f32 bias/ReLU ----
    for w_ref, b_ref in ((w2_ref, b2_ref), (w3_ref, b3_ref), (w4_ref, b4_ref)):
        h = jnp.dot(h.astype(jnp.bfloat16), w_ref[...],
                    preferred_element_type=jnp.float32)
        h = jnp.maximum(h + b_ref[...], 0.0)

    # ---- fc5 ----
    if scalar_out:
        # out_dim == 1: a (tile_n,512)@(512,1) matmul is ~1/256 MXU utilization and a
        # (tile_n, 1) output block forces masked stores + a 4-byte-strided output DMA.
        # VPU/XLU instead, producing a lane-dense (1, tile_n) row.
        d = h.shape[1]                                       # 512
        prod = h * w5_ref[...]                               # (tile_n, d), VPU
        p = prod[:, 0:128]
        for c in range(128, d, 128):                         # fold lanes d -> 128
            p = p + prod[:, c:c + 128]                       # (tile_n, 128)
        r = p.T                                              # (128, tile_n) XLU transpose
        # Single native sublane reduce (one XLU pass per vreg) instead of an unrolled
        # halving tree that slices below the 8-sublane granule.
        row = jnp.sum(r, axis=0, keepdims=True)              # (1, tile_n)
        o_ref[...] = (row + b5_ref[...]).astype(o_ref.dtype)  # lane-dense store
    else:
        h = jnp.dot(h.astype(jnp.bfloat16), w5_ref[...],
                    preferred_element_type=jnp.float32) + b5_ref[...]
        o_ref[...] = h.astype(o_ref.dtype)


def _round_up(n, m):
    return ((n + m - 1) // m) * m


@functools.partial(jax.jit, static_argnames=("tile_n",))
def mlp_forward(x, params, *, tile_n=1024):
    """x: (N, in_dim) f32.  params: w{i} of shape (in, out), b{i} of shape (1, out)."""
    N, in_dim = x.shape
    hidden = (128, 256, 512, 512)
    out_dim = params["w5"].shape[1]
    small_in = in_dim <= 16        # fc1 on the VPU
    scalar_out = out_dim == 1      # fc5 on the VPU/XLU with a lane-dense output row

    # Tile size: multiple of 128, capped at 2048 so live activations (~10 KB/row:
    # f32 h + bf16 copy + prod) stay ~20 MiB even on v7x's 64 MiB VMEM.
    tile_n = max(128, (int(tile_n) // 128) * 128)
    tile_n = min(tile_n, 2048)
    if N > 128:
        # Keep >= 2 grid steps so the "parallel" axis can shard across the two v7x
        # TensorCores (single-step grids leave one TC idle).
        tile_n = min(tile_n, _round_up(pl.cdiv(N, 2), 128))
    else:
        tile_n = 128
    n_tiles = pl.cdiv(N, tile_n)
    n_pad = n_tiles * tile_n
    if n_pad != N:
        x = jnp.pad(x, ((0, n_pad - N), (0, 0)))

    f32, bf16 = jnp.float32, jnp.bfloat16
    w1 = params["w1"].astype(f32 if small_in else bf16)
    w2 = params["w2"].astype(bf16)
    w3 = params["w3"].astype(bf16)
    w4 = params["w4"].astype(bf16)
    b1 = params["b1"].reshape(1, -1).astype(f32)
    b2 = params["b2"].reshape(1, -1).astype(f32)
    b3 = params["b3"].reshape(1, -1).astype(f32)
    b4 = params["b4"].reshape(1, -1).astype(f32)
    if scalar_out:
        w5 = params["w5"].reshape(1, -1).astype(f32)         # (1, 512) row for VPU
        b5 = params["b5"].reshape(1, 1).astype(f32)
    else:
        w5 = params["w5"].astype(bf16)
        b5 = params["b5"].reshape(1, -1).astype(f32)

    def resident(arr):
        # Constant block index => fetched into VMEM once and reused across grid steps.
        # (pipeline_mode=pl.Buffered(1) would halve the ~2 MiB weight footprint; not
        #  worth it at this size.)
        return pl.BlockSpec(arr.shape, lambda i: (0, 0))

    in_specs = [
        pl.BlockSpec((tile_n, in_dim), lambda i: (i, 0)),    # x tile
        resident(w1), resident(b1),
        resident(w2), resident(b2),
        resident(w3), resident(b3),
        resident(w4), resident(b4),
        resident(w5), resident(b5),
    ]
    if scalar_out:
        out_shape = jax.ShapeDtypeStruct((1, n_pad), x.dtype)
        out_spec = pl.BlockSpec((1, tile_n), lambda i: (0, i))   # lane-dense row / step
    else:
        out_shape = jax.ShapeDtypeStruct((n_pad, out_dim), x.dtype)
        out_spec = pl.BlockSpec((tile_n, out_dim), lambda i: (i, 0))

    # Advisory cost hint so XLA schedules the surrounding pad/slice ops around a
    # compute-bound custom call.
    dims_all = [in_dim] + list(hidden) + [out_dim]
    flops = 2 * n_pad * sum(dims_all[i] * dims_all[i + 1] for i in range(len(dims_all) - 1))
    weight_bytes = sum(int(a.size) * a.dtype.itemsize
                       for a in (w1, b1, w2, b2, w3, b3, w4, b4, w5, b5))
    bytes_accessed = n_pad * in_dim * 4 + n_pad * out_dim * 4 + weight_bytes
    cost = pl.CostEstimate(flops=flops, transcendentals=0, bytes_accessed=bytes_accessed)

    out = pl.pallas_call(
        functools.partial(_mlp_kernel, small_in=small_in, scalar_out=scalar_out),
        out_shape=out_shape,
        grid_spec=pltpu.PrefetchScalarGridSpec(
            num_scalar_prefetch=0,
            grid=(n_tiles,),
            in_specs=in_specs,
            out_specs=out_spec,
        ),
        compiler_params=pltpu.CompilerParams(
            dimension_semantics=("parallel",),
            # Raised above v5e's 16 MiB default; kept under v7x's 64 MiB physical VMEM
            # so the tile_n sweep (<= 2048) never spills activations to HBM.
            vmem_limit_bytes=48 * 1024 * 1024,
        ),
        cost_estimate=cost,
    )(x, w1, b1, w2, b2, w3, b3, w4, b4, w5, b5)

    if scalar_out:
        out = out.reshape(n_pad, 1)
    return out[:N]


def init_mlp_params(key, in_dim, out_dim):
    """PyTorch nn.Linear-style init; weights stored as (in, out) so layers are x @ W + b."""
    dims = [(in_dim, 128), (128, 256), (256, 512), (512, 512), (512, out_dim)]
    params = {}
    for idx, (din, dout) in enumerate(dims, start=1):
        key, kw, kb = jax.random.split(key, 3)
        bound = 1.0 / jnp.sqrt(din)
        w_pt = jax.random.uniform(kw, (dout, din), jnp.float32, -bound, bound)  # torch layout
        b = jax.random.uniform(kb, (dout,), jnp.float32, -bound, bound)
        params[f"w{idx}"] = jnp.transpose(w_pt)   # (in, out)
        params[f"b{idx}"] = b.reshape(1, dout)
    return params


def mlp_reference(x, params, *, mimic_kernel_precision=False):
    """Pure-JAX forward.  With mimic_kernel_precision=True, fc2..fc4 use bf16 inputs and
    f32 accumulation, matching the kernel's numerics when in_dim<=16 / out_dim==1
    (fc1/fc5 stay f32 as in the kernel's VPU paths)."""
    cast = (lambda a: a.astype(jnp.bfloat16)) if mimic_kernel_precision else (lambda a: a)
    h = jnp.maximum(x @ params["w1"] + params["b1"], 0.0)
    for i in (2, 3, 4):
        h = jnp.dot(cast(h), cast(params[f"w{i}"]),
                    preferred_element_type=jnp.float32) + params[f"b{i}"]
        h = jnp.maximum(h, 0.0)
    return h @ params["w5"] + params["b5"]


if __name__ == "__main__":
    in_dim, out_dim = 3, 1   # 3-D query points -> scalar (SDF-style) value

    key = jax.random.PRNGKey(0)
    key, kx1, kx2 = jax.random.split(key, 3)
    params = init_mlp_params(key, in_dim, out_dim)

    # Main case: not a tile multiple -> exercises padding and a 2-step "parallel" grid.
    N = 1000
    x = jax.random.normal(kx1, (N, in_dim), jnp.float32)
    out = jax.block_until_ready(mlp_forward(x, params, tile_n=1024))
    assert out.shape == (N, out_dim)
    ref_exact = mlp_reference(x, params, mimic_kernel_precision=True)
    ref_f32 = mlp_reference(x, params)
    assert jnp.allclose(out, ref_exact, atol=2e-3, rtol=2e-3), "mismatch vs bf16-precision reference"
    assert jnp.allclose(out, ref_f32, atol=5e-2, rtol=5e-2), "mismatch vs f32 reference"

    # Tiny batch: single 128-row tile path.
    N2 = 64
    x2 = jax.random.normal(kx2, (N2, in_dim), jnp.float32)
    out2 = jax.block_until_ready(mlp_forward(x2, params, tile_n=1024))
    assert out2.shape == (N2, out_dim)
    ref2 = mlp_reference(x2, params, mimic_kernel_precision=True)
    assert jnp.allclose(out2, ref2, atol=2e-3, rtol=2e-3), "mismatch on tiny-batch path"

    print("KERNEL_OK")
</pallas_src>

<mosaic_0001>
module attributes {stable_mosaic.version = 11 : i64} {
  func.func @_mlp_kernel(%arg0: i32, %arg1: memref<512x3xf32, #tpu.memory_space<vmem>>, %arg2: memref<3x128xf32, #tpu.memory_space<vmem>>, %arg3: memref<1x128xf32, #tpu.memory_space<vmem>>, %arg4: memref<128x256xbf16, #tpu.memory_space<vmem>>, %arg5: memref<1x256xf32, #tpu.memory_space<vmem>>, %arg6: memref<256x512xbf16, #tpu.memory_space<vmem>>, %arg7: memref<1x512xf32, #tpu.memory_space<vmem>>, %arg8: memref<512x512xbf16, #tpu.memory_space<vmem>>, %arg9: memref<1x512xf32, #tpu.memory_space<vmem>>, %arg10: memref<1x512xf32, #tpu.memory_space<vmem>>, %arg11: memref<1x1xf32, #tpu.memory_space<vmem>>, %arg12: memref<1x512xf32, #tpu.memory_space<vmem>>) attributes {dimension_semantics = [#tpu.dimension_semantics<parallel>], iteration_bounds = array<i64: 2>, scalar_prefetch = 0 : i64, scratch_operands = 0 : i64, tpu.core_type = #tpu.core_type<tc>, window_params = [{transform_indices = @transform_0, window_bounds = array<i64: 512, 3>}, {pipeline_mode = #tpu.pipeline_mode<synchronous>, transform_indices = @transform_1, window_bounds = array<i64: 3, 128>}, {pipeline_mode = #tpu.pipeline_mode<synchronous>, transform_indices = @transform_2, window_bounds = array<i64: 1, 128>}, {pipeline_mode = #tpu.pipeline_mode<synchronous>, transform_indices = @transform_3, window_bounds = array<i64: 128, 256>}, {pipeline_mode = #tpu.pipeline_mode<synchronous>, transform_indices = @transform_4, window_bounds = array<i64: 1, 256>}, {pipeline_mode = #tpu.pipeline_mode<synchronous>, transform_indices = @transform_5, window_bounds = array<i64: 256, 512>}, {pipeline_mode = #tpu.pipeline_mode<synchronous>, transform_indices = @transform_6, window_bounds = array<i64: 1, 512>}, {pipeline_mode = #tpu.pipeline_mode<synchronous>, transform_indices = @transform_7, window_bounds = array<i64: 512, 512>}, {pipeline_mode = #tpu.pipeline_mode<synchronous>, transform_indices = @transform_8, window_bounds = array<i64: 1, 512>}, {pipeline_mode = #tpu.pipeline_mode<synchronous>, transform_indices = @transform_9, window_bounds = array<i64: 1, 512>}, {pipeline_mode = #tpu.pipeline_mode<synchronous>, transform_indices = @transform_10, window_bounds = array<i64: 1, 1>}, {transform_indices = @transform_11, window_bounds = array<i64: 1, 512>}]} {
    %c0 = arith.constant 0 : index
    %c0_0 = arith.constant 0 : index
    %0 = vector.load %arg1[%c0, %c0_0] : memref<512x3xf32, #tpu.memory_space<vmem>>, vector<512x3xf32>
    %1 = vector.extract_strided_slice %0 {offsets = [0, 0], sizes = [512, 1], strides = [1, 1]} : vector<512x3xf32> to vector<512x1xf32>
    %c0_1 = arith.constant 0 : index
    %c0_2 = arith.constant 0 : index
    %2 = vector.load %arg2[%c0_1, %c0_2] : memref<3x128xf32, #tpu.memory_space<vmem>>, vector<1x128xf32>
    %3 = vector.broadcast %1 : vector<512x1xf32> to vector<512x128xf32>
    %4 = vector.broadcast %2 : vector<1x128xf32> to vector<512x128xf32>
    %5 = arith.mulf %3, %4 : vector<512x128xf32>
    %6 = vector.extract_strided_slice %0 {offsets = [0, 1], sizes = [512, 1], strides = [1, 1]} : vector<512x3xf32> to vector<512x1xf32>
    %c1 = arith.constant 1 : index
    %c0_3 = arith.constant 0 : index
    %7 = vector.load %arg2[%c1, %c0_3] : memref<3x128xf32, #tpu.memory_space<vmem>>, vector<1x128xf32>
    %8 = vector.broadcast %6 : vector<512x1xf32> to vector<512x128xf32>
    %9 = vector.broadcast %7 : vector<1x128xf32> to vector<512x128xf32>
    %10 = arith.mulf %8, %9 : vector<512x128xf32>
    %11 = arith.addf %5, %10 : vector<512x128xf32>
    %12 = vector.extract_strided_slice %0 {offsets = [0, 2], sizes = [512, 1], strides = [1, 1]} : vector<512x3xf32> to vector<512x1xf32>
    %c2 = arith.constant 2 : index
    %c0_4 = arith.constant 0 : index
    %13 = vector.load %arg2[%c2, %c0_4] : memref<3x128xf32, #tpu.memory_space<vmem>>, vector<1x128xf32>
    %14 = vector.broadcast %12 : vector<512x1xf32> to vector<512x128xf32>
    %15 = vector.broadcast %13 : vector<1x128xf32> to vector<512x128xf32>
    %16 = arith.mulf %14, %15 : vector<512x128xf32>
    %17 = arith.addf %11, %16 : vector<512x128xf32>
    %c0_5 = arith.constant 0 : index
    %c0_6 = arith.constant 0 : index
    %18 = vector.load %arg3[%c0_5, %c0_6] : memref<1x128xf32, #tpu.memory_space<vmem>>, vector<1x128xf32>
    %19 = vector.broadcast %18 : vector<1x128xf32> to vector<512x128xf32>
    %20 = arith.addf %17, %19 : vector<512x128xf32>
    %cst = arith.constant 0.000000e+00 : f32
    %21 = vector.broadcast %cst : f32 to vector<512x128xf32>
    %22 = arith.maximumf %20, %21 : vector<512x128xf32>
    %23 = arith.truncf %22 : vector<512x128xf32> to vector<512x128xbf16>
    %c0_7 = arith.constant 0 : index
    %c0_8 = arith.constant 0 : index
    %24 = vector.load %arg4[%c0_7, %c0_8] : memref<128x256xbf16, #tpu.memory_space<vmem>>, vector<128x256xbf16>
    %cst_9 = arith.constant dense<0.000000e+00> : vector<512x256xf32>
    %25 = tpu.matmul %23, %24, %cst_9 {dimension_numbers = #tpu.dot_dimension_numbers<[1], [0], [0], [1], [0, 0, 1, 1], [], []>} : vector<512x128xbf16>, vector<128x256xbf16>, vector<512x256xf32> -> vector<512x256xf32>
    %c0_10 = arith.constant 0 : index
    %c0_11 = arith.constant 0 : index
    %26 = vector.load %arg5[%c0_10, %c0_11] : memref<1x256xf32, #tpu.memory_space<vmem>>, vector<1x256xf32>
    %27 = vector.broadcast %26 : vector<1x256xf32> to vector<512x256xf32>
    %28 = arith.addf %25, %27 : vector<512x256xf32>
    %cst_12 = arith.constant 0.000000e+00 : f32
    %29 = vector.broadcast %cst_12 : f32 to vector<512x256xf32>
    %30 = arith.maximumf %28, %29 : vector<512x256xf32>
    %31 = arith.truncf %30 : vector<512x256xf32> to vector<512x256xbf16>
    %c0_13 = arith.constant 0 : index
    %c0_14 = arith.constant 0 : index
    %32 = vector.load %arg6[%c0_13, %c0_14] : memref<256x512xbf16, #tpu.memory_space<vmem>>, vector<256x512xbf16>
    %cst_15 = arith.constant dense<0.000000e+00> : vector<512x512xf32>
    %33 = tpu.matmul %31, %32, %cst_15 {dimension_numbers = #tpu.dot_dimension_numbers<[1], [0], [0], [1], [0, 0, 1, 1], [], []>} : vector<512x256xbf16>, vector<256x512xbf16>, vector<512x512xf32> -> vector<512x512xf32>
    %c0_16 = arith.constant 0 : index
    %c0_17 = arith.constant 0 : index
    %34 = vector.load %arg7[%c0_16, %c0_17] : memref<1x512xf32, #tpu.memory_space<vmem>>, vector<1x512xf32>
    %35 = vector.broadcast %34 : vector<1x512xf32> to vector<512x512xf32>
    %36 = arith.addf %33, %35 : vector<512x512xf32>
    %cst_18 = arith.constant 0.000000e+00 : f32
    %37 = vector.broadcast %cst_18 : f32 to vector<512x512xf32>
    %38 = arith.maximumf %36, %37 : vector<512x512xf32>
    %39 = arith.truncf %38 : vector<512x512xf32> to vector<512x512xbf16>
    %c0_19 = arith.constant 0 : index
    %c0_20 = arith.constant 0 : index
    %40 = vector.load %arg8[%c0_19, %c0_20] : memref<512x512xbf16, #tpu.memory_space<vmem>>, vector<512x512xbf16>
    %cst_21 = arith.constant dense<0.000000e+00> : vector<512x512xf32>
    %41 = tpu.matmul %39, %40, %cst_21 {dimension_numbers = #tpu.dot_dimension_numbers<[1], [0], [0], [1], [0, 0, 1, 1], [], []>} : vector<512x512xbf16>, vector<512x512xbf16>, vector<512x512xf32> -> vector<512x512xf32>
    %c0_22 = arith.constant 0 : index
    %c0_23 = arith.constant 0 : index
    %42 = vector.load %arg9[%c0_22, %c0_23] : memref<1x512xf32, #tpu.memory_space<vmem>>, vector<1x512xf32>
    %43 = vector.broadcast %42 : vector<1x512xf32> to vector<512x512xf32>
    %44 = arith.addf %41, %43 : vector<512x512xf32>
    %cst_24 = arith.constant 0.000000e+00 : f32
    %45 = vector.broadcast %cst_24 : f32 to vector<512x512xf32>
    %46 = arith.maximumf %44, %45 : vector<512x512xf32>
    %c0_25 = arith.constant 0 : index
    %c0_26 = arith.constant 0 : index
    %47 = vector.load %arg10[%c0_25, %c0_26] : memref<1x512xf32, #tpu.memory_space<vmem>>, vector<1x512xf32>
    %48 = vector.broadcast %47 : vector<1x512xf32> to vector<512x512xf32>
    %49 = arith.mulf %46, %48 : vector<512x512xf32>
    %50 = vector.extract_strided_slice %49 {offsets = [0, 0], sizes = [512, 128], strides = [1, 1]} : vector<512x512xf32> to vector<512x128xf32>
    %51 = vector.extract_strided_slice %49 {offsets = [0, 128], sizes = [512, 128], strides = [1, 1]} : vector<512x512xf32> to vector<512x128xf32>
    %52 = arith.addf %50, %51 : vector<512x128xf32>
    %53 = vector.extract_strided_slice %49 {offsets = [0, 256], sizes = [512, 128], strides = [1, 1]} : vector<512x512xf32> to vector<512x128xf32>
    %54 = arith.addf %52, %53 : vector<512x128xf32>
    %55 = vector.extract_strided_slice %49 {offsets = [0, 384], sizes = [512, 128], strides = [1, 1]} : vector<512x512xf32> to vector<512x128xf32>
    %56 = arith.addf %54, %55 : vector<512x128xf32>
    %57 = tpu.transpose %56, [1, 0] : vector<512x128xf32> -> vector<128x512xf32>
    %cst_27 = arith.constant dense<0.000000e+00> : vector<512xf32>
    %58 = vector.multi_reduction <add>, %57, %cst_27 [0] : vector<128x512xf32> to vector<512xf32>
    %59 = vector.shape_cast %58 : vector<512xf32> to vector<1x512xf32>
    %c0_28 = arith.constant 0 : index
    %c0_29 = arith.constant 0 : index
    %60 = vector.load %arg11[%c0_28, %c0_29] : memref<1x1xf32, #tpu.memory_space<vmem>>, vector<1x1xf32>
    %61 = vector.broadcast %60 : vector<1x1xf32> to vector<1x512xf32>
    %62 = arith.addf %59, %61 : vector<1x512xf32>
    %c0_30 = arith.constant 0 : index
    %c0_31 = arith.constant 0 : index
    %63 = vector.load %arg12[%c0_30, %c0_31] : memref<1x512xf32, #tpu.memory_space<vmem>>, vector<1x512xf32>
    tpu.vector_store %arg12[%c0_30, %c0_31], %62 {strides = array<i32>} : memref<1x512xf32, #tpu.memory_space<vmem>>, vector<1x512xf32>,
    return
  }
  func.func @transform_0(%arg0: i32) -> (i32, i32) {
    %c0_i32 = arith.constant 0 : i32
    %c0_i32_0 = arith.constant 0 : i32
    return %arg0, %c0_i32 : i32, i32
  }
  func.func @transform_1(%arg0: i32) -> (i32, i32) {
    %c0_i32 = arith.constant 0 : i32
    %c0_i32_0 = arith.constant 0 : i32
    %c0_i32_1 = arith.constant 0 : i32
    return %c0_i32, %c0_i32_0 : i32, i32
  }
  func.func @transform_2(%arg0: i32) -> (i32, i32) {
    %c0_i32 = arith.constant 0 : i32
    %c0_i32_0 = arith.constant 0 : i32
    %c0_i32_1 = arith.constant 0 : i32
    return %c0_i32, %c0_i32_0 : i32, i32
  }
  func.func @transform_3(%arg0: i32) -> (i32, i32) {
    %c0_i32 = arith.constant 0 : i32
    %c0_i32_0 = arith.constant 0 : i32
    %c0_i32_1 = arith.constant 0 : i32
    return %c0_i32, %c0_i32_0 : i32, i32
  }
  func.func @transform_4(%arg0: i32) -> (i32, i32) {
    %c0_i32 = arith.constant 0 : i32
    %c0_i32_0 = arith.constant 0 : i32
    %c0_i32_1 = arith.constant 0 : i32
    return %c0_i32, %c0_i32_0 : i32, i32
  }
  func.func @transform_5(%arg0: i32) -> (i32, i32) {
    %c0_i32 = arith.constant 0 : i32
    %c0_i32_0 = arith.constant 0 : i32
    %c0_i32_1 = arith.constant 0 : i32
    return %c0_i32, %c0_i32_0 : i32, i32
  }
  func.func @transform_6(%arg0: i32) -> (i32, i32) {
    %c0_i32 = arith.constant 0 : i32
    %c0_i32_0 = arith.constant 0 : i32
    %c0_i32_1 = arith.constant 0 : i32
    return %c0_i32, %c0_i32_0 : i32, i32
  }
  func.func @transform_7(%arg0: i32) -> (i32, i32) {
    %c0_i32 = arith.constant 0 : i32
    %c0_i32_0 = arith.constant 0 : i32
    %c0_i32_1 = arith.constant 0 : i32
    return %c0_i32, %c0_i32_0 : i32, i32
  }
  func.func @transform_8(%arg0: i32) -> (i32, i32) {
    %c0_i32 = arith.constant 0 : i32
    %c0_i32_0 = arith.constant 0 : i32
    %c0_i32_1 = arith.constant 0 : i32
    return %c0_i32, %c0_i32_0 : i32, i32
  }
  func.func @transform_9(%arg0: i32) -> (i32, i32) {
    %c0_i32 = arith.constant 0 : i32
    %c0_i32_0 = arith.constant 0 : i32
    %c0_i32_1 = arith.constant 0 : i32
    return %c0_i32, %c0_i32_0 : i32, i32
  }
  func.func @transform_10(%arg0: i32) -> (i32, i32) {
    %c0_i32 = arith.constant 0 : i32
    %c0_i32_0 = arith.constant 0 : i32
    %c0_i32_1 = arith.constant 0 : i32
    return %c0_i32, %c0_i32_0 : i32, i32
  }
  func.func @transform_11(%arg0: i32) -> (i32, i32) {
    %c0_i32 = arith.constant 0 : i32
    %c0_i32_0 = arith.constant 0 : i32
    return %c0_i32, %arg0 : i32, i32
  }
}

</mosaic_0001>

<bundles_post_ra>
// kernel: mlp_forward.1
= control target key start
LH: loop header
LB: loop body
LE: loop exit
PB: predicated region body
PF: predicated region fallthrough
CT: control target
= control target key end

     0   :  { %s7928_s19 = smov 0   ;;  %s13166_s0 = inlined_call_operand.vmem [shape: f32[1024,3], index: 0, kind: input, shape index: {}]   ;;  %s13167_s1 = inlined_call_operand.vmem [shape: f32[3,128], index: 1, kind: input, shape index: {}]   ;;  %s13168_s2 = inlined_call_operand.vmem [shape: f32[1,128], index: 2, kind: input, shape index: {}]   ;;  %s13169_s3 = inlined_call_operand.vmem [shape: bf16[128,256], index: 3, kind: input, shape index: {}]   ;;  %s13170_s4 = inlined_call_operand.vmem [shape: f32[1,256], index: 4, kind: input, shape index: {}]   ;;  %s13171_s5 = inlined_call_operand.vmem [shape: bf16[256,512], index: 5, kind: input, shape index: {}]   ;;  %s13172_s6 = inlined_call_operand.vmem [shape: f32[1,512], index: 6, kind: input, shape index: {}]   ;;  %s13173_s7 = inlined_call_operand.vmem [shape: bf16[512,512], index: 7, kind: input, shape index: {}]   ;;  %s13174_s8 = inlined_call_operand.vmem [shape: f32[1,512], index: 8, kind: input, shape index: {}]   ;;  %s13175_s9 = inlined_call_operand.vmem [shape: f32[1,512], index: 9, kind: input, shape index: {}]   ;;  %s13176_s10 = inlined_call_operand.<no memory space> [shape: f32[1,1], index: 10, kind: input, shape index: {}]   ;;  %s13177_s11 = inlined_call_operand.vmem [shape: f32[1,1024], index: 11, kind: output, shape index: {}]  }
   0x1   :  { %v16_v0 = vstv %s13176_s10 }
   0x2   :  { %17 = vst [vmem:[#allocation2] sm:$0x1] %v16_v0 }
   0x3 LB: > { %s7176_s20 = sadd.s32 4294967295, %s7859_s19   ;;  %p7180_p0 = scmp.ge.s32.totalorder %s7859_s19, 1  ;;  %s7859_s19 = sphi %s7928_s19, %s23_s19  }
   0x4   : > { %p340_p1 = scmp.lt.s32.totalorder %s7859_s19, 3 }
   0x6   : > { %p341_p2 = pnand %p7180_p0, %p340_p1 }
   0x8   : > { %344 = sbr.rel (%p341_p2) target bundleno = 1862 (0x746), region = 64 }
   0xd   : > { %s7181_s21 = sshll.u32 %s7176_s20, 6  ;;  %v13180_v1 = vmov 2   ;;  %v13182_v2 = vmov 1   ;;  %v13178_v3 = vmov 0   ;;  %v7524_v23 = vld [vmem:[%s13169_s3 + $0x74] ss:$8 sps:$4 sm:$0xff]  }
   0xe   : > { %7427 = vset.pattern.permute.xlu0 %v13180_v1  ;;  %7426 = vset.pattern.permute.xlu1 %v13182_v2  ;;  %p380_p3 = scmp.lt.s32.totalorder %s7181_s21, 127  ;;  %v7526_v25 = vld [vmem:[%s13169_s3 + $0x70] ss:$8 sps:$4 sm:$0xff]   ;;  %v7527_v26 = vld [vmem:[%s13169_s3 + $0x64] ss:$8 sps:$4 sm:$0xff]   ;;  %s7183_s14 = sshll.u32 %s7176_s20, 2 }
   0xf   : > { %1929 = vmatprep.mubr.bf16.mxu0 %v13178_v3  ;;  %2089 = vmatprep.mubr.bf16.mxu1 %v13178_v3  ;;  %v7529_v27 = vld [vmem:[%s13169_s3 + $0x60] ss:$8 sps:$4 sm:$0xff]   ;;  %v7530_v30 = vld [vmem:[%s13169_s3 + $0x54] ss:$8 sps:$4 sm:$0xff]   ;;  %v7532_v31 = vld [vmem:[%s13169_s3 + $0x50] ss:$8 sps:$4 sm:$0xff]  }
  0x10   : > { %s13861_s21 = smov (!%p380_p3, %s7181_s21), 127  ;;  %1897 = vmatprep.subr.bf16.mxu0 %v7524_v23  ;;  %7398 = vmatprep.subr.bf16.mxu1 %v7524_v23  ;;  %v7533_v32 = vld [vmem:[%s13169_s3 + $0x44] ss:$8 sps:$4 sm:$0xff]   ;;  %v7535_v33 = vld [vmem:[%s13169_s3 + $0x40] ss:$8 sps:$4 sm:$0xff]   ;;  %p386_p4 = scmp.lt.s32.totalorder %s7183_s14, 7 }
  0x11   : > { %s7182_s10 = sshll.u32 %s13861_s21, 3  ;;  %1898 = vmatpush1.bf16.msra.mxu0 %v7526_v25  ;;  %7406 = vmatpush1.bf16.msra.mxu1 %v7526_v25  ;;  %v7536_v35 = vld [vmem:[%s13169_s3 + $0x34] ss:$8 sps:$4 sm:$0xff]   ;;  %v7538_v36 = vld [vmem:[%s13169_s3 + $0x30] ss:$8 sps:$4 sm:$0xff]  }
  0x12   : > { %s7945_s24 = scalar_lea.vmem %s13166_s0, %s7182_s10  ;;  %1899 = vmatprep.subr.bf16.mxu0 %v7527_v26  ;;  %7399 = vmatprep.subr.bf16.mxu1 %v7527_v26  ;;  %v7539_v38 = vld [vmem:[%s13169_s3 + $0x24] ss:$8 sps:$4 sm:$0xff]   ;;  %v7541_v39 = vld [vmem:[%s13169_s3 + $0x20] ss:$8 sps:$4 sm:$0xff]   ;;  %v7542_v40 = vld [vmem:[%s13169_s3 + $0x14] ss:$8 sps:$4 sm:$0xff]  }
  0x13   : > { %v7948_v4 = vld [vmem:[%s7945_s24] sm:$0xff]  ;;  %v393_v5 = vld [vmem:[%s7945_s24 + $0x10] sm:$0xff]  ;;  %v7954_v6 = vld [vmem:[%s7945_s24 + $0x8] sm:$0xff]  ;;  %s13863_s14 = smov (!%p386_p4, %s7183_s14), 7 }
  0x14   : > { %1235 = vperm.xlu0 %7427, %v7948_v4   ;;  %846 = vperm.xlu1 %7426, %v7948_v4   ;;  %v395_v7 = vld [vmem:[%s7945_s24 + $0x20] sm:$0xff]  ;;  %v397_v8 = vld [vmem:[%s7945_s24 + $0x30] sm:$0xff]  ;;  %v7972_v11 = vld [vmem:[%s7945_s24 + $0x18] sm:$0xff]  ;;  %s388_s16 = scalar_lea.vmem %s13177_s11, %s13863_s14 }
  0x15   : > { %v7962_v9 = vld [vmem:[%s7945_s24 + $0x40] sm:$0xff]  ;;  %v7966_v10 = vld [vmem:[%s7945_s24 + $0x50] sm:$0xff]  ;;  %v7999_v17 = vld [vmem:[%s7945_s24 + $0x28] sm:$0xff]  ;;  %1900 = vmatpush1.bf16.msra.mxu0 %v7529_v27  ;;  %7407 = vmatpush1.bf16.msra.mxu1 %v7529_v27 }
  0x16   : > { %v7975_v12 = vld [vmem:[%s7945_s24 + $0x60] sm:$0xff]  ;;  %v7979_v13 = vld [vmem:[%s7945_s24 + $0x70] sm:$0xff]  ;;  %v8005_v18 = vld [vmem:[%s7945_s24 + $0x118] sm:$0xff]  ;;  %1901 = vmatprep.subr.bf16.mxu0 %v7530_v30  ;;  %7400 = vmatprep.subr.bf16.mxu1 %v7530_v30 }
  0x17   : > { %v7986_v14 = vld [vmem:[%s7945_s24 + $0x80] sm:$0xff]  ;;  %v7989_v15 = vld [vmem:[%s7945_s24 + $0x90] sm:$0xff]  ;;  %v8020_v21 = vld [vmem:[%s7945_s24 + $0x138] sm:$0xff] }
  0x18   : > { %1243 = vperm.xlu0 %7427, %v393_v5   ;;  %850 = vperm.xlu1 %7426, %v7954_v6   ;;  %v7995_v16 = vld [vmem:[%s7945_s24 + $0xa0] sm:$0xff]  ;;  %v8009_v19 = vld [vmem:[%s7945_s24 + $0xb0] sm:$0xff]  ;;  %v8031_v24 = vld [vmem:[%s7945_s24 + $0x38] sm:$0xff] }
  0x19   : > { %v8014_v20 = vld [vmem:[%s7945_s24 + $0xc0] sm:$0xff]  ;;  %v8024_v22 = vld [vmem:[%s7945_s24 + $0xd0] sm:$0xff]  ;;  %v434_v29 = vld [vmem:[%s7945_s24 + $0x158] sm:$0xff]  ;;  %1902 = vmatpush1.bf16.msra.mxu0 %v7532_v31  ;;  %7408 = vmatpush1.bf16.msra.mxu1 %v7532_v31 }
  0x1a   : > { %v8045_v28 = vld [vmem:[%s7945_s24 + $0xe0] sm:$0xff]  ;;  %v421_v34 = vld [vmem:[%s7945_s24 + $0xf0] sm:$0xff]  ;;  %1903 = vmatprep.subr.bf16.mxu0 %v7533_v32  ;;  %7401 = vmatprep.subr.bf16.mxu1 %v7533_v32  ;;  %v400_v37 = vld [vmem:[%s7945_s24 + $0x48] sm:$0xff] }
  0x1b   : > { %v7544_v41 = vld [vmem:[%s13169_s3 + $0x10] ss:$8 sps:$4 sm:$0xff]   ;;  %v7545_v42 = vld [vmem:[%s13169_s3 + $0x4] ss:$8 sps:$4 sm:$0xff]   ;;  %v7547_v43 = vld [vmem:[%s13169_s3] ss:$8 sps:$4 sm:$0xff]  }
  0x1c   : > { %1251 = vperm.xlu0 %7427, %v395_v7   ;;  %7428 = vset.pattern.permute.xlu1 %v13180_v1  ;;  %v402_v44 = vld [vmem:[%s7945_s24 + $0x58] sm:$0xff]  ;;  %v404_v45 = vld [vmem:[%s7945_s24 + $0x68] sm:$0xff]  ;;  %v8133_v54 = vld [vmem:[%s7945_s24 + $0x110] sm:$0xff] }
  0x1d   : > { %1239 = vperm.xlu1 %7428, %v7954_v6   ;;  %1904 = vmatpush1.bf16.msra.mxu0 %v7535_v33  ;;  %v406_v46 = vld [vmem:[%s7945_s24 + $0x78] sm:$0xff]  ;;  %v408_v47 = vld [vmem:[%s7945_s24 + $0x88] sm:$0xff]  ;;  %v8155_v61 = vld [vmem:[%s7945_s24 + $0x130] sm:$0xff] }
  0x1e   : > { %7409 = vmatpush1.bf16.msra.mxu1 %v7535_v33  ;;  %1905 = vmatprep.subr.bf16.mxu0 %v7536_v35  ;;  %v8114_v48 = vld [vmem:[%s7945_s24 + $0x98] sm:$0xff]  ;;  %v8118_v49 = vld [vmem:[%s7945_s24 + $0x108] sm:$0xff]  ;;  %v423_v31 = vld [vmem:[%s7945_s24 + $0x100] sm:$0xff] }
  0x1f   : > { %7402 = vmatprep.subr.bf16.mxu1 %v7536_v35  ;;  %v8140_v56 = vld [vmem:[%s7945_s24 + $0x128] sm:$0xff]  ;;  %v8213_v27 = vld [vmem:[%s7945_s24 + $0xb8] sm:$0xff] }
  0x20   : > { %1259 = vperm.xlu0 %7427, %v397_v8   ;;  %v8164_v0 = vld [vmem:[%s7945_s24 + $0x148] sm:$0xff] }
  0x21   : > { %7429 = vset.pattern.permute.xlu1 %v13178_v3  ;;  %1906 = vmatpush1.bf16.msra.mxu0 %v7538_v36 }
  0x22   : > { %468 = vperm.xlu1 %7429, %v393_v5   ;;  %7410 = vmatpush1.bf16.msra.mxu1 %v7538_v36 }
  0x23   : > { %1907 = vmatprep.subr.bf16.mxu0 %v7539_v38  ;;  %7403 = vmatprep.subr.bf16.mxu1 %v7539_v38 }
  0x24   : > { %1267 = vperm.xlu0 %7427, %v7962_v9  }
  0x25   : > { %1908 = vmatpush1.bf16.msra.mxu0 %v7541_v39 }
  0x26   : > { %7430 = vset.pattern.permute.xlu1 %v13182_v2  ;;  %7411 = vmatpush1.bf16.msra.mxu1 %v7541_v39 }
  0x27   : > { %854 = vperm.xlu1 %7430, %v393_v5   ;;  %1909 = vmatprep.subr.bf16.mxu0 %v7542_v40 }
  0x28   : > { %1275 = vperm.xlu0 %7427, %v7966_v10   ;;  %7404 = vmatprep.subr.bf16.mxu1 %v7542_v40  ;;  %v412_v40 = vld [vmem:[%s7945_s24 + $0xa8] sm:$0xff] }
  0x29   : > { %1910 = vmatpush1.bf16.msra.mxu0 %v7544_v41 }
  0x2a   : > { %7412 = vmatpush1.bf16.msra.mxu1 %v7544_v41  ;;  %1911 = vmatprep.subr.bf16.mxu0 %v7545_v42  ;;  %v8258_v41 = vld [vmem:[%s13167_s1 + $0x1] ss:$0 sm:$0xff] }
  0x2b   : > { %858 = vperm.xlu1 %7430, %v7972_v11   ;;  %7405 = vmatprep.subr.bf16.mxu1 %v7545_v42 }
  0x2c   : > { %1283 = vperm.xlu0 %7427, %v7975_v12  }
  0x2d   : > { %1912 = vmatpush1.bf16.msra.mxu0 %v7547_v43 }
  0x2e   : > { %7413 = vmatpush1.bf16.msra.mxu1 %v7547_v43  ;;  %v8265_v43 = vld [vmem:[%s13167_s1 + $0x2] ss:$0 sm:$0xff] }
  0x2f   : > { %7431 = vset.pattern.permute.xlu1 %v13180_v1 }
  0x30   : > { %1291 = vperm.xlu0 %7427, %v7979_v13   ;;  %1247 = vperm.xlu1 %7431, %v7972_v11  }
  0x34   : > { %1299 = vperm.xlu0 %7427, %v7986_v14   ;;  %7432 = vset.pattern.permute.xlu1 %v13178_v3 }
  0x35   : > { %478 = vperm.xlu1 %7432, %v395_v7  }
  0x38   : > { %1307 = vperm.xlu0 %7427, %v7989_v15  }
  0x39   : > { %7433 = vset.pattern.permute.xlu1 %v13182_v2 }
  0x3a   : > { %862 = vperm.xlu1 %7433, %v395_v7  }
  0x3c   : > { %7459 = vset.pattern.permute.xlu0 %v13182_v2 }
  0x3d   : > { %926 = vperm.xlu0 %7459, %v7995_v16  }
  0x3e   : > { %866 = vperm.xlu1 %7433, %v7999_v17  }
  0x41   : > { %986 = vperm.xlu0 %7459, %v8005_v18  }
  0x42   : > { %7434 = vset.pattern.permute.xlu1 %v13180_v1 }
  0x43   : > { %1255 = vperm.xlu1 %7434, %v7999_v17  }
  0x45   : > { %934 = vperm.xlu0 %7459, %v8009_v19  }
  0x47   : > { %7435 = vset.pattern.permute.xlu1 %v13178_v3 }
  0x48   : > { %488 = vperm.xlu1 %7435, %v397_v8  }
  0x49   : > { %942 = vperm.xlu0 %7459, %v8014_v20  }
  0x4c   : > { %7436 = vset.pattern.permute.xlu1 %v13182_v2 }
  0x4d   : > { %1002 = vperm.xlu0 %7459, %v8020_v21   ;;  %870 = vperm.xlu1 %7436, %v397_v8   ;;  %v8180_v8 = vld [vmem:[%s7945_s24 + $0x150] sm:$0xff] }
  0x51   : > { %950 = vperm.xlu0 %7459, %v8024_v22   ;;  %874 = vperm.xlu1 %7436, %v8031_v24  }
  0x55   : > { %958 = vperm.xlu0 %7459, %v8045_v28   ;;  %7437 = vset.pattern.permute.xlu1 %v13180_v1 }
  0x56   : > { %1263 = vperm.xlu1 %7437, %v8031_v24  }
  0x59   : > { %1018 = vperm.xlu0 %7459, %v434_v29  }
  0x5a   : > { %7438 = vset.pattern.permute.xlu1 %v13178_v3 }
  0x5b   : > { %498 = vperm.xlu1 %7438, %v7962_v9  }
  0x5d   : > { %966 = vperm.xlu0 %7459, %v421_v34   ;;  %v8236_v34 = vld [vmem:[%s7945_s24 + $0xd8] sm:$0xff] }
  0x5f   : > { %7439 = vset.pattern.permute.xlu1 %v13182_v2 }
  0x60   : > { %878 = vperm.xlu1 %7439, %v7962_v9  }
  0x61   : > { %7485 = vset.pattern.permute.xlu0 %v13178_v3 }
  0x62   : > { %458 = vperm.xlu0 %7485, %v7948_v4  }
  0x64   : > { %882 = vperm.xlu1 %7439, %v400_v37  }
  0x66   : > { %463 = vperm.xlu0 %7485, %v7954_v6  }
  0x68   : > { %7440 = vset.pattern.permute.xlu1 %v13180_v1 }
  0x69   : > { %1271 = vperm.xlu1 %7440, %v400_v37  }
  0x6a   : > { %473 = vperm.xlu0 %7485, %v7972_v11  }
  0x6d   : > { %7441 = vset.pattern.permute.xlu1 %v13178_v3 }
  0x6e   : > { %483 = vperm.xlu0 %7485, %v7999_v17   ;;  %508 = vperm.xlu1 %7441, %v7966_v10  }
  0x72   : > { %493 = vperm.xlu0 %7485, %v8031_v24   ;;  %7442 = vset.pattern.permute.xlu1 %v13182_v2 }
  0x73   : > { %886 = vperm.xlu1 %7442, %v7966_v10   ;;  %v436_v10 = vld [vmem:[%s7945_s24 + $0x168] sm:$0xff] }
  0x76   : > { %503 = vperm.xlu0 %7485, %v400_v37  }
  0x77   : > { %890 = vperm.xlu1 %7442, %v402_v44  }
  0x7a   : > { %513 = vperm.xlu0 %7485, %v402_v44  }
  0x7b   : > { %7443 = vset.pattern.permute.xlu1 %v13180_v1 }
  0x7c   : > { %1279 = vperm.xlu1 %7443, %v402_v44   ;;  %v8270_v44 = vld [vmem:[%s13167_s1] ss:$0 sm:$0xff] }
  0x7e   : > { %523 = vperm.xlu0 %7485, %v404_v45  }
  0x80   : > { %7444 = vset.pattern.permute.xlu1 %v13178_v3 }
  0x81   : > { %518 = vperm.xlu1 %7444, %v7975_v12  }
  0x82   : > { %533 = vperm.xlu0 %7485, %v406_v46  }
  0x85   : > { %7445 = vset.pattern.permute.xlu1 %v13182_v2 }
  0x86   : > { %894 = vperm.xlu1 %7445, %v7975_v12   ;;  %543 = vperm.xlu0 %7485, %v408_v47  }
  0x8a   : > { %898 = vperm.xlu1 %7445, %v404_v45   ;;  %553 = vperm.xlu0 %7485, %v8114_v48  }
  0x8e   : > { %7446 = vset.pattern.permute.xlu1 %v13180_v1  ;;  %623 = vperm.xlu0 %7485, %v8118_v49  }
  0x8f   : > { %1287 = vperm.xlu1 %7446, %v404_v45   ;;  %v8122_v50 = vpop.permute.xlu1 %846  ;;  %v8124_v51 = vpop.permute.xlu0 %1235 }
  0x92   : > { %558 = vperm.xlu0 %7485, %v7995_v16  }
  0x93   : > { %7447 = vset.pattern.permute.xlu1 %v13178_v3  ;;  %v8128_v52 = vpop.permute.xlu1 %850  ;;  %v8130_v53 = vpop.permute.xlu0 %1243 }
  0x94   : > { %528 = vperm.xlu1 %7447, %v7979_v13  }
  0x96   : > { %628 = vperm.xlu0 %7485, %v8133_v54  }
  0x97   : > { %v8137_v55 = vpop.permute.xlu0 %1251 }
  0x98   : > { %7448 = vset.pattern.permute.xlu1 %v13182_v2  ;;  %v8143_v57 = vpop.permute.xlu1 %1239 }
  0x99   : > { %902 = vperm.xlu1 %7448, %v7979_v13   ;;  %v438_v13 = vld [vmem:[%s7945_s24 + $0x178] sm:$0xff] }
  0x9a   : > { %643 = vperm.xlu0 %7485, %v8140_v56  }
  0x9b   : > { %v8147_v58 = vpop.permute.xlu0 %1259 }
  0x9d   : > { %906 = vperm.xlu1 %7448, %v406_v46   ;;  %v8149_v59 = vpop.permute.xlu1 %468 }
  0x9e   : > { %578 = vperm.xlu0 %7485, %v8014_v20  }
  0x9f   : > { %v8152_v60 = vpop.permute.xlu0 %1267 }
  0xa1   : > { %7449 = vset.pattern.permute.xlu1 %v13180_v1 }
  0xa2   : > { %1295 = vperm.xlu1 %7449, %v406_v46   ;;  %v8158_v62 = vpop.permute.xlu1 %854  ;;  %648 = vperm.xlu0 %7485, %v8155_v61   ;;  %v1105_v46 = vmul.f32 %v8258_v41, %v8122_v50 }
  0xa3   : > { %v8161_v63 = vpop.permute.xlu0 %1275 }
  0xa6   : > { %7450 = vset.pattern.permute.xlu1 %v13178_v3  ;;  %v8167_v4 = vpop.permute.xlu1 %858  ;;  %663 = vperm.xlu0 %7485, %v8164_v0  }
  0xa7   : > { %538 = vperm.xlu1 %7450, %v7986_v14   ;;  %v8171_v5 = vpop.permute.xlu0 %1283 }
  0xaa   : > { %598 = vperm.xlu0 %7485, %v8045_v28  }
  0xab   : > { %7451 = vset.pattern.permute.xlu1 %v13182_v2  ;;  %v8175_v6 = vpop.permute.xlu1 %1247  ;;  %v8177_v7 = vpop.permute.xlu0 %1291 }
  0xac   : > { %910 = vperm.xlu1 %7451, %v7986_v14  }
  0xae   : > { %668 = vperm.xlu0 %7485, %v8180_v8  }
  0xaf   : > { %v8184_v9 = vpop.permute.xlu0 %1299 }
  0xb0   : > { %914 = vperm.xlu1 %7451, %v408_v47   ;;  %v8187_v11 = vpop.permute.xlu1 %478 }
  0xb2   : > { %683 = vperm.xlu0 %7485, %v436_v10  }
  0xb3   : > { %v8189_v12 = vpop.permute.xlu0 %1307 }
  0xb4   : > { %7452 = vset.pattern.permute.xlu1 %v13180_v1 }
  0xb5   : > { %1303 = vperm.xlu1 %7452, %v408_v47   ;;  %v8193_v17 = vpop.permute.xlu1 %862  ;;  %v1494_v47 = vmul.f32 %v8265_v43, %v8124_v51  ;;  %v782_v51 = vmul.f32 %v8270_v44, %v8149_v59 }
  0xb6   : > { %693 = vperm.xlu0 %7485, %v438_v13   ;;  %v1107_v13 = vmul.f32 %v8258_v41, %v8158_v62  ;;  %v1496_v62 = vmul.f32 %v8265_v43, %v8130_v53 }
  0xb8   : > { %v8195_v14 = vpop.permute.xlu0 %926 }
  0xb9   : > { %7453 = vset.pattern.permute.xlu1 %v13178_v3  ;;  %v8198_v23 = vpop.permute.xlu1 %866 }
  0xba   : > { %548 = vperm.xlu1 %7453, %v7989_v15   ;;  %7492 = vset.pattern.permute.xlu0 %v13180_v1 }
  0xbb   : > { %1367 = vperm.xlu0 %7492, %v8118_v49  }
  0xbc   : > { %v8203_v24 = vpop.permute.xlu0 %986 }
  0xbe   : > { %7454 = vset.pattern.permute.xlu1 %v13182_v2  ;;  %v8206_v25 = vpop.permute.xlu1 %1255 }
  0xbf   : > { %918 = vperm.xlu1 %7454, %v7989_v15   ;;  %1371 = vperm.xlu0 %7492, %v8133_v54  }
  0xc0   : > { %v8210_v26 = vpop.permute.xlu0 %934 }
  0xc3   : > { %922 = vperm.xlu1 %7454, %v8114_v48   ;;  %v8216_v28 = vpop.permute.xlu1 %488  ;;  %1327 = vperm.xlu0 %7492, %v8213_v27  }
  0xc4   : > { %v8219_v29 = vpop.permute.xlu0 %942 }
  0xc7   : > { %7455 = vset.pattern.permute.xlu1 %v13180_v1  ;;  %1383 = vperm.xlu0 %7492, %v8140_v56   ;;  %v1106_v1 = vmul.f32 %v8258_v41, %v8128_v52  ;;  %v1108_v52 = vmul.f32 %v8258_v41, %v8167_v4 }
  0xc8   : > { %1311 = vperm.xlu1 %7455, %v8114_v48   ;;  %v8224_v15 = vpop.permute.xlu1 %870  ;;  %v8226_v30 = vpop.permute.xlu0 %1002 }
  0xcb   : > { %1387 = vperm.xlu0 %7492, %v8155_v61  }
  0xcc   : > { %7456 = vset.pattern.permute.xlu1 %v13178_v3  ;;  %v8231_v32 = vpop.permute.xlu1 %874  ;;  %v8233_v33 = vpop.permute.xlu0 %950 }
  0xcd   : > { %618 = vperm.xlu1 %7456, %v423_v31  }
  0xcf   : > { %1343 = vperm.xlu0 %7492, %v8236_v34  }
  0xd0   : > { %v8239_v35 = vpop.permute.xlu0 %958 }
  0xd1   : > { %13323 = vst [vmem:[#allocation3_spill] sm:$0xff] %v8239_v35  ;;  %7457 = vset.pattern.permute.xlu1 %v13182_v2  ;;  %v8242_v36 = vpop.permute.xlu1 %1263 }
  0xd2   : > { %974 = vperm.xlu1 %7457, %v423_v31  }
  0xd3   : > { %1399 = vperm.xlu0 %7492, %v8164_v0  }
  0xd4   : > { %v8245_v37 = vpop.permute.xlu0 %1018 }
  0xd5   : > { %13324 = vst [vmem:[#allocation4_spill] sm:$0xff] %v8245_v37  ;;  %v13326_v37 = vmov 2  }
  0xd6   : > { %978 = vperm.xlu1 %7457, %v8118_v49   ;;  %v8248_v38 = vpop.permute.xlu1 %498 }
  0xd7   : > { %1403 = vperm.xlu0 %7492, %v8180_v8  }
  0xd8   : > { %v8251_v39 = vpop.permute.xlu0 %966 }
  0xd9   : > { %13325 = vst [vmem:[#allocation5_spill] sm:$0xff] %v8251_v39 }
  0xda   : > { %7458 = vset.pattern.permute.xlu1 %v13178_v3 }
  0xdb   : > { %563 = vperm.xlu1 %7458, %v412_v40   ;;  %v8260_v42 = vpop.permute.xlu1 %878 }
  0xdd   : > { %v459_v45 = vpop.permute.xlu0 %458 }
  0xde   : > { %v780_v48 = vmul.f32 %v8270_v44, %v459_v45  ;;  %v1495_v45 = vmul.f32 %v8265_v43, %v8143_v57 }
  0xdf   : > { %7460 = vset.pattern.permute.xlu1 %v13182_v2  ;;  %v8278_v49 = vpop.permute.xlu1 %882 }
  0xe0   : > { %v1169_v10 = vadd.f32 %v1105_v46, %v780_v48  ;;  %930 = vperm.xlu1 %7460, %v412_v40   ;;  %v1171_v48 = vadd.f32 %v1107_v13, %v782_v51  ;;  %v1109_v13 = vmul.f32 %v8258_v41, %v8193_v17 }
  0xe1   : > { %v464_v3 = vpop.permute.xlu0 %463 }
  0xe2   : > { %v1558_v39 = vadd.f32 %v1494_v47, %v1169_v10  ;;  %v781_v50 = vmul.f32 %v8270_v44, %v464_v3  ;;  %v8297_v3 = vld [vmem:[%s13168_s2] ss:$0 sm:$0xff]  ;;  %v1497_v47 = vmul.f32 %v8265_v43, %v8175_v6 }
  0xe4   : > { %v1170_v2 = vadd.f32 %v1106_v1, %v781_v50  ;;  %7461 = vset.pattern.permute.xlu1 %v13326_v37  ;;  %v8290_v46 = vpop.permute.xlu1 %1271  ;;  %v1629_v59 = vadd.f32 %v8297_v3, %v1558_v39  ;;  %v1110_v50 = vmul.f32 %v8258_v41, %v8198_v23  ;;  %v1498_v23 = vmul.f32 %v8265_v43, %v8137_v55 }
  0xe5   : > { %v474_v35 = vpop.permute.xlu0 %473  ;;  %1363 = vperm.xlu1 %7461, %v423_v31   ;;  %v1560_v31 = vadd.f32 %v1496_v62, %v1171_v48  ;;  %v1111_v55 = vmul.f32 %v8258_v41, %v8224_v15  ;;  %v1501_v15 = vmul.f32 %v8265_v43, %v8242_v36  ;;  %v1114_v36 = vmul.f32 %v8258_v41, %v8278_v49 }
  0xe6   : > { %v1559_v57 = vadd.f32 %v1495_v45, %v1170_v2  ;;  %v783_v1 = vmul.f32 %v8270_v44, %v474_v35  ;;  %v1693_v39 = vmax.f32 %v1629_v59, 0.0  ;;  %v784_v45 = vmul.f32 %v8270_v44, %v8187_v11 }
  0xe7   : > { %v1631_v59 = vadd.f32 %v8297_v3, %v1560_v31  ;;  %v786_v31 = vmul.f32 %v8270_v44, %v8216_v28  ;;  %v1503_v49 = vmul.f32 %v8265_v43, %v8290_v46 }
  0xe8   : > { %v1172_v53 = vadd.f32 %v1108_v52, %v783_v1  ;;  %v1630_v10 = vadd.f32 %v8297_v3, %v1559_v57  ;;  %v1499_v57 = vmul.f32 %v8265_v43, %v8206_v25 }
  0xe9   : > { %v484_v51 = vpop.permute.xlu0 %483  ;;  %1315 = vperm.xlu1 %7461, %v7995_v16   ;;  %v8311_v2 = vpop.permute.xlu1 %508  ;;  %v1173_v16 = vadd.f32 %v1109_v13, %v784_v45  ;;  %v1112_v13 = vmul.f32 %v8258_v41, %v8231_v32  ;;  %v1175_v45 = vadd.f32 %v1111_v55, %v786_v31  ;;  %v13328_v32 = vmov 1  }
  0xea   : > { %v1561_v4 = vadd.f32 %v1497_v47, %v1172_v53  ;;  %v785_v35 = vmul.f32 %v8270_v44, %v484_v51  ;;  %v1694_v6 = vmax.f32 %v1630_v10, 0.0  ;;  %v13327_v47 = vmov 0  }
  0xeb   : > { %v790_v46 = vmul.f32 %v8270_v44, %v8311_v2 }
  0xec   : > { %v1174_v62 = vadd.f32 %v1110_v50, %v785_v35  ;;  %v1757_v48 = vpack.c.bf16 %v1694_v6, %v1693_v39  ;;  %v1632_v17 = vadd.f32 %v8297_v3, %v1561_v4  ;;  %v1695_v50 = vmax.f32 %v1631_v59, 0.0 }
  0xed   : > { %v494_v52 = vpop.permute.xlu0 %493  ;;  %1319 = vperm.xlu1 %7461, %v412_v40   ;;  %v1562_v40 = vadd.f32 %v1498_v23, %v1173_v16  ;;  %v1500_v39 = vmul.f32 %v8265_v43, %v8147_v58  ;;  %v1113_v58 = vmul.f32 %v8258_v41, %v8260_v42  ;;  %v1502_v42 = vmul.f32 %v8265_v43, %v8152_v60 }
  0xee   : > { %1930 = vmatmul.mubr.bf16.vlgmr.msra.gmra.mxu0 %v1757_v48  ;;  %v887_v1 = vpop.permute.xlu1 %886  ;;  %v1563_v11 = vadd.f32 %v1499_v57, %v1174_v62  ;;  %v787_v53 = vmul.f32 %v8270_v44, %v494_v52  ;;  %v1696_v10 = vmax.f32 %v1632_v17, 0.0  ;;  %v788_v57 = vmul.f32 %v8270_v44, %v8248_v38 }
  0xef   : > { %1939 = vmatprep.mubr.bf16.mxu0 %v13327_v47  ;;  %v1633_v62 = vadd.f32 %v8297_v3, %v1562_v40  ;;  %v1564_v23 = vadd.f32 %v1500_v39, %v1175_v45  ;;  %v1115_v60 = vmul.f32 %v8258_v41, %v887_v1 }
  0xf0   : > { %v1176_v51 = vadd.f32 %v1112_v13, %v787_v53  ;;  %v1758_v4 = vpack.c.bf16 %v1696_v10, %v1695_v50  ;;  %v1634_v35 = vadd.f32 %v8297_v3, %v1563_v11  ;;  %v1177_v10 = vadd.f32 %v1113_v58, %v788_v57 }
  0xf1   : > { %7462 = vset.pattern.permute.xlu1 %v13327_v47  ;;  %v504_v6 = vpop.permute.xlu0 %503  ;;  %v1697_v16 = vmax.f32 %v1633_v62, 0.0  ;;  %v1635_v38 = vadd.f32 %v8297_v3, %v1564_v23 }
  0xf2   : > { %633 = vperm.xlu1 %7462, %v8005_v18   ;;  %v891_v25 = vpop.permute.xlu1 %890  ;;  %v1565_v48 = vadd.f32 %v1501_v15, %v1176_v51  ;;  %v789_v17 = vmul.f32 %v8270_v44, %v504_v6  ;;  %v1698_v52 = vmax.f32 %v1634_v35, 0.0  ;;  %v1566_v31 = vadd.f32 %v1502_v42, %v1177_v10 }
  0xf3   : > { %v1699_v39 = vmax.f32 %v1635_v38, 0.0 }
  0xf4   : > { %v1759_v11 = vpack.c.bf16 %v1698_v52, %v1697_v16  ;;  %v1636_v53 = vadd.f32 %v8297_v3, %v1565_v48  ;;  %v1637_v1 = vadd.f32 %v8297_v3, %v1566_v31 }
  0xf5   : > { %v514_v40 = vpop.permute.xlu0 %513 }
  0xf6   : > { %7463 = vset.pattern.permute.xlu1 %v13328_v32  ;;  %1940 = vmatmul.mubr.bf16.gmra.mxu0 %v1758_v4  ;;  %v791_v13 = vmul.f32 %v8270_v44, %v514_v40  ;;  %v1700_v50 = vmax.f32 %v1636_v53, 0.0  ;;  %v1116_v4 = vmul.f32 %v8258_v41, %v891_v25  ;;  %v1504_v25 = vmul.f32 %v8265_v43, %v8161_v63 }
  0xf7   : > { %982 = vperm.xlu1 %7463, %v8133_v54   ;;  %v1280_v28 = vpop.permute.xlu1 %1279  ;;  %1949 = vmatprep.mubr.bf16.mxu0 %v13327_v47  ;;  %v1178_v54 = vadd.f32 %v1114_v36, %v789_v17  ;;  %v1179_v17 = vadd.f32 %v1115_v60, %v790_v46  ;;  %v1701_v58 = vmax.f32 %v1637_v1, 0.0  ;;  %v1506_v40 = vmul.f32 %v8265_v43, %v8171_v5 }
  0xf8   : > { %v1180_v6 = vadd.f32 %v1116_v4, %v791_v13  ;;  %v1505_v45 = vmul.f32 %v8265_v43, %v1280_v28  ;;  %v1760_v15 = vpack.c.bf16 %v1700_v50, %v1699_v39 }
  0xf9   : > { %v1567_v55 = vadd.f32 %v1503_v49, %v1178_v54  ;;  %v524_v35 = vpop.permute.xlu0 %523  ;;  %v1568_v23 = vadd.f32 %v1504_v25, %v1179_v17  ;;  %v8379_v54 = vld [vmem:[%s7945_s24 + $0xf8] sm:$0xff] }
  0xfa   : > { %v1569_v28 = vadd.f32 %v1505_v45, %v1180_v6  ;;  %v793_v36 = vmul.f32 %v8270_v44, %v524_v35  ;;  %1359 = vperm.xlu0 %7492, %v8379_v54   ;;  %v1508_v45 = vmul.f32 %v8265_v43, %v8177_v7 }
  0xfb   : > { %7464 = vset.pattern.permute.xlu1 %v13327_v47  ;;  %v1638_v62 = vadd.f32 %v8297_v3, %v1567_v55  ;;  %v1639_v38 = vadd.f32 %v8297_v3, %v1568_v23 }
  0xfc   : > { %568 = vperm.xlu1 %7464, %v8009_v19   ;;  %v519_v59 = vpop.permute.xlu1 %518 }
  0xfd   : > { %v534_v2 = vpop.permute.xlu0 %533  ;;  %v1702_v52 = vmax.f32 %v1638_v62, 0.0  ;;  %v792_v53 = vmul.f32 %v8270_v44, %v519_v59  ;;  %v427_v59 = vld [vmem:[%s7945_s24 + $0x120] sm:$0xff]  ;;  %v1703_v60 = vmax.f32 %v1639_v38, 0.0 }
  0xfe   : > { %1950 = vmatmul.mubr.bf16.gmra.mxu0 %v1759_v11  ;;  %v1640_v11 = vadd.f32 %v8297_v3, %v1569_v28  ;;  %v795_v1 = vmul.f32 %v8270_v44, %v534_v2 }
  0xff   : > { %1959 = vmatprep.mubr.bf16.mxu0 %v13327_v47  ;;  %v1761_v10 = vpack.c.bf16 %v1702_v52, %v1701_v58 }
 0x100   : > { %573 = vperm.xlu1 %7464, %v8213_v27   ;;  %v1704_v50 = vmax.f32 %v1640_v11, 0.0 }
 0x101   : > { %v895_v51 = vpop.permute.xlu1 %894  ;;  %v8376_v57 = vpop.permute.xlu0 %543 }
 0x104   : > { %7465 = vset.pattern.permute.xlu1 %v13328_v32 }
 0x105   : > { %938 = vperm.xlu1 %7465, %v8213_v27   ;;  %v899_v48 = vpop.permute.xlu1 %898  ;;  %v1117_v27 = vmul.f32 %v8258_v41, %v895_v51  ;;  %v8391_v31 = vpop.permute.xlu0 %553 }
 0x106   : > { %1960 = vmatmul.mubr.bf16.gmra.mxu0 %v1760_v15  ;;  %v1118_v16 = vmul.f32 %v8258_v41, %v899_v48 }
 0x107   : > { %1969 = vmatprep.mubr.bf16.mxu0 %v13327_v47  ;;  %v1181_v49 = vadd.f32 %v1117_v27, %v792_v53 }
 0x109   : > { %7466 = vset.pattern.permute.xlu1 %v13326_v37  ;;  %v1570_v51 = vadd.f32 %v1506_v40, %v1181_v49  ;;  %v8398_v6 = vpop.permute.xlu0 %623 }
 0x10a   : > { %1375 = vperm.xlu1 %7466, %v8005_v18   ;;  %v1288_v63 = vpop.permute.xlu1 %1287  ;;  %v1182_v18 = vadd.f32 %v1118_v16, %v793_v36  ;;  %v416_v36 = vld [vmem:[%s7945_s24 + $0xc8] sm:$0xff]  ;;  %v8412_v16 = vld [vmem:[%s7945_s24 + $0x160] sm:$0xff] }
 0x10b   : > { %v1507_v42 = vmul.f32 %v8265_v43, %v1288_v63  ;;  %v1641_v46 = vadd.f32 %v8297_v3, %v1570_v51  ;;  %1411 = vperm.xlu0 %7492, %v8412_v16  }
 0x10d   : > { %v1571_v13 = vadd.f32 %v1507_v42, %v1182_v18  ;;  %v1705_v17 = vmax.f32 %v1641_v46, 0.0  ;;  %v8407_v58 = vpop.permute.xlu0 %558 }
 0x10e   : > { %1323 = vperm.xlu1 %7466, %v8009_v19   ;;  %1970 = vmatmul.mubr.bf16.gmra.mxu0 %v1761_v10  ;;  %v1762_v19 = vpack.c.bf16 %v1704_v50, %v1703_v60  ;;  %v797_v60 = vmul.f32 %v8270_v44, %v8376_v57 }
 0x10f   : > { %v529_v55 = vpop.permute.xlu1 %528  ;;  %1979 = vmatprep.mubr.bf16.mxu0 %v13327_v47  ;;  %v1642_v5 = vadd.f32 %v8297_v3, %v1571_v13  ;;  %v1510_v13 = vmul.f32 %v8265_v43, %v8184_v9 }
 0x110   : > { %v794_v39 = vmul.f32 %v8270_v44, %v529_v55 }
 0x111   : > { %v1706_v48 = vmax.f32 %v1642_v5, 0.0  ;;  %v8419_v53 = vpop.permute.xlu0 %628 }
 0x112   : > { %7467 = vset.pattern.permute.xlu1 %v13327_v47 }
 0x113   : > { %638 = vperm.xlu1 %7467, %v427_v59   ;;  %v1763_v52 = vpack.c.bf16 %v1706_v48, %v1705_v17 }
 0x114   : > { %v903_v4 = vpop.permute.xlu1 %902 }
 0x115   : > { %v1119_v35 = vmul.f32 %v8258_v41, %v903_v4  ;;  %v8423_v38 = vpop.permute.xlu0 %643 }
 0x116   : > { %1980 = vmatmul.mubr.bf16.gmra.mxu0 %v1762_v19 }
 0x117   : > { %7468 = vset.pattern.permute.xlu1 %v13328_v32  ;;  %1989 = vmatprep.mubr.bf16.mxu0 %v13327_v47  ;;  %v1183_v15 = vadd.f32 %v1119_v35, %v794_v39 }
 0x118   : > { %990 = vperm.xlu1 %7468, %v427_v59   ;;  %v907_v62 = vpop.permute.xlu1 %906 }
 0x119   : > { %v1120_v25 = vmul.f32 %v8258_v41, %v907_v62  ;;  %v1572_v28 = vadd.f32 %v1508_v45, %v1183_v15  ;;  %v8433_v4 = vpop.permute.xlu0 %578  ;;  %v8438_v45 = vld [vmem:[%s7945_s24 + $0x170] sm:$0xff] }
 0x11a   : > { %1419 = vperm.xlu0 %7492, %v8438_v45  }
 0x11b   : > { %v1184_v27 = vadd.f32 %v1120_v25, %v795_v1 }
 0x11c   : > { %994 = vperm.xlu1 %7468, %v8140_v56   ;;  %v1643_v56 = vadd.f32 %v8297_v3, %v1572_v28 }
 0x11d   : > { %v1296_v23 = vpop.permute.xlu1 %1295  ;;  %v8442_v57 = vpop.permute.xlu0 %648 }
 0x11e   : > { %v1509_v7 = vmul.f32 %v8265_v43, %v1296_v23  ;;  %1990 = vmatmul.mubr.bf16.gmra.mxu0 %v1763_v52  ;;  %v1707_v42 = vmax.f32 %v1643_v56, 0.0  ;;  %v8462_v56 = vld [vmem:[%s7945_s24 + $0x180] sm:$0xff] }
 0x11f   : > { %1999 = vmatprep.mubr.bf16.mxu0 %v13327_v47  ;;  %1427 = vperm.xlu0 %7492, %v8462_v56  }
 0x120   : > { %v1573_v2 = vadd.f32 %v1509_v7, %v1184_v27  ;;  %7469 = vset.pattern.permute.xlu1 %v13327_v47  ;;  %v799_v7 = vmul.f32 %v8270_v44, %v8391_v31 }
 0x121   : > { %583 = vperm.xlu1 %7469, %v416_v36   ;;  %v8447_v17 = vpop.permute.xlu0 %663 }
 0x122   : > { %v1644_v63 = vadd.f32 %v8297_v3, %v1573_v2  ;;  %v539_v11 = vpop.permute.xlu1 %538 }
 0x123   : > { %v796_v55 = vmul.f32 %v8270_v44, %v539_v11 }
 0x124   : > { %v1708_v10 = vmax.f32 %v1644_v63, 0.0 }
 0x125   : > { %7470 = vset.pattern.permute.xlu1 %v13328_v32  ;;  %v8459_v2 = vpop.permute.xlu0 %598 }
 0x126   : > { %946 = vperm.xlu1 %7470, %v416_v36   ;;  %v1764_v40 = vpack.c.bf16 %v1708_v10, %v1707_v42  ;;  %v8469_v42 = vld [vmem:[%s7945_s24 + $0x190] sm:$0xff] }
 0x127   : > { %v911_v49 = vpop.permute.xlu1 %910  ;;  %1435 = vperm.xlu0 %7492, %v8469_v42  }
 0x128   : > { %v1121_v18 = vmul.f32 %v8258_v41, %v911_v49  ;;  %2000 = vmatmul.mubr.bf16.gmra.mxu0 %v1764_v40 }
 0x129   : > { %2009 = vmatprep.mubr.bf16.mxu0 %v13327_v47  ;;  %v8473_v10 = vpop.permute.xlu0 %668 }
 0x12a   : > { %7471 = vset.pattern.permute.xlu1 %v13326_v37  ;;  %v1185_v50 = vadd.f32 %v1121_v18, %v796_v55 }
 0x12b   : > { %1379 = vperm.xlu1 %7471, %v427_v59   ;;  %v915_v51 = vpop.permute.xlu1 %914 }
 0x12c   : > { %v1122_v5 = vmul.f32 %v8258_v41, %v915_v51  ;;  %v1574_v19 = vadd.f32 %v1510_v13, %v1185_v50 }
 0x12d   : > { %v8483_v50 = vpop.permute.xlu0 %683 }
 0x12e   : > { %v1186_v39 = vadd.f32 %v1122_v5, %v797_v60  ;;  %v1645_v59 = vadd.f32 %v8297_v3, %v1574_v19  ;;  %v8487_v5 = vld [vmem:[%s7945_s24 + $0x188] sm:$0xff]  ;;  %v7836_v19 = vld [vmem:[%s7945_s24 + $0x138] sm:$0xff] }
 0x12f   : > { %1331 = vperm.xlu1 %7471, %v8014_v20  }
 0x130   : > { %v1304_v35 = vpop.permute.xlu1 %1303  ;;  %v1709_v20 = vmax.f32 %v1645_v59, 0.0  ;;  %v813_v59 = vmul.f32 %v8270_v44, %v8398_v6  ;;  %v1125_v6 = vmul.f32 %v8258_v41, %v8195_v14 }
 0x131   : > { %v1511_v46 = vmul.f32 %v8265_v43, %v1304_v35 }
 0x133   : > { %v1575_v9 = vadd.f32 %v1511_v46, %v1186_v39  ;;  %1335 = vperm.xlu1 %7471, %v416_v36   ;;  %v7837_v39 = vld [vmem:[%s7945_s24 + $0xd0] sm:$0xff] }
 0x135   : > { %v1646_v15 = vadd.f32 %v8297_v3, %v1575_v9  ;;  %v549_v62 = vpop.permute.xlu1 %548  ;;  %v431_v9 = vld [vmem:[%s7945_s24 + $0x140] sm:$0xff] }
 0x136   : > { %v798_v52 = vmul.f32 %v8270_v44, %v549_v62 }
 0x137   : > { %7472 = vset.pattern.permute.xlu1 %v13327_v47  ;;  %v1710_v48 = vmax.f32 %v1646_v15, 0.0 }
 0x138   : > { %653 = vperm.xlu1 %7472, %v8020_v21   ;;  %v1512_v21 = vmul.f32 %v8265_v43, %v8189_v12 }
 0x139   : > { %v1765_v1 = vpack.c.bf16 %v1710_v48, %v1709_v20 }
 0x13a   : > { %v919_v25 = vpop.permute.xlu1 %918 }
 0x13b   : > { %v1123_v28 = vmul.f32 %v8258_v41, %v919_v25  ;;  %2010 = vmatmul.mubr.bf16.gmra.mxu0 %v1765_v1 }
 0x13c   : > { %7473 = vset.pattern.permute.xlu1 %v13328_v32  ;;  %2019 = vmatprep.mubr.bf16.mxu0 %v13327_v47 }
 0x13d   : > { %998 = vperm.xlu1 %7473, %v8155_v61   ;;  %v1187_v23 = vadd.f32 %v1123_v28, %v798_v52  ;;  %v800_v28 = vmul.f32 %v8270_v44, %v8407_v58 }
 0x13e   : > { %v923_v27 = vpop.permute.xlu1 %922 }
 0x13f   : > { %v1124_v36 = vmul.f32 %v8258_v41, %v923_v27  ;;  %v1576_v61 = vadd.f32 %v1512_v21, %v1187_v23  ;;  %v8510_v27 = vld [vmem:[%s7945_s24 + $0x198] sm:$0xff] }
 0x141   : > { %7474 = vset.pattern.permute.xlu1 %v13327_v47  ;;  %v1188_v63 = vadd.f32 %v1124_v36, %v799_v7  ;;  %v1647_v40 = vadd.f32 %v8297_v3, %v1576_v61  ;;  %v1189_v61 = vadd.f32 %v1125_v6, %v800_v28  ;;  %v7554_v28 = vld [vmem:[%s13171_s5 + $0xa8] ss:$16 sps:$4 sm:$0xff]  }
 0x142   : > { %588 = vperm.xlu1 %7474, %v8024_v22   ;;  %v8478_v22 = vld [vmem:[%s7945_s24 + $0x1a0] sm:$0xff] }
 0x143   : > { %v1312_v12 = vpop.permute.xlu1 %1311  ;;  %1443 = vperm.xlu0 %7492, %v8478_v22   ;;  %v1711_v55 = vmax.f32 %v1647_v40, 0.0 }
 0x144   : > { %v1513_v11 = vmul.f32 %v8265_v43, %v1312_v12 }
 0x146   : > { %v1577_v31 = vadd.f32 %v1513_v11, %v1188_v63  ;;  %593 = vperm.xlu1 %7474, %v8236_v34   ;;  %v420_v11 = vld [vmem:[%s7945_s24 + $0xe8] sm:$0xff] }
 0x147   : > { %7503 = vset.pattern.permute.xlu0 %v13327_v47 }
 0x148   : > { %v1648_v49 = vadd.f32 %v8297_v3, %v1577_v31  ;;  %v619_v18 = vpop.permute.xlu1 %618  ;;  %703 = vperm.xlu0 %7503, %v8487_v5  }
 0x149   : > { %v812_v52 = vmul.f32 %v8270_v44, %v619_v18 }
 0x14a   : > { %7475 = vset.pattern.permute.xlu1 %v13328_v32  ;;  %v1712_v13 = vmax.f32 %v1648_v49, 0.0  ;;  %v7550_v49 = vld [vmem:[%s13171_s5 + $0xec] ss:$16 sps:$4 sm:$0xff]  }
 0x14b   : > { %954 = vperm.xlu1 %7475, %v8236_v34   ;;  %v8493_v34 = vpop.permute.xlu0 %693  ;;  %3201 = vmatprep.subr.bf16.mxu0 %v7550_v49  ;;  %v7563_v49 = vld [vmem:[%s13171_s5 + $0x48] ss:$16 sps:$4 sm:$0xff]  }
 0x14c   : > { %v1766_v51 = vpack.c.bf16 %v1712_v13, %v1711_v55  ;;  %713 = vperm.xlu0 %7503, %v8510_v27  }
 0x14d   : > { %v975_v60 = vpop.permute.xlu1 %974 }
 0x14e   : > { %2020 = vmatmul.mubr.bf16.gmra.mxu0 %v1766_v51  ;;  %v1137_v25 = vmul.f32 %v8258_v41, %v975_v60  ;;  %v7548_v51 = vld [vmem:[%s13171_s5 + $0xe8] ss:$16 sps:$4 sm:$0xff]  }
 0x14f   : > { %7476 = vset.pattern.permute.xlu1 %v13326_v37  ;;  %2029 = vmatprep.mubr.bf16.mxu0 %v13327_v47  ;;  %v1368_v62 = vpop.permute.xlu0 %1367 }
 0x150   : > { %1391 = vperm.xlu1 %7476, %v7836_v19   ;;  %v1527_v48 = vmul.f32 %v8265_v43, %v1368_v62  ;;  %v1201_v7 = vadd.f32 %v1137_v25, %v812_v52  ;;  %3202 = vmatpush1.bf16.msra.mxu0 %v7548_v51  ;;  %v7551_v62 = vld [vmem:[%s13171_s5 + $0xc8] ss:$16 sps:$4 sm:$0xff]  }
 0x151   : > { %v979_v35 = vpop.permute.xlu1 %978  ;;  %v8590_v51 = vld [vmem:[%s7945_s24 + $0x1d8] sm:$0xff] }
 0x152   : > { %v1138_v15 = vmul.f32 %v8258_v41, %v979_v35 }
 0x154   : > { %1339 = vperm.xlu1 %7476, %v7837_v39   ;;  %v1202_v20 = vadd.f32 %v1138_v15, %v813_v59  ;;  %v7553_v59 = vld [vmem:[%s13171_s5 + $0xcc] ss:$16 sps:$4 sm:$0xff]  }
 0x155   : > { %3203 = vmatprep.subr.bf16.mxu0 %v7553_v59 }
 0x156   : > { %v564_v46 = vpop.permute.xlu1 %563  ;;  %v1591_v21 = vadd.f32 %v1527_v48, %v1202_v20  ;;  %3204 = vmatpush1.bf16.msra.mxu0 %v7551_v62 }
 0x158   : > { %7477 = vset.pattern.permute.xlu1 %v13327_v47  ;;  %v1662_v12 = vadd.f32 %v8297_v3, %v1591_v21 }
 0x159   : > { %658 = vperm.xlu1 %7477, %v431_v9  }
 0x15a   : > { %v1726_v18 = vmax.f32 %v1662_v12, 0.0 }
 0x15b   : > { %v931_v1 = vpop.permute.xlu1 %930 }
 0x15c   : > { %v1126_v58 = vmul.f32 %v8258_v41, %v931_v1  ;;  %v7556_v1 = vld [vmem:[%s13171_s5 + $0xac] ss:$16 sps:$4 sm:$0xff]  }
 0x15d   : > { %7478 = vset.pattern.permute.xlu1 %v13328_v32  ;;  %3205 = vmatprep.subr.bf16.mxu0 %v7556_v1  ;;  %v7569_v1 = vld [vmem:[%s13171_s5 + $0x8] ss:$16 sps:$4 sm:$0xff]  }
 0x15e   : > { %1006 = vperm.xlu1 %7478, %v431_v9   ;;  %3206 = vmatpush1.bf16.msra.mxu0 %v7554_v28 }
 0x160   : > { %v1364_v23 = vpop.permute.xlu1 %1363 }
 0x161   : > { %v1526_v36 = vmul.f32 %v8265_v43, %v1364_v23  ;;  %v7559_v23 = vld [vmem:[%s13171_s5 + $0x8c] ss:$16 sps:$4 sm:$0xff]  }
 0x162   : > { %1010 = vperm.xlu1 %7478, %v8164_v0   ;;  %v801_v0 = vmul.f32 %v8270_v44, %v564_v46  ;;  %3207 = vmatprep.subr.bf16.mxu0 %v7559_v23 }
 0x163   : > { %v1590_v14 = vadd.f32 %v1526_v36, %v1201_v7  ;;  %v8550_v7 = vld [vmem:[%s7945_s24 + $0x1a8] sm:$0xff] }
 0x164   : > { %v1316_v63 = vpop.permute.xlu1 %1315  ;;  %v1190_v19 = vadd.f32 %v1126_v58, %v801_v0  ;;  %v7557_v36 = vld [vmem:[%s13171_s5 + $0x88] ss:$16 sps:$4 sm:$0xff]   ;;  %723 = vperm.xlu0 %7503, %v8550_v7   ;;  %v7565_v58 = vld [vmem:[%s13171_s5 + $0x4c] ss:$16 sps:$4 sm:$0xff]  }
 0x165   : > { %v1661_v31 = vadd.f32 %v8297_v3, %v1590_v14  ;;  %v1514_v40 = vmul.f32 %v8265_v43, %v1316_v63  ;;  %3208 = vmatpush1.bf16.msra.mxu0 %v7557_v36  ;;  %v8562_v14 = vld [vmem:[%s7945_s24 + $0x1b8] sm:$0xff] }
 0x166   : > { %7479 = vset.pattern.permute.xlu1 %v13327_v47  ;;  %v7560_v63 = vld [vmem:[%s13171_s5 + $0x68] ss:$16 sps:$4 sm:$0xff]   ;;  %v7574_v36 = vld [vmem:[%s13171_s5 + $0x1ec] ss:$16 sps:$4 sm:$0xff]  }
 0x167   : > { %v1578_v55 = vadd.f32 %v1514_v40, %v1189_v61  ;;  %603 = vperm.xlu1 %7479, %v420_v11   ;;  %v1725_v13 = vmax.f32 %v1661_v31, 0.0  ;;  %v7562_v61 = vld [vmem:[%s13171_s5 + $0x6c] ss:$16 sps:$4 sm:$0xff]  }
 0x168   : > { %v1320_v60 = vpop.permute.xlu1 %1319  ;;  %733 = vperm.xlu0 %7503, %v8562_v14   ;;  %3209 = vmatprep.subr.bf16.mxu0 %v7562_v61  ;;  %v8572_v40 = vld [vmem:[%s7945_s24 + $0x1c8] sm:$0xff] }
 0x169   : > { %v1515_v35 = vmul.f32 %v8265_v43, %v1320_v60  ;;  %v1773_v39 = vpack.c.bf16 %v1726_v18, %v1725_v13  ;;  %v1649_v46 = vadd.f32 %v8297_v3, %v1578_v55  ;;  %3210 = vmatpush1.bf16.msra.mxu0 %v7560_v63  ;;  %v814_v18 = vmul.f32 %v8270_v44, %v8419_v53  ;;  %v8583_v55 = vld [vmem:[%s7945_s24 + $0x158] sm:$0xff] }
 0x16a   : > { %3211 = vmatprep.subr.bf16.mxu0 %v7565_v58  ;;  %v7568_v13 = vld [vmem:[%s13171_s5 + $0x2c] ss:$16 sps:$4 sm:$0xff]   ;;  %v7566_v53 = vld [vmem:[%s13171_s5 + $0x28] ss:$16 sps:$4 sm:$0xff]   ;;  %v7840_v58 = vld [vmem:[%s7945_s24 + $0xf0] sm:$0xff] }
 0x16b   : > { %v1579_v15 = vadd.f32 %v1515_v35, %v1190_v19  ;;  %7480 = vset.pattern.permute.xlu1 %v13328_v32  ;;  %2090 = vmatmul.mubr.bf16.vlgmr.msra.gmra.mxu1 %v1773_v39  ;;  %v1713_v25 = vmax.f32 %v1649_v46, 0.0  ;;  %v1140_v46 = vmul.f32 %v8258_v41, %v8203_v24 }
 0x16c   : > { %962 = vperm.xlu1 %7480, %v420_v11   ;;  %2099 = vmatprep.mubr.bf16.mxu1 %v13327_v47 }
 0x16d   : > { %v1650_v20 = vadd.f32 %v8297_v3, %v1579_v15  ;;  %v634_v48 = vpop.permute.xlu1 %633  ;;  %743 = vperm.xlu0 %7503, %v8572_v40   ;;  %3212 = vmatpush1.bf16.msra.mxu0 %v7563_v49 }
 0x16e   : > { %3213 = vmatprep.subr.bf16.mxu0 %v7568_v13  ;;  %v815_v15 = vmul.f32 %v8270_v44, %v634_v48  ;;  %v8612_v48 = vld [vmem:[%s7945_s24 + $0x1b0] sm:$0xff] }
 0x16f   : > { %v1714_v6 = vmax.f32 %v1650_v20, 0.0  ;;  %v7571_v20 = vld [vmem:[%s13171_s5 + $0xc] ss:$16 sps:$4 sm:$0xff]  }
 0x170   : > { %7481 = vset.pattern.permute.xlu1 %v13326_v37 }
 0x171   : > { %1395 = vperm.xlu1 %7481, %v431_v9   ;;  %v1767_v52 = vpack.c.bf16 %v1714_v6, %v1713_v25  ;;  %v7838_v9 = vld [vmem:[%s7945_s24 + $0xe0] sm:$0xff]  ;;  %753 = vperm.xlu0 %7503, %v8590_v51  }
 0x172   : > { %v983_v21 = vpop.permute.xlu1 %982  ;;  %3214 = vmatpush1.bf16.msra.mxu0 %v7566_v53 }
 0x173   : > { %2030 = vmatmul.mubr.bf16.gmra.mxu0 %v1767_v52  ;;  %v1139_v0 = vmul.f32 %v8258_v41, %v983_v21  ;;  %3215 = vmatprep.subr.bf16.mxu0 %v7571_v20  ;;  %v1204_v52 = vadd.f32 %v1140_v46, %v815_v15  ;;  %v7580_v46 = vld [vmem:[%s13171_s5 + $0x1ac] ss:$16 sps:$4 sm:$0xff]   ;;  %v7578_v15 = vld [vmem:[%s13171_s5 + $0x1a8] ss:$16 sps:$4 sm:$0xff]  }
 0x174   : > { %2039 = vmatprep.mubr.bf16.mxu0 %v13327_v47 }
 0x175   : > { %1347 = vperm.xlu1 %7481, %v7838_v9   ;;  %v1203_v60 = vadd.f32 %v1139_v0, %v814_v18  ;;  %7512 = vset.pattern.permute.xlu0 %v13326_v37  ;;  %v7572_v9 = vld [vmem:[%s13171_s5 + $0x1e8] ss:$16 sps:$4 sm:$0xff]   ;;  %v7577_v0 = vld [vmem:[%s13171_s5 + $0x1cc] ss:$16 sps:$4 sm:$0xff]  }
 0x176   : > { %1451 = vperm.xlu0 %7512, %v8612_v48   ;;  %3216 = vmatpush1.bf16.msra.mxu0 %v7569_v1  ;;  %v8650_v1 = vld [vmem:[%s7945_s24 + $0x1c0] sm:$0xff] }
 0x177   : > { %v569_v12 = vpop.permute.xlu1 %568  ;;  %3217 = vmatprep.subr.bf16.mxu0 %v7574_v36  ;;  %v817_v36 = vmul.f32 %v8270_v44, %v8423_v38 }
 0x178   : > { %v802_v21 = vmul.f32 %v8270_v44, %v569_v12 }
 0x179   : > { %1351 = vperm.xlu1 %7481, %v420_v11   ;;  %v1372_v11 = vpop.permute.xlu0 %1371 }
 0x17a   : > { %v1528_v19 = vmul.f32 %v8265_v43, %v1372_v11  ;;  %3218 = vmatpush2.bf16.msra.mxu0 %v7572_v9  ;;  %v7575_v11 = vld [vmem:[%s13171_s5 + $0x1c8] ss:$16 sps:$4 sm:$0xff]   ;;  %1459 = vperm.xlu0 %7512, %v8650_v1  }
 0x17b   : > { %v574_v31 = vpop.permute.xlu1 %573  ;;  %3219 = vmatprep.subr.bf16.mxu0 %v7577_v0  ;;  %v8696_v0 = vld [vmem:[%s7945_s24 + $0x1d0] sm:$0xff] }
 0x17c   : > { %v803_v62 = vmul.f32 %v8270_v44, %v574_v31  ;;  %v1592_v25 = vadd.f32 %v1528_v19, %v1203_v60 }
 0x17d   : > { %7482 = vset.pattern.permute.xlu1 %v13327_v47  ;;  %v1328_v59 = vpop.permute.xlu0 %1327 }
 0x17e   : > { %673 = vperm.xlu1 %7482, %v8583_v55   ;;  %v1517_v24 = vmul.f32 %v8265_v43, %v1328_v59  ;;  %v1663_v61 = vadd.f32 %v8297_v3, %v1592_v25  ;;  %3220 = vmatpush2.bf16.msra.mxu0 %v7575_v11  ;;  %v1129_v11 = vmul.f32 %v8258_v41, %v8219_v29 }
 0x17f   : > { %3221 = vmatprep.subr.bf16.mxu0 %v7580_v46  ;;  %1467 = vperm.xlu0 %7512, %v8696_v0  }
 0x180   : > { %v939_v35 = vpop.permute.xlu1 %938  ;;  %v1727_v13 = vmax.f32 %v1663_v61, 0.0 }
 0x181   : > { %v1128_v39 = vmul.f32 %v8258_v41, %v939_v35  ;;  %v1384_v61 = vpop.permute.xlu0 %1383 }
 0x182   : > { %7483 = vset.pattern.permute.xlu1 %v13328_v32  ;;  %3222 = vmatpush2.bf16.msra.mxu0 %v7578_v15  ;;  %v1531_v38 = vmul.f32 %v8265_v43, %v1384_v61 }
 0x183   : > { %1014 = vperm.xlu1 %7483, %v8180_v8   ;;  %v1192_v6 = vadd.f32 %v1128_v39, %v803_v62  ;;  %v1127_v8 = vmul.f32 %v8258_v41, %v8210_v26 }
 0x185   : > { %v1376_v28 = vpop.permute.xlu1 %1375  ;;  %v1581_v63 = vadd.f32 %v1517_v24, %v1192_v6  ;;  %v1191_v31 = vadd.f32 %v1127_v8, %v802_v21  ;;  %v7583_v6 = vld [vmem:[%s13171_s5 + $0x18c] ss:$16 sps:$4 sm:$0xff]  }
 0x186   : > { %v1529_v23 = vmul.f32 %v8265_v43, %v1376_v28  ;;  %v7581_v28 = vld [vmem:[%s13171_s5 + $0x188] ss:$16 sps:$4 sm:$0xff]   ;;  %3223 = vmatprep.subr.bf16.mxu0 %v7583_v6  ;;  %v7589_v21 = vld [vmem:[%s13171_s5 + $0x14c] ss:$16 sps:$4 sm:$0xff]  }
 0x187   : > { %7484 = vset.pattern.permute.xlu1 %v13327_v47  ;;  %v1652_v53 = vadd.f32 %v8297_v3, %v1581_v63  ;;  %3224 = vmatpush2.bf16.msra.mxu0 %v7581_v28  ;;  %v7592_v63 = vld [vmem:[%s13171_s5 + $0x12c] ss:$16 sps:$4 sm:$0xff]  }
 0x188   : > { %v1593_v26 = vadd.f32 %v1529_v23, %v1204_v52  ;;  %608 = vperm.xlu1 %7484, %v7840_v58   ;;  %v7584_v52 = vld [vmem:[%s13171_s5 + $0x168] ss:$16 sps:$4 sm:$0xff]  }
 0x189   : > { %v1324_v12 = vpop.permute.xlu1 %1323  ;;  %v1716_v62 = vmax.f32 %v1652_v53, 0.0 }
 0x18a   : > { %v1664_v49 = vadd.f32 %v8297_v3, %v1593_v26  ;;  %v1516_v18 = vmul.f32 %v8265_v43, %v1324_v12  ;;  %v7590_v26 = vld [vmem:[%s13171_s5 + $0x128] ss:$16 sps:$4 sm:$0xff]  }
 0x18c   : > { %v1580_v60 = vadd.f32 %v1516_v18, %v1191_v31  ;;  %613 = vperm.xlu1 %7484, %v8379_v54   ;;  %v1728_v19 = vmax.f32 %v1664_v49, 0.0  ;;  %v7595_v31 = vld [vmem:[%s13171_s5 + $0x10c] ss:$16 sps:$4 sm:$0xff]   ;;  %v7593_v18 = vld [vmem:[%s13171_s5 + $0x108] ss:$16 sps:$4 sm:$0xff]  }
 0x18e   : > { %v1651_v35 = vadd.f32 %v8297_v3, %v1580_v60  ;;  %v639_v39 = vpop.permute.xlu1 %638  ;;  %v1774_v59 = vpack.c.bf16 %v1728_v19, %v1727_v13  ;;  %v804_v13 = vmul.f32 %v8270_v44, %v8433_v4 }
 0x18f   : > { %v816_v53 = vmul.f32 %v8270_v44, %v639_v39 }
 0x190   : > { %7486 = vset.pattern.permute.xlu1 %v13328_v32  ;;  %2100 = vmatmul.mubr.bf16.gmra.mxu1 %v1774_v59  ;;  %v1715_v20 = vmax.f32 %v1651_v35, 0.0  ;;  %v1193_v46 = vadd.f32 %v1129_v11, %v804_v13  ;;  %v8748_v11 = vld [vmem:[%s13167_s1 + $0x1] ss:$0 sm:$0xff] }
 0x191   : > { %970 = vperm.xlu1 %7486, %v8379_v54   ;;  %2109 = vmatprep.mubr.bf16.mxu1 %v13327_v47  ;;  %v7586_v54 = vld [vmem:[%s13171_s5 + $0x16c] ss:$16 sps:$4 sm:$0xff]  }
 0x192   : > { %v1768_v25 = vpack.c.bf16 %v1716_v62, %v1715_v20  ;;  %3225 = vmatprep.subr.bf16.mxu0 %v7586_v54 }
 0x193   : > { %v991_v24 = vpop.permute.xlu1 %990  ;;  %3226 = vmatpush2.bf16.msra.mxu0 %v7584_v52 }
 0x194   : > { %2040 = vmatmul.mubr.bf16.gmra.mxu0 %v1768_v25  ;;  %3227 = vmatprep.subr.bf16.mxu0 %v7589_v21  ;;  %v1141_v49 = vmul.f32 %v8258_v41, %v991_v24 }
 0x195   : > { %7487 = vset.pattern.permute.xlu1 %v13326_v37  ;;  %2049 = vmatprep.mubr.bf16.mxu0 %v13327_v47 }
 0x196   : > { %1407 = vperm.xlu1 %7487, %v8583_v55   ;;  %v7587_v55 = vld [vmem:[%s13171_s5 + $0x148] ss:$16 sps:$4 sm:$0xff]   ;;  %v1205_v35 = vadd.f32 %v1141_v49, %v816_v53  ;;  %v1388_v53 = vpop.permute.xlu0 %1387 }
 0x197   : > { %v995_v8 = vpop.permute.xlu1 %994  ;;  %3228 = vmatpush2.bf16.msra.mxu0 %v7587_v55 }
 0x198   : > { %v1142_v9 = vmul.f32 %v8258_v41, %v995_v8  ;;  %3229 = vmatprep.subr.bf16.mxu0 %v7592_v63 }
 0x19a   : > { %1355 = vperm.xlu1 %7487, %v7840_v58   ;;  %v1206_v58 = vadd.f32 %v1142_v9, %v817_v36 }
 0x19b   : > { %3230 = vmatpush2.bf16.msra.mxu0 %v7590_v26 }
 0x19c   : > { %v584_v23 = vpop.permute.xlu1 %583  ;;  %3231 = vmatprep.subr.bf16.mxu0 %v7595_v31  ;;  %v1595_v60 = vadd.f32 %v1531_v38, %v1206_v58  ;;  %v8739_v31 = vld [vmem:[%s13167_s1] ss:$0 sm:$0xff] }
 0x19d   : > { %v805_v6 = vmul.f32 %v8270_v44, %v584_v23  ;;  %v818_v49 = vmul.f32 %v8739_v31, %v8442_v57  ;;  %v8758_v57 = vld [vmem:[%s13167_s1 + $0x2] ss:$0 sm:$0xff] }
 0x19e   : > { %7488 = vset.pattern.permute.xlu1 %v13327_v47  ;;  %v1666_v15 = vadd.f32 %v8297_v3, %v1595_v60 }
 0x19f   : > { %678 = vperm.xlu1 %7488, %v8412_v16   ;;  %3232 = vmatpush2.bf16.msra.mxu0 %v7593_v18 }
 0x1a0   : > { %v1730_v25 = vmax.f32 %v1666_v15, 0.0  ;;  %v1144_v15 = vmul.f32 %v8748_v11, %v8226_v30  ;;  %v1131_v30 = vmul.f32 %v8748_v11, %v8233_v33 }
 0x1a1   : > { %v947_v12 = vpop.permute.xlu1 %946 }
 0x1a2   : > { %v1130_v20 = vmul.f32 %v8258_v41, %v947_v12  ;;  %v8733_v12 = vld [vmem:[%s7945_s24 + $0x1e8] sm:$0xff] }
 0x1a3   : > { %7489 = vset.pattern.permute.xlu1 %v13328_v32 }
 0x1a4   : > { %1022 = vperm.xlu1 %7489, %v8412_v16   ;;  %v7841_v16 = vld [vmem:[%s7945_s24 + $0x168] sm:$0xff]  ;;  %v1194_v8 = vadd.f32 %v1130_v20, %v805_v6 }
 0x1a6   : > { %v1380_v19 = vpop.permute.xlu1 %1379 }
 0x1a7   : > { %v1530_v59 = vmul.f32 %v8265_v43, %v1380_v19 }
 0x1a8   : > { %1026 = vperm.xlu1 %7489, %v7841_v16  }
 0x1a9   : > { %v1594_v62 = vadd.f32 %v1530_v59, %v1205_v35  ;;  %v1532_v35 = vmul.f32 %v8758_v57, %v1388_v53 }
 0x1aa   : > { %v1332_v29 = vpop.permute.xlu1 %1331 }
 0x1ab   : > { %v1665_v4 = vadd.f32 %v8297_v3, %v1594_v62  ;;  %v1518_v39 = vmul.f32 %v8265_v43, %v1332_v29 }
 0x1ac   : > { %7490 = vset.pattern.permute.xlu1 %v13326_v37 }
 0x1ad   : > { %v1582_v24 = vadd.f32 %v1518_v39, %v1193_v46  ;;  %1415 = vperm.xlu1 %7490, %v7841_v16   ;;  %v1729_v28 = vmax.f32 %v1665_v4, 0.0  ;;  %v1344_v46 = vpop.permute.xlu0 %1343 }
 0x1ae   : > { %v1336_v54 = vpop.permute.xlu1 %1335  ;;  %v8724_v26 = vpop.f32.mrf.mxu0 }
 0x1af   : > { %v1519_v52 = vmul.f32 %v8265_v43, %v1336_v54  ;;  %v1775_v21 = vpack.c.bf16 %v1730_v25, %v1729_v28  ;;  %v1653_v41 = vadd.f32 %v8297_v3, %v1582_v24  ;;  %v8720_v43 = vld [vmem:[%s7945_s24 + $0x1e0] sm:$0xff]  ;;  %v1521_v25 = vmul.f32 %v8758_v57, %v1344_v46  ;;  %v8772_v24 = vld [vmem:[%s7945_s24 + $0x1f8] sm:$0xff] }
 0x1b0   : > { %1475 = vperm.xlu0 %7512, %v8720_v43   ;;  %v8729_v38 = vpop.f32.mrf.mxu0 }
 0x1b1   : > { %v1583_v55 = vadd.f32 %v1519_v52, %v1194_v8  ;;  %7491 = vset.pattern.permute.xlu1 %v13327_v47  ;;  %2110 = vmatmul.mubr.bf16.gmra.mxu1 %v1775_v21  ;;  %v1717_v36 = vmax.f32 %v1653_v41, 0.0 }
 0x1b2   : > { %688 = vperm.xlu1 %7491, %v8438_v45   ;;  %2119 = vmatprep.mubr.bf16.mxu1 %v13327_v47  ;;  %v8743_v18 = vpop.f32.mrf.mxu0 }
 0x1b3   : > { %v1654_v44 = vadd.f32 %v8297_v3, %v1583_v55  ;;  %v654_v23 = vpop.permute.xlu1 %653  ;;  %v7842_v3 = vld [vmem:[%s7945_s24 + $0x178] sm:$0xff] }
 0x1b4   : > { %7517 = vset.pattern.permute.xlu0 %v13327_v47  ;;  %v8753_v60 = vpop.f32.mrf.mxu0  ;;  %v819_v62 = vmul.f32 %v8739_v31, %v654_v23 }
 0x1b5   : > { %v1718_v9 = vmax.f32 %v1654_v44, 0.0  ;;  %763 = vperm.xlu0 %7517, %v8733_v12  }
 0x1b6   : > { %7493 = vset.pattern.permute.xlu1 %v13328_v32  ;;  %v8767_v20 = vpop.f32.mrf.mxu0  ;;  %v1208_v28 = vadd.f32 %v1144_v15, %v819_v62 }
 0x1b7   : > { %1030 = vperm.xlu1 %7493, %v8438_v45   ;;  %v1769_v61 = vpack.c.bf16 %v1718_v9, %v1717_v36  ;;  %v8791_v9 = vld [vmem:[%s7945_s24 + $0x1f0] sm:$0xff] }
 0x1b8   : > { %v999_v63 = vpop.permute.xlu1 %998  ;;  %v8779_v52 = vpop.f32.mrf.mxu0 }
 0x1b9   : > { %2050 = vmatmul.mubr.bf16.gmra.mxu0 %v1769_v61  ;;  %v1143_v13 = vmul.f32 %v8748_v11, %v999_v63  ;;  %773 = vperm.xlu0 %7517, %v8772_v24  }
 0x1ba   : > { %2059 = vmatprep.mubr.bf16.mxu0 %v13327_v47  ;;  %v8795_v63 = vpop.f32.mrf.mxu0 }
 0x1bb   : > { %1034 = vperm.xlu1 %7493, %v7842_v3   ;;  %v1207_v19 = vadd.f32 %v1143_v13, %v818_v49 }
 0x1bd   : > { %v589_v58 = vpop.permute.xlu1 %588  ;;  %v1596_v4 = vadd.f32 %v1532_v35, %v1207_v19  ;;  %7521 = vset.pattern.permute.xlu0 %v13326_v37  ;;  %v8801_v19 = vpop.f32.mrf.mxu0 }
 0x1be   : > { %v806_v54 = vmul.f32 %v8739_v31, %v589_v58  ;;  %1483 = vperm.xlu0 %7521, %v8791_v9  }
 0x1bf   : > { %7494 = vset.pattern.permute.xlu1 %v13326_v37  ;;  %v8806_v15 = vpop.f32.mrf.mxu0 }
 0x1c0   : > { %1423 = vperm.xlu1 %7494, %v7842_v3   ;;  %v1195_v44 = vadd.f32 %v1131_v30, %v806_v54 }
 0x1c1   : > { %v594_v45 = vpop.permute.xlu1 %593  ;;  %v8811_v62 = vpop.f32.mrf.mxu0 }
 0x1c2   : > { %v807_v29 = vmul.f32 %v8739_v31, %v594_v45 }
 0x1c4   : > { %7495 = vset.pattern.permute.xlu1 %v13327_v47 }
 0x1c5   : > { %698 = vperm.xlu1 %7495, %v8462_v56  }
 0x1c6   : > { %v955_v59 = vpop.permute.xlu1 %954 }
 0x1c7   : > { %v1132_v16 = vmul.f32 %v8748_v11, %v955_v59 }
 0x1c9   : > { %7496 = vset.pattern.permute.xlu1 %v13328_v32  ;;  %v1196_v39 = vadd.f32 %v1132_v16, %v807_v29  ;;  %v8814_v29 = vpop.f32.mrf.mxu0 }
 0x1ca   : > { %1038 = vperm.xlu1 %7496, %v8462_v56   ;;  %v8784_v56 = vld [vmem:[%s13168_s2] ss:$0 sm:$0xff] }
 0x1cb   : > { %v1392_v6 = vpop.permute.xlu1 %1391  ;;  %v1667_v21 = vadd.f32 %v8784_v56, %v1596_v4  ;;  %v1585_v41 = vadd.f32 %v1521_v25, %v1196_v39  ;;  %v821_v39 = vmul.f32 %v8739_v31, %v8447_v17  ;;  %v8820_v30 = vpop.f32.mrf.mxu0  ;;  %v7598_v17 = vld [vmem:[%s13171_s5 + $0xe4] ss:$16 sps:$4 sm:$0xff]  }
 0x1cc   : > { %v1533_v8 = vmul.f32 %v8758_v57, %v1392_v6  ;;  %v1400_v6 = vpop.permute.xlu0 %1399  ;;  %2848 = vmatprep.subr.bf16.mxu1 %v7598_v17 }
 0x1cd   : > { %v1731_v61 = vmax.f32 %v1667_v21, 0.0  ;;  %v1656_v3 = vadd.f32 %v8784_v56, %v1585_v41  ;;  %v8831_v41 = vpop.f32.mrf.mxu0 }
 0x1ce   : > { %v1597_v55 = vadd.f32 %v1533_v8, %v1208_v28  ;;  %1042 = vperm.xlu1 %7496, %v8487_v5   ;;  %v1535_v28 = vmul.f32 %v8758_v57, %v1400_v6  ;;  %v7596_v8 = vld [vmem:[%s13171_s5 + $0xe0] ss:$16 sps:$4 sm:$0xff]  }
 0x1cf   : > { %v1340_v33 = vpop.permute.xlu1 %1339  ;;  %v1720_v35 = vmax.f32 %v1656_v3, 0.0  ;;  %2849 = vmatpush1.bf16.msra.mxu1 %v7596_v8 }
 0x1d0   : > { %v1668_v23 = vadd.f32 %v8784_v56, %v1597_v55  ;;  %v1520_v36 = vmul.f32 %v8758_v57, %v1340_v33 }
 0x1d2   : > { %v1584_v58 = vadd.f32 %v1520_v36, %v1195_v44  ;;  %7497 = vset.pattern.permute.xlu1 %v13326_v37  ;;  %v1732_v45 = vmax.f32 %v1668_v23, 0.0  ;;  %v13329_v44 = vld [vmem:[#allocation3_spill] sm:$0xff]  ;;  %v808_v36 = vmul.f32 %v8739_v31, %v8459_v2 }
 0x1d3   : > { %1431 = vperm.xlu1 %7497, %v8487_v5   ;;  %v1133_v23 = vmul.f32 %v8748_v11, %v13329_v44  ;;  %v7601_v2 = vld [vmem:[%s13171_s5 + $0xc4] ss:$16 sps:$4 sm:$0xff]  }
 0x1d4   : > { %v1655_v49 = vadd.f32 %v8784_v56, %v1584_v58  ;;  %v659_v13 = vpop.permute.xlu1 %658  ;;  %v1776_v53 = vpack.c.bf16 %v1732_v45, %v1731_v61  ;;  %v8841_v58 = vpop.f32.mrf.mxu0  ;;  %2850 = vmatprep.subr.bf16.mxu1 %v7601_v2 }
 0x1d6   : > { %2120 = vmatmul.mubr.bf16.gmra.mxu1 %v1776_v53  ;;  %v1719_v59 = vmax.f32 %v1655_v49, 0.0  ;;  %v7599_v53 = vld [vmem:[%s13171_s5 + $0xc0] ss:$16 sps:$4 sm:$0xff]  }
 0x1d7   : > { %7498 = vset.pattern.permute.xlu1 %v13327_v47  ;;  %2129 = vmatprep.mubr.bf16.mxu1 %v13327_v47 }
 0x1d8   : > { %708 = vperm.xlu1 %7498, %v8469_v42   ;;  %v1770_v16 = vpack.c.bf16 %v1720_v35, %v1719_v59  ;;  %v1197_v35 = vadd.f32 %v1133_v23, %v808_v36  ;;  %2851 = vmatpush1.bf16.msra.mxu1 %v7599_v53  ;;  %v7602_v36 = vld [vmem:[%s13171_s5 + $0xa0] ss:$16 sps:$4 sm:$0xff]   ;;  %v7607_v53 = vld [vmem:[%s13171_s5 + $0x84] ss:$16 sps:$4 sm:$0xff]  }
 0x1d9   : > { %v1007_v46 = vpop.permute.xlu1 %1006 }
 0x1da   : > { %2060 = vmatmul.mubr.bf16.gmra.mxu0 %v1770_v16  ;;  %v1145_v21 = vmul.f32 %v8748_v11, %v1007_v46 }
 0x1db   : > { %2069 = vmatprep.mubr.bf16.mxu0 %v13327_v47 }
 0x1dc   : > { %7499 = vset.pattern.permute.xlu1 %v13328_v32 }
 0x1dd   : > { %1046 = vperm.xlu1 %7499, %v8469_v42   ;;  %v1011_v5 = vpop.permute.xlu1 %1010 }
 0x1de   : > { %v1146_v25 = vmul.f32 %v8748_v11, %v1011_v5  ;;  %v8855_v5 = vpop.f32.mrf.mxu0 }
 0x1e0   : > { %v1210_v42 = vadd.f32 %v1146_v25, %v821_v39  ;;  %v8860_v17 = vpop.f32.mrf.mxu0 }
 0x1e1   : > { %1050 = vperm.xlu1 %7499, %v8510_v27  }
 0x1e2   : > { %v604_v4 = vpop.permute.xlu1 %603  ;;  %v1599_v55 = vadd.f32 %v1535_v28, %v1210_v42 }
 0x1e3   : > { %v809_v39 = vmul.f32 %v8739_v31, %v604_v4 }
 0x1e4   : > { %v1670_v45 = vadd.f32 %v8784_v56, %v1599_v55 }
 0x1e5   : > { %7500 = vset.pattern.permute.xlu1 %v13326_v37 }
 0x1e6   : > { %1439 = vperm.xlu1 %7500, %v8510_v27   ;;  %v820_v27 = vmul.f32 %v8739_v31, %v659_v13 }
 0x1e7   : > { %v963_v54 = vpop.permute.xlu1 %962 }
 0x1e8   : > { %v1209_v61 = vadd.f32 %v1145_v21, %v820_v27  ;;  %v1134_v59 = vmul.f32 %v8748_v11, %v963_v54 }
 0x1ea   : > { %7501 = vset.pattern.permute.xlu1 %v13327_v47  ;;  %v1198_v28 = vadd.f32 %v1134_v59, %v809_v39  ;;  %v1404_v39 = vpop.permute.xlu0 %1403 }
 0x1eb   : > { %718 = vperm.xlu1 %7501, %v8478_v22  }
 0x1ec   : > { %v1396_v33 = vpop.permute.xlu1 %1395 }
 0x1ed   : > { %v1534_v3 = vmul.f32 %v8758_v57, %v1396_v33  ;;  %v8867_v33 = vpop.f32.mrf.mxu0 }
 0x1ef   : > { %v1598_v49 = vadd.f32 %v1534_v3, %v1209_v61  ;;  %7502 = vset.pattern.permute.xlu1 %v13328_v32  ;;  %v7604_v61 = vld [vmem:[%s13171_s5 + $0xa4] ss:$16 sps:$4 sm:$0xff]  }
 0x1f0   : > { %1054 = vperm.xlu1 %7502, %v8478_v22   ;;  %v1348_v13 = vpop.permute.xlu1 %1347  ;;  %v1734_v22 = vmax.f32 %v1670_v45, 0.0  ;;  %2852 = vmatprep.subr.bf16.mxu1 %v7604_v61  ;;  %v8876_v45 = vpop.f32.mrf.mxu0 }
 0x1f1   : > { %v1669_v16 = vadd.f32 %v8784_v56, %v1598_v49  ;;  %v1522_v46 = vmul.f32 %v8758_v57, %v1348_v13  ;;  %2853 = vmatpush1.bf16.msra.mxu1 %v7602_v36  ;;  %v7605_v13 = vld [vmem:[%s13171_s5 + $0x80] ss:$16 sps:$4 sm:$0xff]  }
 0x1f2   : > { %v8880_v49 = vpop.f32.mrf.mxu0  ;;  %2854 = vmatprep.subr.bf16.mxu1 %v7607_v53  ;;  %v13330_v36 = vld [vmem:[#allocation4_spill] sm:$0xff] }
 0x1f3   : > { %v1586_v25 = vadd.f32 %v1522_v46, %v1197_v35  ;;  %v1733_v6 = vmax.f32 %v1669_v16, 0.0  ;;  %v7608_v16 = vld [vmem:[%s13171_s5 + $0x60] ss:$16 sps:$4 sm:$0xff]   ;;  %v7610_v46 = vld [vmem:[%s13171_s5 + $0x64] ss:$16 sps:$4 sm:$0xff]  }
 0x1f4   : > { %1058 = vperm.xlu1 %7502, %v8550_v7   ;;  %v1352_v42 = vpop.permute.xlu1 %1351  ;;  %v8890_v35 = vpop.f32.mrf.mxu0 }
 0x1f5   : > { %v1523_v8 = vmul.f32 %v8758_v57, %v1352_v42  ;;  %v1777_v54 = vpack.c.bf16 %v1734_v22, %v1733_v6  ;;  %v1657_v21 = vadd.f32 %v8784_v56, %v1586_v25  ;;  %2855 = vmatpush1.bf16.msra.mxu1 %v7605_v13  ;;  %v822_v22 = vmul.f32 %v8739_v31, %v8473_v10 }
 0x1f6   : > { %2856 = vmatprep.subr.bf16.mxu1 %v7610_v46  ;;  %v8902_v25 = vpop.f32.mrf.mxu0  ;;  %v13184_v6 = vlaneseq }
 0x1f7   : > { %v1587_v27 = vadd.f32 %v1523_v8, %v1198_v28  ;;  %2130 = vmatmul.mubr.bf16.gmra.mxu1 %v1777_v54  ;;  %v1721_v44 = vmax.f32 %v1657_v21, 0.0  ;;  %v1536_v28 = vmul.f32 %v8758_v57, %v1404_v39  ;;  %v1360_v21 = vpop.permute.xlu0 %1359 }
 0x1f8   : > { %7504 = vset.pattern.permute.xlu1 %v13326_v37  ;;  %2139 = vmatprep.mubr.bf16.mxu1 %v13327_v47  ;;  %v8908_v10 = vpop.f32.mrf.mxu0  ;;  %v8921_v61 = vshrl.u32 %v13184_v6, 7 }
 0x1f9   : > { %v1658_v4 = vadd.f32 %v8784_v56, %v1587_v27  ;;  %1447 = vperm.xlu1 %7504, %v8550_v7   ;;  %v674_v55 = vpop.permute.xlu1 %673  ;;  %2857 = vmatpush1.bf16.msra.mxu1 %v7608_v16 }
 0x1fa   : > { %v823_v27 = vmul.f32 %v8739_v31, %v674_v55  ;;  %13331 = vst [vmem:[#allocation3_spill] sm:$0xff] %v8921_v61  ;;  %v1525_v55 = vmul.f32 %v8758_v57, %v1360_v21  ;;  %v8926_v13 = vsub.s32 1, %v8921_v61 }
 0x1fb   : > { %v1722_v23 = vmax.f32 %v1658_v4, 0.0 }
 0x1fc   : > { %13332 = vst [vmem:[#allocation4_spill] sm:$0xff] %v8926_v13 }
 0x1fd   : > { %7505 = vset.pattern.permute.xlu1 %v13327_v47  ;;  %v1771_v3 = vpack.c.bf16 %v1722_v23, %v1721_v44  ;;  %v7611_v44 = vld [vmem:[%s13171_s5 + $0x40] ss:$16 sps:$4 sm:$0xff]   ;;  %v7613_v23 = vld [vmem:[%s13171_s5 + $0x44] ss:$16 sps:$4 sm:$0xff]  }
 0x1fe   : > { %728 = vperm.xlu1 %7505, %v8612_v48   ;;  %v1015_v7 = vpop.permute.xlu1 %1014  ;;  %2858 = vmatprep.subr.bf16.mxu1 %v7613_v23 }
 0x1ff   : > { %2070 = vmatmul.mubr.bf16.gmra.mxu0 %v1771_v3  ;;  %2859 = vmatpush1.bf16.msra.mxu1 %v7611_v44 }
 0x200   : > { %2079 = vmatprep.mubr.bf16.mxu0 %v13327_v47 }
 0x202   : > { %7506 = vset.pattern.permute.xlu1 %v13328_v32 }
 0x203   : > { %1062 = vperm.xlu1 %7506, %v8612_v48   ;;  %v609_v2 = vpop.permute.xlu1 %608  ;;  %v1147_v48 = vmul.f32 %v8748_v11, %v1015_v7 }
 0x204   : > { %v810_v46 = vmul.f32 %v8739_v31, %v609_v2 }
 0x205   : > { %v1211_v42 = vadd.f32 %v1147_v48, %v822_v22  ;;  %v13333_v48 = vld [vmem:[#allocation5_spill] sm:$0xff] }
 0x206   : > { %v1135_v39 = vmul.f32 %v8748_v11, %v13333_v48 }
 0x207   : > { %1066 = vperm.xlu1 %7506, %v8562_v14   ;;  %v614_v59 = vpop.permute.xlu1 %613  ;;  %v1600_v3 = vadd.f32 %v1536_v28, %v1211_v42  ;;  %v1805_v42 = vld [vmem:[%s13170_s4] sm:$0x3] }
 0x208   : > { %v811_v4 = vmul.f32 %v8739_v31, %v614_v59  ;;  %v8929_v59 = vpop.f32.mrf.mxu0  ;;  %v8940_v21 = vrot.slane %v1805_v42, %v8926_v13 }
 0x209   : > { %v1671_v28 = vadd.f32 %v8784_v56, %v1600_v3 }
 0x20a   : > { %v8943_v2 = vpop.f32.mrf.mxu0 }
 0x20b   : > { %7507 = vset.pattern.permute.xlu1 %v13326_v37  ;;  %v1735_v3 = vmax.f32 %v1671_v28, 0.0 }
 0x20c   : > { %1455 = vperm.xlu1 %7507, %v8562_v14   ;;  %v971_v8 = vpop.permute.xlu1 %970  ;;  %v1148_v14 = vmul.f32 %v8748_v11, %v13330_v36  ;;  %v8949_v36 = vsub.s32 0, %v8921_v61 }
 0x20d   : > { %v1136_v54 = vmul.f32 %v8748_v11, %v971_v8 }
 0x20e   : > { %v1212_v16 = vadd.f32 %v1148_v14, %v823_v27  ;;  %13334 = vst [vmem:[#allocation5_spill] sm:$0xff] %v8949_v36  ;;  %v1938_v14 = vadd.f32 %v8753_v60, %v8940_v21  ;;  %v7614_v60 = vld [vmem:[%s13171_s5 + $0x20] ss:$16 sps:$4 sm:$0xff]  }
 0x20f   : > { %v1200_v7 = vadd.f32 %v1136_v54, %v811_v4  ;;  %v1199_v4 = vadd.f32 %v1135_v39, %v810_v46  ;;  %v8956_v46 = vpop.f32.mrf.mxu0  ;;  %v7616_v39 = vld [vmem:[%s13171_s5 + $0x24] ss:$16 sps:$4 sm:$0xff]  }
 0x210   : > { %7508 = vset.pattern.permute.xlu1 %v13327_v47  ;;  %v2253_v28 = vmax.f32 %v1938_v14, 0.0  ;;  %2860 = vmatprep.subr.bf16.mxu1 %v7616_v39 }
 0x211   : > { %738 = vperm.xlu1 %7508, %v8650_v1   ;;  %v1408_v53 = vpop.permute.xlu1 %1407  ;;  %v1589_v8 = vadd.f32 %v1525_v55, %v1200_v7  ;;  %2861 = vmatpush1.bf16.msra.mxu1 %v7614_v60 }
 0x212   : > { %v1537_v22 = vmul.f32 %v8758_v57, %v1408_v53 }
 0x213   : > { %v1660_v7 = vadd.f32 %v8784_v56, %v1589_v8  ;;  %v8967_v8 = vrot.slane %v1805_v42, %v8949_v36  ;;  %v1948_v42 = vadd.f32 %v8801_v19, %v8940_v21 }
 0x214   : > { %v1601_v54 = vadd.f32 %v1537_v22, %v1212_v16  ;;  %v1934_v16 = vadd.f32 %v8729_v38, %v8940_v21 }
 0x215   : > { %7509 = vset.pattern.permute.xlu1 %v13328_v32  ;;  %v1356_v27 = vpop.permute.xlu1 %1355  ;;  %v1724_v38 = vmax.f32 %v1660_v7, 0.0  ;;  %v1932_v7 = vadd.f32 %v8724_v26, %v8967_v8  ;;  %v7619_v26 = vld [vmem:[%s13171_s5 + $0x4] ss:$16 sps:$4 sm:$0xff]  }
 0x216   : > { %v1672_v44 = vadd.f32 %v8784_v56, %v1601_v54  ;;  %v1524_v23 = vmul.f32 %v8758_v57, %v1356_v27  ;;  %1070 = vperm.xlu1 %7509, %v8650_v1   ;;  %v2251_v27 = vmax.f32 %v1934_v16, 0.0  ;;  %2862 = vmatprep.subr.bf16.mxu1 %v7619_v26 }
 0x218   : > { %v1736_v55 = vmax.f32 %v1672_v44, 0.0  ;;  %v1588_v53 = vadd.f32 %v1524_v23, %v1199_v4  ;;  %v1936_v4 = vadd.f32 %v8743_v18, %v8967_v8  ;;  %v8972_v44 = vpop.f32.mrf.mxu0  ;;  %v1412_v18 = vpop.permute.xlu0 %1411 }
 0x219   : > { %v1538_v39 = vmul.f32 %v8758_v57, %v1412_v18  ;;  %v7622_v18 = vld [vmem:[%s13171_s5 + $0x1e4] ss:$16 sps:$4 sm:$0xff]  }
 0x21a   : > { %v1659_v22 = vadd.f32 %v8784_v56, %v1588_v53  ;;  %1074 = vperm.xlu1 %7509, %v8572_v40   ;;  %v679_v1 = vpop.permute.xlu1 %678  ;;  %v1778_v48 = vpack.c.bf16 %v1736_v55, %v1735_v3  ;;  %v8978_v3 = vpack.c.bf16 %v2253_v28, %v2251_v27  ;;  %v1944_v53 = vadd.f32 %v8779_v52, %v8940_v21 }
 0x21b   : > { %v824_v16 = vmul.f32 %v8739_v31, %v679_v1  ;;  %v2252_v19 = vmax.f32 %v1936_v4, 0.0  ;;  %v2250_v1 = vmax.f32 %v1932_v7, 0.0  ;;  %v1946_v27 = vadd.f32 %v8795_v63, %v8967_v8 }
 0x21c   : > { %v1723_v54 = vmax.f32 %v1659_v22, 0.0  ;;  %2140 = vmatmul.mubr.bf16.gmra.mxu1 %v1778_v48  ;;  %v8987_v22 = vpop.f32.mrf.mxu0  ;;  %v2257_v48 = vmax.f32 %v1948_v42, 0.0  ;;  %v2255_v28 = vmax.f32 %v1944_v53, 0.0  ;;  %v1958_v42 = vadd.f32 %v8820_v30, %v8940_v21 }
 0x21d   : > { %2149 = vmatprep.mubr.bf16.mxu1 %v13327_v47  ;;  %v1942_v63 = vadd.f32 %v8767_v20, %v8967_v8  ;;  %v1954_v30 = vadd.f32 %v8811_v62, %v8940_v21 }
 0x21e   : > { %7510 = vset.pattern.permute.xlu1 %v13326_v37  ;;  %v1772_v23 = vpack.c.bf16 %v1724_v38, %v1723_v54  ;;  %v8999_v54 = vpack.c.bf16 %v2252_v19, %v2250_v1  ;;  %v9003_v4 = vpop.f32.mrf.mxu0  ;;  %v9009_v7 = vpack.c.bf16 %v2257_v48, %v2255_v28  ;;  %v2261_v20 = vmax.f32 %v1958_v42, 0.0  ;;  %v7625_v28 = vld [vmem:[%s13171_s5 + $0x1c4] ss:$16 sps:$4 sm:$0xff]  }
 0x21f   : > { %1463 = vperm.xlu1 %7510, %v8572_v40   ;;  %v1023_v14 = vpop.permute.xlu1 %1022  ;;  %v7617_v40 = vld [vmem:[%s13171_s5] ss:$16 sps:$4 sm:$0xff]  }
 0x220   : > { %v1149_v55 = vmul.f32 %v8748_v11, %v1023_v14  ;;  %2080 = vmatmul.mubr.bf16.gmra.mxu0 %v1772_v23  ;;  %2863 = vmatpush1.bf16.msra.mxu1 %v7617_v40  ;;  %v825_v23 = vmul.f32 %v8739_v31, %v8483_v50  ;;  %v9019_v53 = vpop.f32.mrf.mxu0  ;;  %v2256_v40 = vmax.f32 %v1946_v27, 0.0  ;;  %v1956_v27 = vadd.f32 %v8814_v29, %v8967_v8 }
 0x221   : > { %3233 = vmatprep.mubr.bf16.mxu0 %v8978_v3  ;;  %2864 = vmatprep.subr.bf16.mxu1 %v7622_v18  ;;  %v1952_v18 = vadd.f32 %v8806_v15, %v8967_v8 }
 0x222   : > { %v1213_v60 = vadd.f32 %v1149_v55, %v824_v16  ;;  %v7620_v55 = vld [vmem:[%s13171_s5 + $0x1e0] ss:$16 sps:$4 sm:$0xff]  }
 0x223   : > { %7511 = vset.pattern.permute.xlu1 %v13327_v47  ;;  %v1027_v52 = vpop.permute.xlu1 %1026 }
 0x224   : > { %748 = vperm.xlu1 %7511, %v8696_v0   ;;  %v1150_v38 = vmul.f32 %v8748_v11, %v1027_v52  ;;  %v1602_v14 = vadd.f32 %v1538_v39, %v1213_v60  ;;  %2865 = vmatpush2.bf16.msra.mxu1 %v7620_v55  ;;  %v2254_v60 = vmax.f32 %v1942_v63, 0.0  ;;  %v9029_v39 = vpop.f32.mrf.mxu0  ;;  %v2259_v52 = vmax.f32 %v1954_v30, 0.0 }
 0x225   : > { %2866 = vmatprep.subr.bf16.mxu1 %v7625_v28  ;;  %v2260_v30 = vmax.f32 %v1956_v27, 0.0 }
 0x226   : > { %v1214_v16 = vadd.f32 %v1150_v38, %v825_v23  ;;  %v1673_v26 = vadd.f32 %v8784_v56, %v1602_v14  ;;  %v9039_v38 = vpack.c.bf16 %v2256_v40, %v2254_v60  ;;  %v1968_v23 = vadd.f32 %v8860_v17, %v8940_v21  ;;  %v9049_v63 = vpop.f32.mrf.mxu0  ;;  %v1420_v17 = vpop.permute.xlu0 %1419 }
 0x227   : > { %v9045_v14 = vpack.c.bf16 %v2261_v20, %v2259_v52  ;;  %v2258_v40 = vmax.f32 %v1952_v18, 0.0  ;;  %v1540_v60 = vmul.f32 %v8758_v57, %v1420_v17  ;;  %v1974_v18 = vadd.f32 %v8876_v45, %v8940_v21 }
 0x228   : > { %7513 = vset.pattern.permute.xlu1 %v13328_v32  ;;  %3234 = vmatmul.mubr.bf16.vlgmr.msra.gmra.mxu0 %v8999_v54  ;;  %v1416_v50 = vpop.permute.xlu1 %1415  ;;  %v1737_v55 = vmax.f32 %v1673_v26, 0.0  ;;  %v9058_v20 = vpop.f32.mrf.mxu0 }
 0x229   : > { %v1539_v19 = vmul.f32 %v8758_v57, %v1416_v50  ;;  %1078 = vperm.xlu1 %7513, %v8696_v0   ;;  %3243 = vmatprep.mubr.bf16.mxu0 %v9009_v7  ;;  %v7623_v0 = vld [vmem:[%s13171_s5 + $0x1c0] ss:$16 sps:$4 sm:$0xff]   ;;  %v1964_v50 = vadd.f32 %v8841_v58, %v8940_v21 }
 0x22a   : > { %2867 = vmatpush2.bf16.msra.mxu1 %v7623_v0  ;;  %v7626_v58 = vld [vmem:[%s13171_s5 + $0x1a0] ss:$16 sps:$4 sm:$0xff]   ;;  %v9069_v52 = vpop.permute.xlu0 %1427  ;;  %v9075_v0 = vpop.f32.mrf.mxu0 }
 0x22b   : > { %v1603_v48 = vadd.f32 %v1539_v19, %v1214_v16  ;;  %v2265_v19 = vmax.f32 %v1968_v23, 0.0  ;;  %v1978_v23 = vadd.f32 %v8890_v35, %v8940_v21  ;;  %v827_v35 = vmul.f32 %v8739_v31, %v8493_v34 }
 0x22c   : > { %v1976_v34 = vadd.f32 %v8880_v49, %v8967_v8 }
 0x22d   : > { %v1674_v62 = vadd.f32 %v8784_v56, %v1603_v48  ;;  %1082 = vperm.xlu1 %7513, %v8590_v51   ;;  %v689_v1 = vpop.permute.xlu1 %688  ;;  %v2263_v48 = vmax.f32 %v1964_v50, 0.0 }
 0x22e   : > { %v826_v26 = vmul.f32 %v8739_v31, %v689_v1  ;;  %v1966_v1 = vadd.f32 %v8855_v5, %v8967_v8  ;;  %v9097_v45 = vpop.permute.xlu0 %1435 }
 0x22f   : > { %v1738_v42 = vmax.f32 %v1674_v62, 0.0  ;;  %v9071_v62 = vpack.c.bf16 %v2260_v30, %v2258_v40  ;;  %v2269_v30 = vmax.f32 %v1978_v23, 0.0  ;;  %v2267_v40 = vmax.f32 %v1974_v18, 0.0 }
 0x230   : > { %3244 = vmatmul.mubr.bf16.gmra.mxu0 %v9039_v38  ;;  %v2264_v50 = vmax.f32 %v1966_v1, 0.0  ;;  %v1984_v23 = vadd.f32 %v8908_v10, %v8940_v21 }
 0x231   : > { %7514 = vset.pattern.permute.xlu1 %v13326_v37  ;;  %3253 = vmatprep.mubr.bf16.mxu0 %v9045_v14  ;;  %v1779_v29 = vpack.c.bf16 %v1738_v42, %v1737_v55  ;;  %v9081_v42 = vpack.c.bf16 %v2265_v19, %v2263_v48  ;;  %v1962_v55 = vadd.f32 %v8831_v41, %v8967_v8 }
 0x232   : > { %1471 = vperm.xlu1 %7514, %v8590_v51   ;;  %v1031_v16 = vpop.permute.xlu1 %1030  ;;  %v7628_v51 = vld [vmem:[%s13171_s5 + $0x1a4] ss:$16 sps:$4 sm:$0xff]   ;;  %v9108_v1 = vpack.c.bf16 %v2269_v30, %v2267_v40  ;;  %v9126_v18 = vpop.permute.xlu0 %1443 }
 0x233   : > { %v1151_v15 = vmul.f32 %v8748_v11, %v1031_v16  ;;  %2150 = vmatmul.mubr.bf16.gmra.mxu1 %v1779_v29  ;;  %2868 = vmatprep.subr.bf16.mxu1 %v7628_v51  ;;  %v9092_v29 = vpop.f32.mrf.mxu0  ;;  %v2262_v16 = vmax.f32 %v1962_v55, 0.0 }
 0x234   : > { %2159 = vmatprep.mubr.bf16.mxu1 %v13327_v47  ;;  %2869 = vmatpush2.bf16.msra.mxu1 %v7626_v58 }
 0x235   : > { %v1215_v28 = vadd.f32 %v1151_v15, %v826_v26  ;;  %v9099_v26 = vpack.c.bf16 %v2264_v50, %v2262_v16  ;;  %v9103_v58 = vpop.f32.mrf.mxu0  ;;  %v2271_v16 = vmax.f32 %v1984_v23, 0.0 }
 0x236   : > { %7515 = vset.pattern.permute.xlu1 %v13327_v47  ;;  %v1035_v27 = vpop.permute.xlu1 %1034 }
 0x237   : > { %758 = vperm.xlu1 %7515, %v8720_v43   ;;  %v1152_v5 = vmul.f32 %v8748_v11, %v1035_v27  ;;  %v1604_v17 = vadd.f32 %v1540_v60, %v1215_v28  ;;  %v1988_v60 = vadd.f32 %v8943_v2, %v8940_v21  ;;  %v7629_v27 = vld [vmem:[%s13171_s5 + $0x180] ss:$16 sps:$4 sm:$0xff]   ;;  %v7631_v2 = vld [vmem:[%s13171_s5 + $0x184] ss:$16 sps:$4 sm:$0xff]   ;;  %v9124_v55 = vpop.f32.mrf.mxu0 }
 0x238   : > { %3254 = vmatmul.mubr.bf16.gmra.mxu0 %v9071_v62  ;;  %2870 = vmatprep.subr.bf16.mxu1 %v7631_v2 }
 0x239   : > { %3263 = vmatprep.mubr.bf16.mxu0 %v9081_v42  ;;  %v1216_v19 = vadd.f32 %v1152_v5, %v827_v35  ;;  %v1675_v51 = vadd.f32 %v8784_v56, %v1604_v17  ;;  %v2273_v50 = vmax.f32 %v1988_v60, 0.0  ;;  %2871 = vmatpush2.bf16.msra.mxu1 %v7629_v27  ;;  %v9128_v30 = vpop.f32.mrf.mxu0  ;;  %v1542_v27 = vmul.f32 %v8758_v57, %v9069_v52 }
 0x23b   : > { %7516 = vset.pattern.permute.xlu1 %v13328_v32  ;;  %v1424_v41 = vpop.permute.xlu1 %1423  ;;  %v1739_v35 = vmax.f32 %v1675_v51, 0.0  ;;  %v9139_v51 = vpack.c.bf16 %v2273_v50, %v2271_v16 }
 0x23c   : > { %v1541_v15 = vmul.f32 %v8758_v57, %v1424_v41  ;;  %1086 = vperm.xlu1 %7516, %v8720_v43   ;;  %v1972_v43 = vadd.f32 %v8867_v33, %v8967_v8  ;;  %v2268_v33 = vmax.f32 %v1976_v34, 0.0  ;;  %v1998_v34 = vadd.f32 %v9003_v4, %v8940_v21  ;;  %v7634_v4 = vld [vmem:[%s13171_s5 + $0x164] ss:$16 sps:$4 sm:$0xff]  }
 0x23d   : > { %2872 = vmatprep.subr.bf16.mxu1 %v7634_v4 }
 0x23e   : > { %v1605_v48 = vadd.f32 %v1541_v15, %v1216_v19  ;;  %v2266_v17 = vmax.f32 %v1972_v43, 0.0  ;;  %v1986_v15 = vadd.f32 %v8929_v59, %v8967_v8  ;;  %v704_v59 = vpop.permute.xlu0 %703  ;;  %v7632_v43 = vld [vmem:[%s13171_s5 + $0x160] ss:$16 sps:$4 sm:$0xff]   ;;  %v2277_v23 = vmax.f32 %v1998_v34, 0.0 }
 0x23f   : > { %2873 = vmatpush2.bf16.msra.mxu1 %v7632_v43 }
 0x240   : > { %v1676_v28 = vadd.f32 %v8784_v56, %v1605_v48  ;;  %1090 = vperm.xlu1 %7516, %v8733_v12   ;;  %3264 = vmatmul.mubr.bf16.gmra.mxu0 %v9099_v26  ;;  %v699_v49 = vpop.permute.xlu1 %698  ;;  %v9132_v19 = vpack.c.bf16 %v2268_v33, %v2266_v17  ;;  %v1982_v48 = vadd.f32 %v8902_v25, %v8967_v8 }
 0x241   : > { %3273 = vmatprep.mubr.bf16.mxu0 %v9108_v1  ;;  %v828_v60 = vmul.f32 %v8739_v31, %v699_v49  ;;  %v2272_v49 = vmax.f32 %v1986_v15, 0.0  ;;  %v829_v33 = vmul.f32 %v8739_v31, %v704_v59 }
 0x242   : > { %v1740_v5 = vmax.f32 %v1676_v28, 0.0  ;;  %v1994_v28 = vadd.f32 %v8972_v44, %v8940_v21  ;;  %v2270_v44 = vmax.f32 %v1982_v48, 0.0  ;;  %v1992_v48 = vadd.f32 %v8956_v46, %v8967_v8 }
 0x244   : > { %7518 = vset.pattern.permute.xlu1 %v13326_v37  ;;  %v1780_v41 = vpack.c.bf16 %v1740_v5, %v1739_v35  ;;  %v2275_v50 = vmax.f32 %v1994_v28, 0.0  ;;  %v9165_v17 = vpack.c.bf16 %v2272_v49, %v2270_v44  ;;  %v7635_v28 = vld [vmem:[%s13171_s5 + $0x140] ss:$16 sps:$4 sm:$0xff]   ;;  %v2018_v44 = vadd.f32 %v9124_v55, %v8940_v21 }
 0x245   : > { %1479 = vperm.xlu1 %7518, %v8733_v12   ;;  %v1039_v10 = vpop.permute.xlu1 %1038  ;;  %v9144_v12 = vpop.f32.mrf.mxu0 }
 0x246   : > { %v1153_v40 = vmul.f32 %v8748_v11, %v1039_v10  ;;  %2160 = vmatmul.mubr.bf16.gmra.mxu1 %v1780_v41  ;;  %v1996_v41 = vadd.f32 %v8987_v22, %v8967_v8  ;;  %v2008_v10 = vadd.f32 %v9058_v20, %v8940_v21  ;;  %v9174_v34 = vpack.c.bf16 %v2277_v23, %v2275_v50 }
 0x247   : > { %2169 = vmatprep.mubr.bf16.mxu1 %v13327_v47  ;;  %v9163_v35 = vpop.f32.mrf.mxu0  ;;  %v2006_v23 = vadd.f32 %v9049_v63, %v8967_v8 }
 0x248   : > { %3274 = vmatmul.mubr.bf16.gmra.mxu0 %v9132_v19  ;;  %v1217_v2 = vadd.f32 %v1153_v40, %v828_v60  ;;  %v2276_v20 = vmax.f32 %v1996_v41, 0.0  ;;  %v2002_v41 = vadd.f32 %v9019_v53, %v8967_v8  ;;  %v7640_v53 = vld [vmem:[%s13171_s5 + $0x124] ss:$16 sps:$4 sm:$0xff]  }
 0x249   : > { %7519 = vset.pattern.permute.xlu1 %v13327_v47  ;;  %3283 = vmatprep.mubr.bf16.mxu0 %v9139_v51  ;;  %v1043_v25 = vpop.permute.xlu1 %1042  ;;  %v2027_v60 = vpop.f32.mrf.mxu0 }
 0x24a   : > { %768 = vperm.xlu1 %7519, %v8791_v9   ;;  %v1154_v5 = vmul.f32 %v8748_v11, %v1043_v25  ;;  %v1606_v52 = vadd.f32 %v1542_v27, %v1217_v2  ;;  %v2274_v25 = vmax.f32 %v1992_v48, 0.0  ;;  %v2278_v48 = vmax.f32 %v2002_v41, 0.0 }
 0x24b   : > { %v9182_v59 = vpop.f32.mrf.mxu0 }
 0x24c   : > { %v1218_v15 = vadd.f32 %v1154_v5, %v829_v33  ;;  %v1677_v43 = vadd.f32 %v8784_v56, %v1606_v52  ;;  %v9193_v2 = vpack.c.bf16 %v2276_v20, %v2274_v25  ;;  %v2028_v25 = vadd.f32 %v2027_v60, %v8940_v21 }
 0x24d   : > { %v9197_v33 = vpop.f32.mrf.mxu0 }
 0x24e   : > { %7520 = vset.pattern.permute.xlu1 %v13328_v32  ;;  %v1432_v16 = vpop.permute.xlu1 %1431  ;;  %v2004_v32 = vadd.f32 %v9029_v39, %v8940_v21  ;;  %v7637_v39 = vld [vmem:[%s13171_s5 + $0x144] ss:$16 sps:$4 sm:$0xff]   ;;  %v1741_v5 = vmax.f32 %v1677_v43, 0.0 }
 0x24f   : > { %v1543_v40 = vmul.f32 %v8758_v57, %v1432_v16  ;;  %1094 = vperm.xlu1 %7520, %v8791_v9   ;;  %v2281_v9 = vmax.f32 %v2008_v10, 0.0  ;;  %2874 = vmatprep.subr.bf16.mxu1 %v7637_v39  ;;  %v2014_v16 = vadd.f32 %v9092_v29, %v8940_v21  ;;  %v2280_v10 = vmax.f32 %v2006_v23, 0.0  ;;  %v9211_v55 = vpop.f32.mrf.mxu0  ;;  %v714_v29 = vpop.permute.xlu0 %713 }
 0x250   : > { %3284 = vmatmul.mubr.bf16.gmra.mxu0 %v9165_v17  ;;  %v2279_v49 = vmax.f32 %v2004_v32, 0.0  ;;  %2875 = vmatpush2.bf16.msra.mxu1 %v7635_v28  ;;  %v1544_v32 = vmul.f32 %v8758_v57, %v9097_v45  ;;  %v831_v28 = vmul.f32 %v8739_v31, %v714_v29  ;;  %v7641_v45 = vld [vmem:[%s13171_s5 + $0x100] ss:$16 sps:$4 sm:$0xff]  }
 0x251   : > { %v1607_v22 = vadd.f32 %v1543_v40, %v1218_v15  ;;  %3293 = vmatprep.mubr.bf16.mxu0 %v9174_v34  ;;  %v2285_v40 = vmax.f32 %v2018_v44, 0.0  ;;  %2876 = vmatprep.subr.bf16.mxu1 %v7640_v53  ;;  %v2283_v43 = vmax.f32 %v2014_v16, 0.0 }
 0x252   : > { %v9202_v50 = vpack.c.bf16 %v2281_v9, %v2279_v49  ;;  %v9224_v9 = vpack.c.bf16 %v2280_v10, %v2278_v48  ;;  %v2022_v48 = vadd.f32 %v9128_v30, %v8967_v8 }
 0x253   : > { %v1678_v4 = vadd.f32 %v8784_v56, %v1607_v22  ;;  %1098 = vperm.xlu1 %7520, %v8772_v24   ;;  %v709_v46 = vpop.permute.xlu1 %708  ;;  %v9231_v49 = vpack.c.bf16 %v2285_v40, %v2283_v43  ;;  %v724_v40 = vpop.permute.xlu0 %723  ;;  %v2034_v43 = vadd.f32 %v9197_v33, %v8940_v21 }
 0x254   : > { %v2286_v33 = vmax.f32 %v2022_v48, 0.0 }
 0x255   : > { %v1742_v27 = vmax.f32 %v1678_v4, 0.0  ;;  %v2016_v4 = vadd.f32 %v9103_v58, %v8967_v8  ;;  %v2012_v58 = vadd.f32 %v9075_v0, %v8967_v8 }
 0x257   : > { %7522 = vset.pattern.permute.xlu1 %v13326_v37  ;;  %v1781_v63 = vpack.c.bf16 %v1742_v27, %v1741_v5  ;;  %v830_v37 = vmul.f32 %v8739_v31, %v709_v46  ;;  %v2037_v46 = vpop.f32.mrf.mxu0  ;;  %v7643_v27 = vld [vmem:[%s13171_s5 + $0x104] ss:$16 sps:$4 sm:$0xff]   ;;  %v2284_v5 = vmax.f32 %v2016_v4, 0.0 }
 0x258   : > { %1487 = vperm.xlu1 %7522, %v8772_v24   ;;  %3294 = vmatmul.mubr.bf16.gmra.mxu0 %v9193_v2  ;;  %v1047_v52 = vpop.permute.xlu1 %1046  ;;  %v7638_v24 = vld [vmem:[%s13171_s5 + $0x120] ss:$16 sps:$4 sm:$0xff]   ;;  %v2038_v29 = vadd.f32 %v2037_v46, %v8940_v21  ;;  %v7649_v46 = vld [vmem:[%s13173_s7 + $0x2e4] ss:$16 sps:$4 sm:$0xff]  }
 0x259   : > { %3303 = vmatprep.mubr.bf16.mxu0 %v9202_v50  ;;  %v1155_v15 = vmul.f32 %v8748_v11, %v1047_v52  ;;  %2170 = vmatmul.mubr.bf16.gmra.mxu1 %v1781_v63  ;;  %v9241_v23 = vpop.f32.mrf.mxu0  ;;  %v2289_v52 = vmax.f32 %v2028_v25, 0.0  ;;  %v2282_v63 = vmax.f32 %v2012_v58, 0.0  ;;  %v9278_v58 = vpop.permute.xlu0 %733 }
 0x25a   : > { %2179 = vmatprep.mubr.bf16.mxu1 %v13327_v47  ;;  %2877 = vmatpush2.bf16.msra.mxu1 %v7638_v24 }
 0x25b   : > { %v1219_v22 = vadd.f32 %v1155_v15, %v830_v37  ;;  %2878 = vmatprep.subr.bf16.mxu1 %v7643_v27  ;;  %v2043_v0 = vpop.f32.mrf.mxu0  ;;  %v9249_v15 = vpack.c.bf16 %v2284_v5, %v2282_v63  ;;  %5081 = vmatprep.subr.bf16.mxu0 %v7649_v46  ;;  %v9319_v46 = vld [vmem:[%s13168_s2] ss:$0 sm:$0xff] }
 0x25c   : > { %v1051_v20 = vpop.permute.xlu1 %1050 }
 0x25d   : > { %v1156_v39 = vmul.f32 %v8748_v11, %v1051_v20  ;;  %v1608_v31 = vadd.f32 %v1544_v32, %v1219_v22  ;;  %v2024_v11 = vadd.f32 %v9144_v12, %v8940_v21  ;;  %v2026_v12 = vadd.f32 %v9163_v35, %v8967_v8  ;;  %v2045_v32 = vpop.f32.mrf.mxu0  ;;  %v7647_v35 = vld [vmem:[%s13173_s7 + $0x2e0] ss:$16 sps:$4 sm:$0xff]  }
 0x25e   : > { %2879 = vmatpush2.bf16.msra.mxu1 %v7641_v45  ;;  %v9275_v45 = vld [vmem:[%s13167_s1 + $0x1] ss:$0 sm:$0xff]  ;;  %5082 = vmatpush1.bf16.msra.mxu0 %v7647_v35 }
 0x25f   : > { %v1220_v44 = vadd.f32 %v1156_v39, %v831_v28  ;;  %v1679_v10 = vadd.f32 %v8784_v56, %v1608_v31  ;;  %v2287_v37 = vmax.f32 %v2024_v11, 0.0  ;;  %v2288_v4 = vmax.f32 %v2026_v12, 0.0  ;;  %v2047_v25 = vpop.f32.mrf.mxu0  ;;  %v9283_v11 = vld [vmem:[%s13167_s1] ss:$0 sm:$0xff] }
 0x260   : > { %3304 = vmatmul.mubr.bf16.gmra.mxu0 %v9224_v9  ;;  %v2293_v28 = vmax.f32 %v2038_v29, 0.0  ;;  %v2291_v31 = vmax.f32 %v2034_v43, 0.0 }
 0x261   : > { %3313 = vmatprep.mubr.bf16.mxu0 %v9231_v49  ;;  %v1440_v60 = vpop.permute.xlu1 %1439  ;;  %v1743_v20 = vmax.f32 %v1679_v10, 0.0  ;;  %v9287_v5 = vpack.c.bf16 %v2288_v4, %v2286_v33  ;;  %v2032_v10 = vadd.f32 %v9182_v59, %v8967_v8  ;;  %v9308_v59 = vpop.permute.xlu0 %743 }
 0x262   : > { %v1545_v41 = vmul.f32 %v8758_v57, %v1440_v60  ;;  %v9255_v57 = vpack.c.bf16 %v2289_v52, %v2287_v37  ;;  %v9300_v37 = vld [vmem:[%s13167_s1 + $0x2] ss:$0 sm:$0xff] }
 0x263   : > { %v1546_v12 = vmul.f32 %v9300_v37, %v9126_v18 }
 0x264   : > { %v1609_v16 = vadd.f32 %v1545_v41, %v1220_v44  ;;  %v2036_v44 = vadd.f32 %v9211_v55, %v8967_v8  ;;  %v2048_v41 = vadd.f32 %v2047_v25, %v8940_v21  ;;  %v2044_v55 = vadd.f32 %v2043_v0, %v8940_v21 }
 0x265   : > { %v2046_v0 = vadd.f32 %v2045_v32, %v8967_v8  ;;  %v9325_v33 = vpop.permute.xlu0 %753 }
 0x266   : > { %v1680_v24 = vadd.f32 %v8784_v56, %v1609_v16  ;;  %v719_v53 = vpop.permute.xlu1 %718  ;;  %v7646_v56 = vld [vmem:[%s13173_s7 + $0xe4] ss:$16 sps:$4 sm:$0xff]   ;;  %v9292_v16 = vpack.c.bf16 %v2293_v28, %v2291_v31  ;;  %v2292_v29 = vmax.f32 %v2036_v44, 0.0  ;;  %v2297_v48 = vmax.f32 %v2048_v41, 0.0 }
 0x267   : > { %4728 = vmatprep.subr.bf16.mxu1 %v7646_v56  ;;  %v832_v60 = vmul.f32 %v9283_v11, %v719_v53  ;;  %v2295_v56 = vmax.f32 %v2044_v55, 0.0  ;;  %v2296_v31 = vmax.f32 %v2046_v0, 0.0 }
 0x268   : > { %v1744_v22 = vmax.f32 %v1680_v24, 0.0  ;;  %3314 = vmatmul.mubr.bf16.gmra.mxu0 %v9249_v15  ;;  %v833_v24 = vmul.f32 %v9283_v11, %v724_v40 }
 0x269   : > { %3323 = vmatprep.mubr.bf16.mxu0 %v9255_v57 }
 0x26a   : > { %v1782_v30 = vpack.c.bf16 %v1744_v22, %v1743_v20  ;;  %v2290_v20 = vmax.f32 %v2032_v10, 0.0 }
 0x26b   : > { %v1055_v39 = vpop.permute.xlu1 %1054 }
 0x26c   : > { %v1157_v27 = vmul.f32 %v9275_v45, %v1055_v39  ;;  %2180 = vmatmul.mubr.bf16.gmra.mxu1 %v1782_v30  ;;  %v9311_v18 = vpack.c.bf16 %v2292_v29, %v2290_v20  ;;  %v9314_v30 = vpack.c.bf16 %v2297_v48, %v2295_v56  ;;  %v2042_v39 = vadd.f32 %v9241_v23, %v8967_v8  ;;  %v7655_v23 = vld [vmem:[%s13173_s7 + $0x2c4] ss:$16 sps:$4 sm:$0xff]   ;;  %v1452_v48 = vpop.permute.xlu0 %1451 }
 0x26d   : > { %2189 = vmatprep.mubr.bf16.mxu1 %v13327_v47  ;;  %5083 = vmatprep.subr.bf16.mxu0 %v7655_v23 }
 0x26e   : > { %v1221_v52 = vadd.f32 %v1157_v27, %v832_v60 }
 0x26f   : > { %v1059_v63 = vpop.permute.xlu1 %1058 }
 0x270   : > { %3324 = vmatmul.mubr.bf16.gmra.mxu0 %v9287_v5  ;;  %v1158_v53 = vmul.f32 %v9275_v45, %v1059_v63  ;;  %v1610_v22 = vadd.f32 %v1546_v12, %v1221_v52  ;;  %v2294_v52 = vmax.f32 %v2042_v39, 0.0  ;;  %v7653_v63 = vld [vmem:[%s13173_s7 + $0x2c0] ss:$16 sps:$4 sm:$0xff]  }
 0x271   : > { %3333 = vmatprep.mubr.bf16.mxu0 %v9292_v16  ;;  %5084 = vmatpush1.bf16.msra.mxu0 %v7653_v63 }
 0x272   : > { %v1222_v35 = vadd.f32 %v1158_v53, %v833_v24  ;;  %v1681_v28 = vadd.f32 %v9319_v46, %v1610_v22  ;;  %v9335_v55 = vpack.c.bf16 %v2296_v31, %v2294_v52  ;;  %v835_v31 = vmul.f32 %v9283_v11, %v9278_v58  ;;  %v7659_v58 = vld [vmem:[%s13173_s7 + $0x2a0] ss:$16 sps:$4 sm:$0xff]  }
 0x274   : > { %v1448_v43 = vpop.permute.xlu1 %1447  ;;  %v1745_v41 = vmax.f32 %v1681_v28, 0.0 }
 0x275   : > { %v1547_v4 = vmul.f32 %v9300_v37, %v1448_v43 }
 0x277   : > { %v1611_v40 = vadd.f32 %v1547_v4, %v1222_v35  ;;  %v1548_v4 = vmul.f32 %v9300_v37, %v1452_v48 }
 0x278   : > { %3334 = vmatmul.mubr.bf16.gmra.mxu0 %v9311_v18 }
 0x279   : > { %v1682_v25 = vadd.f32 %v9319_v46, %v1611_v40  ;;  %v2051_v32 = vpop.f32.mrf.mxu0  ;;  %3343 = vmatprep.mubr.bf16.mxu0 %v9314_v30  ;;  %v729_v27 = vpop.permute.xlu1 %728 }
 0x27a   : > { %v2052_v43 = vadd.f32 %v2051_v32, %v8967_v8  ;;  %v834_v56 = vmul.f32 %v9283_v11, %v729_v27 }
 0x27b   : > { %v1746_v60 = vmax.f32 %v1682_v25, 0.0  ;;  %v2053_v44 = vpop.f32.mrf.mxu0 }
 0x27c   : > { %v2054_v24 = vadd.f32 %v2053_v44, %v8940_v21 }
 0x27d   : > { %v2055_v10 = vpop.f32.mrf.mxu0  ;;  %v1783_v12 = vpack.c.bf16 %v1746_v60, %v1745_v41  ;;  %v2298_v60 = vmax.f32 %v2052_v43, 0.0 }
 0x27e   : > { %v2056_v53 = vadd.f32 %v2055_v10, %v8967_v8  ;;  %v1063_v29 = vpop.permute.xlu1 %1062  ;;  %v2299_v0 = vmax.f32 %v2054_v24, 0.0  ;;  %v7661_v24 = vld [vmem:[%s13173_s7 + $0x2a4] ss:$16 sps:$4 sm:$0xff]  }
 0x27f   : > { %v1159_v22 = vmul.f32 %v9275_v45, %v1063_v29  ;;  %v2057_v20 = vpop.f32.mrf.mxu0  ;;  %2190 = vmatmul.mubr.bf16.gmra.mxu1 %v1783_v12  ;;  %5085 = vmatprep.subr.bf16.mxu0 %v7661_v24 }
 0x280   : > { %v2058_v35 = vadd.f32 %v2057_v20, %v8940_v21  ;;  %3344 = vmatmul.mubr.bf16.gmra.mxu0 %v9335_v55  ;;  %2199 = vmatprep.mubr.bf16.mxu1 %v13327_v47  ;;  %v2300_v40 = vmax.f32 %v2056_v53, 0.0 }
 0x281   : > { %v1223_v28 = vadd.f32 %v1159_v22, %v834_v56  ;;  %5086 = vmatpush1.bf16.msra.mxu0 %v7659_v58 }
 0x282   : > { %v2301_v39 = vmax.f32 %v2058_v35, 0.0  ;;  %v1067_v25 = vpop.permute.xlu1 %1066  ;;  %v9351_v44 = vpack.c.bf16 %v2300_v40, %v2298_v60  ;;  %v1460_v35 = vpop.permute.xlu0 %1459 }
 0x283   : > { %v1160_v32 = vmul.f32 %v9275_v45, %v1067_v25  ;;  %v1612_v41 = vadd.f32 %v1548_v4, %v1223_v28  ;;  %v1550_v28 = vmul.f32 %v9300_v37, %v1460_v35 }
 0x284   : > { %v9349_v27 = vpack.c.bf16 %v2301_v39, %v2299_v0  ;;  %v837_v39 = vmul.f32 %v9283_v11, %v9308_v59 }
 0x285   : > { %v1224_v63 = vadd.f32 %v1160_v32, %v835_v31  ;;  %v1683_v10 = vadd.f32 %v9319_v46, %v1612_v41  ;;  %v7665_v32 = vld [vmem:[%s13173_s7 + $0x280] ss:$16 sps:$4 sm:$0xff]   ;;  %v7667_v41 = vld [vmem:[%s13173_s7 + $0x284] ss:$16 sps:$4 sm:$0xff]  }
 0x286   : > { %3353 = vmatprep.mubr.bf16.mxu0 %v9349_v27  ;;  %5087 = vmatprep.subr.bf16.mxu0 %v7667_v41 }
 0x287   : > { %v1456_v52 = vpop.permute.xlu1 %1455  ;;  %v1747_v48 = vmax.f32 %v1683_v10, 0.0  ;;  %5088 = vmatpush1.bf16.msra.mxu0 %v7665_v32  ;;  %v1468_v32 = vpop.permute.xlu0 %1467 }
 0x288   : > { %v1549_v23 = vmul.f32 %v9300_v37, %v1456_v52  ;;  %3354 = vmatmul.mubr.bf16.gmra.mxu0 %v9351_v44 }
 0x28a   : > { %v1613_v12 = vadd.f32 %v1549_v23, %v1224_v63 }
 0x28c   : > { %v1684_v53 = vadd.f32 %v9319_v46, %v1613_v12  ;;  %v739_v29 = vpop.permute.xlu1 %738 }
 0x28d   : > { %v836_v4 = vmul.f32 %v9283_v11, %v739_v29 }
 0x28e   : > { %v1748_v22 = vmax.f32 %v1684_v53, 0.0 }
 0x290   : > { %v1784_v20 = vpack.c.bf16 %v1748_v22, %v1747_v48 }
 0x291   : > { %v1071_v43 = vpop.permute.xlu1 %1070 }
 0x292   : > { %v1161_v56 = vmul.f32 %v9275_v45, %v1071_v43  ;;  %2200 = vmatmul.mubr.bf16.gmra.mxu1 %v1784_v20 }
 0x293   : > { %2209 = vmatprep.mubr.bf16.mxu1 %v13327_v47 }
 0x294   : > { %v1225_v40 = vadd.f32 %v1161_v56, %v836_v4 }
 0x295   : > { %v1075_v0 = vpop.permute.xlu1 %1074 }
 0x296   : > { %v1162_v25 = vmul.f32 %v9275_v45, %v1075_v0  ;;  %v1614_v31 = vadd.f32 %v1550_v28, %v1225_v40 }
 0x298   : > { %v1226_v63 = vadd.f32 %v1162_v25, %v837_v39  ;;  %v1685_v59 = vadd.f32 %v9319_v46, %v1614_v31 }
 0x29a   : > { %v2061_v60 = vpop.f32.mrf.mxu0  ;;  %v1464_v52 = vpop.permute.xlu1 %1463  ;;  %v1749_v56 = vmax.f32 %v1685_v59, 0.0  ;;  %v7671_v59 = vld [vmem:[%s13173_s7 + $0x260] ss:$16 sps:$4 sm:$0xff]  }
 0x29b   : > { %v1551_v23 = vmul.f32 %v9300_v37, %v1464_v52  ;;  %v2062_v48 = vadd.f32 %v2061_v60, %v8967_v8 }
 0x29c   : > { %v2063_v58 = vpop.f32.mrf.mxu0 }
 0x29d   : > { %v1615_v10 = vadd.f32 %v1551_v23, %v1226_v63  ;;  %v2064_v24 = vadd.f32 %v2063_v58, %v8940_v21  ;;  %v2302_v28 = vmax.f32 %v2062_v48, 0.0  ;;  %v1552_v23 = vmul.f32 %v9300_v37, %v1468_v32 }
 0x29e   : > { %v2065_v12 = vpop.f32.mrf.mxu0 }
 0x29f   : > { %v2066_v53 = vadd.f32 %v2065_v12, %v8967_v8  ;;  %v749_v29 = vpop.permute.xlu1 %748  ;;  %v1686_v22 = vadd.f32 %v9319_v46, %v1615_v10  ;;  %v2303_v0 = vmax.f32 %v2064_v24, 0.0  ;;  %v9397_v10 = vpop.f32.mrf.mxu1  ;;  %v7673_v24 = vld [vmem:[%s13173_s7 + $0x264] ss:$16 sps:$4 sm:$0xff]  }
 0x2a0   : > { %v2067_v20 = vpop.f32.mrf.mxu0  ;;  %v838_v60 = vmul.f32 %v9283_v11, %v749_v29  ;;  %5089 = vmatprep.subr.bf16.mxu0 %v7673_v24 }
 0x2a1   : > { %v2068_v43 = vadd.f32 %v2067_v20, %v8940_v21  ;;  %v1750_v35 = vmax.f32 %v1686_v22, 0.0  ;;  %v2304_v4 = vmax.f32 %v2066_v53, 0.0  ;;  %v839_v53 = vmul.f32 %v9283_v11, %v9325_v33  ;;  %5090 = vmatpush1.bf16.msra.mxu0 %v7671_v59  ;;  %v9405_v22 = vpop.f32.mrf.mxu1 }
 0x2a3   : > { %v2305_v40 = vmax.f32 %v2068_v43, 0.0  ;;  %v1785_v25 = vpack.c.bf16 %v1750_v35, %v1749_v56  ;;  %v9387_v52 = vpack.c.bf16 %v2304_v4, %v2302_v28  ;;  %v9409_v4 = vpop.f32.mrf.mxu1 }
 0x2a4   : > { %v1079_v39 = vpop.permute.xlu1 %1078 }
 0x2a5   : > { %v1163_v31 = vmul.f32 %v9275_v45, %v1079_v39  ;;  %v9385_v41 = vpack.c.bf16 %v2305_v40, %v2303_v0  ;;  %13335 = vst [vmem:[#allocation6_spill] sm:$0xff] %v9387_v52  ;;  %2210 = vmatmul.mubr.bf16.gmra.mxu1 %v1785_v25  ;;  %v9412_v33 = vpop.f32.mrf.mxu1  ;;  %v1476_v25 = vpop.permute.xlu0 %1475 }
 0x2a6   : > { %2219 = vmatprep.mubr.bf16.mxu1 %v13327_v47 }
 0x2a7   : > { %3363 = vmatprep.mubr.bf16.mxu0 %v9385_v41  ;;  %v1227_v63 = vadd.f32 %v1163_v31, %v838_v60  ;;  %v9414_v60 = vpop.f32.mrf.mxu1 }
 0x2a8   : > { %3364 = vmatmul.mubr.bf16.gmra.mxu0 %v9387_v52  ;;  %v1083_v58 = vpop.permute.xlu1 %1082 }
 0x2a9   : > { %v1164_v12 = vmul.f32 %v9275_v45, %v1083_v58  ;;  %v1616_v29 = vadd.f32 %v1552_v23, %v1227_v63  ;;  %v7677_v58 = vld [vmem:[%s13173_s7 + $0x240] ss:$16 sps:$4 sm:$0xff]   ;;  %v764_v59 = vpop.permute.xlu0 %763 }
 0x2ab   : > { %v1228_v20 = vadd.f32 %v1164_v12, %v839_v53  ;;  %v1687_v56 = vadd.f32 %v9319_v46, %v1616_v29  ;;  %v7679_v12 = vld [vmem:[%s13173_s7 + $0x244] ss:$16 sps:$4 sm:$0xff]   ;;  %v9425_v29 = vpop.f32.mrf.mxu1 }
 0x2ac   : > { %5091 = vmatprep.subr.bf16.mxu0 %v7679_v12 }
 0x2ad   : > { %v1472_v48 = vpop.permute.xlu1 %1471  ;;  %v1751_v28 = vmax.f32 %v1687_v56, 0.0  ;;  %5092 = vmatpush1.bf16.msra.mxu0 %v7677_v58  ;;  %v774_v58 = vpop.permute.xlu0 %773 }
 0x2ae   : > { %v1553_v43 = vmul.f32 %v9300_v37, %v1472_v48  ;;  %v1554_v48 = vmul.f32 %v9300_v37, %v1476_v25 }
 0x2b0   : > { %v1617_v35 = vadd.f32 %v1553_v43, %v1228_v20  ;;  %v841_v20 = vmul.f32 %v9283_v11, %v764_v59 }
 0x2b2   : > { %v1688_v0 = vadd.f32 %v9319_v46, %v1617_v35  ;;  %v759_v40 = vpop.permute.xlu1 %758 }
 0x2b3   : > { %v840_v23 = vmul.f32 %v9283_v11, %v759_v40 }
 0x2b4   : > { %v1752_v39 = vmax.f32 %v1688_v0, 0.0  ;;  %v9430_v0 = vpop.f32.mrf.mxu1 }
 0x2b6   : > { %v1786_v31 = vpack.c.bf16 %v1752_v39, %v1751_v28  ;;  %v9434_v12 = vpop.f32.mrf.mxu1 }
 0x2b7   : > { %v1087_v32 = vpop.permute.xlu1 %1086 }
 0x2b8   : > { %v1165_v63 = vmul.f32 %v9275_v45, %v1087_v32  ;;  %2220 = vmatmul.mubr.bf16.gmra.mxu1 %v1786_v31 }
 0x2b9   : > { %2229 = vmatprep.mubr.bf16.mxu1 %v13327_v47 }
 0x2ba   : > { %v1229_v24 = vadd.f32 %v1165_v63, %v840_v23 }
 0x2bb   : > { %v1091_v53 = vpop.permute.xlu1 %1090 }
 0x2bc   : > { %v1166_v43 = vmul.f32 %v9275_v45, %v1091_v53  ;;  %v1618_v56 = vadd.f32 %v1554_v48, %v1229_v24 }
 0x2be   : > { %v1230_v28 = vadd.f32 %v1166_v43, %v841_v20  ;;  %v1689_v23 = vadd.f32 %v9319_v46, %v1618_v56  ;;  %v9440_v43 = vpop.f32.mrf.mxu1 }
 0x2bf   : > { %v2071_v35 = vpop.f32.mrf.mxu0 }
 0x2c0   : > { %v1480_v40 = vpop.permute.xlu1 %1479  ;;  %v2072_v24 = vadd.f32 %v2071_v35, %v8967_v8  ;;  %v1753_v56 = vmax.f32 %v1689_v23, 0.0  ;;  %v9443_v61 = vpop.f32.mrf.mxu1  ;;  %v7683_v35 = vld [vmem:[%s13173_s7 + $0x220] ss:$16 sps:$4 sm:$0xff]  }
 0x2c1   : > { %v1555_v39 = vmul.f32 %v9300_v37, %v1480_v40  ;;  %v2073_v31 = vpop.f32.mrf.mxu0 }
 0x2c2   : > { %v2074_v25 = vadd.f32 %v2073_v31, %v8940_v21  ;;  %v2306_v13 = vmax.f32 %v2072_v24, 0.0 }
 0x2c3   : > { %v1619_v32 = vadd.f32 %v1555_v39, %v1230_v28  ;;  %v2075_v63 = vpop.f32.mrf.mxu0 }
 0x2c4   : > { %v2076_v59 = vadd.f32 %v2075_v63, %v8967_v8  ;;  %v2307_v6 = vmax.f32 %v2074_v25, 0.0  ;;  %v1484_v25 = vpop.permute.xlu0 %1483 }
 0x2c5   : > { %v1690_v53 = vadd.f32 %v9319_v46, %v1619_v32  ;;  %v2077_v48 = vpop.f32.mrf.mxu0  ;;  %v769_v20 = vpop.permute.xlu1 %768  ;;  %v7685_v32 = vld [vmem:[%s13173_s7 + $0x224] ss:$16 sps:$4 sm:$0xff]   ;;  %v1556_v24 = vmul.f32 %v9300_v37, %v1484_v25 }
 0x2c6   : > { %v2078_v40 = vadd.f32 %v2077_v48, %v8940_v21  ;;  %v2308_v39 = vmax.f32 %v2076_v59, 0.0  ;;  %v842_v59 = vmul.f32 %v9283_v11, %v769_v20  ;;  %5093 = vmatprep.subr.bf16.mxu0 %v7685_v32  ;;  %v843_v20 = vmul.f32 %v9283_v11, %v774_v58  ;;  %v7689_v11 = vld [vmem:[%s13173_s7 + $0x200] ss:$16 sps:$4 sm:$0xff]   ;;  %v7691_v58 = vld [vmem:[%s13173_s7 + $0x204] ss:$16 sps:$4 sm:$0xff]  }
 0x2c7   : > { %v1754_v28 = vmax.f32 %v1690_v53, 0.0  ;;  %5094 = vmatpush1.bf16.msra.mxu0 %v7683_v35 }
 0x2c8   : > { %v2309_v36 = vmax.f32 %v2078_v40, 0.0  ;;  %v9453_v53 = vpack.c.bf16 %v2308_v39, %v2306_v13  ;;  %5095 = vmatprep.subr.bf16.mxu0 %v7691_v58 }
 0x2c9   : > { %v1787_v31 = vpack.c.bf16 %v1754_v28, %v1753_v56 }
 0x2ca   : > { %v1095_v63 = vpop.permute.xlu1 %1094  ;;  %v9445_v52 = vpack.c.bf16 %v2309_v36, %v2307_v6  ;;  %v9460_v6 = vpop.f32.mrf.mxu1 }
 0x2cb   : > { %v1167_v23 = vmul.f32 %v9275_v45, %v1095_v63  ;;  %2230 = vmatmul.mubr.bf16.gmra.mxu1 %v1787_v31  ;;  %5096 = vmatpush1.bf16.msra.mxu0 %v7689_v11 }
 0x2cc   : > { %3373 = vmatprep.mubr.bf16.mxu0 %v9445_v52  ;;  %2239 = vmatprep.mubr.bf16.mxu1 %v13327_v47  ;;  %v9464_v40 = vpop.f32.mrf.mxu1 }
 0x2cd   : > { %3374 = vmatmul.mubr.bf16.gmra.mxu0 %v9453_v53  ;;  %v1231_v36 = vadd.f32 %v1167_v23, %v842_v59 }
 0x2ce   : > { %v1099_v13 = vpop.permute.xlu1 %1098  ;;  %v9467_v56 = vpop.f32.mrf.mxu1 }
 0x2cf   : > { %v1168_v48 = vmul.f32 %v9275_v45, %v1099_v13  ;;  %v1620_v28 = vadd.f32 %v1556_v24, %v1231_v36 }
 0x2d0   : > { %v9471_v59 = vpop.f32.mrf.mxu1 }
 0x2d1   : > { %v1232_v31 = vadd.f32 %v1168_v48, %v843_v20  ;;  %v1691_v32 = vadd.f32 %v9319_v46, %v1620_v28  ;;  %v7644_v20 = vld [vmem:[%s13173_s7 + $0xe0] ss:$16 sps:$4 sm:$0xff]  }
 0x2d2   : > { %v9480_v36 = vpop.f32.mrf.mxu1 }
 0x2d3   : > { %v1488_v39 = vpop.permute.xlu1 %1487  ;;  %v1755_v25 = vmax.f32 %v1691_v32, 0.0 }
 0x2d4   : > { %v1557_v63 = vmul.f32 %v9300_v37, %v1488_v39  ;;  %v9483_v24 = vpop.f32.mrf.mxu1  ;;  %v7652_v39 = vld [vmem:[%s13173_s7 + $0xc4] ss:$16 sps:$4 sm:$0xff]  }
 0x2d6   : > { %v1621_v23 = vadd.f32 %v1557_v63, %v1232_v31  ;;  %v9485_v13 = vpop.f32.mrf.mxu1  ;;  %v2098_v31 = vadd.f32 %v9412_v33, %v8940_v21  ;;  %v7650_v33 = vld [vmem:[%s13173_s7 + $0xc0] ss:$16 sps:$4 sm:$0xff]  }
 0x2d8   : > { %v1692_v35 = vadd.f32 %v9319_v46, %v1621_v23  ;;  %v9497_v32 = vpop.f32.mrf.mxu1 }
 0x2da   : > { %v1756_v45 = vmax.f32 %v1692_v35, 0.0 }
 0x2dc   : > { %v1788_v37 = vpack.c.bf16 %v1756_v45, %v1755_v25  ;;  %v2094_v25 = vadd.f32 %v9405_v22, %v8940_v21 }
 0x2de   : > { %2240 = vmatmul.mubr.bf16.gmra.mxu1 %v1788_v37  ;;  %v2317_v37 = vmax.f32 %v2098_v31, 0.0 }
 0x2df   : > { %2880 = vmatprep.mubr.bf16.mxu1 %v8978_v3 }
 0x2e0   : > { %v2081_v46 = vpop.f32.mrf.mxu0 }
 0x2e1   : > { %v2082_v23 = vadd.f32 %v2081_v46, %v8967_v8 }
 0x2e2   : > { %v2083_v48 = vpop.f32.mrf.mxu0 }
 0x2e3   : > { %v2084_v3 = vadd.f32 %v2083_v48, %v8940_v21  ;;  %v9513_v48 = vpop.f32.mrf.mxu1 }
 0x2e4   : > { %v2085_v28 = vpop.f32.mrf.mxu0 }
 0x2e5   : > { %v2086_v63 = vadd.f32 %v2085_v28, %v8967_v8  ;;  %v2311_v46 = vmax.f32 %v2084_v3, 0.0  ;;  %v7656_v3 = vld [vmem:[%s13173_s7 + $0xa0] ss:$16 sps:$4 sm:$0xff]  }
 0x2e6   : > { %v2087_v35 = vpop.f32.mrf.mxu0  ;;  %2881 = vmatmul.mubr.bf16.vlgmr.msra.gmra.mxu1 %v8999_v54  ;;  %v7658_v54 = vld [vmem:[%s13173_s7 + $0xa4] ss:$16 sps:$4 sm:$0xff]  }
 0x2e7   : > { %v2088_v45 = vadd.f32 %v2087_v35, %v8940_v21  ;;  %4729 = vmatpush1.bf16.msra.mxu1 %v7644_v20  ;;  %2890 = vmatprep.mubr.bf16.mxu1 %v9009_v7  ;;  %v2312_v11 = vmax.f32 %v2086_v63, 0.0  ;;  %v2310_v20 = vmax.f32 %v2082_v23, 0.0  ;;  %v2315_v7 = vmax.f32 %v2094_v25, 0.0  ;;  %v7695_v23 = vld [vmem:[%s13173_s7 + $0x3e0] ss:$16 sps:$4 sm:$0xff]  }
 0x2e8   : > { %v9508_v58 = vpop.f32.mrf.mxu0  ;;  %4730 = vmatprep.subr.bf16.mxu1 %v7652_v39  ;;  %v7697_v39 = vld [vmem:[%s13173_s7 + $0x3e4] ss:$16 sps:$4 sm:$0xff]   ;;  %v2096_v63 = vadd.f32 %v9409_v4, %v8967_v8  ;;  %v2108_v25 = vadd.f32 %v9434_v12, %v8940_v21  ;;  %v2104_v12 = vadd.f32 %v9425_v29, %v8940_v21 }
 0x2e9   : > { %v2313_v22 = vmax.f32 %v2088_v45, 0.0  ;;  %v9524_v47 = vpack.c.bf16 %v2312_v11, %v2310_v20  ;;  %v9537_v45 = vpack.c.bf16 %v2317_v37, %v2315_v7  ;;  %v7664_v4 = vld [vmem:[%s13173_s7 + $0x84] ss:$16 sps:$4 sm:$0xff]   ;;  %5097 = vmatprep.subr.bf16.mxu0 %v7697_v39  ;;  %v9544_v11 = vpop.f32.mrf.mxu1 }
 0x2ea   : > { %v9515_v28 = vpop.f32.mrf.mxu0  ;;  %v2316_v37 = vmax.f32 %v2096_v63, 0.0  ;;  %5098 = vmatpush2.bf16.msra.mxu0 %v7695_v23  ;;  %v7670_v29 = vld [vmem:[%s13173_s7 + $0x64] ss:$16 sps:$4 sm:$0xff]   ;;  %v2319_v7 = vmax.f32 %v2104_v12, 0.0  ;;  %v2106_v63 = vadd.f32 %v9430_v0, %v8967_v8  ;;  %v7668_v23 = vld [vmem:[%s13173_s7 + $0x60] ss:$16 sps:$4 sm:$0xff]   ;;  %v2102_v0 = vadd.f32 %v9414_v60, %v8967_v8 }
 0x2eb   : > { %v9517_v35 = vpack.c.bf16 %v2313_v22, %v2311_v46  ;;  %4731 = vmatpush1.bf16.msra.mxu1 %v7650_v33  ;;  %v2092_v33 = vadd.f32 %v9397_v10, %v8967_v8  ;;  %v9554_v46 = vpop.f32.mrf.mxu1  ;;  %v2321_v10 = vmax.f32 %v2108_v25, 0.0  ;;  %v2118_v25 = vadd.f32 %v9464_v40, %v8940_v21  ;;  %v7701_v40 = vld [vmem:[%s13173_s7 + $0x3c0] ss:$16 sps:$4 sm:$0xff]   ;;  %v7703_v60 = vld [vmem:[%s13173_s7 + $0x3c4] ss:$16 sps:$4 sm:$0xff]  }
 0x2ec   : > { %v9526_v31 = vpop.f32.mrf.mxu0  ;;  %4732 = vmatprep.subr.bf16.mxu1 %v7658_v54  ;;  %5099 = vmatprep.subr.bf16.mxu0 %v7703_v60 }
 0x2ed   : > { %3383 = vmatprep.mubr.bf16.mxu0 %v9517_v35 }
 0x2ee   : > { %2891 = vmatmul.mubr.bf16.gmra.mxu1 %v9039_v38  ;;  %v9547_v54 = vpop.f32.mrf.mxu0  ;;  %3384 = vmatmul.mubr.bf16.gmra.mxu0 %v9524_v47  ;;  %v7662_v38 = vld [vmem:[%s13173_s7 + $0x80] ss:$16 sps:$4 sm:$0xff]  }
 0x2ef   : > { %2900 = vmatprep.mubr.bf16.mxu1 %v9045_v14  ;;  %3393 = vmatprep.mubr.bf16.mxu0 %v9537_v45  ;;  %v2314_v14 = vmax.f32 %v2092_v33, 0.0  ;;  %v7676_v33 = vld [vmem:[%s13173_s7 + $0x44] ss:$16 sps:$4 sm:$0xff]  }
 0x2f0   : > { %v9556_v22 = vpop.f32.mrf.mxu0  ;;  %4733 = vmatpush1.bf16.msra.mxu1 %v7656_v3  ;;  %v9570_v3 = vpop.f32.mrf.mxu1  ;;  %5100 = vmatpush2.bf16.msra.mxu0 %v7701_v40 }
 0x2f1   : > { %13336 = vst [vmem:[#allocation7_spill] sm:$0xff] %v9556_v22  ;;  %4734 = vmatprep.subr.bf16.mxu1 %v7664_v4  ;;  %v9566_v39 = vpack.c.bf16 %v2316_v37, %v2314_v14  ;;  %v9579_v4 = vpack.c.bf16 %v2321_v10, %v2319_v7  ;;  %v2114_v37 = vadd.f32 %v9443_v61, %v8940_v21  ;;  %v7674_v61 = vld [vmem:[%s13173_s7 + $0x40] ss:$16 sps:$4 sm:$0xff]   ;;  %v2318_v14 = vmax.f32 %v2102_v0, 0.0 }
 0x2f2   : > { %v9564_v20 = vpop.f32.mrf.mxu0 }
 0x2f3   : > { %13337 = vst [vmem:[#allocation8_spill] sm:$0xff] %v9564_v20 }
 0x2f4   : > { %v9572_v22 = vpop.f32.mrf.mxu0  ;;  %4735 = vmatpush1.bf16.msra.mxu1 %v7662_v38  ;;  %v9600_v38 = vpop.f32.mrf.mxu1 }
 0x2f5   : > { %13338 = vst [vmem:[#allocation9_spill] sm:$0xff] %v9572_v22  ;;  %4736 = vmatprep.subr.bf16.mxu1 %v7670_v29  ;;  %v7682_v29 = vld [vmem:[%s13173_s7 + $0x24] ss:$16 sps:$4 sm:$0xff]  }
 0x2f6   : > { %2901 = vmatmul.mubr.bf16.gmra.mxu1 %v9071_v62  ;;  %v9587_v12 = vpop.f32.mrf.mxu0  ;;  %3394 = vmatmul.mubr.bf16.gmra.mxu0 %v9566_v39  ;;  %v2320_v62 = vmax.f32 %v2106_v63, 0.0  ;;  %v2323_v63 = vmax.f32 %v2114_v37, 0.0  ;;  %v7688_v37 = vld [vmem:[%s13173_s7 + $0x4] ss:$16 sps:$4 sm:$0xff]  }
 0x2f7   : > { %2910 = vmatprep.mubr.bf16.mxu1 %v9081_v42  ;;  %3403 = vmatprep.mubr.bf16.mxu0 %v9579_v4  ;;  %v2325_v42 = vmax.f32 %v2118_v25, 0.0  ;;  %v7680_v25 = vld [vmem:[%s13173_s7 + $0x20] ss:$16 sps:$4 sm:$0xff]  }
 0x2f8   : > { %v9602_v10 = vpop.f32.mrf.mxu0  ;;  %4737 = vmatpush1.bf16.msra.mxu1 %v7668_v23  ;;  %v9612_v22 = vpack.c.bf16 %v2320_v62, %v2318_v14  ;;  %v2116_v23 = vadd.f32 %v9460_v6, %v8967_v8  ;;  %v2112_v6 = vadd.f32 %v9440_v43, %v8967_v8  ;;  %v7686_v43 = vld [vmem:[%s13173_s7] ss:$16 sps:$4 sm:$0xff]  }
 0x2f9   : > { %13339 = vst [vmem:[#allocation10_spill] sm:$0xff] %v9602_v10  ;;  %4738 = vmatprep.subr.bf16.mxu1 %v7676_v33  ;;  %v9616_v10 = vpop.f32.mrf.mxu1  ;;  %v2128_v33 = vadd.f32 %v9483_v24, %v8940_v21  ;;  %v9625_v0 = vpack.c.bf16 %v2325_v42, %v2323_v63  ;;  %v2124_v24 = vadd.f32 %v9471_v59, %v8940_v21  ;;  %v7694_v42 = vld [vmem:[%s13173_s7 + $0x1e4] ss:$16 sps:$4 sm:$0xff]  }
 0x2fa   : > { %v9610_v7 = vpop.f32.mrf.mxu0  ;;  %v2324_v62 = vmax.f32 %v2116_v23, 0.0  ;;  %v2126_v23 = vadd.f32 %v9480_v36, %v8967_v8  ;;  %v2122_v36 = vadd.f32 %v9467_v56, %v8967_v8  ;;  %v7709_v56 = vld [vmem:[%s13173_s7 + $0x3a4] ss:$16 sps:$4 sm:$0xff]  }
 0x2fb   : > { %v9632_v40 = vpop.f32.mrf.mxu1  ;;  %v2327_v14 = vmax.f32 %v2124_v24, 0.0  ;;  %v7700_v24 = vld [vmem:[%s13173_s7 + $0x1c4] ss:$16 sps:$4 sm:$0xff]   ;;  %5101 = vmatprep.subr.bf16.mxu0 %v7709_v56 }
 0x2fc   : > { %v9618_v20 = vpop.f32.mrf.mxu0  ;;  %4739 = vmatpush1.bf16.msra.mxu1 %v7674_v61 }
 0x2fd   : > { %4740 = vmatprep.subr.bf16.mxu1 %v7682_v29  ;;  %v2322_v29 = vmax.f32 %v2112_v6, 0.0  ;;  %v9650_v59 = vpop.f32.mrf.mxu1 }
 0x2fe   : > { %2911 = vmatmul.mubr.bf16.gmra.mxu1 %v9099_v26  ;;  %v9635_v60 = vpop.f32.mrf.mxu0  ;;  %3404 = vmatmul.mubr.bf16.gmra.mxu0 %v9612_v22  ;;  %v2329_v26 = vmax.f32 %v2128_v33, 0.0  ;;  %v7692_v33 = vld [vmem:[%s13173_s7 + $0x1e0] ss:$16 sps:$4 sm:$0xff]  }
 0x2ff   : > { %2920 = vmatprep.mubr.bf16.mxu1 %v9108_v1  ;;  %3413 = vmatprep.mubr.bf16.mxu0 %v9625_v0  ;;  %v9654_v63 = vpack.c.bf16 %v2324_v62, %v2322_v29  ;;  %v9672_v62 = vpop.f32.mrf.mxu1 }
 0x300   : > { %v9642_v61 = vpop.f32.mrf.mxu0  ;;  %4741 = vmatpush1.bf16.msra.mxu1 %v7680_v25  ;;  %v9665_v6 = vpack.c.bf16 %v2329_v26, %v2327_v14  ;;  %v7707_v26 = vld [vmem:[%s13173_s7 + $0x3a0] ss:$16 sps:$4 sm:$0xff]   ;;  %v2326_v14 = vmax.f32 %v2122_v36, 0.0  ;;  %v2148_v36 = vadd.f32 %v9616_v10, %v8940_v21 }
 0x301   : > { %13340 = vst [vmem:[#allocation11_spill] sm:$0xff] %v9642_v61  ;;  %4742 = vmatprep.subr.bf16.mxu1 %v7688_v37  ;;  %v2138_v37 = vadd.f32 %v9544_v11, %v8940_v21  ;;  %v2134_v11 = vadd.f32 %v9497_v32, %v8940_v21  ;;  %v7698_v32 = vld [vmem:[%s13173_s7 + $0x1c0] ss:$16 sps:$4 sm:$0xff]   ;;  %v2157_v61 = vpop.f32.mrf.mxu1  ;;  %5102 = vmatpush2.bf16.msra.mxu0 %v7707_v26 }
 0x302   : > { %v9652_v1 = vpop.f32.mrf.mxu0 }
 0x303   : > { %13341 = vst [vmem:[#allocation12_spill] sm:$0xff] %v9652_v1  ;;  %v2333_v29 = vmax.f32 %v2138_v37, 0.0 }
 0x304   : > { %v9658_v25 = vpop.f32.mrf.mxu0  ;;  %4743 = vmatpush1.bf16.msra.mxu1 %v7686_v43 }
 0x305   : > { %13342 = vst [vmem:[#allocation13_spill] sm:$0xff] %v9658_v25  ;;  %4744 = vmatprep.subr.bf16.mxu1 %v7694_v42 }
 0x306   : > { %2921 = vmatmul.mubr.bf16.gmra.mxu1 %v9132_v19  ;;  %v9675_v43 = vpop.f32.mrf.mxu0  ;;  %3414 = vmatmul.mubr.bf16.gmra.mxu0 %v9654_v63  ;;  %v2328_v19 = vmax.f32 %v2126_v23, 0.0  ;;  %v2331_v23 = vmax.f32 %v2134_v11, 0.0  ;;  %v2132_v11 = vadd.f32 %v9485_v13, %v8967_v8 }
 0x307   : > { %2930 = vmatprep.mubr.bf16.mxu1 %v9139_v51  ;;  %3423 = vmatprep.mubr.bf16.mxu0 %v9665_v6  ;;  %v7706_v51 = vld [vmem:[%s13173_s7 + $0x1a4] ss:$16 sps:$4 sm:$0xff]  }
 0x308   : > { %v9688_v42 = vpop.f32.mrf.mxu0  ;;  %4745 = vmatpush2.bf16.msra.mxu1 %v7692_v33  ;;  %v9698_v1 = vpack.c.bf16 %v2328_v19, %v2326_v14  ;;  %v2136_v33 = vadd.f32 %v9513_v48, %v8967_v8  ;;  %v9711_v56 = vpack.c.bf16 %v2333_v29, %v2331_v23  ;;  %v2144_v48 = vadd.f32 %v9570_v3, %v8940_v21 }
 0x309   : > { %13343 = vst [vmem:[#allocation14_spill] sm:$0xff] %v9688_v42  ;;  %4746 = vmatprep.subr.bf16.mxu1 %v7700_v24  ;;  %v9702_v42 = vpop.f32.mrf.mxu1  ;;  %v7704_v24 = vld [vmem:[%s13173_s7 + $0x1a0] ss:$16 sps:$4 sm:$0xff]   ;;  %v2330_v29 = vmax.f32 %v2132_v11, 0.0 }
 0x30a   : > { %v9696_v25 = vpop.f32.mrf.mxu0  ;;  %v2332_v26 = vmax.f32 %v2136_v33, 0.0  ;;  %v2142_v33 = vadd.f32 %v9554_v46, %v8967_v8  ;;  %v7715_v46 = vld [vmem:[%s13173_s7 + $0x384] ss:$16 sps:$4 sm:$0xff]  }
 0x30b   : > { %13344 = vst [vmem:[#allocation15_spill] sm:$0xff] %v9696_v25  ;;  %v2163_v19 = vpop.f32.mrf.mxu1  ;;  %5103 = vmatprep.subr.bf16.mxu0 %v7715_v46 }
 0x30c   : > { %v9704_v37 = vpop.f32.mrf.mxu0  ;;  %4747 = vmatpush2.bf16.msra.mxu1 %v7698_v32  ;;  %v2337_v32 = vmax.f32 %v2148_v36, 0.0  ;;  %v9723_v13 = vpack.c.bf16 %v2332_v26, %v2330_v29 }
 0x30d   : > { %13345 = vst [vmem:[#allocation16_spill] sm:$0xff] %v9704_v37  ;;  %4748 = vmatprep.subr.bf16.mxu1 %v7706_v51  ;;  %v2335_v51 = vmax.f32 %v2144_v48, 0.0  ;;  %v2165_v14 = vpop.f32.mrf.mxu1 }
 0x30e   : > { %2931 = vmatmul.mubr.bf16.gmra.mxu1 %v9165_v17  ;;  %3424 = vmatmul.mubr.bf16.gmra.mxu0 %v9698_v1  ;;  %v9721_v10 = vpop.f32.mrf.mxu0  ;;  %v2146_v17 = vadd.f32 %v9600_v38, %v8967_v8  ;;  %v7712_v38 = vld [vmem:[%s13173_s7 + $0x184] ss:$16 sps:$4 sm:$0xff]  }
 0x30f   : > { %2940 = vmatprep.mubr.bf16.mxu1 %v9174_v34  ;;  %3433 = vmatprep.mubr.bf16.mxu0 %v9711_v56  ;;  %v2158_v34 = vadd.f32 %v2157_v61, %v8940_v21  ;;  %v9730_v3 = vpack.c.bf16 %v2337_v32, %v2335_v51  ;;  %v2154_v61 = vadd.f32 %v9650_v59, %v8940_v21  ;;  %v2167_v11 = vpop.f32.mrf.mxu1  ;;  %v2334_v59 = vmax.f32 %v2142_v33, 0.0 }
 0x310   : > { %4749 = vmatpush2.bf16.msra.mxu1 %v7704_v24  ;;  %v9727_v23 = vpop.f32.mrf.mxu0  ;;  %v7710_v24 = vld [vmem:[%s13173_s7 + $0x180] ss:$16 sps:$4 sm:$0xff]   ;;  %v2336_v36 = vmax.f32 %v2146_v17, 0.0  ;;  %v2156_v51 = vadd.f32 %v9672_v62, %v8967_v8  ;;  %v2168_v17 = vadd.f32 %v2167_v11, %v8940_v21  ;;  %v2164_v33 = vadd.f32 %v2163_v19, %v8940_v21 }
 0x311   : > { %13346 = vst [vmem:[#allocation17_spill] sm:$0xff] %v9727_v23  ;;  %4750 = vmatprep.subr.bf16.mxu1 %v7712_v38  ;;  %v2341_v26 = vmax.f32 %v2158_v34, 0.0  ;;  %v2339_v32 = vmax.f32 %v2154_v61, 0.0  ;;  %v2152_v34 = vadd.f32 %v9632_v40, %v8967_v8  ;;  %v7718_v40 = vld [vmem:[%s13173_s7 + $0x364] ss:$16 sps:$4 sm:$0xff]   ;;  %v2166_v11 = vadd.f32 %v2165_v14, %v8967_v8 }
 0x312   : > { %v9752_v48 = vpop.f32.mrf.mxu0  ;;  %v9754_v29 = vpack.c.bf16 %v2336_v36, %v2334_v59  ;;  %v2340_v62 = vmax.f32 %v2156_v51, 0.0  ;;  %v2345_v61 = vmax.f32 %v2168_v17, 0.0  ;;  %v2343_v36 = vmax.f32 %v2164_v33, 0.0  ;;  %v7719_v51 = vld [vmem:[%s13173_s7 + $0x160] ss:$16 sps:$4 sm:$0xff]  }
 0x313   : > { %v9761_v25 = vpack.c.bf16 %v2341_v26, %v2339_v32  ;;  %v2162_v32 = vadd.f32 %v9702_v42, %v8967_v8  ;;  %v7721_v17 = vld [vmem:[%s13173_s7 + $0x164] ss:$16 sps:$4 sm:$0xff]  }
 0x314   : > { %4751 = vmatpush2.bf16.msra.mxu1 %v7710_v24  ;;  %v9758_v23 = vpop.f32.mrf.mxu0  ;;  %v9784_v59 = vpack.c.bf16 %v2345_v61, %v2343_v36  ;;  %v7727_v61 = vld [vmem:[%s13173_s7 + $0x324] ss:$16 sps:$4 sm:$0xff]  }
 0x315   : > { %4752 = vmatprep.subr.bf16.mxu1 %v7721_v17  ;;  %v2342_v33 = vmax.f32 %v2162_v32, 0.0 }
 0x316   : > { %2941 = vmatmul.mubr.bf16.gmra.mxu1 %v9193_v2  ;;  %3434 = vmatmul.mubr.bf16.gmra.mxu0 %v9723_v13  ;;  %v7713_v2 = vld [vmem:[%s13173_s7 + $0x380] ss:$16 sps:$4 sm:$0xff]   ;;  %v9770_v38 = vpop.f32.mrf.mxu0 }
 0x317   : > { %2950 = vmatprep.mubr.bf16.mxu1 %v9202_v50  ;;  %3443 = vmatprep.mubr.bf16.mxu0 %v9730_v3 }
 0x318   : > { %5104 = vmatpush2.bf16.msra.mxu0 %v7713_v2  ;;  %v2338_v2 = vmax.f32 %v2152_v34, 0.0  ;;  %v9778_v19 = vpop.f32.mrf.mxu0  ;;  %v2344_v34 = vmax.f32 %v2166_v11, 0.0  ;;  %4753 = vmatpush2.bf16.msra.mxu1 %v7719_v51  ;;  %v7725_v11 = vld [vmem:[%s13173_s7 + $0x320] ss:$16 sps:$4 sm:$0xff]  }
 0x319   : > { %v2171_v50 = vpop.f32.mrf.mxu1  ;;  %5105 = vmatprep.subr.bf16.mxu0 %v7718_v40 }
 0x31a   : > { %v9799_v42 = vpop.f32.mrf.mxu0 }
 0x31b   : > { %v2173_v37 = vpop.f32.mrf.mxu1 }
 0x31c   : > { %v2174_v14 = vadd.f32 %v2173_v37, %v8940_v21 }
 0x31d   : > { %v2175_v24 = vpop.f32.mrf.mxu1 }
 0x31e   : > { %2951 = vmatmul.mubr.bf16.gmra.mxu1 %v9224_v9  ;;  %3444 = vmatmul.mubr.bf16.gmra.mxu0 %v9754_v29  ;;  %v9775_v9 = vpack.c.bf16 %v2340_v62, %v2338_v2  ;;  %v2347_v62 = vmax.f32 %v2174_v14, 0.0  ;;  %v9810_v2 = vpack.c.bf16 %v2344_v34, %v2342_v33  ;;  %v2176_v36 = vadd.f32 %v2175_v24, %v8967_v8  ;;  %v7730_v24 = vld [vmem:[%s13173_s7 + $0x304] ss:$16 sps:$4 sm:$0xff]  }
 0x31f   : > { %2960 = vmatprep.mubr.bf16.mxu1 %v9231_v49  ;;  %3453 = vmatprep.mubr.bf16.mxu0 %v9761_v25  ;;  %v2177_v46 = vpop.f32.mrf.mxu1  ;;  %v7716_v49 = vld [vmem:[%s13173_s7 + $0x360] ss:$16 sps:$4 sm:$0xff]  }
 0x320   : > { %v2178_v26 = vadd.f32 %v2177_v46, %v8940_v21  ;;  %5106 = vmatpush2.bf16.msra.mxu0 %v7716_v49  ;;  %v9812_v46 = vpop.f32.mrf.mxu0  ;;  %v2348_v14 = vmax.f32 %v2176_v36, 0.0 }
 0x322   : > { %v2349_v37 = vmax.f32 %v2178_v26, 0.0  ;;  %v2172_v26 = vadd.f32 %v2171_v50, %v8967_v8  ;;  %v9828_v51 = vpop.f32.mrf.mxu0  ;;  %v7728_v50 = vld [vmem:[%s13173_s7 + $0x300] ss:$16 sps:$4 sm:$0xff]  }
 0x324   : > { %v9818_v49 = vpack.c.bf16 %v2349_v37, %v2347_v62  ;;  %v2346_v34 = vmax.f32 %v2172_v26, 0.0  ;;  %v9837_v37 = vpop.f32.mrf.mxu0  ;;  %v7731_v26 = vld [vmem:[%s13173_s7 + $0x140] ss:$16 sps:$4 sm:$0xff]  }
 0x326   : > { %2961 = vmatmul.mubr.bf16.gmra.mxu1 %v9249_v15  ;;  %3454 = vmatmul.mubr.bf16.gmra.mxu0 %v9775_v9  ;;  %v7722_v15 = vld [vmem:[%s13173_s7 + $0x340] ss:$16 sps:$4 sm:$0xff]  }
 0x327   : > { %2970 = vmatprep.mubr.bf16.mxu1 %v9255_v57  ;;  %3463 = vmatprep.mubr.bf16.mxu0 %v9784_v59  ;;  %v7724_v57 = vld [vmem:[%s13173_s7 + $0x344] ss:$16 sps:$4 sm:$0xff]  }
 0x328   : > { %5107 = vmatprep.subr.bf16.mxu0 %v7724_v57  ;;  %v9835_v57 = vpack.c.bf16 %v2348_v14, %v2346_v34 }
 0x329   : > { %5108 = vmatpush2.bf16.msra.mxu0 %v7722_v15 }
 0x32a   : > { %5109 = vmatprep.subr.bf16.mxu0 %v7727_v61 }
 0x32c   : > { %v2181_v40 = vpop.f32.mrf.mxu1 }
 0x32d   : > { %5110 = vmatpush2.bf16.msra.mxu0 %v7725_v11  ;;  %v2182_v36 = vadd.f32 %v2181_v40, %v8967_v8 }
 0x32e   : > { %v2183_v32 = vpop.f32.mrf.mxu1  ;;  %2971 = vmatmul.mubr.bf16.gmra.mxu1 %v9287_v5  ;;  %3464 = vmatmul.mubr.bf16.gmra.mxu0 %v9810_v2 }
 0x32f   : > { %2980 = vmatprep.mubr.bf16.mxu1 %v9292_v16  ;;  %3473 = vmatprep.mubr.bf16.mxu0 %v9818_v49  ;;  %v2184_v5 = vadd.f32 %v2183_v32, %v8940_v21  ;;  %v7733_v32 = vld [vmem:[%s13173_s7 + $0x144] ss:$16 sps:$4 sm:$0xff]  }
 0x330   : > { %v2185_v17 = vpop.f32.mrf.mxu1  ;;  %5111 = vmatprep.subr.bf16.mxu0 %v7730_v24  ;;  %v9852_v24 = vpop.f32.mrf.mxu0  ;;  %4754 = vmatprep.subr.bf16.mxu1 %v7733_v32 }
 0x331   : > { %v2186_v33 = vadd.f32 %v2185_v17, %v8967_v8  ;;  %5112 = vmatpush2.bf16.msra.mxu0 %v7728_v50  ;;  %v2351_v62 = vmax.f32 %v2184_v5, 0.0  ;;  %4755 = vmatpush2.bf16.msra.mxu1 %v7731_v26  ;;  %v7736_v26 = vld [vmem:[%s13173_s7 + $0x124] ss:$16 sps:$4 sm:$0xff]  }
 0x332   : > { %v2187_v16 = vpop.f32.mrf.mxu1  ;;  %v9855_v40 = vpop.f32.mrf.mxu0  ;;  %4756 = vmatprep.subr.bf16.mxu1 %v7736_v26  ;;  %v7737_v26 = vld [vmem:[%s13173_s7 + $0x100] ss:$16 sps:$4 sm:$0xff]  }
 0x333   : > { %v2188_v15 = vadd.f32 %v2187_v16, %v8940_v21  ;;  %v2352_v14 = vmax.f32 %v2186_v33, 0.0 }
 0x334   : > { %v9862_v50 = vpop.f32.mrf.mxu0 }
 0x335   : > { %v2353_v61 = vmax.f32 %v2188_v15, 0.0 }
 0x336   : > { %2981 = vmatmul.mubr.bf16.gmra.mxu1 %v9311_v18  ;;  %3474 = vmatmul.mubr.bf16.gmra.mxu0 %v9835_v57  ;;  %v2350_v18 = vmax.f32 %v2182_v36, 0.0  ;;  %v9864_v16 = vpop.f32.mrf.mxu0 }
 0x337   : > { %2990 = vmatprep.mubr.bf16.mxu1 %v9314_v30  ;;  %v9844_v11 = vpack.c.bf16 %v2353_v61, %v2351_v62  ;;  %13347 = vst [vmem:[#allocation18_spill] sm:$0xff] %v9864_v16 }
 0x338   : > { %v9857_v30 = vpack.c.bf16 %v2352_v14, %v2350_v18  ;;  %v9878_v32 = vpop.f32.mrf.mxu0 }
 0x339   : > { %3483 = vmatprep.mubr.bf16.mxu0 %v9844_v11 }
 0x33e   : > { %2991 = vmatmul.mubr.bf16.gmra.mxu1 %v9335_v55  ;;  %3484 = vmatmul.mubr.bf16.gmra.mxu0 %v9857_v30 }
 0x33f   : > { %v2191_v17 = vpop.f32.mrf.mxu1  ;;  %3000 = vmatprep.mubr.bf16.mxu1 %v9349_v27  ;;  %v7734_v27 = vld [vmem:[%s13173_s7 + $0x120] ss:$16 sps:$4 sm:$0xff]  }
 0x340   : > { %v2192_v62 = vadd.f32 %v2191_v17, %v8967_v8  ;;  %4757 = vmatpush2.bf16.msra.mxu1 %v7734_v27 }
 0x341   : > { %v2193_v5 = vpop.f32.mrf.mxu1 }
 0x342   : > { %v2194_v15 = vadd.f32 %v2193_v5, %v8940_v21  ;;  %v2354_v17 = vmax.f32 %v2192_v62, 0.0 }
 0x343   : > { %v2195_v34 = vpop.f32.mrf.mxu1 }
 0x344   : > { %v2196_v33 = vadd.f32 %v2195_v34, %v8967_v8  ;;  %v2355_v14 = vmax.f32 %v2194_v15, 0.0  ;;  %v13349_v34 = vld [vmem:[#allocation6_spill] sm:$0xff] }
 0x345   : > { %v2197_v61 = vpop.f32.mrf.mxu1 }
 0x346   : > { %v2198_v55 = vadd.f32 %v2197_v61, %v8940_v21  ;;  %3001 = vmatmul.mubr.bf16.gmra.mxu1 %v9351_v44  ;;  %v2356_v36 = vmax.f32 %v2196_v33, 0.0 }
 0x347   : > { %3010 = vmatprep.mubr.bf16.mxu1 %v9385_v41  ;;  %v9884_v41 = vpop.f32.mrf.mxu0 }
 0x348   : > { %v2357_v18 = vmax.f32 %v2198_v55, 0.0  ;;  %v9882_v44 = vpack.c.bf16 %v2356_v36, %v2354_v17  ;;  %13348 = vst [vmem:[#allocation19_spill] sm:$0xff] %v9884_v41 }
 0x349   : > { %v9890_v33 = vpop.f32.mrf.mxu0 }
 0x34a   : > { %v9880_v5 = vpack.c.bf16 %v2357_v18, %v2355_v14 }
 0x34b   : > { %v9892_v62 = vpop.f32.mrf.mxu0 }
 0x34c   : > { %3493 = vmatprep.mubr.bf16.mxu0 %v9880_v5  ;;  %13350 = vst [vmem:[#allocation6_spill] sm:$0xff] %v9892_v62 }
 0x34d   : > { %3494 = vmatmul.mubr.bf16.gmra.mxu0 %v9882_v44  ;;  %v9904_v14 = vpop.f32.mrf.mxu0 }
 0x34e   : > { %3011 = vmatmul.mubr.bf16.gmra.mxu1 %v13349_v34 }
 0x34f   : > { %3020 = vmatprep.mubr.bf16.mxu1 %v9445_v52  ;;  %v7739_v52 = vld [vmem:[%s13173_s7 + $0x104] ss:$16 sps:$4 sm:$0xff]  }
 0x350   : > { %4758 = vmatprep.subr.bf16.mxu1 %v7739_v52  ;;  %v7745_v52 = vld [vmem:[%s13173_s7 + $0x2ec] ss:$16 sps:$4 sm:$0xff]  }
 0x351   : > { %4759 = vmatpush2.bf16.msra.mxu1 %v7737_v26  ;;  %5787 = vmatprep.subr.bf16.mxu0 %v7745_v52 }
 0x352   : > { %v2201_v15 = vpop.f32.mrf.mxu1 }
 0x353   : > { %v2202_v18 = vadd.f32 %v2201_v15, %v8967_v8 }
 0x354   : > { %v2203_v61 = vpop.f32.mrf.mxu1 }
 0x355   : > { %v2204_v36 = vadd.f32 %v2203_v61, %v8940_v21  ;;  %v2358_v62 = vmax.f32 %v2202_v18, 0.0 }
 0x356   : > { %v2205_v55 = vpop.f32.mrf.mxu1  ;;  %3021 = vmatmul.mubr.bf16.gmra.mxu1 %v9453_v53 }
 0x357   : > { %v2206_v27 = vadd.f32 %v2205_v55, %v8967_v8  ;;  %3030 = vmatprep.mubr.bf16.mxu1 %v9517_v35  ;;  %v2359_v61 = vmax.f32 %v2204_v36, 0.0  ;;  %v9908_v55 = vpop.f32.mrf.mxu0 }
 0x358   : > { %v2207_v17 = vpop.f32.mrf.mxu1 }
 0x359   : > { %v2208_v53 = vadd.f32 %v2207_v17, %v8940_v21  ;;  %v2360_v34 = vmax.f32 %v2206_v27, 0.0  ;;  %v9917_v15 = vpop.f32.mrf.mxu0 }
 0x35b   : > { %v2361_v35 = vmax.f32 %v2208_v53, 0.0  ;;  %v9912_v41 = vpack.c.bf16 %v2360_v34, %v2358_v62  ;;  %v9920_v27 = vpop.f32.mrf.mxu0  ;;  %v7742_v62 = vld [vmem:[%s13173_s7 + $0xec] ss:$16 sps:$4 sm:$0xff]  }
 0x35c   : > { %13351 = vst [vmem:[#allocation20_spill] sm:$0xff] %v9920_v27  ;;  %5434 = vmatprep.subr.bf16.mxu1 %v7742_v62 }
 0x35d   : > { %v9910_v16 = vpack.c.bf16 %v2361_v35, %v2359_v61 }
 0x35e   : > { %3031 = vmatmul.mubr.bf16.gmra.mxu1 %v9524_v47  ;;  %v9927_v47 = vpop.f32.mrf.mxu0 }
 0x35f   : > { %3040 = vmatprep.mubr.bf16.mxu1 %v9537_v45  ;;  %3503 = vmatprep.mubr.bf16.mxu0 %v9910_v16  ;;  %13352 = vst [vmem:[#allocation21_spill] sm:$0xff] %v9927_v47 }
 0x360   : > { %3504 = vmatmul.mubr.bf16.gmra.mxu0 %v9912_v41 }
 0x365   : > { %v2211_v36 = vpop.f32.mrf.mxu1 }
 0x366   : > { %3041 = vmatmul.mubr.bf16.gmra.mxu1 %v9566_v39  ;;  %v9934_v39 = vpop.f32.mrf.mxu0 }
 0x367   : > { %3050 = vmatprep.mubr.bf16.mxu1 %v9579_v4  ;;  %v2213_v45 = vpop.f32.mrf.mxu1  ;;  %v2212_v4 = vadd.f32 %v2211_v36, %v8967_v8 }
 0x368   : > { %v2214_v18 = vadd.f32 %v2213_v45, %v8940_v21  ;;  %v9940_v27 = vpop.f32.mrf.mxu0 }
 0x369   : > { %v2215_v26 = vpop.f32.mrf.mxu1  ;;  %v2362_v45 = vmax.f32 %v2212_v4, 0.0 }
 0x36a   : > { %v2216_v17 = vadd.f32 %v2215_v26, %v8967_v8  ;;  %v2363_v35 = vmax.f32 %v2214_v18, 0.0  ;;  %v9947_v36 = vpop.f32.mrf.mxu0 }
 0x36b   : > { %v2217_v53 = vpop.f32.mrf.mxu1  ;;  %13353 = vst [vmem:[#allocation22_spill] sm:$0xff] %v9947_v36 }
 0x36c   : > { %v2218_v34 = vadd.f32 %v2217_v53, %v8940_v21  ;;  %v2364_v61 = vmax.f32 %v2216_v17, 0.0 }
 0x36e   : > { %3051 = vmatmul.mubr.bf16.gmra.mxu1 %v9612_v22  ;;  %v2365_v62 = vmax.f32 %v2218_v34, 0.0  ;;  %v9944_v26 = vpack.c.bf16 %v2364_v61, %v2362_v45  ;;  %v9952_v22 = vpop.f32.mrf.mxu0 }
 0x36f   : > { %3060 = vmatprep.mubr.bf16.mxu1 %v9625_v0 }
 0x370   : > { %v9942_v47 = vpack.c.bf16 %v2365_v62, %v2363_v35  ;;  %v9954_v18 = vpop.f32.mrf.mxu0 }
 0x371   : > { %13354 = vst [vmem:[#allocation23_spill] sm:$0xff] %v9954_v18 }
 0x372   : > { %3513 = vmatprep.mubr.bf16.mxu0 %v9942_v47 }
 0x373   : > { %3514 = vmatmul.mubr.bf16.gmra.mxu0 %v9944_v26 }
 0x376   : > { %3061 = vmatmul.mubr.bf16.gmra.mxu1 %v9654_v63 }
 0x377   : > { %3070 = vmatprep.mubr.bf16.mxu1 %v9665_v6  ;;  %v9962_v6 = vpop.f32.mrf.mxu0 }
 0x378   : > { %v2221_v0 = vpop.f32.mrf.mxu1 }
 0x379   : > { %v2222_v34 = vadd.f32 %v2221_v0, %v8967_v8 }
 0x37a   : > { %v2223_v52 = vpop.f32.mrf.mxu1 }
 0x37b   : > { %v2224_v4 = vadd.f32 %v2223_v52, %v8940_v21  ;;  %v2366_v36 = vmax.f32 %v2222_v34, 0.0  ;;  %v9966_v52 = vpop.f32.mrf.mxu0 }
 0x37c   : > { %v2225_v17 = vpop.f32.mrf.mxu1  ;;  %13355 = vst [vmem:[#allocation24_spill] sm:$0xff] %v9966_v52 }
 0x37d   : > { %v2226_v53 = vadd.f32 %v2225_v17, %v8967_v8  ;;  %v2367_v62 = vmax.f32 %v2224_v4, 0.0 }
 0x37e   : > { %v2227_v61 = vpop.f32.mrf.mxu1  ;;  %3071 = vmatmul.mubr.bf16.gmra.mxu1 %v9698_v1  ;;  %v9974_v1 = vpop.f32.mrf.mxu0 }
 0x37f   : > { %v2228_v63 = vadd.f32 %v2227_v61, %v8940_v21  ;;  %3080 = vmatprep.mubr.bf16.mxu1 %v9711_v56  ;;  %v2368_v35 = vmax.f32 %v2226_v53, 0.0 }
 0x380   : > { %v9976_v0 = vpop.f32.mrf.mxu0 }
 0x381   : > { %v2369_v45 = vmax.f32 %v2228_v63, 0.0  ;;  %v9968_v17 = vpack.c.bf16 %v2368_v35, %v2366_v36  ;;  %13356 = vst [vmem:[#allocation25_spill] sm:$0xff] %v9976_v0 }
 0x382   : > { %v9980_v36 = vpop.f32.mrf.mxu0 }
 0x383   : > { %v9964_v18 = vpack.c.bf16 %v2369_v45, %v2367_v62 }
 0x384   : > { %v9985_v63 = vpop.f32.mrf.mxu0 }
 0x385   : > { %3523 = vmatprep.mubr.bf16.mxu0 %v9964_v18  ;;  %13357 = vst [vmem:[#allocation26_spill] sm:$0xff] %v9985_v63 }
 0x386   : > { %3081 = vmatmul.mubr.bf16.gmra.mxu1 %v9723_v13  ;;  %3524 = vmatmul.mubr.bf16.gmra.mxu0 %v9968_v17  ;;  %v9988_v0 = vpop.f32.mrf.mxu0 }
 0x387   : > { %3090 = vmatprep.mubr.bf16.mxu1 %v9730_v3  ;;  %13358 = vst [vmem:[#allocation27_spill] sm:$0xff] %v9988_v0 }
 0x38b   : > { %v2231_v56 = vpop.f32.mrf.mxu1 }
 0x38c   : > { %v2232_v61 = vadd.f32 %v2231_v56, %v8967_v8  ;;  %v9998_v56 = vpop.f32.mrf.mxu0 }
 0x38d   : > { %v2233_v4 = vpop.f32.mrf.mxu1  ;;  %13359 = vst [vmem:[#allocation28_spill] sm:$0xff] %v9998_v56 }
 0x38e   : > { %3091 = vmatmul.mubr.bf16.gmra.mxu1 %v9754_v29  ;;  %v2234_v34 = vadd.f32 %v2233_v4, %v8940_v21  ;;  %v2370_v29 = vmax.f32 %v2232_v61, 0.0 }
 0x38f   : > { %v2235_v53 = vpop.f32.mrf.mxu1  ;;  %3100 = vmatprep.mubr.bf16.mxu1 %v9761_v25 }
 0x390   : > { %v2236_v13 = vadd.f32 %v2235_v53, %v8967_v8  ;;  %v2371_v45 = vmax.f32 %v2234_v34, 0.0  ;;  %v13360_v53 = vld [vmem:[#allocation3_spill] sm:$0xff] }
 0x391   : > { %v2237_v3 = vpop.f32.mrf.mxu1  ;;  %v10001_v34 = vsub.s32 3, %v13360_v53 }
 0x392   : > { %v2238_v35 = vadd.f32 %v2237_v3, %v8940_v21  ;;  %v2372_v62 = vmax.f32 %v2236_v13, 0.0  ;;  %v10003_v13 = vpop.f32.mrf.mxu0 }
 0x393   : > { %13361 = vst [vmem:[#allocation29_spill] sm:$0xff] %v10001_v34  ;;  %13362 = vst [vmem:[#allocation30_spill] sm:$0xff] %v10003_v13 }
 0x394   : > { %v2373_v52 = vmax.f32 %v2238_v35, 0.0  ;;  %v9993_v4 = vpack.c.bf16 %v2372_v62, %v2370_v29 }
 0x396   : > { %3101 = vmatmul.mubr.bf16.gmra.mxu1 %v9775_v9  ;;  %v9991_v25 = vpack.c.bf16 %v2373_v52, %v2371_v45  ;;  %v10010_v9 = vld [vmem:[%s13172_s6] sm:$0xf]  ;;  %v10023_v45 = vsub.s32 2, %v13360_v53 }
 0x397   : > { %3110 = vmatprep.mubr.bf16.mxu1 %v9784_v59  ;;  %v10012_v59 = vpop.f32.mrf.mxu0  ;;  %v10016_v3 = vrot.slane %v10010_v9, %v10001_v34 }
 0x398   : > { %3533 = vmatprep.mubr.bf16.mxu0 %v9991_v25  ;;  %13363 = vst [vmem:[#allocation31_spill] sm:$0xff] %v10012_v59  ;;  %13364 = vst [vmem:[#allocation32_spill] sm:$0xff] %v10023_v45  ;;  %v10037_v53 = vrot.slane %v10010_v9, %v10023_v45 }
 0x399   : > { %3534 = vmatmul.mubr.bf16.gmra.mxu0 %v9993_v4  ;;  %v3242_v62 = vadd.f32 %v9547_v54, %v10016_v3  ;;  %v10025_v29 = vpop.f32.mrf.mxu0  ;;  %v3238_v34 = vadd.f32 %v9515_v28, %v10016_v3 }
 0x39a   : > { %13365 = vst [vmem:[#allocation33_spill] sm:$0xff] %v10025_v29 }
 0x39b   : > { %v3561_v54 = vmax.f32 %v3242_v62, 0.0 }
 0x39e   : > { %v2241_v61 = vpop.f32.mrf.mxu1  ;;  %3111 = vmatmul.mubr.bf16.gmra.mxu1 %v9810_v2 }
 0x39f   : > { %3120 = vmatprep.mubr.bf16.mxu1 %v9818_v49  ;;  %v2242_v59 = vadd.f32 %v2241_v61, %v8967_v8 }
 0x3a0   : > { %v2243_v52 = vpop.f32.mrf.mxu1 }
 0x3a1   : > { %v2244_v2 = vadd.f32 %v2243_v52, %v8940_v21  ;;  %v2374_v61 = vmax.f32 %v2242_v59, 0.0  ;;  %v3236_v59 = vadd.f32 %v9508_v58, %v10037_v53 }
 0x3a2   : > { %v2245_v35 = vpop.f32.mrf.mxu1 }
 0x3a3   : > { %v2246_v49 = vadd.f32 %v2245_v35, %v8967_v8  ;;  %v2375_v52 = vmax.f32 %v2244_v2, 0.0  ;;  %v10039_v8 = vpop.f32.mrf.mxu0  ;;  %v3556_v58 = vmax.f32 %v3236_v59, 0.0  ;;  %v3262_v59 = vadd.f32 %v9635_v60, %v10016_v3  ;;  %v7749_v60 = vld [vmem:[%s13173_s7 + $0x2c8] ss:$16 sps:$4 sm:$0xff]  }
 0x3a4   : > { %v2247_v63 = vpop.f32.mrf.mxu1  ;;  %13366 = vst [vmem:[#allocation34_spill] sm:$0xff] %v10039_v8 }
 0x3a5   : > { %v2248_v56 = vadd.f32 %v2247_v63, %v8940_v21  ;;  %v2376_v0 = vmax.f32 %v2246_v49, 0.0  ;;  %v3557_v21 = vmax.f32 %v3238_v34, 0.0  ;;  %v10058_v34 = vpop.f32.mrf.mxu0 }
 0x3a6   : > { %v10031_v13 = vpop.f32.mrf.mxu1  ;;  %3121 = vmatmul.mubr.bf16.gmra.mxu1 %v9835_v57  ;;  %v3240_v57 = vadd.f32 %v9526_v31, %v10037_v53  ;;  %13368 = vst [vmem:[#allocation36_spill] sm:$0xff] %v10058_v34  ;;  %v13369_v31 = vld [vmem:[#allocation8_spill] sm:$0xff] }
 0x3a7   : > { %v2377_v35 = vmax.f32 %v2248_v56, 0.0  ;;  %3130 = vmatprep.mubr.bf16.mxu1 %v9844_v11  ;;  %v10047_v62 = vpack.c.bf16 %v2376_v0, %v2374_v61  ;;  %v3252_v11 = vadd.f32 %v9587_v12, %v10016_v3  ;;  %v10054_v2 = vpack.c.bf16 %v3561_v54, %v3557_v21 }
 0x3a8   : > { %v10041_v28 = vpop.f32.mrf.mxu1  ;;  %v3248_v0 = vadd.f32 %v13369_v31, %v10016_v3  ;;  %v7743_v31 = vld [vmem:[%s13173_s7 + $0x2e8] ss:$16 sps:$4 sm:$0xff]  }
 0x3a9   : > { %v10043_v63 = vpack.c.bf16 %v2377_v35, %v2375_v52  ;;  %13367 = vst [vmem:[#allocation35_spill] sm:$0xff] %v10054_v2  ;;  %v3560_v52 = vmax.f32 %v3240_v57, 0.0  ;;  %v3569_v35 = vmax.f32 %v3252_v11, 0.0 }
 0x3aa   : > { %v10049_v56 = vpop.f32.mrf.mxu1  ;;  %v3565_v45 = vmax.f32 %v3248_v0, 0.0 }
 0x3ab   : > { %3543 = vmatprep.mubr.bf16.mxu0 %v10043_v63  ;;  %v10079_v57 = vpack.c.bf16 %v3560_v52, %v3556_v58 }
 0x3ac   : > { %v10060_v49 = vpop.f32.mrf.mxu1  ;;  %3544 = vmatmul.mubr.bf16.gmra.mxu0 %v10047_v62  ;;  %v10092_v0 = vpack.c.bf16 %v3569_v35, %v3565_v45 }
 0x3ad   : > { %5113 = vmatprep.mubr.bf16.mxu0 %v10054_v2  ;;  %13372 = vst [vmem:[#allocation38_spill] sm:$0xff] %v10079_v57  ;;  %v13373_v2 = vld [vmem:[#allocation9_spill] sm:$0xff] }
 0x3ae   : > { %v10066_v12 = vpop.f32.mrf.mxu1  ;;  %3131 = vmatmul.mubr.bf16.gmra.mxu1 %v9857_v30  ;;  %v10069_v54 = vpop.f32.mrf.mxu0  ;;  %v3250_v30 = vadd.f32 %v13373_v2, %v10037_v53  ;;  %13375 = vst [vmem:[#allocation39_spill] sm:$0xff] %v10092_v0  ;;  %v3258_v2 = vadd.f32 %v9610_v7, %v10016_v3  ;;  %v3577_v7 = vmax.f32 %v3262_v59, 0.0 }
 0x3af   : > { %13370 = vst [vmem:[#allocation8_spill] sm:$0xff] %v10069_v54  ;;  %3140 = vmatprep.mubr.bf16.mxu1 %v9880_v5  ;;  %v7751_v5 = vld [vmem:[%s13173_s7 + $0x2cc] ss:$16 sps:$4 sm:$0xff]   ;;  %v13376_v54 = vld [vmem:[#allocation7_spill] sm:$0xff] }
 0x3b0   : > { %v10072_v61 = vpop.f32.mrf.mxu1  ;;  %v10074_v21 = vpop.f32.mrf.mxu0  ;;  %v3246_v52 = vadd.f32 %v13376_v54, %v10037_v53  ;;  %v3568_v45 = vmax.f32 %v3250_v30, 0.0  ;;  %v3573_v30 = vmax.f32 %v3258_v2, 0.0 }
 0x3b1   : > { %13371 = vst [vmem:[#allocation37_spill] sm:$0xff] %v10074_v21 }
 0x3b2   : > { %v10083_v8 = vpop.f32.mrf.mxu1  ;;  %v10085_v11 = vpop.f32.mrf.mxu0  ;;  %v10136_v2 = vpack.c.bf16 %v3577_v7, %v3573_v30 }
 0x3b3   : > { %13374 = vst [vmem:[#allocation9_spill] sm:$0xff] %v10085_v11 }
 0x3b4   : > { %v10096_v58 = vpop.f32.mrf.mxu1  ;;  %v10098_v21 = vpop.f32.mrf.mxu0  ;;  %5114 = vmatmul.mubr.bf16.vlgmr.msra.gmra.mxu0 %v10079_v57  ;;  %v7757_v57 = vld [vmem:[%s13173_s7 + $0x2ac] ss:$16 sps:$4 sm:$0xff]   ;;  %13382 = vst [vmem:[#allocation44_spill] sm:$0xff] %v10136_v2 }
 0x3b5   : > { %13377 = vst [vmem:[#allocation7_spill] sm:$0xff] %v10098_v21  ;;  %5123 = vmatprep.mubr.bf16.mxu0 %v10092_v0  ;;  %5788 = vmatpush1.bf16.msra.mxu0 %v7743_v31  ;;  %v3564_v31 = vmax.f32 %v3246_v52, 0.0  ;;  %v3272_v52 = vadd.f32 %v9675_v43, %v10016_v3  ;;  %v7761_v43 = vld [vmem:[%s13173_s7 + $0x288] ss:$16 sps:$4 sm:$0xff]  }
 0x3b6   : > { %v10107_v35 = vpop.f32.mrf.mxu1  ;;  %3141 = vmatmul.mubr.bf16.gmra.mxu1 %v9882_v44  ;;  %v10110_v54 = vpop.f32.mrf.mxu0  ;;  %5789 = vmatprep.subr.bf16.mxu0 %v7751_v5  ;;  %v7755_v44 = vld [vmem:[%s13173_s7 + $0x2a8] ss:$16 sps:$4 sm:$0xff]   ;;  %v3260_v5 = vadd.f32 %v9618_v20, %v10037_v53 }
 0x3b7   : > { %13378 = vst [vmem:[#allocation40_spill] sm:$0xff] %v10110_v54  ;;  %3150 = vmatprep.mubr.bf16.mxu1 %v9910_v16  ;;  %v10123_v54 = vpack.c.bf16 %v3568_v45, %v3564_v31  ;;  %v7763_v16 = vld [vmem:[%s13173_s7 + $0x28c] ss:$16 sps:$4 sm:$0xff]  }
 0x3b8   : > { %v10116_v0 = vpop.f32.mrf.mxu1  ;;  %v10118_v11 = vpop.f32.mrf.mxu0  ;;  %v3576_v7 = vmax.f32 %v3260_v5, 0.0 }
 0x3b9   : > { %13379 = vst [vmem:[#allocation41_spill] sm:$0xff] %v10118_v11  ;;  %5790 = vmatpush1.bf16.msra.mxu0 %v7749_v60  ;;  %13380 = vst [vmem:[#allocation42_spill] sm:$0xff] %v10123_v54  ;;  %v13383_v60 = vld [vmem:[#allocation10_spill] sm:$0xff] }
 0x3ba   : > { %v10127_v21 = vpop.f32.mrf.mxu1  ;;  %v10129_v59 = vpop.f32.mrf.mxu0  ;;  %5791 = vmatprep.subr.bf16.mxu0 %v7757_v57  ;;  %v3256_v45 = vadd.f32 %v13383_v60, %v10037_v53  ;;  %v13385_v57 = vld [vmem:[#allocation12_spill] sm:$0xff] }
 0x3bb   : > { %13381 = vst [vmem:[#allocation43_spill] sm:$0xff] %v10129_v59  ;;  %v3268_v59 = vadd.f32 %v13385_v57, %v10016_v3  ;;  %v3585_v57 = vmax.f32 %v3272_v52, 0.0 }
 0x3bc   : > { %v10140_v31 = vpop.f32.mrf.mxu1  ;;  %v10142_v20 = vpop.f32.mrf.mxu0  ;;  %5124 = vmatmul.mubr.bf16.gmra.mxu0 %v10123_v54  ;;  %v7769_v54 = vld [vmem:[%s13173_s7 + $0x26c] ss:$16 sps:$4 sm:$0xff]  }
 0x3bd   : > { %13384 = vst [vmem:[#allocation10_spill] sm:$0xff] %v10142_v20  ;;  %5133 = vmatprep.mubr.bf16.mxu0 %v10136_v2  ;;  %5792 = vmatpush1.bf16.msra.mxu0 %v7755_v44  ;;  %v3572_v44 = vmax.f32 %v3256_v45, 0.0  ;;  %v3581_v5 = vmax.f32 %v3268_v59, 0.0  ;;  %v3282_v59 = vadd.f32 %v9721_v10, %v10016_v3  ;;  %v7773_v10 = vld [vmem:[%s13173_s7 + $0x248] ss:$16 sps:$4 sm:$0xff]  }
 0x3be   : > { %v10151_v30 = vpop.f32.mrf.mxu1  ;;  %3151 = vmatmul.mubr.bf16.gmra.mxu1 %v9912_v41  ;;  %v10154_v60 = vpop.f32.mrf.mxu0  ;;  %5793 = vmatprep.subr.bf16.mxu0 %v7763_v16  ;;  %v7767_v41 = vld [vmem:[%s13173_s7 + $0x268] ss:$16 sps:$4 sm:$0xff]  }
 0x3bf   : > { %13386 = vst [vmem:[#allocation12_spill] sm:$0xff] %v10154_v60  ;;  %3160 = vmatprep.mubr.bf16.mxu1 %v9942_v47  ;;  %v10167_v60 = vpack.c.bf16 %v3576_v7, %v3572_v44  ;;  %v13389_v16 = vld [vmem:[#allocation13_spill] sm:$0xff]  ;;  %v7775_v47 = vld [vmem:[%s13173_s7 + $0x24c] ss:$16 sps:$4 sm:$0xff]   ;;  %v10180_v45 = vpack.c.bf16 %v3585_v57, %v3581_v5 }
 0x3c0   : > { %v10160_v2 = vpop.f32.mrf.mxu1  ;;  %v10162_v11 = vpop.f32.mrf.mxu0  ;;  %v3270_v20 = vadd.f32 %v13389_v16, %v10037_v53 }
 0x3c1   : > { %13387 = vst [vmem:[#allocation45_spill] sm:$0xff] %v10162_v11  ;;  %5794 = vmatpush1.bf16.msra.mxu0 %v7761_v43  ;;  %13388 = vst [vmem:[#allocation46_spill] sm:$0xff] %v10167_v60  ;;  %v13392_v43 = vld [vmem:[#allocation11_spill] sm:$0xff]  ;;  %v3593_v11 = vmax.f32 %v3282_v59, 0.0 }
 0x3c2   : > { %v10171_v29 = vpop.f32.mrf.mxu1  ;;  %v10173_v52 = vpop.f32.mrf.mxu0  ;;  %5795 = vmatprep.subr.bf16.mxu0 %v7769_v54  ;;  %13391 = vst [vmem:[#allocation47_spill] sm:$0xff] %v10180_v45  ;;  %v3266_v7 = vadd.f32 %v13392_v43, %v10037_v53  ;;  %v13394_v54 = vld [vmem:[#allocation15_spill] sm:$0xff]  ;;  %v3584_v57 = vmax.f32 %v3270_v20, 0.0 }
 0x3c3   : > { %13390 = vst [vmem:[#allocation13_spill] sm:$0xff] %v10173_v52  ;;  %v3278_v52 = vadd.f32 %v13394_v54, %v10016_v3  ;;  %v7779_v20 = vld [vmem:[%s13173_s7 + $0x228] ss:$16 sps:$4 sm:$0xff]  }
 0x3c4   : > { %v10184_v44 = vpop.f32.mrf.mxu1  ;;  %v10186_v16 = vpop.f32.mrf.mxu0  ;;  %5134 = vmatmul.mubr.bf16.gmra.mxu0 %v10167_v60  ;;  %v3580_v60 = vmax.f32 %v3266_v7, 0.0 }
 0x3c5   : > { %13393 = vst [vmem:[#allocation11_spill] sm:$0xff] %v10186_v16  ;;  %5143 = vmatprep.mubr.bf16.mxu0 %v10180_v45  ;;  %5796 = vmatpush1.bf16.msra.mxu0 %v7767_v41  ;;  %v3589_v41 = vmax.f32 %v3278_v52, 0.0  ;;  %v3292_v52 = vadd.f32 %v9770_v38, %v10016_v3 }
 0x3c6   : > { %v10195_v5 = vpop.f32.mrf.mxu1  ;;  %3161 = vmatmul.mubr.bf16.gmra.mxu1 %v9944_v26  ;;  %v10198_v43 = vpop.f32.mrf.mxu0  ;;  %5797 = vmatprep.subr.bf16.mxu0 %v7775_v47  ;;  %v7781_v26 = vld [vmem:[%s13173_s7 + $0x22c] ss:$16 sps:$4 sm:$0xff]  }
 0x3c7   : > { %13395 = vst [vmem:[#allocation15_spill] sm:$0xff] %v10198_v43  ;;  %3170 = vmatprep.mubr.bf16.mxu1 %v9964_v18  ;;  %v10211_v43 = vpack.c.bf16 %v3584_v57, %v3580_v60  ;;  %v13398_v47 = vld [vmem:[#allocation16_spill] sm:$0xff]  ;;  %v3288_v57 = vadd.f32 %v9752_v48, %v10016_v3 }
 0x3c8   : > { %v10201_v54 = vpop.f32.mrf.mxu1  ;;  %v10203_v45 = vpop.f32.mrf.mxu0  ;;  %v3280_v18 = vadd.f32 %v13398_v47, %v10037_v53 }
 0x3c9   : > { %13396 = vst [vmem:[#allocation48_spill] sm:$0xff] %v10203_v45  ;;  %5798 = vmatpush1.bf16.msra.mxu0 %v7773_v10  ;;  %13397 = vst [vmem:[#allocation49_spill] sm:$0xff] %v10211_v43  ;;  %v10221_v10 = vpack.c.bf16 %v3593_v11, %v3589_v41  ;;  %v13401_v45 = vld [vmem:[#allocation14_spill] sm:$0xff] }
 0x3ca   : > { %v10215_v59 = vpop.f32.mrf.mxu1  ;;  %v10217_v7 = vpop.f32.mrf.mxu0  ;;  %5799 = vmatprep.subr.bf16.mxu0 %v7781_v26  ;;  %v3276_v16 = vadd.f32 %v13401_v45, %v10037_v53  ;;  %v3592_v47 = vmax.f32 %v3280_v18, 0.0  ;;  %v3601_v45 = vmax.f32 %v3292_v52, 0.0  ;;  %v13406_v52 = vld [vmem:[#allocation4_spill] sm:$0xff] }
 0x3cb   : > { %13399 = vst [vmem:[#allocation16_spill] sm:$0xff] %v10217_v7  ;;  %13400 = vst [vmem:[#allocation50_spill] sm:$0xff] %v10221_v10  ;;  %v3597_v7 = vmax.f32 %v3288_v57, 0.0  ;;  %v13408_v57 = vld [vmem:[#allocation17_spill] sm:$0xff] }
 0x3cc   : > { %v10225_v34 = vpop.f32.mrf.mxu1  ;;  %v10227_v60 = vpop.f32.mrf.mxu0  ;;  %5144 = vmatmul.mubr.bf16.gmra.mxu0 %v10211_v43  ;;  %v3588_v41 = vmax.f32 %v3276_v16, 0.0 }
 0x3cd   : > { %5153 = vmatprep.mubr.bf16.mxu0 %v10221_v10  ;;  %5800 = vmatpush1.bf16.msra.mxu0 %v7779_v20  ;;  %v3290_v20 = vadd.f32 %v9758_v23, %v10037_v53  ;;  %v10257_v16 = vpack.c.bf16 %v3601_v45, %v3597_v7  ;;  %v3298_v23 = vadd.f32 %v9799_v42, %v10016_v3 }
 0x3ce   : > { %v10233_v38 = vpop.f32.mrf.mxu1  ;;  %3171 = vmatmul.mubr.bf16.gmra.mxu1 %v9968_v17  ;;  %v10236_v11 = vpop.f32.mrf.mxu0  ;;  %v10243_v48 = vpack.c.bf16 %v3592_v47, %v3588_v41  ;;  %v3302_v17 = vadd.f32 %v9828_v51, %v10016_v3  ;;  %v3286_v47 = vadd.f32 %v13408_v57, %v10037_v53 }
 0x3cf   : > { %13402 = vst [vmem:[#allocation14_spill] sm:$0xff] %v10236_v11  ;;  %3180 = vmatprep.mubr.bf16.mxu1 %v9991_v25  ;;  %v10255_v25 = vrot.slane %v10010_v9, %v13406_v52  ;;  %13407 = vst [vmem:[#allocation54_spill] sm:$0xff] %v10257_v16  ;;  %v3600_v52 = vmax.f32 %v3290_v20, 0.0  ;;  %v7785_v20 = vld [vmem:[%s13173_s7 + $0x208] ss:$16 sps:$4 sm:$0xff]  }
 0x3d0   : > { %v10239_v26 = vpop.f32.mrf.mxu1  ;;  %v10241_v43 = vpop.f32.mrf.mxu0  ;;  %13404 = vst [vmem:[#allocation52_spill] sm:$0xff] %v10243_v48  ;;  %v3609_v57 = vmax.f32 %v3302_v17, 0.0 }
 0x3d1   : > { %13403 = vst [vmem:[#allocation51_spill] sm:$0xff] %v10241_v43  ;;  %v2889_v51 = vadd.f32 %v10060_v49, %v10255_v25  ;;  %v3605_v49 = vmax.f32 %v3298_v23, 0.0 }
 0x3d2   : > { %v10247_v18 = vpop.f32.mrf.mxu1  ;;  %v10249_v10 = vpop.f32.mrf.mxu0 }
 0x3d3   : > { %13405 = vst [vmem:[#allocation53_spill] sm:$0xff] %v10249_v10  ;;  %v2885_v10 = vadd.f32 %v10041_v28, %v10255_v25  ;;  %v3300_v28 = vadd.f32 %v9812_v46, %v10037_v53 }
 0x3d4   : > { %v10261_v41 = vpop.f32.mrf.mxu1  ;;  %v10263_v11 = vpop.f32.mrf.mxu0  ;;  %5154 = vmatmul.mubr.bf16.gmra.mxu0 %v10243_v48  ;;  %v3596_v48 = vmax.f32 %v3286_v47, 0.0 }
 0x3d5   : > { %13409 = vst [vmem:[#allocation17_spill] sm:$0xff] %v10263_v11  ;;  %5163 = vmatprep.mubr.bf16.mxu0 %v10257_v16  ;;  %v3559_v16 = vmax.f32 %v2889_v51, 0.0  ;;  %v3312_v51 = vadd.f32 %v9862_v50, %v10016_v3  ;;  %v10303_v11 = vpack.c.bf16 %v3609_v57, %v3605_v49  ;;  %v2899_v50 = vadd.f32 %v10096_v58, %v10255_v25 }
 0x3d6   : > { %v10271_v7 = vpop.f32.mrf.mxu1  ;;  %3181 = vmatmul.mubr.bf16.gmra.mxu1 %v9993_v4  ;;  %v10274_v45 = vpop.f32.mrf.mxu0  ;;  %v7787_v4 = vld [vmem:[%s13173_s7 + $0x20c] ss:$16 sps:$4 sm:$0xff]   ;;  %v10289_v17 = vpack.c.bf16 %v3600_v52, %v3596_v48  ;;  %v3296_v48 = vadd.f32 %v9778_v19, %v10037_v53  ;;  %v3608_v19 = vmax.f32 %v3300_v28, 0.0 }
 0x3d7   : > { %13410 = vst [vmem:[#allocation55_spill] sm:$0xff] %v10274_v45  ;;  %3190 = vmatprep.mubr.bf16.mxu1 %v10043_v63  ;;  %v13413_v63 = vld [vmem:[#allocation5_spill] sm:$0xff]  ;;  %13414 = vst [vmem:[#allocation58_spill] sm:$0xff] %v10303_v11  ;;  %5801 = vmatprep.subr.bf16.mxu0 %v7787_v4  ;;  %v3617_v4 = vmax.f32 %v3312_v51, 0.0 }
 0x3d8   : > { %v10279_v42 = vpop.f32.mrf.mxu1  ;;  %v10281_v43 = vpop.f32.mrf.mxu0  ;;  %13412 = vst [vmem:[#allocation57_spill] sm:$0xff] %v10289_v17  ;;  %v10295_v47 = vrot.slane %v10010_v9, %v13413_v63  ;;  %v3308_v63 = vadd.f32 %v9852_v24, %v10016_v3  ;;  %5802 = vmatpush1.bf16.msra.mxu0 %v7785_v20  ;;  %v2895_v24 = vadd.f32 %v10072_v61, %v10255_v25  ;;  %v3604_v58 = vmax.f32 %v3296_v48, 0.0 }
 0x3d9   : > { %13411 = vst [vmem:[#allocation56_spill] sm:$0xff] %v10281_v43  ;;  %v3555_v43 = vmax.f32 %v2885_v10, 0.0  ;;  %v3322_v61 = vadd.f32 %v9890_v33, %v10016_v3  ;;  %v7748_v33 = vld [vmem:[%s13173_s7 + $0xcc] ss:$16 sps:$4 sm:$0xff]  }
 0x3da   : > { %v10297_v45 = vpop.f32.mrf.mxu1  ;;  %v10299_v23 = vpop.f32.mrf.mxu0  ;;  %v2887_v46 = vadd.f32 %v10049_v56, %v10295_v47  ;;  %v2883_v56 = vadd.f32 %v10031_v13, %v10295_v47  ;;  %v3613_v28 = vmax.f32 %v3308_v63, 0.0  ;;  %v3567_v13 = vmax.f32 %v2899_v50, 0.0  ;;  %v7740_v63 = vld [vmem:[%s13173_s7 + $0xe8] ss:$16 sps:$4 sm:$0xff]  }
 0x3db   : > { %v10319_v10 = vpack.c.bf16 %v3559_v16, %v3555_v43  ;;  %v3563_v48 = vmax.f32 %v2895_v24, 0.0  ;;  %v3306_v50 = vadd.f32 %v9837_v37, %v10037_v53  ;;  %v2909_v37 = vadd.f32 %v10140_v31, %v10255_v25 }
 0x3dc   : > { %v10309_v52 = vpop.f32.mrf.mxu1  ;;  %v10311_v9 = vpop.f32.mrf.mxu0  ;;  %5164 = vmatmul.mubr.bf16.gmra.mxu0 %v10289_v17  ;;  %v3558_v43 = vmax.f32 %v2887_v46, 0.0  ;;  %v3554_v17 = vmax.f32 %v2883_v56, 0.0  ;;  %v10345_v46 = vpack.c.bf16 %v3617_v4, %v3613_v28  ;;  %v3318_v4 = vadd.f32 %v9878_v32, %v10016_v3  ;;  %v7746_v32 = vld [vmem:[%s13173_s7 + $0xc8] ss:$16 sps:$4 sm:$0xff]  }
 0x3dd   : > { %5173 = vmatprep.mubr.bf16.mxu0 %v10303_v11  ;;  %13415 = vst [vmem:[#allocation59_spill] sm:$0xff] %v10319_v10  ;;  %v10335_v11 = vpack.c.bf16 %v3608_v19, %v3604_v58  ;;  %v2893_v24 = vadd.f32 %v10066_v12, %v10295_v47  ;;  %v3625_v28 = vmax.f32 %v3322_v61, 0.0  ;;  %v3612_v31 = vmax.f32 %v3306_v50, 0.0  ;;  %v7754_v61 = vld [vmem:[%s13173_s7 + $0xac] ss:$16 sps:$4 sm:$0xff]  }
 0x3de   : > { %v10323_v57 = vpop.f32.mrf.mxu1  ;;  %3191 = vmatmul.mubr.bf16.gmra.mxu1 %v10047_v62  ;;  %v10326_v49 = vpop.f32.mrf.mxu0  ;;  %v3310_v62 = vadd.f32 %v9855_v40, %v10037_v53  ;;  %13419 = vst [vmem:[#allocation63_spill] sm:$0xff] %v10345_v46  ;;  %v10352_v19 = vpack.c.bf16 %v3558_v43, %v3554_v17  ;;  %v2897_v40 = vadd.f32 %v10083_v8, %v10295_v47  ;;  %v7793_v50 = vld [vmem:[%s13173_s7 + $0x3ec] ss:$16 sps:$4 sm:$0xff]  }
 0x3df   : > { %13416 = vst [vmem:[#allocation60_spill] sm:$0xff] %v10326_v49  ;;  %4760 = vmatprep.mubr.bf16.mxu1 %v10319_v10  ;;  %13417 = vst [vmem:[#allocation61_spill] sm:$0xff] %v10335_v11  ;;  %v10369_v17 = vpack.c.bf16 %v3567_v13, %v3563_v48  ;;  %v3621_v48 = vmax.f32 %v3318_v4, 0.0  ;;  %v3332_v4 = vadd.f32 %v9917_v15, %v10016_v3  ;;  %5803 = vmatprep.subr.bf16.mxu0 %v7793_v50 }
 0x3e0   : > { %v10331_v16 = vpop.f32.mrf.mxu1  ;;  %v10333_v20 = vpop.f32.mrf.mxu0  ;;  %13420 = vst [vmem:[#allocation64_spill] sm:$0xff] %v10352_v19  ;;  %v3616_v8 = vmax.f32 %v3310_v62, 0.0  ;;  %v3566_v13 = vmax.f32 %v2897_v40, 0.0 }
 0x3e1   : > { %13421 = vst [vmem:[#allocation65_spill] sm:$0xff] %v10369_v17  ;;  %v10403_v10 = vpack.c.bf16 %v3625_v28, %v3621_v48  ;;  %v3328_v28 = vadd.f32 %v9904_v14, %v10016_v3  ;;  %v2903_v48 = vadd.f32 %v10107_v35, %v10295_v47  ;;  %v3633_v50 = vmax.f32 %v3332_v4, 0.0 }
 0x3e2   : > { %v10339_v51 = vpop.f32.mrf.mxu1  ;;  %v10341_v49 = vpop.f32.mrf.mxu0  ;;  %v10395_v40 = vpack.c.bf16 %v3616_v8, %v3612_v31  ;;  %v13426_v8 = vld [vmem:[#allocation18_spill] sm:$0xff]  ;;  %v2915_v14 = vadd.f32 %v10160_v2, %v10255_v25 }
 0x3e3   : > { %13418 = vst [vmem:[#allocation62_spill] sm:$0xff] %v10341_v49  ;;  %v3316_v31 = vadd.f32 %v13426_v8, %v10037_v53  ;;  %v3629_v4 = vmax.f32 %v3328_v28, 0.0  ;;  %v3570_v8 = vmax.f32 %v2903_v48, 0.0  ;;  %v13431_v28 = vld [vmem:[#allocation6_spill] sm:$0xff] }
 0x3e4   : > { %v10356_v56 = vpop.f32.mrf.mxu1  ;;  %v10358_v58 = vpop.f32.mrf.mxu0  ;;  %5174 = vmatmul.mubr.bf16.gmra.mxu0 %v10335_v11  ;;  %v2905_v11 = vadd.f32 %v10116_v0, %v10255_v25  ;;  %v3575_v0 = vmax.f32 %v2909_v37, 0.0  ;;  %13423 = vst [vmem:[#allocation67_spill] sm:$0xff] %v10395_v40 }
 0x3e5   : > { %5183 = vmatprep.mubr.bf16.mxu0 %v10345_v46 }
 0x3e6   : > { %v10373_v43 = vpop.f32.mrf.mxu1  ;;  %4761 = vmatmul.mubr.bf16.vlgmr.msra.gmra.mxu1 %v10352_v19  ;;  %v10382_v62 = vpop.f32.mrf.mxu0  ;;  %v3571_v37 = vmax.f32 %v2905_v11, 0.0  ;;  %v7760_v11 = vld [vmem:[%s13173_s7 + $0x8c] ss:$16 sps:$4 sm:$0xff]  }
 0x3e7   : > { %5435 = vmatpush1.bf16.msra.mxu1 %v7740_v63  ;;  %4770 = vmatprep.mubr.bf16.mxu1 %v10369_v17  ;;  %13422 = vst [vmem:[#allocation66_spill] sm:$0xff] %v10382_v62  ;;  %v7791_v63 = vld [vmem:[%s13173_s7 + $0x3e8] ss:$16 sps:$4 sm:$0xff]  }
 0x3e8   : > { %v10384_v12 = vpop.f32.mrf.mxu1  ;;  %5436 = vmatprep.subr.bf16.mxu1 %v7748_v33  ;;  %v13424_v17 = vld [vmem:[#allocation19_spill] sm:$0xff]  ;;  %v3562_v33 = vmax.f32 %v2893_v24, 0.0  ;;  %v10414_v24 = vpop.f32.mrf.mxu0  ;;  %5804 = vmatpush2.bf16.msra.mxu0 %v7791_v63 }
 0x3e9   : > { %v3320_v19 = vadd.f32 %v13424_v17, %v10037_v53  ;;  %13425 = vst [vmem:[#allocation19_spill] sm:$0xff] %v10403_v10  ;;  %v7752_v62 = vld [vmem:[%s13173_s7 + $0xa8] ss:$16 sps:$4 sm:$0xff]   ;;  %v2907_v17 = vadd.f32 %v10127_v21, %v10295_v47  ;;  %v10427_v21 = vpack.c.bf16 %v3575_v0, %v3571_v37  ;;  %v3620_v0 = vmax.f32 %v3316_v31, 0.0 }
 0x3ea   : > { %v10399_v46 = vpop.f32.mrf.mxu1  ;;  %v10410_v49 = vpack.c.bf16 %v3566_v13, %v3562_v33  ;;  %v10440_v63 = vpop.f32.mrf.mxu0  ;;  %v7766_v33 = vld [vmem:[%s13173_s7 + $0x6c] ss:$16 sps:$4 sm:$0xff]   ;;  %v3342_v31 = vadd.f32 %v9940_v27, %v10016_v3 }
 0x3eb   : > { %5437 = vmatpush1.bf16.msra.mxu1 %v7746_v32  ;;  %v2919_v32 = vadd.f32 %v10184_v44, %v10255_v25  ;;  %13428 = vst [vmem:[#allocation68_spill] sm:$0xff] %v10427_v21  ;;  %v3624_v13 = vmax.f32 %v3320_v19, 0.0  ;;  %v7758_v44 = vld [vmem:[%s13173_s7 + $0x88] ss:$16 sps:$4 sm:$0xff]   ;;  %v3574_v19 = vmax.f32 %v2907_v17, 0.0  ;;  %v3579_v17 = vmax.f32 %v2915_v14, 0.0 }
 0x3ec   : > { %13427 = vst [vmem:[#allocation18_spill] sm:$0xff] %v10410_v49  ;;  %v10416_v15 = vpop.f32.mrf.mxu1  ;;  %5184 = vmatmul.mubr.bf16.gmra.mxu0 %v10395_v40  ;;  %5438 = vmatprep.subr.bf16.mxu1 %v7754_v61  ;;  %v10466_v48 = vpop.f32.mrf.mxu0  ;;  %v7772_v27 = vld [vmem:[%s13173_s7 + $0x4c] ss:$16 sps:$4 sm:$0xff]  }
 0x3ed   : > { %5193 = vmatprep.mubr.bf16.mxu0 %v10403_v10  ;;  %v3583_v2 = vmax.f32 %v2919_v32, 0.0  ;;  %v10447_v37 = vpack.c.bf16 %v3624_v13, %v3620_v0  ;;  %v3326_v32 = vadd.f32 %v13431_v28, %v10037_v53  ;;  %v10462_v13 = vpack.c.bf16 %v3574_v19, %v3570_v8 }
 0x3ee   : > { %v10431_v61 = vpop.f32.mrf.mxu1  ;;  %4771 = vmatmul.mubr.bf16.gmra.mxu1 %v10410_v49  ;;  %v10455_v49 = vpack.c.bf16 %v3633_v50, %v3629_v4  ;;  %v13433_v50 = vld [vmem:[#allocation21_spill] sm:$0xff]  ;;  %v2913_v4 = vadd.f32 %v10151_v30, %v10295_v47  ;;  %v2925_v28 = vadd.f32 %v10201_v54, %v10255_v25 }
 0x3ef   : > { %4780 = vmatprep.mubr.bf16.mxu1 %v10427_v21  ;;  %5439 = vmatpush1.bf16.msra.mxu1 %v7752_v62  ;;  %13429 = vst [vmem:[#allocation69_spill] sm:$0xff] %v10447_v37  ;;  %v3330_v62 = vadd.f32 %v9908_v55, %v10037_v53  ;;  %13432 = vst [vmem:[#allocation6_spill] sm:$0xff] %v10462_v13  ;;  %v2917_v55 = vadd.f32 %v10171_v29, %v10295_v47 }
 0x3f0   : > { %v10442_v35 = vpop.f32.mrf.mxu1  ;;  %5440 = vmatprep.subr.bf16.mxu1 %v7760_v11  ;;  %13430 = vst [vmem:[#allocation70_spill] sm:$0xff] %v10455_v49  ;;  %v7764_v11 = vld [vmem:[%s13173_s7 + $0x68] ss:$16 sps:$4 sm:$0xff]   ;;  %v3338_v14 = vadd.f32 %v13433_v50, %v10016_v3  ;;  %v10479_v29 = vpack.c.bf16 %v3583_v2, %v3579_v17  ;;  %v3628_v2 = vmax.f32 %v3326_v32, 0.0  ;;  %v10492_v17 = vpop.f32.mrf.mxu0  ;;  %v7799_v32 = vld [vmem:[%s13173_s7 + $0x3cc] ss:$16 sps:$4 sm:$0xff]  }
 0x3f1   : > { %v3632_v19 = vmax.f32 %v3330_v62, 0.0  ;;  %v3582_v62 = vmax.f32 %v2917_v55, 0.0  ;;  %13435 = vst [vmem:[#allocation71_spill] sm:$0xff] %v10492_v17  ;;  %5805 = vmatprep.subr.bf16.mxu0 %v7799_v32 }
 0x3f2   : > { %v10451_v21 = vpop.f32.mrf.mxu1  ;;  %13434 = vst [vmem:[#allocation21_spill] sm:$0xff] %v10479_v29  ;;  %v3637_v50 = vmax.f32 %v3338_v14, 0.0  ;;  %v3352_v14 = vadd.f32 %v9962_v6, %v10016_v3 }
 0x3f3   : > { %5441 = vmatpush1.bf16.msra.mxu1 %v7758_v44  ;;  %v2929_v44 = vadd.f32 %v10225_v34, %v10255_v25  ;;  %v7770_v34 = vld [vmem:[%s13173_s7 + $0x48] ss:$16 sps:$4 sm:$0xff]   ;;  %v10505_v55 = vpack.c.bf16 %v3632_v19, %v3628_v2 }
 0x3f4   : > { %v10468_v0 = vpop.f32.mrf.mxu1  ;;  %5194 = vmatmul.mubr.bf16.gmra.mxu0 %v10447_v37  ;;  %5442 = vmatprep.subr.bf16.mxu1 %v7766_v33  ;;  %v3641_v33 = vmax.f32 %v3342_v31, 0.0  ;;  %v7778_v31 = vld [vmem:[%s13173_s7 + $0x2c] ss:$16 sps:$4 sm:$0xff]   ;;  %v7776_v37 = vld [vmem:[%s13173_s7 + $0x28] ss:$16 sps:$4 sm:$0xff]   ;;  %v3649_v32 = vmax.f32 %v3352_v14, 0.0 }
 0x3f5   : > { %5203 = vmatprep.mubr.bf16.mxu0 %v10455_v49  ;;  %v3591_v54 = vmax.f32 %v2929_v44, 0.0  ;;  %13436 = vst [vmem:[#allocation72_spill] sm:$0xff] %v10505_v55  ;;  %v3587_v44 = vmax.f32 %v2925_v28, 0.0  ;;  %v13438_v19 = vld [vmem:[#allocation20_spill] sm:$0xff]  ;;  %v3348_v28 = vadd.f32 %v9952_v22, %v10016_v3  ;;  %v2935_v22 = vadd.f32 %v10239_v26, %v10255_v25 }
 0x3f6   : > { %v10483_v8 = vpop.f32.mrf.mxu1  ;;  %4781 = vmatmul.mubr.bf16.gmra.mxu1 %v10462_v13  ;;  %v10513_v49 = vpack.c.bf16 %v3641_v33, %v3637_v50  ;;  %v3336_v2 = vadd.f32 %v13438_v19, %v10037_v53  ;;  %v7784_v33 = vld [vmem:[%s13173_s7 + $0xc] ss:$16 sps:$4 sm:$0xff]   ;;  %v2923_v50 = vadd.f32 %v10195_v5, %v10295_v47 }
 0x3f7   : > { %4790 = vmatprep.mubr.bf16.mxu1 %v10479_v29  ;;  %5443 = vmatpush1.bf16.msra.mxu1 %v7764_v11  ;;  %v7797_v11 = vld [vmem:[%s13173_s7 + $0x3c8] ss:$16 sps:$4 sm:$0xff]   ;;  %v3340_v29 = vadd.f32 %v9934_v39, %v10037_v53  ;;  %v2927_v39 = vadd.f32 %v10215_v59, %v10295_v47  ;;  %v10537_v59 = vpack.c.bf16 %v3591_v54, %v3587_v44  ;;  %v3645_v14 = vmax.f32 %v3348_v28, 0.0 }
 0x3f8   : > { %v10494_v30 = vpop.f32.mrf.mxu1  ;;  %5444 = vmatprep.subr.bf16.mxu1 %v7772_v27  ;;  %v3578_v27 = vmax.f32 %v2913_v4, 0.0  ;;  %13437 = vst [vmem:[#allocation73_spill] sm:$0xff] %v10513_v49  ;;  %v10524_v4 = vpop.f32.mrf.mxu0  ;;  %5806 = vmatpush2.bf16.msra.mxu0 %v7797_v11  ;;  %v3636_v54 = vmax.f32 %v3336_v2, 0.0  ;;  %v3362_v2 = vadd.f32 %v9980_v36, %v10016_v3  ;;  %v13444_v28 = vld [vmem:[#allocation22_spill] sm:$0xff] }
 0x3f9   : > { %13440 = vst [vmem:[#allocation74_spill] sm:$0xff] %v10537_v59  ;;  %v7796_v36 = vld [vmem:[%s13173_s7 + $0x1cc] ss:$16 sps:$4 sm:$0xff]  }
 0x3fa   : > { %v10509_v13 = vpop.f32.mrf.mxu1  ;;  %v10520_v10 = vpack.c.bf16 %v3582_v62, %v3578_v27  ;;  %v3640_v62 = vmax.f32 %v3340_v29, 0.0  ;;  %v3590_v29 = vmax.f32 %v2927_v39, 0.0  ;;  %v10550_v11 = vpop.f32.mrf.mxu0  ;;  %v7790_v27 = vld [vmem:[%s13173_s7 + $0x1ec] ss:$16 sps:$4 sm:$0xff]   ;;  %v3595_v39 = vmax.f32 %v2935_v22, 0.0 }
 0x3fb   : > { %5445 = vmatpush1.bf16.msra.mxu1 %v7770_v34  ;;  %v2939_v34 = vadd.f32 %v10261_v41, %v10255_v25  ;;  %v7782_v41 = vld [vmem:[%s13173_s7 + $0x8] ss:$16 sps:$4 sm:$0xff]  }
 0x3fc   : > { %13439 = vst [vmem:[#allocation20_spill] sm:$0xff] %v10520_v10  ;;  %v10526_v6 = vpop.f32.mrf.mxu1  ;;  %5204 = vmatmul.mubr.bf16.gmra.mxu0 %v10505_v55  ;;  %5446 = vmatprep.subr.bf16.mxu1 %v7778_v31  ;;  %v10557_v44 = vpack.c.bf16 %v3640_v62, %v3636_v54  ;;  %v10576_v54 = vpop.f32.mrf.mxu0  ;;  %v7800_v55 = vld [vmem:[%s13173_s7 + $0x1a8] ss:$16 sps:$4 sm:$0xff]  }
 0x3fd   : > { %5213 = vmatprep.mubr.bf16.mxu0 %v10513_v49  ;;  %v3599_v26 = vmax.f32 %v2939_v34, 0.0  ;;  %v10565_v49 = vpack.c.bf16 %v3649_v32, %v3645_v14  ;;  %v3346_v34 = vadd.f32 %v13444_v28, %v10037_v53  ;;  %v3358_v32 = vadd.f32 %v9974_v1, %v10016_v3  ;;  %v7794_v1 = vld [vmem:[%s13173_s7 + $0x1c8] ss:$16 sps:$4 sm:$0xff]   ;;  %v7805_v28 = vld [vmem:[%s13173_s7 + $0x3ac] ss:$16 sps:$4 sm:$0xff]  }
 0x3fe   : > { %v10541_v31 = vpop.f32.mrf.mxu1  ;;  %4791 = vmatmul.mubr.bf16.gmra.mxu1 %v10520_v10  ;;  %13441 = vst [vmem:[#allocation75_spill] sm:$0xff] %v10557_v44  ;;  %v2945_v14 = vadd.f32 %v10279_v42, %v10255_v25  ;;  %5807 = vmatprep.subr.bf16.mxu0 %v7805_v28 }
 0x3ff   : > { %4800 = vmatprep.mubr.bf16.mxu1 %v10537_v59  ;;  %5447 = vmatpush1.bf16.msra.mxu1 %v7776_v37  ;;  %v13442_v37 = vld [vmem:[#allocation23_spill] sm:$0xff]  ;;  %v3586_v59 = vmax.f32 %v2923_v50, 0.0  ;;  %v2937_v50 = vadd.f32 %v10247_v18, %v10295_v47  ;;  %v10589_v18 = vpack.c.bf16 %v3599_v26, %v3595_v39  ;;  %v3653_v39 = vmax.f32 %v3358_v32, 0.0 }
 0x400   : > { %v10552_v5 = vpop.f32.mrf.mxu1  ;;  %5448 = vmatprep.subr.bf16.mxu1 %v7784_v33  ;;  %v3350_v19 = vadd.f32 %v13442_v37, %v10037_v53  ;;  %13443 = vst [vmem:[#allocation23_spill] sm:$0xff] %v10565_v49  ;;  %v7788_v33 = vld [vmem:[%s13173_s7 + $0x1e8] ss:$16 sps:$4 sm:$0xff]  }
 0x401   : > { %v10572_v62 = vpack.c.bf16 %v3590_v29, %v3586_v59  ;;  %v2949_v59 = vadd.f32 %v10309_v52, %v10255_v25  ;;  %13446 = vst [vmem:[#allocation76_spill] sm:$0xff] %v10589_v18  ;;  %v3644_v52 = vmax.f32 %v3346_v34, 0.0  ;;  %v3598_v26 = vmax.f32 %v2937_v50, 0.0  ;;  %v13449_v50 = vld [vmem:[#allocation25_spill] sm:$0xff] }
 0x402   : > { %v10561_v10 = vpop.f32.mrf.mxu1  ;;  %v3648_v22 = vmax.f32 %v3350_v19, 0.0  ;;  %v10602_v19 = vpop.f32.mrf.mxu0 }
 0x403   : > { %5449 = vmatpush1.bf16.msra.mxu1 %v7782_v41  ;;  %13445 = vst [vmem:[#allocation22_spill] sm:$0xff] %v10572_v62  ;;  %v2933_v41 = vadd.f32 %v10233_v38, %v10295_v47  ;;  %13447 = vst [vmem:[#allocation77_spill] sm:$0xff] %v10602_v19  ;;  %v3607_v42 = vmax.f32 %v2949_v59, 0.0  ;;  %v3603_v59 = vmax.f32 %v2945_v14, 0.0 }
 0x404   : > { %v10578_v37 = vpop.f32.mrf.mxu1  ;;  %5214 = vmatmul.mubr.bf16.gmra.mxu0 %v10557_v44  ;;  %5450 = vmatprep.subr.bf16.mxu1 %v7790_v27  ;;  %v3657_v27 = vmax.f32 %v3362_v2, 0.0  ;;  %v7802_v2 = vld [vmem:[%s13173_s7 + $0x1ac] ss:$16 sps:$4 sm:$0xff]   ;;  %v10615_v34 = vpack.c.bf16 %v3648_v22, %v3644_v52 }
 0x405   : > { %5223 = vmatprep.mubr.bf16.mxu0 %v10565_v49  ;;  %v13450_v49 = vld [vmem:[#allocation30_spill] sm:$0xff]  ;;  %v13452_v22 = vld [vmem:[#allocation24_spill] sm:$0xff] }
 0x406   : > { %v10593_v29 = vpop.f32.mrf.mxu1  ;;  %4801 = vmatmul.mubr.bf16.gmra.mxu1 %v10572_v62  ;;  %13448 = vst [vmem:[#allocation78_spill] sm:$0xff] %v10615_v34  ;;  %v3372_v32 = vadd.f32 %v13450_v49, %v10016_v3  ;;  %v10623_v44 = vpack.c.bf16 %v3657_v27, %v3653_v39  ;;  %v3356_v52 = vadd.f32 %v13452_v22, %v10037_v53  ;;  %v13455_v27 = vld [vmem:[#allocation27_spill] sm:$0xff] }
 0x407   : > { %4810 = vmatprep.mubr.bf16.mxu1 %v10589_v18  ;;  %5451 = vmatpush2.bf16.msra.mxu1 %v7788_v33  ;;  %v7803_v33 = vld [vmem:[%s13173_s7 + $0x3a8] ss:$16 sps:$4 sm:$0xff]   ;;  %v3360_v18 = vadd.f32 %v13449_v50, %v10037_v53  ;;  %v10634_v50 = vpop.f32.mrf.mxu0  ;;  %v3368_v14 = vadd.f32 %v13455_v27, %v10016_v3 }
 0x408   : > { %v10604_v38 = vpop.f32.mrf.mxu1  ;;  %5452 = vmatprep.subr.bf16.mxu1 %v7796_v36  ;;  %v3594_v36 = vmax.f32 %v2933_v41, 0.0  ;;  %13451 = vst [vmem:[#allocation25_spill] sm:$0xff] %v10623_v44  ;;  %v2947_v41 = vadd.f32 %v10297_v45, %v10295_v47  ;;  %13454 = vst [vmem:[#allocation24_spill] sm:$0xff] %v10634_v50  ;;  %5808 = vmatpush2.bf16.msra.mxu0 %v7803_v33  ;;  %v2943_v45 = vadd.f32 %v10271_v7, %v10295_v47  ;;  %v13459_v27 = vld [vmem:[#allocation28_spill] sm:$0xff] }
 0x409   : > { %v3656_v39 = vmax.f32 %v3360_v18, 0.0  ;;  %v3661_v18 = vmax.f32 %v3368_v14, 0.0  ;;  %v2957_v14 = vadd.f32 %v10339_v51, %v10295_v47  ;;  %v2953_v51 = vadd.f32 %v10323_v57, %v10295_v47 }
 0x40a   : > { %v10619_v62 = vpop.f32.mrf.mxu1  ;;  %v10630_v40 = vpack.c.bf16 %v3598_v26, %v3594_v36  ;;  %v10644_v26 = vpack.c.bf16 %v3607_v42, %v3603_v59  ;;  %v2955_v36 = vadd.f32 %v10331_v16, %v10255_v25  ;;  %v3606_v22 = vmax.f32 %v2947_v41, 0.0  ;;  %v10654_v42 = vpop.f32.mrf.mxu0  ;;  %v13460_v16 = vld [vmem:[#allocation36_spill] sm:$0xff]  ;;  %v13462_v41 = vld [vmem:[#allocation26_spill] sm:$0xff] }
 0x40b   : > { %5453 = vmatpush2.bf16.msra.mxu1 %v7794_v1  ;;  %v2959_v1 = vadd.f32 %v10356_v56, %v10255_v25  ;;  %v3652_v56 = vmax.f32 %v3356_v52, 0.0  ;;  %13457 = vst [vmem:[#allocation79_spill] sm:$0xff] %v10654_v42  ;;  %v3614_v57 = vmax.f32 %v2957_v14, 0.0 }
 0x40c   : > { %13453 = vst [vmem:[#allocation30_spill] sm:$0xff] %v10630_v40  ;;  %v10636_v49 = vpop.f32.mrf.mxu1  ;;  %5224 = vmatmul.mubr.bf16.gmra.mxu0 %v10615_v34  ;;  %5454 = vmatprep.subr.bf16.mxu1 %v7802_v2  ;;  %13456 = vst [vmem:[#allocation27_spill] sm:$0xff] %v10644_v26  ;;  %v3665_v2 = vmax.f32 %v3372_v32, 0.0  ;;  %v3602_v32 = vmax.f32 %v2943_v45, 0.0  ;;  %v3366_v34 = vadd.f32 %v13462_v41, %v10037_v53  ;;  %v13464_v45 = vld [vmem:[#allocation33_spill] sm:$0xff] }
 0x40d   : > { %5233 = vmatprep.mubr.bf16.mxu0 %v10623_v44  ;;  %v3615_v59 = vmax.f32 %v2959_v1, 0.0  ;;  %v10658_v7 = vpack.c.bf16 %v3656_v39, %v3652_v56  ;;  %v10674_v1 = vpop.f32.mrf.mxu0  ;;  %v3378_v56 = vadd.f32 %v13464_v45, %v10016_v3  ;;  %v7811_v45 = vld [vmem:[%s13173_s7 + $0x38c] ss:$16 sps:$4 sm:$0xff]  }
 0x40e   : > { %v10648_v28 = vpop.f32.mrf.mxu1  ;;  %4811 = vmatmul.mubr.bf16.gmra.mxu1 %v10630_v40  ;;  %v3370_v40 = vadd.f32 %v13459_v27, %v10037_v53  ;;  %v10666_v52 = vpack.c.bf16 %v3665_v2, %v3661_v18  ;;  %v10670_v19 = vpack.c.bf16 %v3606_v22, %v3602_v32  ;;  %v2969_v2 = vadd.f32 %v10416_v15, %v10255_v25  ;;  %v7806_v15 = vld [vmem:[%s13173_s7 + $0x188] ss:$16 sps:$4 sm:$0xff]  }
 0x40f   : > { %4820 = vmatprep.mubr.bf16.mxu1 %v10644_v26  ;;  %5455 = vmatpush2.bf16.msra.mxu1 %v7800_v55  ;;  %13458 = vst [vmem:[#allocation80_spill] sm:$0xff] %v10658_v7  ;;  %v3382_v26 = vadd.f32 %v13460_v16, %v10016_v3  ;;  %v3611_v55 = vmax.f32 %v2955_v36, 0.0  ;;  %v2965_v32 = vadd.f32 %v10384_v12, %v10255_v25  ;;  %v10700_v16 = vpop.f32.mrf.mxu0  ;;  %v7809_v12 = vld [vmem:[%s13173_s7 + $0x388] ss:$16 sps:$4 sm:$0xff]  }
 0x410   : > { %v10656_v33 = vpop.f32.mrf.mxu1  ;;  %13461 = vst [vmem:[#allocation28_spill] sm:$0xff] %v10666_v52  ;;  %13463 = vst [vmem:[#allocation36_spill] sm:$0xff] %v10670_v19  ;;  %v3664_v22 = vmax.f32 %v3370_v40, 0.0  ;;  %v7808_v40 = vld [vmem:[%s13173_s7 + $0x18c] ss:$16 sps:$4 sm:$0xff]   ;;  %v3623_v41 = vmax.f32 %v2969_v2, 0.0  ;;  %5809 = vmatprep.subr.bf16.mxu0 %v7811_v45  ;;  %v2975_v45 = vadd.f32 %v10442_v35, %v10255_v25 }
 0x411   : > { %v10684_v36 = vpack.c.bf16 %v3615_v59, %v3611_v55  ;;  %v3673_v27 = vmax.f32 %v3382_v26, 0.0  ;;  %v3660_v59 = vmax.f32 %v3366_v34, 0.0  ;;  %13466 = vst [vmem:[#allocation33_spill] sm:$0xff] %v10700_v16  ;;  %v3669_v26 = vmax.f32 %v3378_v56, 0.0  ;;  %5456 = vmatprep.subr.bf16.mxu1 %v7808_v40  ;;  %v13468_v34 = vld [vmem:[#allocation34_spill] sm:$0xff]  ;;  %v13469_v56 = vld [vmem:[#allocation7_spill] sm:$0xff]  ;;  %5810 = vmatpush2.bf16.msra.mxu0 %v7809_v12 }
 0x412   : > { %v10662_v44 = vpop.f32.mrf.mxu1  ;;  %v3380_v14 = vadd.f32 %v13468_v34, %v10037_v53  ;;  %v3392_v2 = vadd.f32 %v13469_v56, %v10016_v3  ;;  %v3619_v40 = vmax.f32 %v2965_v32, 0.0  ;;  %v13471_v16 = vld [vmem:[#allocation31_spill] sm:$0xff]  ;;  %v13479_v35 = vld [vmem:[#allocation10_spill] sm:$0xff] }
 0x413   : > { %13465 = vst [vmem:[#allocation26_spill] sm:$0xff] %v10684_v36  ;;  %5457 = vmatpush2.bf16.msra.mxu1 %v7806_v15  ;;  %v3376_v42 = vadd.f32 %v13471_v16, %v10037_v53  ;;  %v13474_v15 = vld [vmem:[#allocation37_spill] sm:$0xff] }
 0x414   : > { %v10676_v39 = vpop.f32.mrf.mxu1  ;;  %5234 = vmatmul.mubr.bf16.gmra.mxu0 %v10658_v7  ;;  %v10718_v7 = vpack.c.bf16 %v3673_v27, %v3669_v26  ;;  %v3388_v32 = vadd.f32 %v13474_v15, %v10016_v3  ;;  %v2979_v27 = vadd.f32 %v10468_v0, %v10255_v25  ;;  %v10736_v16 = vpack.c.bf16 %v3623_v41, %v3619_v40 }
 0x415   : > { %5243 = vmatprep.mubr.bf16.mxu0 %v10666_v52  ;;  %v3681_v26 = vmax.f32 %v3392_v2, 0.0  ;;  %v3668_v0 = vmax.f32 %v3376_v42, 0.0 }
 0x416   : > { %v10688_v18 = vpop.f32.mrf.mxu1  ;;  %4821 = vmatmul.mubr.bf16.gmra.mxu1 %v10670_v19  ;;  %v3610_v19 = vmax.f32 %v2953_v51, 0.0  ;;  %13470 = vst [vmem:[#allocation34_spill] sm:$0xff] %v10718_v7  ;;  %13475 = vst [vmem:[#allocation37_spill] sm:$0xff] %v10736_v16  ;;  %v3677_v12 = vmax.f32 %v3388_v32, 0.0  ;;  %v13481_v32 = vld [vmem:[#allocation8_spill] sm:$0xff] }
 0x417   : > { %4830 = vmatprep.mubr.bf16.mxu1 %v10684_v36  ;;  %v10710_v36 = vpack.c.bf16 %v3664_v22, %v3660_v59  ;;  %v2967_v22 = vadd.f32 %v10399_v46, %v10295_v47  ;;  %v10726_v59 = vpop.f32.mrf.mxu0  ;;  %v2963_v46 = vadd.f32 %v10373_v43, %v10295_v47  ;;  %v13478_v43 = vld [vmem:[#allocation9_spill] sm:$0xff] }
 0x418   : > { %v10702_v55 = vpop.f32.mrf.mxu1  ;;  %v10722_v50 = vpack.c.bf16 %v3614_v57, %v3610_v19  ;;  %13473 = vst [vmem:[#allocation31_spill] sm:$0xff] %v10726_v59  ;;  %v3672_v19 = vmax.f32 %v3380_v14, 0.0  ;;  %v3631_v14 = vmax.f32 %v2979_v27, 0.0  ;;  %v3390_v15 = vadd.f32 %v13478_v43, %v10037_v53 }
 0x419   : > { %13467 = vst [vmem:[#allocation81_spill] sm:$0xff] %v10710_v36  ;;  %v3622_v34 = vmax.f32 %v2967_v22, 0.0  ;;  %v10746_v56 = vpop.f32.mrf.mxu0  ;;  %v10758_v42 = vpack.c.bf16 %v3681_v26, %v3677_v12  ;;  %v7814_v22 = vld [vmem:[%s13173_s7 + $0x36c] ss:$16 sps:$4 sm:$0xff]   ;;  %v3386_v27 = vadd.f32 %v13481_v32, %v10037_v53  ;;  %v7812_v26 = vld [vmem:[%s13173_s7 + $0x368] ss:$16 sps:$4 sm:$0xff]  }
 0x41a   : > { %v10714_v52 = vpop.f32.mrf.mxu1  ;;  %13472 = vst [vmem:[#allocation7_spill] sm:$0xff] %v10722_v50  ;;  %13476 = vst [vmem:[#allocation82_spill] sm:$0xff] %v10746_v56  ;;  %v10750_v40 = vpack.c.bf16 %v3672_v19, %v3668_v0  ;;  %5811 = vmatprep.subr.bf16.mxu0 %v7814_v22  ;;  %v13489_v56 = vld [vmem:[#allocation11_spill] sm:$0xff] }
 0x41b   : > { %13480 = vst [vmem:[#allocation9_spill] sm:$0xff] %v10758_v42  ;;  %v10769_v0 = vpop.f32.mrf.mxu0  ;;  %5812 = vmatpush2.bf16.msra.mxu0 %v7812_v26  ;;  %v3412_v59 = vadd.f32 %v13489_v56, %v10016_v3  ;;  %v7821_v56 = vld [vmem:[%s13173_s7 + $0x328] ss:$16 sps:$4 sm:$0xff]  }
 0x41c   : > { %v10728_v51 = vpop.f32.mrf.mxu1  ;;  %5244 = vmatmul.mubr.bf16.gmra.mxu0 %v10710_v36  ;;  %13477 = vst [vmem:[#allocation83_spill] sm:$0xff] %v10750_v40  ;;  %13483 = vst [vmem:[#allocation8_spill] sm:$0xff] %v10769_v0 }
 0x41d   : > { %5253 = vmatprep.mubr.bf16.mxu0 %v10718_v7  ;;  %v3402_v7 = vadd.f32 %v13479_v35, %v10016_v3  ;;  %v2973_v35 = vadd.f32 %v10431_v61, %v10295_v47  ;;  %v10786_v32 = vpop.f32.mrf.mxu0  ;;  %v7817_v61 = vld [vmem:[%s13173_s7 + $0x16c] ss:$16 sps:$4 sm:$0xff]  }
 0x41e   : > { %v10740_v57 = vpop.f32.mrf.mxu1  ;;  %4831 = vmatmul.mubr.bf16.gmra.mxu1 %v10722_v50  ;;  %v3618_v50 = vmax.f32 %v2963_v46, 0.0  ;;  %v2977_v46 = vadd.f32 %v10451_v21, %v10295_v47  ;;  %v3680_v21 = vmax.f32 %v3390_v15, 0.0  ;;  %13486 = vst [vmem:[#allocation84_spill] sm:$0xff] %v10786_v32  ;;  %5458 = vmatprep.subr.bf16.mxu1 %v7817_v61  ;;  %v2999_v61 = vadd.f32 %v10578_v37, %v10255_v25  ;;  %v7826_v37 = vld [vmem:[%s13173_s7 + $0x30c] ss:$16 sps:$4 sm:$0xff]  }
 0x41f   : > { %4840 = vmatprep.mubr.bf16.mxu1 %v10736_v16  ;;  %v3627_v16 = vmax.f32 %v2975_v45, 0.0  ;;  %v13484_v45 = vld [vmem:[#allocation41_spill] sm:$0xff] }
 0x420   : > { %v10748_v41 = vpop.f32.mrf.mxu1  ;;  %v10765_v19 = vpack.c.bf16 %v3622_v34, %v3618_v50  ;;  %v3398_v12 = vadd.f32 %v13484_v45, %v10016_v3  ;;  %v2989_v50 = vadd.f32 %v10526_v6, %v10255_v25  ;;  %v3689_v45 = vmax.f32 %v3402_v7, 0.0  ;;  %v7818_v7 = vld [vmem:[%s13173_s7 + $0x348] ss:$16 sps:$4 sm:$0xff]  }
 0x421   : > { %v10782_v34 = vpack.c.bf16 %v3631_v14, %v3627_v16  ;;  %v2985_v6 = vadd.f32 %v10494_v30, %v10255_v25  ;;  %v7815_v16 = vld [vmem:[%s13173_s7 + $0x168] ss:$16 sps:$4 sm:$0xff]   ;;  %v3676_v14 = vmax.f32 %v3386_v27, 0.0  ;;  %v3630_v15 = vmax.f32 %v2977_v46, 0.0  ;;  %v7820_v30 = vld [vmem:[%s13173_s7 + $0x34c] ss:$16 sps:$4 sm:$0xff]   ;;  %v10812_v46 = vpop.f32.mrf.mxu0 }
 0x422   : > { %v10754_v2 = vpop.f32.mrf.mxu1  ;;  %13482 = vst [vmem:[#allocation10_spill] sm:$0xff] %v10765_v19  ;;  %v3685_v26 = vmax.f32 %v3398_v12, 0.0  ;;  %v3626_v27 = vmax.f32 %v2973_v35, 0.0  ;;  %5459 = vmatpush2.bf16.msra.mxu1 %v7815_v16  ;;  %5813 = vmatprep.subr.bf16.mxu0 %v7820_v30  ;;  %v7823_v12 = vld [vmem:[%s13173_s7 + $0x32c] ss:$16 sps:$4 sm:$0xff]   ;;  %v2987_v35 = vadd.f32 %v10509_v13, %v10295_v47 }
 0x423   : > { %13485 = vst [vmem:[#allocation41_spill] sm:$0xff] %v10782_v34  ;;  %v3635_v0 = vmax.f32 %v2985_v6, 0.0  ;;  %5814 = vmatpush2.bf16.msra.mxu0 %v7818_v7  ;;  %v10844_v7 = vpop.f32.mrf.mxu0 }
 0x424   : > { %v10771_v43 = vpop.f32.mrf.mxu1  ;;  %5254 = vmatmul.mubr.bf16.gmra.mxu0 %v10750_v40  ;;  %v10818_v17 = vpack.c.bf16 %v3689_v45, %v3685_v26  ;;  %v13493_v45 = vld [vmem:[#allocation45_spill] sm:$0xff]  ;;  %5815 = vmatprep.subr.bf16.mxu0 %v7823_v12  ;;  %v3697_v26 = vmax.f32 %v3412_v59, 0.0  ;;  %v3647_v59 = vmax.f32 %v2999_v61, 0.0 }
 0x425   : > { %5263 = vmatprep.mubr.bf16.mxu0 %v10758_v42  ;;  %v13488_v42 = vld [vmem:[#allocation43_spill] sm:$0xff]  ;;  %v3408_v6 = vadd.f32 %v13493_v45, %v10016_v3 }
 0x426   : > { %v10788_v40 = vpop.f32.mrf.mxu1  ;;  %4841 = vmatmul.mubr.bf16.gmra.mxu1 %v10765_v19  ;;  %v10808_v19 = vpack.c.bf16 %v3680_v21, %v3676_v14  ;;  %v3400_v36 = vadd.f32 %v13488_v42, %v10037_v53  ;;  %13490 = vst [vmem:[#allocation43_spill] sm:$0xff] %v10818_v17  ;;  %v13491_v42 = vld [vmem:[#allocation40_spill] sm:$0xff]  ;;  %v10825_v21 = vpack.c.bf16 %v3630_v15, %v3626_v27 }
 0x427   : > { %4850 = vmatprep.mubr.bf16.mxu1 %v10782_v34  ;;  %v3639_v34 = vmax.f32 %v2989_v50, 0.0  ;;  %v3396_v50 = vadd.f32 %v13491_v42, %v10037_v53  ;;  %v2983_v15 = vadd.f32 %v10483_v8, %v10295_v47  ;;  %v2995_v27 = vadd.f32 %v10552_v5, %v10255_v25  ;;  %5816 = vmatpush2.bf16.msra.mxu0 %v7821_v56  ;;  %v13496_v5 = vld [vmem:[#allocation13_spill] sm:$0xff] }
 0x428   : > { %v10800_v22 = vpop.f32.mrf.mxu1  ;;  %13487 = vst [vmem:[#allocation85_spill] sm:$0xff] %v10808_v19  ;;  %13492 = vst [vmem:[#allocation11_spill] sm:$0xff] %v10825_v21  ;;  %v3688_v13 = vmax.f32 %v3400_v36, 0.0  ;;  %v3693_v12 = vmax.f32 %v3408_v6, 0.0  ;;  %5817 = vmatprep.subr.bf16.mxu0 %v7826_v37  ;;  %v3410_v56 = vadd.f32 %v13496_v5, %v10037_v53  ;;  %v13498_v6 = vld [vmem:[#allocation12_spill] sm:$0xff]  ;;  %v2997_v37 = vadd.f32 %v10561_v10, %v10295_v47 }
 0x429   : > { %v10840_v14 = vpack.c.bf16 %v3639_v34, %v3635_v0  ;;  %v3684_v36 = vmax.f32 %v3396_v50, 0.0  ;;  %v3638_v0 = vmax.f32 %v2987_v35, 0.0  ;;  %v7824_v34 = vld [vmem:[%s13173_s7 + $0x308] ss:$16 sps:$4 sm:$0xff]   ;;  %v3634_v45 = vmax.f32 %v2983_v15, 0.0 }
 0x42a   : > { %v10814_v32 = vpop.f32.mrf.mxu1  ;;  %v3422_v50 = vadd.f32 %v10227_v60, %v10016_v3  ;;  %v3643_v35 = vmax.f32 %v2995_v27, 0.0  ;;  %v3406_v61 = vadd.f32 %v13498_v6, %v10037_v53  ;;  %v13501_v60 = vld [vmem:[#allocation48_spill] sm:$0xff]  ;;  %v2993_v10 = vadd.f32 %v10541_v31, %v10295_v47 }
 0x42b   : > { %13494 = vst [vmem:[#allocation40_spill] sm:$0xff] %v10840_v14  ;;  %v10860_v42 = vpack.c.bf16 %v3688_v13, %v3684_v36  ;;  %5818 = vmatpush2.bf16.msra.mxu0 %v7824_v34  ;;  %v10874_v13 = vpack.c.bf16 %v3638_v0, %v3634_v45  ;;  %v3418_v27 = vadd.f32 %v13501_v60, %v10016_v3  ;;  %v3696_v0 = vmax.f32 %v3410_v56, 0.0  ;;  %v13505_v31 = vld [vmem:[#allocation16_spill] sm:$0xff] }
 0x42c   : > { %v10829_v16 = vpop.f32.mrf.mxu1  ;;  %5264 = vmatmul.mubr.bf16.gmra.mxu0 %v10808_v19  ;;  %v10888_v34 = vpack.c.bf16 %v3647_v59, %v3643_v35  ;;  %v3705_v5 = vmax.f32 %v3422_v50, 0.0  ;;  %v3005_v45 = vadd.f32 %v10604_v38, %v10255_v25  ;;  %v3692_v6 = vmax.f32 %v3406_v61, 0.0  ;;  %v13506_v38 = vld [vmem:[#allocation17_spill] sm:$0xff] }
 0x42d   : > { %5273 = vmatprep.mubr.bf16.mxu0 %v10818_v17  ;;  %13495 = vst [vmem:[#allocation45_spill] sm:$0xff] %v10860_v42  ;;  %v10870_v17 = vpack.c.bf16 %v3697_v26, %v3693_v12  ;;  %13499 = vst [vmem:[#allocation12_spill] sm:$0xff] %v10874_v13  ;;  %v3009_v26 = vadd.f32 %v10636_v49, %v10255_v25  ;;  %v3646_v49 = vmax.f32 %v2997_v37, 0.0  ;;  %v3701_v56 = vmax.f32 %v3418_v27, 0.0  ;;  %v13508_v37 = vld [vmem:[#allocation15_spill] sm:$0xff] }
 0x42e   : > { %v10846_v30 = vpop.f32.mrf.mxu1  ;;  %4851 = vmatmul.mubr.bf16.gmra.mxu1 %v10825_v21  ;;  %13502 = vst [vmem:[#allocation48_spill] sm:$0xff] %v10888_v34  ;;  %v3432_v19 = vadd.f32 %v13506_v38, %v10016_v3  ;;  %v3007_v27 = vadd.f32 %v10619_v62, %v10295_v47  ;;  %v7827_v62 = vld [vmem:[%s13173_s7 + $0x148] ss:$16 sps:$4 sm:$0xff]  }
 0x42f   : > { %4860 = vmatprep.mubr.bf16.mxu1 %v10840_v14  ;;  %v10864_v14 = vpop.f32.mrf.mxu0  ;;  %13497 = vst [vmem:[#allocation13_spill] sm:$0xff] %v10870_v17  ;;  %v3655_v35 = vmax.f32 %v3009_v26, 0.0  ;;  %v10910_v61 = vpack.c.bf16 %v3705_v5, %v3701_v56  ;;  %v3019_v5 = vadd.f32 %v10676_v39, %v10255_v25  ;;  %v3003_v56 = vadd.f32 %v10593_v29, %v10295_v47 }
 0x430   : > { %v10855_v8 = vpop.f32.mrf.mxu1  ;;  %v3713_v39 = vmax.f32 %v3432_v19, 0.0  ;;  %v3654_v38 = vmax.f32 %v3007_v27, 0.0 }
 0x431   : > { %v10878_v15 = vpop.f32.mrf.mxu0  ;;  %13507 = vst [vmem:[#allocation16_spill] sm:$0xff] %v10910_v61  ;;  %v3663_v29 = vmax.f32 %v3019_v5, 0.0 }
 0x432   : > { %v10866_v21 = vpop.f32.mrf.mxu1  ;;  %13500 = vst [vmem:[#allocation86_spill] sm:$0xff] %v10878_v15  ;;  %v3416_v15 = vadd.f32 %v13508_v37, %v10037_v53 }
 0x433   : > { %v10898_v60 = vpop.f32.mrf.mxu0 }
 0x434   : > { %v10880_v36 = vpop.f32.mrf.mxu1  ;;  %5274 = vmatmul.mubr.bf16.gmra.mxu0 %v10860_v42  ;;  %13503 = vst [vmem:[#allocation87_spill] sm:$0xff] %v10898_v60  ;;  %v3420_v42 = vadd.f32 %v13505_v31, %v10037_v53 }
 0x435   : > { %5283 = vmatprep.mubr.bf16.mxu0 %v10870_v17  ;;  %v10902_v17 = vpack.c.bf16 %v3696_v0, %v3692_v6  ;;  %v10918_v26 = vpop.f32.mrf.mxu0 }
 0x436   : > { %v10892_v12 = vpop.f32.mrf.mxu1  ;;  %4861 = vmatmul.mubr.bf16.gmra.mxu1 %v10874_v13  ;;  %v3642_v13 = vmax.f32 %v2993_v10, 0.0  ;;  %13510 = vst [vmem:[#allocation15_spill] sm:$0xff] %v10918_v26  ;;  %v13511_v10 = vld [vmem:[#allocation51_spill] sm:$0xff] }
 0x437   : > { %4870 = vmatprep.mubr.bf16.mxu1 %v10888_v34  ;;  %13504 = vst [vmem:[#allocation88_spill] sm:$0xff] %v10902_v17  ;;  %v3651_v34 = vmax.f32 %v3005_v45, 0.0  ;;  %v3428_v6 = vadd.f32 %v13511_v10, %v10016_v3  ;;  %v10944_v37 = vpop.f32.mrf.mxu0 }
 0x438   : > { %v10900_v59 = vpop.f32.mrf.mxu1  ;;  %v10914_v60 = vpack.c.bf16 %v3646_v49, %v3642_v13  ;;  %v7829_v13 = vld [vmem:[%s13173_s7 + $0x14c] ss:$16 sps:$4 sm:$0xff]   ;;  %v3704_v49 = vmax.f32 %v3420_v42, 0.0 }
 0x439   : > { %v10928_v45 = vpack.c.bf16 %v3655_v35, %v3651_v34  ;;  %v3015_v34 = vadd.f32 %v10656_v33, %v10255_v25  ;;  %5460 = vmatprep.subr.bf16.mxu1 %v7829_v13  ;;  %v3700_v35 = vmax.f32 %v3416_v15, 0.0  ;;  %v3709_v42 = vmax.f32 %v3428_v6, 0.0  ;;  %v10952_v26 = vpop.f32.mrf.mxu0 }
 0x43a   : > { %v10906_v50 = vpop.f32.mrf.mxu1  ;;  %13509 = vst [vmem:[#allocation17_spill] sm:$0xff] %v10914_v60  ;;  %5461 = vmatpush2.bf16.msra.mxu1 %v7827_v62  ;;  %v3442_v15 = vadd.f32 %v10311_v9, %v10016_v3  ;;  %v13517_v62 = vld [vmem:[#allocation14_spill] sm:$0xff]  ;;  %v3029_v9 = vadd.f32 %v10728_v51, %v10255_v25 }
 0x43b   : > { %13512 = vst [vmem:[#allocation51_spill] sm:$0xff] %v10928_v45  ;;  %v3659_v27 = vmax.f32 %v3015_v34, 0.0  ;;  %v10958_v13 = vpack.c.bf16 %v3713_v39, %v3709_v42  ;;  %v3426_v6 = vadd.f32 %v13517_v62, %v10037_v53  ;;  %v3025_v62 = vadd.f32 %v10702_v55, %v10255_v25 }
 0x43c   : > { %v10920_v0 = vpop.f32.mrf.mxu1  ;;  %5284 = vmatmul.mubr.bf16.gmra.mxu0 %v10902_v17  ;;  %v3650_v17 = vmax.f32 %v3003_v56, 0.0  ;;  %v13519_v56 = vld [vmem:[#allocation56_spill] sm:$0xff]  ;;  %v3721_v42 = vmax.f32 %v3442_v15, 0.0  ;;  %v3452_v55 = vadd.f32 %v10358_v58, %v10016_v3  ;;  %v3039_v58 = vadd.f32 %v10771_v43, %v10255_v25 }
 0x43d   : > { %5293 = vmatprep.mubr.bf16.mxu0 %v10910_v61  ;;  %v10948_v61 = vpack.c.bf16 %v3704_v49, %v3700_v35  ;;  %13516 = vst [vmem:[#allocation90_spill] sm:$0xff] %v10958_v13  ;;  %v3017_v49 = vadd.f32 %v10662_v44, %v10295_v47  ;;  %v3438_v35 = vadd.f32 %v13519_v56, %v10016_v3  ;;  %v3708_v51 = vmax.f32 %v3426_v6, 0.0 }
 0x43e   : > { %v10938_v31 = vpop.f32.mrf.mxu1  ;;  %4871 = vmatmul.mubr.bf16.gmra.mxu1 %v10914_v60  ;;  %v13514_v60 = vld [vmem:[#allocation53_spill] sm:$0xff]  ;;  %v10962_v5 = vpack.c.bf16 %v3654_v38, %v3650_v17  ;;  %v10974_v39 = vpack.c.bf16 %v3663_v29, %v3659_v27  ;;  %v3013_v17 = vadd.f32 %v10648_v28, %v10295_v47  ;;  %v10978_v38 = vpop.f32.mrf.mxu0  ;;  %v3671_v27 = vmax.f32 %v3029_v9, 0.0 }
 0x43f   : > { %4880 = vmatprep.mubr.bf16.mxu1 %v10928_v45  ;;  %13513 = vst [vmem:[#allocation89_spill] sm:$0xff] %v10948_v61  ;;  %v3430_v19 = vadd.f32 %v13514_v60, %v10037_v53  ;;  %13515 = vst [vmem:[#allocation53_spill] sm:$0xff] %v10952_v26  ;;  %v3662_v56 = vmax.f32 %v3017_v49, 0.0  ;;  %v3440_v28 = vadd.f32 %v10299_v23, %v10037_v53  ;;  %v13523_v49 = vld [vmem:[#allocation55_spill] sm:$0xff]  ;;  %v3729_v43 = vmax.f32 %v3452_v55, 0.0 }
 0x440   : > { %v10946_v10 = vpop.f32.mrf.mxu1  ;;  %13518 = vst [vmem:[#allocation14_spill] sm:$0xff] %v10962_v5  ;;  %13520 = vst [vmem:[#allocation56_spill] sm:$0xff] %v10974_v39  ;;  %v10992_v45 = vpop.f32.mrf.mxu0 }
 0x441   : > { %v3712_v34 = vmax.f32 %v3430_v19, 0.0  ;;  %v3717_v19 = vmax.f32 %v3438_v35, 0.0  ;;  %v3436_v35 = vadd.f32 %v13523_v49, %v10037_v53 }
 0x442   : > { %v10954_v33 = vpop.f32.mrf.mxu1 }
 0x443   : > { %v10998_v6 = vpack.c.bf16 %v3721_v42, %v3717_v19  ;;  %v3716_v19 = vmax.f32 %v3436_v35, 0.0 }
 0x444   : > { %v10966_v60 = vpop.f32.mrf.mxu1  ;;  %5294 = vmatmul.mubr.bf16.gmra.mxu0 %v10948_v61  ;;  %v3658_v61 = vmax.f32 %v3013_v17, 0.0  ;;  %v3448_v17 = vadd.f32 %v10333_v20, %v10016_v3  ;;  %v11024_v20 = vpop.f32.mrf.mxu0 }
 0x445   : > { %5303 = vmatprep.mubr.bf16.mxu0 %v10958_v13  ;;  %v10988_v13 = vpack.c.bf16 %v3712_v34, %v3708_v51  ;;  %13522 = vst [vmem:[#allocation92_spill] sm:$0xff] %v10998_v6  ;;  %v3027_v34 = vadd.f32 %v10714_v52, %v10295_v47  ;;  %v7832_v52 = vld [vmem:[%s13173_s7 + $0x12c] ss:$16 sps:$4 sm:$0xff]   ;;  %v3023_v51 = vadd.f32 %v10688_v18, %v10295_v47 }
 0x446   : > { %v10980_v44 = vpop.f32.mrf.mxu1  ;;  %4881 = vmatmul.mubr.bf16.gmra.mxu1 %v10962_v5  ;;  %v11002_v9 = vpack.c.bf16 %v3662_v56, %v3658_v61  ;;  %v7830_v61 = vld [vmem:[%s13173_s7 + $0x128] ss:$16 sps:$4 sm:$0xff]   ;;  %5462 = vmatprep.subr.bf16.mxu1 %v7832_v52  ;;  %v11032_v49 = vpop.f32.mrf.mxu0  ;;  %v3725_v18 = vmax.f32 %v3448_v17, 0.0  ;;  %v3037_v17 = vadd.f32 %v10754_v2, %v10295_v47  ;;  %v3033_v2 = vadd.f32 %v10740_v57, %v10295_v47 }
 0x447   : > { %4890 = vmatprep.mubr.bf16.mxu1 %v10974_v39  ;;  %13521 = vst [vmem:[#allocation91_spill] sm:$0xff] %v10988_v13  ;;  %v3667_v39 = vmax.f32 %v3025_v62, 0.0  ;;  %v3720_v62 = vmax.f32 %v3440_v28, 0.0  ;;  %5463 = vmatpush2.bf16.msra.mxu1 %v7830_v61  ;;  %v3666_v5 = vmax.f32 %v3023_v51, 0.0  ;;  %v13529_v52 = vld [vmem:[#allocation60_spill] sm:$0xff]  ;;  %v3460_v57 = vadd.f32 %v10440_v63, %v10037_v53 }
 0x448   : > { %v10986_v29 = vpop.f32.mrf.mxu1  ;;  %13524 = vst [vmem:[#allocation55_spill] sm:$0xff] %v11002_v9 }
 0x449   : > { %v11014_v42 = vpack.c.bf16 %v3671_v27, %v3667_v39  ;;  %v3035_v39 = vadd.f32 %v10748_v41, %v10255_v25  ;;  %v3670_v27 = vmax.f32 %v3027_v34, 0.0  ;;  %v3462_v41 = vadd.f32 %v10466_v48, %v10016_v3 }
 0x44a   : > { %v10994_v15 = vpop.f32.mrf.mxu1  ;;  %v11044_v34 = vpack.c.bf16 %v3729_v43, %v3725_v18  ;;  %v3458_v48 = vadd.f32 %v10414_v24, %v10016_v3 }
 0x44b   : > { %13525 = vst [vmem:[#allocation93_spill] sm:$0xff] %v11014_v42  ;;  %v3675_v35 = vmax.f32 %v3035_v39, 0.0  ;;  %v11048_v61 = vpack.c.bf16 %v3670_v27, %v3666_v5  ;;  %v3737_v39 = vmax.f32 %v3462_v41, 0.0 }
 0x44c   : > { %v11006_v23 = vpop.f32.mrf.mxu1  ;;  %5304 = vmatmul.mubr.bf16.gmra.mxu0 %v10988_v13  ;;  %v11036_v13 = vpack.c.bf16 %v3720_v62, %v3716_v19  ;;  %v3049_v62 = vadd.f32 %v10829_v16, %v10255_v25  ;;  %v3045_v19 = vadd.f32 %v10800_v22, %v10255_v25  ;;  %v3678_v16 = vmax.f32 %v3037_v17, 0.0  ;;  %v13534_v17 = vld [vmem:[#allocation66_spill] sm:$0xff] }
 0x44d   : > { %5313 = vmatprep.mubr.bf16.mxu0 %v10998_v6  ;;  %v3679_v6 = vmax.f32 %v3039_v58, 0.0  ;;  %13530 = vst [vmem:[#allocation60_spill] sm:$0xff] %v11048_v61  ;;  %v11052_v58 = vpop.f32.mrf.mxu0  ;;  %v3733_v18 = vmax.f32 %v3458_v48, 0.0  ;;  %v3472_v22 = vadd.f32 %v10576_v54, %v10016_v3  ;;  %v3047_v48 = vadd.f32 %v10814_v32, %v10295_v47 }
 0x44e   : > { %v11026_v56 = vpop.f32.mrf.mxu1  ;;  %4891 = vmatmul.mubr.bf16.gmra.mxu1 %v11002_v9  ;;  %13526 = vst [vmem:[#allocation94_spill] sm:$0xff] %v11036_v13  ;;  %v13527_v9 = vld [vmem:[#allocation62_spill] sm:$0xff]  ;;  %v3468_v54 = vadd.f32 %v10524_v4, %v10016_v3  ;;  %v3043_v32 = vadd.f32 %v10788_v40, %v10295_v47 }
 0x44f   : > { %4900 = vmatprep.mubr.bf16.mxu1 %v11014_v42  ;;  %v3450_v55 = vadd.f32 %v13527_v9, %v10037_v53  ;;  %13528 = vst [vmem:[#allocation62_spill] sm:$0xff] %v11044_v34  ;;  %v3446_v42 = vadd.f32 %v13529_v52, %v10037_v53  ;;  %v11062_v51 = vpack.c.bf16 %v3679_v6, %v3675_v35  ;;  %v11072_v27 = vpop.f32.mrf.mxu0  ;;  %v3674_v52 = vmax.f32 %v3033_v2, 0.0  ;;  %v7833_v4 = vld [vmem:[%s13173_s7 + $0x108] ss:$16 sps:$4 sm:$0xff]  }
 0x450   : > { %v11034_v28 = vpop.f32.mrf.mxu1 }
 0x451   : > { %13531 = vst [vmem:[#allocation95_spill] sm:$0xff] %v11062_v51  ;;  %v3728_v5 = vmax.f32 %v3450_v55, 0.0  ;;  %v3724_v24 = vmax.f32 %v3446_v42, 0.0  ;;  %v3687_v55 = vmax.f32 %v3049_v62, 0.0  ;;  %v11084_v42 = vpack.c.bf16 %v3737_v39, %v3733_v18  ;;  %v11092_v62 = vpop.f32.mrf.mxu0 }
 0x452   : > { %v11040_v26 = vpop.f32.mrf.mxu1  ;;  %v3736_v39 = vmax.f32 %v3460_v57, 0.0  ;;  %v3686_v18 = vmax.f32 %v3047_v48, 0.0  ;;  %v3741_v57 = vmax.f32 %v3468_v54, 0.0  ;;  %v13539_v54 = vld [vmem:[#allocation71_spill] sm:$0xff] }
 0x453   : > { %v11076_v35 = vpack.c.bf16 %v3728_v5, %v3724_v24  ;;  %13533 = vst [vmem:[#allocation97_spill] sm:$0xff] %v11084_v42  ;;  %v3059_v5 = vadd.f32 %v10880_v36, %v10255_v25  ;;  %v7835_v36 = vld [vmem:[%s13173_s7 + $0x10c] ss:$16 sps:$4 sm:$0xff]  }
 0x454   : > { %v11054_v9 = vpop.f32.mrf.mxu1  ;;  %5314 = vmatmul.mubr.bf16.gmra.mxu0 %v11036_v13  ;;  %5464 = vmatprep.subr.bf16.mxu1 %v7835_v36  ;;  %v13554_v13 = vld [vmem:[#allocation82_spill] sm:$0xff] }
 0x455   : > { %5323 = vmatprep.mubr.bf16.mxu0 %v11044_v34  ;;  %13532 = vst [vmem:[#allocation96_spill] sm:$0xff] %v11076_v35  ;;  %v11088_v34 = vpack.c.bf16 %v3678_v16, %v3674_v52  ;;  %v3055_v16 = vadd.f32 %v10855_v8, %v10255_v25  ;;  %v3695_v52 = vmax.f32 %v3059_v5, 0.0  ;;  %5465 = vmatpush2.bf16.msra.mxu1 %v7833_v4 }
 0x456   : > { %v11066_v43 = vpop.f32.mrf.mxu1  ;;  %4901 = vmatmul.mubr.bf16.gmra.mxu1 %v11048_v61  ;;  %v3456_v61 = vadd.f32 %v13534_v17, %v10037_v53  ;;  %v3482_v8 = vadd.f32 %v10674_v1, %v10016_v3  ;;  %v3466_v5 = vadd.f32 %v13539_v54, %v10037_v53  ;;  %v3069_v1 = vadd.f32 %v10920_v0, %v10255_v25 }
 0x457   : > { %4910 = vmatprep.mubr.bf16.mxu1 %v11062_v51  ;;  %v3683_v51 = vmax.f32 %v3045_v19, 0.0  ;;  %13535 = vst [vmem:[#allocation66_spill] sm:$0xff] %v11088_v34 }
 0x458   : > { %v11074_v6 = vpop.f32.mrf.mxu1  ;;  %v3732_v40 = vmax.f32 %v3456_v61, 0.0  ;;  %v3691_v61 = vmax.f32 %v3055_v16, 0.0  ;;  %v3740_v0 = vmax.f32 %v3466_v5, 0.0 }
 0x459   : > { %v11102_v2 = vpack.c.bf16 %v3687_v55, %v3683_v51  ;;  %v11106_v19 = vpop.f32.mrf.mxu0  ;;  %v3745_v51 = vmax.f32 %v3472_v22, 0.0 }
 0x45a   : > { %v11080_v41 = vpop.f32.mrf.mxu1  ;;  %v11122_v17 = vpack.c.bf16 %v3736_v39, %v3732_v40  ;;  %v3057_v39 = vadd.f32 %v10866_v21, %v10295_v47 }
 0x45b   : > { %13536 = vst [vmem:[#allocation98_spill] sm:$0xff] %v11102_v2  ;;  %v11126_v22 = vpop.f32.mrf.mxu0  ;;  %v11132_v48 = vpack.c.bf16 %v3745_v51, %v3741_v57  ;;  %v11148_v51 = vpack.c.bf16 %v3695_v52, %v3691_v61  ;;  %v3065_v57 = vadd.f32 %v10900_v59, %v10255_v25  ;;  %v3703_v61 = vmax.f32 %v3069_v1, 0.0  ;;  %v13545_v59 = vld [vmem:[#allocation8_spill] sm:$0xff] }
 0x45c   : > { %v11094_v63 = vpop.f32.mrf.mxu1  ;;  %5324 = vmatmul.mubr.bf16.gmra.mxu0 %v11076_v35  ;;  %13537 = vst [vmem:[#allocation99_spill] sm:$0xff] %v11122_v17  ;;  %v3694_v54 = vmax.f32 %v3057_v39, 0.0  ;;  %v13547_v39 = vld [vmem:[#allocation77_spill] sm:$0xff] }
 0x45d   : > { %5333 = vmatprep.mubr.bf16.mxu0 %v11084_v42  ;;  %v3682_v42 = vmax.f32 %v3043_v32, 0.0  ;;  %13538 = vst [vmem:[#allocation100_spill] sm:$0xff] %v11132_v48  ;;  %v13541_v32 = vld [vmem:[#allocation24_spill] sm:$0xff]  ;;  %v11152_v40 = vpop.f32.mrf.mxu0 }
 0x45e   : > { %v11108_v24 = vpop.f32.mrf.mxu1  ;;  %4911 = vmatmul.mubr.bf16.gmra.mxu1 %v11088_v34  ;;  %v3470_v34 = vadd.f32 %v10550_v11, %v10037_v53  ;;  %v3478_v36 = vadd.f32 %v13541_v32, %v10016_v3  ;;  %13542 = vst [vmem:[#allocation24_spill] sm:$0xff] %v11148_v51 }
 0x45f   : > { %4920 = vmatprep.mubr.bf16.mxu1 %v11102_v2  ;;  %v11136_v4 = vpack.c.bf16 %v3686_v18, %v3682_v42  ;;  %v3053_v42 = vadd.f32 %v10846_v30, %v10295_v47  ;;  %v3753_v18 = vmax.f32 %v3482_v8, 0.0  ;;  %v13544_v30 = vld [vmem:[#allocation79_spill] sm:$0xff]  ;;  %v11166_v2 = vpop.f32.mrf.mxu0 }
 0x460   : > { %v11120_v55 = vpop.f32.mrf.mxu1  ;;  %v3744_v16 = vmax.f32 %v3470_v34, 0.0  ;;  %v3749_v34 = vmax.f32 %v3478_v36, 0.0  ;;  %v3476_v36 = vadd.f32 %v13547_v39, %v10037_v53 }
 0x461   : > { %13540 = vst [vmem:[#allocation71_spill] sm:$0xff] %v11136_v4 }
 0x462   : > { %v11128_v35 = vpop.f32.mrf.mxu1  ;;  %v11162_v32 = vpack.c.bf16 %v3744_v16, %v3740_v0  ;;  %v11172_v5 = vpack.c.bf16 %v3753_v18, %v3749_v34  ;;  %v3067_v16 = vadd.f32 %v10906_v50, %v10295_v47  ;;  %v3079_v18 = vadd.f32 %v10966_v60, %v10255_v25 }
 0x463   : > { %v3063_v50 = vadd.f32 %v10892_v12, %v10295_v47  ;;  %v3748_v60 = vmax.f32 %v3476_v36, 0.0 }
 0x464   : > { %v11140_v11 = vpop.f32.mrf.mxu1  ;;  %5334 = vmatmul.mubr.bf16.gmra.mxu0 %v11122_v17  ;;  %13543 = vst [vmem:[#allocation101_spill] sm:$0xff] %v11162_v32  ;;  %v3690_v17 = vmax.f32 %v3053_v42, 0.0  ;;  %13546 = vst [vmem:[#allocation79_spill] sm:$0xff] %v11172_v5  ;;  %v3711_v12 = vmax.f32 %v3079_v18, 0.0 }
 0x465   : > { %5343 = vmatprep.mubr.bf16.mxu0 %v11132_v48  ;;  %v3480_v48 = vadd.f32 %v13544_v30, %v10037_v53  ;;  %v13550_v30 = vld [vmem:[#allocation31_spill] sm:$0xff] }
 0x466   : > { %v11154_v21 = vpop.f32.mrf.mxu1  ;;  %4921 = vmatmul.mubr.bf16.gmra.mxu1 %v11136_v4  ;;  %v3492_v4 = vadd.f32 %v13545_v59, %v10016_v3  ;;  %v11176_v1 = vpack.c.bf16 %v3694_v54, %v3690_v17  ;;  %v3488_v59 = vadd.f32 %v13550_v30, %v10016_v3  ;;  %v3075_v30 = vadd.f32 %v10946_v10, %v10255_v25 }
 0x467   : > { %4930 = vmatprep.mubr.bf16.mxu1 %v11148_v51  ;;  %v3699_v51 = vmax.f32 %v3065_v57, 0.0  ;;  %v3752_v17 = vmax.f32 %v3480_v48, 0.0  ;;  %v3502_v10 = vadd.f32 %v10864_v14, %v10016_v3  ;;  %v3498_v14 = vadd.f32 %v10812_v46, %v10016_v3 }
 0x468   : > { %v11160_v52 = vpop.f32.mrf.mxu1  ;;  %13548 = vst [vmem:[#allocation8_spill] sm:$0xff] %v11176_v1  ;;  %v3761_v39 = vmax.f32 %v3492_v4, 0.0  ;;  %v3707_v36 = vmax.f32 %v3075_v30, 0.0  ;;  %v3085_v46 = vadd.f32 %v10986_v29, %v10255_v25  ;;  %v3512_v29 = vadd.f32 %v10944_v37, %v10016_v3 }
 0x469   : > { %v11190_v57 = vpack.c.bf16 %v3703_v61, %v3699_v51  ;;  %v3757_v61 = vmax.f32 %v3488_v59, 0.0 }
 0x46a   : > { %v11168_v8 = vpop.f32.mrf.mxu1 }
 0x46b   : > { %13551 = vst [vmem:[#allocation31_spill] sm:$0xff] %v11190_v57 }
 0x46c   : > { %v11180_v0 = vpop.f32.mrf.mxu1  ;;  %v11182_v42 = vpop.f32.mrf.mxu0  ;;  %5344 = vmatmul.mubr.bf16.gmra.mxu0 %v11162_v32  ;;  %v11206_v32 = vpack.c.bf16 %v3752_v17, %v3748_v60  ;;  %v3077_v17 = vadd.f32 %v10954_v33, %v10295_v47  ;;  %v3073_v33 = vadd.f32 %v10938_v31, %v10295_v47  ;;  %v3769_v60 = vmax.f32 %v3502_v10, 0.0 }
 0x46d   : > { %13549 = vst [vmem:[#allocation77_spill] sm:$0xff] %v11182_v42  ;;  %5353 = vmatprep.mubr.bf16.mxu0 %v11172_v5  ;;  %v3702_v5 = vmax.f32 %v3067_v16, 0.0  ;;  %v11216_v16 = vpack.c.bf16 %v3761_v39, %v3757_v61  ;;  %v3089_v39 = vadd.f32 %v11006_v23, %v10255_v25 }
 0x46e   : > { %v11194_v54 = vpop.f32.mrf.mxu1  ;;  %v11196_v34 = vpop.f32.mrf.mxu0  ;;  %4931 = vmatmul.mubr.bf16.gmra.mxu1 %v11176_v1  ;;  %13553 = vst [vmem:[#allocation103_spill] sm:$0xff] %v11206_v32  ;;  %v3698_v1 = vmax.f32 %v3063_v50, 0.0  ;;  %v3710_v61 = vmax.f32 %v3077_v17, 0.0 }
 0x46f   : > { %13552 = vst [vmem:[#allocation102_spill] sm:$0xff] %v11194_v54  ;;  %4940 = vmatprep.mubr.bf16.mxu1 %v11190_v57  ;;  %v3490_v54 = vadd.f32 %v13554_v13, %v10037_v53  ;;  %13555 = vst [vmem:[#allocation82_spill] sm:$0xff] %v11216_v16  ;;  %v13556_v57 = vld [vmem:[#allocation33_spill] sm:$0xff]  ;;  %v3719_v31 = vmax.f32 %v3089_v39, 0.0 }
 0x470   : > { %v11202_v51 = vpop.f32.mrf.mxu1  ;;  %v11204_v48 = vpop.f32.mrf.mxu0  ;;  %v3486_v59 = vadd.f32 %v13556_v57, %v10037_v53  ;;  %v11220_v18 = vpack.c.bf16 %v3702_v5, %v3698_v1  ;;  %v11234_v57 = vpack.c.bf16 %v3711_v12, %v3707_v36  ;;  %v3765_v36 = vmax.f32 %v3498_v14, 0.0 }
 0x471   : > { %v3760_v5 = vmax.f32 %v3490_v54, 0.0 }
 0x472   : > { %v11210_v4 = vpop.f32.mrf.mxu1  ;;  %v11212_v42 = vpop.f32.mrf.mxu0  ;;  %13557 = vst [vmem:[#allocation33_spill] sm:$0xff] %v11220_v18  ;;  %13558 = vst [vmem:[#allocation104_spill] sm:$0xff] %v11234_v57  ;;  %v3756_v23 = vmax.f32 %v3486_v59, 0.0  ;;  %v3715_v59 = vmax.f32 %v3085_v46, 0.0  ;;  %v11260_v17 = vpack.c.bf16 %v3769_v60, %v3765_v36  ;;  %v3099_v60 = vadd.f32 %v11054_v9, %v10255_v25 }
 0x473   : > { %v3777_v36 = vmax.f32 %v3512_v29, 0.0 }
 0x474   : > { %v11224_v13 = vpop.f32.mrf.mxu1  ;;  %v11226_v50 = vpop.f32.mrf.mxu0  ;;  %5354 = vmatmul.mubr.bf16.gmra.mxu0 %v11206_v32  ;;  %v3706_v32 = vmax.f32 %v3073_v33, 0.0  ;;  %13561 = vst [vmem:[#allocation107_spill] sm:$0xff] %v11260_v17 }
 0x475   : > { %5363 = vmatprep.mubr.bf16.mxu0 %v11216_v16  ;;  %v11250_v16 = vpack.c.bf16 %v3760_v5, %v3756_v23  ;;  %v3087_v5 = vadd.f32 %v10994_v15, %v10295_v47  ;;  %v13565_v23 = vld [vmem:[#allocation87_spill] sm:$0xff]  ;;  %v3083_v15 = vadd.f32 %v10980_v44, %v10295_v47  ;;  %v3727_v44 = vmax.f32 %v3099_v60, 0.0 }
 0x476   : > { %v11238_v1 = vpop.f32.mrf.mxu1  ;;  %4941 = vmatmul.mubr.bf16.gmra.mxu1 %v11220_v18  ;;  %v11241_v30 = vpop.f32.mrf.mxu0  ;;  %v3500_v18 = vadd.f32 %v10844_v7, %v10037_v53  ;;  %v11264_v39 = vpack.c.bf16 %v3710_v61, %v3706_v32  ;;  %v3508_v37 = vadd.f32 %v13565_v23, %v10016_v3  ;;  %v3095_v23 = vadd.f32 %v11034_v28, %v10255_v25 }
 0x477   : > { %13559 = vst [vmem:[#allocation105_spill] sm:$0xff] %v11238_v1  ;;  %4950 = vmatprep.mubr.bf16.mxu1 %v11234_v57  ;;  %13560 = vst [vmem:[#allocation106_spill] sm:$0xff] %v11250_v16  ;;  %v13562_v57 = vld [vmem:[#allocation84_spill] sm:$0xff]  ;;  %v3522_v28 = vadd.f32 %v11024_v20, %v10016_v3  ;;  %v3518_v20 = vadd.f32 %v10978_v38, %v10016_v3  ;;  %v3105_v38 = vadd.f32 %v11074_v6, %v10255_v25 }
 0x478   : > { %v11246_v12 = vpop.f32.mrf.mxu1  ;;  %v11248_v54 = vpop.f32.mrf.mxu0  ;;  %v3496_v14 = vadd.f32 %v13562_v57, %v10037_v53  ;;  %13563 = vst [vmem:[#allocation84_spill] sm:$0xff] %v11264_v39  ;;  %v11278_v57 = vpack.c.bf16 %v3719_v31, %v3715_v59  ;;  %v3768_v32 = vmax.f32 %v3500_v18, 0.0  ;;  %v3773_v59 = vmax.f32 %v3508_v37, 0.0 }
 0x479   : > { %v3532_v6 = vadd.f32 %v11092_v62, %v10016_v3  ;;  %v3528_v62 = vadd.f32 %v11052_v58, %v10016_v3  ;;  %v3115_v58 = vadd.f32 %v11120_v55, %v10255_v25  ;;  %v3542_v55 = vadd.f32 %v11166_v2, %v10016_v3 }
 0x47a   : > { %v11254_v10 = vpop.f32.mrf.mxu1  ;;  %v11256_v1 = vpop.f32.mrf.mxu0  ;;  %13566 = vst [vmem:[#allocation87_spill] sm:$0xff] %v11278_v57  ;;  %v3764_v9 = vmax.f32 %v3496_v14, 0.0  ;;  %v3723_v14 = vmax.f32 %v3095_v23, 0.0  ;;  %v3538_v2 = vadd.f32 %v11126_v22, %v10016_v3  ;;  %v3125_v22 = vadd.f32 %v11160_v52, %v10255_v25 }
 0x47c   : > { %v11268_v7 = vpop.f32.mrf.mxu1  ;;  %v11270_v33 = vpop.f32.mrf.mxu0  ;;  %5364 = vmatmul.mubr.bf16.gmra.mxu0 %v11250_v16  ;;  %v11294_v16 = vpack.c.bf16 %v3768_v32, %v3764_v9  ;;  %v3097_v32 = vadd.f32 %v11040_v26, %v10295_v47  ;;  %v3093_v26 = vadd.f32 %v11026_v56, %v10295_v47  ;;  %v3785_v9 = vmax.f32 %v3522_v28, 0.0 }
 0x47d   : > { %13564 = vst [vmem:[#allocation108_spill] sm:$0xff] %v11270_v33  ;;  %5373 = vmatprep.mubr.bf16.mxu0 %v11260_v17  ;;  %v3718_v17 = vmax.f32 %v3087_v5, 0.0  ;;  %v11304_v5 = vpack.c.bf16 %v3777_v36, %v3773_v59  ;;  %v3109_v36 = vadd.f32 %v11094_v63, %v10255_v25  ;;  %v3747_v52 = vmax.f32 %v3125_v22, 0.0 }
 0x47e   : > { %v11282_v46 = vpop.f32.mrf.mxu1  ;;  %4951 = vmatmul.mubr.bf16.gmra.mxu1 %v11264_v39  ;;  %v11285_v61 = vpop.f32.mrf.mxu0  ;;  %13569 = vst [vmem:[#allocation111_spill] sm:$0xff] %v11294_v16  ;;  %v13570_v39 = vld [vmem:[#allocation15_spill] sm:$0xff]  ;;  %v3726_v59 = vmax.f32 %v3097_v32, 0.0  ;;  %v3548_v22 = vadd.f32 %v11196_v34, %v10016_v3 }
 0x47f   : > { %13567 = vst [vmem:[#allocation109_spill] sm:$0xff] %v11282_v46  ;;  %13568 = vst [vmem:[#allocation110_spill] sm:$0xff] %v11285_v61  ;;  %4960 = vmatprep.mubr.bf16.mxu1 %v11278_v57  ;;  %v3510_v46 = vadd.f32 %v13570_v39, %v10037_v53  ;;  %v3714_v61 = vmax.f32 %v3083_v15, 0.0  ;;  %v13572_v57 = vld [vmem:[#allocation86_spill] sm:$0xff]  ;;  %v3735_v56 = vmax.f32 %v3109_v36, 0.0 }
 0x480   : > { %v11290_v31 = vpop.f32.mrf.mxu1  ;;  %v11292_v18 = vpop.f32.mrf.mxu0  ;;  %13571 = vst [vmem:[#allocation15_spill] sm:$0xff] %v11304_v5  ;;  %v3506_v37 = vadd.f32 %v13572_v57, %v10037_v53  ;;  %v11322_v57 = vpack.c.bf16 %v3727_v44, %v3723_v14  ;;  %v3781_v14 = vmax.f32 %v3518_v20, 0.0 }
 0x481   : > { %v11308_v60 = vpack.c.bf16 %v3718_v17, %v3714_v61  ;;  %v3776_v17 = vmax.f32 %v3510_v46, 0.0 }
 0x482   : > { %v11298_v29 = vpop.f32.mrf.mxu1  ;;  %v11300_v33 = vpop.f32.mrf.mxu0  ;;  %13574 = vst [vmem:[#allocation112_spill] sm:$0xff] %v11322_v57  ;;  %v3772_v63 = vmax.f32 %v3506_v37, 0.0  ;;  %v3731_v37 = vmax.f32 %v3105_v38, 0.0  ;;  %v11348_v32 = vpack.c.bf16 %v3785_v9, %v3781_v14  ;;  %v3119_v9 = vadd.f32 %v11140_v11, %v10255_v25 }
 0x483   : > { %13573 = vst [vmem:[#allocation86_spill] sm:$0xff] %v11308_v60 }
 0x484   : > { %v11312_v39 = vpop.f32.mrf.mxu1  ;;  %v11314_v15 = vpop.f32.mrf.mxu0  ;;  %5374 = vmatmul.mubr.bf16.gmra.mxu0 %v11294_v16  ;;  %v3722_v16 = vmax.f32 %v3093_v26, 0.0  ;;  %13577 = vst [vmem:[#allocation115_spill] sm:$0xff] %v11348_v32 }
 0x485   : > { %5383 = vmatprep.mubr.bf16.mxu0 %v11304_v5  ;;  %v11338_v5 = vpack.c.bf16 %v3776_v17, %v3772_v63  ;;  %v3107_v17 = vadd.f32 %v11080_v41, %v10295_v47  ;;  %v3103_v41 = vadd.f32 %v11066_v43, %v10295_v47  ;;  %v3743_v43 = vmax.f32 %v3119_v9, 0.0 }
 0x486   : > { %v11326_v61 = vpop.f32.mrf.mxu1  ;;  %4961 = vmatmul.mubr.bf16.gmra.mxu1 %v11308_v60  ;;  %v11329_v23 = vpop.f32.mrf.mxu0  ;;  %v3520_v60 = vadd.f32 %v10992_v45, %v10037_v53  ;;  %v11352_v36 = vpack.c.bf16 %v3726_v59, %v3722_v16  ;;  %v3793_v59 = vmax.f32 %v3532_v6, 0.0 }
 0x487   : > { %13575 = vst [vmem:[#allocation113_spill] sm:$0xff] %v11326_v61  ;;  %4970 = vmatprep.mubr.bf16.mxu1 %v11322_v57  ;;  %13576 = vst [vmem:[#allocation114_spill] sm:$0xff] %v11338_v5  ;;  %v13578_v57 = vld [vmem:[#allocation53_spill] sm:$0xff]  ;;  %v3734_v14 = vmax.f32 %v3107_v17, 0.0 }
 0x488   : > { %v11334_v44 = vpop.f32.mrf.mxu1  ;;  %v11336_v46 = vpop.f32.mrf.mxu0  ;;  %v3516_v20 = vadd.f32 %v13578_v57, %v10037_v53  ;;  %13579 = vst [vmem:[#allocation53_spill] sm:$0xff] %v11352_v36  ;;  %v11366_v57 = vpack.c.bf16 %v3735_v56, %v3731_v37  ;;  %v3784_v16 = vmax.f32 %v3520_v60, 0.0  ;;  %v3789_v37 = vmax.f32 %v3528_v62, 0.0 }
 0x489   : > { %v3526_v62 = vadd.f32 %v11032_v49, %v10037_v53 }
 0x48a   : > { %v11342_v28 = vpop.f32.mrf.mxu1  ;;  %v11344_v61 = vpop.f32.mrf.mxu0  ;;  %13580 = vst [vmem:[#allocation116_spill] sm:$0xff] %v11366_v57  ;;  %v3780_v11 = vmax.f32 %v3516_v20, 0.0  ;;  %v3739_v20 = vmax.f32 %v3115_v58, 0.0  ;;  %v11392_v17 = vpack.c.bf16 %v3793_v59, %v3789_v37  ;;  %v3129_v59 = vadd.f32 %v11180_v0, %v10255_v25 }
 0x48b   : > { %v3788_v0 = vmax.f32 %v3526_v62, 0.0  ;;  %v3552_v62 = vadd.f32 %v11212_v42, %v10016_v3  ;;  %v3139_v42 = vadd.f32 %v11224_v13, %v10255_v25  ;;  %v3135_v3 = vadd.f32 %v11202_v51, %v10255_v25 }
 0x48c   : > { %v11356_v45 = vpop.f32.mrf.mxu1  ;;  %v11358_v26 = vpop.f32.mrf.mxu0  ;;  %5384 = vmatmul.mubr.bf16.gmra.mxu0 %v11338_v5  ;;  %v3730_v5 = vmax.f32 %v3103_v41, 0.0  ;;  %13583 = vst [vmem:[#allocation119_spill] sm:$0xff] %v11392_v17  ;;  %v11410_v49 = vpack.c.bf16 %v3743_v43, %v3739_v20  ;;  %v3797_v20 = vmax.f32 %v3538_v2, 0.0  ;;  %v3536_v2 = vadd.f32 %v11106_v19, %v10037_v53 }
 0x48d   : > { %5393 = vmatprep.mubr.bf16.mxu0 %v11348_v32  ;;  %v11382_v32 = vpack.c.bf16 %v3784_v16, %v3780_v11  ;;  %v3117_v16 = vadd.f32 %v11128_v35, %v10295_v47  ;;  %v3113_v35 = vadd.f32 %v11108_v24, %v10295_v47  ;;  %v3751_v24 = vmax.f32 %v3129_v59, 0.0 }
 0x48e   : > { %v11370_v38 = vpop.f32.mrf.mxu1  ;;  %4971 = vmatmul.mubr.bf16.gmra.mxu1 %v11352_v36  ;;  %v11373_v63 = vpop.f32.mrf.mxu0  ;;  %v3530_v36 = vadd.f32 %v11072_v27, %v10037_v53  ;;  %v11396_v9 = vpack.c.bf16 %v3734_v14, %v3730_v5  ;;  %13585 = vst [vmem:[#allocation121_spill] sm:$0xff] %v11410_v49  ;;  %v3801_v14 = vmax.f32 %v3542_v55, 0.0  ;;  %v3809_v34 = vmax.f32 %v3552_v62, 0.0 }
 0x48f   : > { %13581 = vst [vmem:[#allocation117_spill] sm:$0xff] %v11370_v38  ;;  %4980 = vmatprep.mubr.bf16.mxu1 %v11366_v57  ;;  %13582 = vst [vmem:[#allocation118_spill] sm:$0xff] %v11382_v32  ;;  %v3742_v37 = vmax.f32 %v3117_v16, 0.0  ;;  %v11454_v19 = vpack.c.bf16 %v3751_v24, %v3747_v52  ;;  %v3796_v13 = vmax.f32 %v3536_v2, 0.0  ;;  %v3805_v24 = vmax.f32 %v3548_v22, 0.0  ;;  %v13597_v22 = vld [vmem:[#allocation77_spill] sm:$0xff] }
 0x490   : > { %v11378_v56 = vpop.f32.mrf.mxu1  ;;  %v11380_v60 = vpop.f32.mrf.mxu0  ;;  %13584 = vst [vmem:[#allocation120_spill] sm:$0xff] %v11396_v9  ;;  %v3792_v5 = vmax.f32 %v3530_v36, 0.0  ;;  %v11436_v16 = vpack.c.bf16 %v3801_v14, %v3797_v20  ;;  %v3759_v52 = vmax.f32 %v3139_v42, 0.0  ;;  %v3550_v51 = vadd.f32 %v11204_v48, %v10037_v53 }
 0x491   : > { %13589 = vst [vmem:[#allocation125_spill] sm:$0xff] %v11454_v19  ;;  %v3546_v42 = vadd.f32 %v13597_v22, %v10037_v53  ;;  %v3149_v48 = vadd.f32 %v11268_v7, %v10255_v25  ;;  %v3145_v7 = vadd.f32 %v11246_v12, %v10255_v25  ;;  %v6396_v22 = vld [vmem:[%s13175_s9] sm:$0xf] }
 0x492   : > { %v11386_v6 = vpop.f32.mrf.mxu1  ;;  %v11388_v38 = vpop.f32.mrf.mxu0  ;;  %13587 = vst [vmem:[#allocation123_spill] sm:$0xff] %v11436_v16 }
 0x494   : > { %v11400_v27 = vpop.f32.mrf.mxu1  ;;  %v11402_v41 = vpop.f32.mrf.mxu0  ;;  %5394 = vmatmul.mubr.bf16.gmra.mxu0 %v11382_v32  ;;  %v3738_v32 = vmax.f32 %v3113_v35, 0.0 }
 0x495   : > { %5403 = vmatprep.mubr.bf16.mxu0 %v11392_v17  ;;  %v11426_v17 = vpack.c.bf16 %v3792_v5, %v3788_v0  ;;  %v3127_v5 = vadd.f32 %v11168_v8, %v10295_v47  ;;  %v3123_v8 = vadd.f32 %v11154_v21, %v10295_v47  ;;  %v4066_v21 = vld [vmem:[%s13174_s8] sm:$0xf] }
 0x496   : > { %v11414_v58 = vpop.f32.mrf.mxu1  ;;  %4981 = vmatmul.mubr.bf16.gmra.mxu1 %v11396_v9  ;;  %v11417_v11 = vpop.f32.mrf.mxu0  ;;  %v3540_v9 = vadd.f32 %v11152_v40, %v10037_v53  ;;  %v11440_v59 = vpack.c.bf16 %v3742_v37, %v3738_v32  ;;  %v13601_v53 = vld [vmem:[#allocation102_spill] sm:$0xff] }
 0x497   : > { %4990 = vmatprep.mubr.bf16.mxu1 %v11410_v49  ;;  %13586 = vst [vmem:[#allocation122_spill] sm:$0xff] %v11426_v17  ;;  %v3750_v37 = vmax.f32 %v3127_v5, 0.0  ;;  %v3755_v5 = vmax.f32 %v3135_v3, 0.0 }
 0x498   : > { %v11422_v43 = vpop.f32.mrf.mxu1  ;;  %v11424_v36 = vpop.f32.mrf.mxu0  ;;  %13588 = vst [vmem:[#allocation124_spill] sm:$0xff] %v11440_v59  ;;  %v3800_v32 = vmax.f32 %v3540_v9, 0.0 }
 0x499   : > { %v11500_v3 = vpack.c.bf16 %v3759_v52, %v3755_v5 }
 0x49a   : > { %v11430_v55 = vpop.f32.mrf.mxu1  ;;  %v11432_v57 = vpop.f32.mrf.mxu0 }
 0x49b   : > { %13599 = vst [vmem:[#allocation132_spill] sm:$0xff] %v11500_v3 }
 0x49c   : > { %v11444_v40 = vpop.f32.mrf.mxu1  ;;  %v11446_v35 = vpop.f32.mrf.mxu0  ;;  %5404 = vmatmul.mubr.bf16.gmra.mxu0 %v11426_v17  ;;  %v13595_v17 = vld [vmem:[#allocation5_spill] sm:$0xff] }
 0x49d   : > { %5413 = vmatprep.mubr.bf16.mxu0 %v11436_v16  ;;  %v3746_v16 = vmax.f32 %v3123_v8, 0.0  ;;  %v11484_v49 = vrot.slane %v4066_v21, %v13595_v17 }
 0x49e   : > { %v11458_v14 = vpop.f32.mrf.mxu1  ;;  %4991 = vmatmul.mubr.bf16.gmra.mxu1 %v11440_v59  ;;  %v11461_v0 = vpop.f32.mrf.mxu0  ;;  %v11473_v59 = vpack.c.bf16 %v3800_v32, %v3796_v13  ;;  %v3137_v32 = vadd.f32 %v11210_v4, %v10295_v47  ;;  %v3808_v4 = vmax.f32 %v3550_v51, 0.0 }
 0x49f   : > { %13590 = vst [vmem:[#allocation126_spill] sm:$0xff] %v11458_v14  ;;  %5000 = vmatprep.mubr.bf16.mxu1 %v11454_v19  ;;  %v11481_v19 = vpack.c.bf16 %v3809_v34, %v3805_v24  ;;  %v11486_v14 = vpack.c.bf16 %v3750_v37, %v3746_v16  ;;  %v13600_v16 = vld [vmem:[#allocation4_spill] sm:$0xff]  ;;  %v3133_v37 = vadd.f32 %v13601_v53, %v10295_v47  ;;  %v3767_v53 = vmax.f32 %v3149_v48, 0.0 }
 0x4a0   : > { %v11466_v20 = vpop.f32.mrf.mxu1  ;;  %v11468_v9 = vpop.f32.mrf.mxu0  ;;  %13592 = vst [vmem:[#allocation128_spill] sm:$0xff] %v11473_v59  ;;  %v11503_v34 = vrot.slane %v4066_v21, %v13600_v16  ;;  %v3804_v21 = vmax.f32 %v3546_v42, 0.0  ;;  %v3758_v5 = vmax.f32 %v3137_v32, 0.0 }
 0x4a1   : > { %13591 = vst [vmem:[#allocation127_spill] sm:$0xff] %v11468_v9  ;;  %13594 = vst [vmem:[#allocation130_spill] sm:$0xff] %v11481_v19 }
 0x4a2   : > { %v11477_v62 = vpop.f32.mrf.mxu1  ;;  %v11479_v2 = vpop.f32.mrf.mxu0  ;;  %13596 = vst [vmem:[#allocation131_spill] sm:$0xff] %v11486_v14  ;;  %v11524_v9 = vpack.c.bf16 %v3808_v4, %v3804_v21 }
 0x4a3   : > { %13593 = vst [vmem:[#allocation129_spill] sm:$0xff] %v11479_v2 }
 0x4a4   : > { %v11494_v8 = vpop.f32.mrf.mxu1  ;;  %v11496_v13 = vpop.f32.mrf.mxu0  ;;  %5414 = vmatmul.mubr.bf16.gmra.mxu0 %v11473_v59  ;;  %13603 = vst [vmem:[#allocation102_spill] sm:$0xff] %v11524_v9 }
 0x4a5   : > { %13598 = vst [vmem:[#allocation77_spill] sm:$0xff] %v11496_v13  ;;  %5423 = vmatprep.mubr.bf16.mxu0 %v11481_v19  ;;  %v11521_v13 = vrot.slane %v6396_v22, %v13595_v17 }
 0x4a6   : > { %v4762_v24 = vpop.f32.mrf.mxu1  ;;  %5001 = vmatmul.mubr.bf16.gmra.mxu1 %v11486_v14  ;;  %v11513_v19 = vpop.f32.mrf.mxu0  ;;  %v3754_v14 = vmax.f32 %v3133_v37, 0.0  ;;  %v13605_v37 = vld [vmem:[#allocation105_spill] sm:$0xff] }
 0x4a7   : > { %13602 = vst [vmem:[#allocation4_spill] sm:$0xff] %v11513_v19  ;;  %v4763_v52 = vadd.f32 %v4762_v24, %v11484_v49  ;;  %5010 = vmatprep.mubr.bf16.mxu1 %v11500_v3  ;;  %v3763_v19 = vmax.f32 %v3145_v7, 0.0  ;;  %v3147_v24 = vadd.f32 %v11254_v10, %v10295_v47  ;;  %v3143_v4 = vadd.f32 %v13605_v37, %v10295_v47 }
 0x4a8   : > { %v4764_v51 = vpop.f32.mrf.mxu1  ;;  %v11517_v59 = vpop.f32.mrf.mxu0  ;;  %v11535_v17 = vpack.c.bf16 %v3758_v5, %v3754_v14  ;;  %v13607_v14 = vld [vmem:[#allocation35_spill] sm:$0xff] }
 0x4a9   : > { %v5116_v12 = vadd.f32 %v11226_v50, %v4763_v52  ;;  %v4765_v2 = vadd.f32 %v4764_v51, %v11503_v34  ;;  %v11532_v50 = vrot.slane %v6396_v22, %v13600_v16  ;;  %v11542_v10 = vpack.c.bf16 %v3767_v53, %v3763_v19 }
 0x4aa   : > { %v4766_v42 = vpop.f32.mrf.mxu1  ;;  %v11528_v32 = vpop.f32.mrf.mxu0  ;;  %13604 = vst [vmem:[#allocation133_spill] sm:$0xff] %v11535_v17  ;;  %v3766_v5 = vmax.f32 %v3147_v24, 0.0  ;;  %v3155_v51 = vadd.f32 %v11290_v31, %v10255_v25  ;;  %v3762_v24 = vmax.f32 %v3143_v4, 0.0 }
 0x4ab   : > { %v6140_v48 = vmax.f32 %v5116_v12, 0.0  ;;  %v5118_v3 = vadd.f32 %v11241_v30, %v4765_v2  ;;  %v4767_v52 = vadd.f32 %v4766_v42, %v11484_v49  ;;  %13606 = vst [vmem:[#allocation105_spill] sm:$0xff] %v11542_v10  ;;  %v3159_v30 = vadd.f32 %v11312_v39, %v10255_v25 }
 0x4ac   : > { %v4768_v7 = vpop.f32.mrf.mxu1  ;;  %v11539_v21 = vpop.f32.mrf.mxu0  ;;  %5424 = vmatmul.mubr.bf16.gmra.mxu0 %v11524_v9  ;;  %v11564_v9 = vpack.c.bf16 %v3766_v5, %v3762_v24  ;;  %v3771_v4 = vmax.f32 %v3155_v51, 0.0  ;;  %v3169_v5 = vadd.f32 %v11356_v45, %v10255_v25  ;;  %v3165_v45 = vadd.f32 %v11334_v44, %v10255_v25 }
 0x4ad   : > { %v6141_v2 = vmax.f32 %v5118_v3, 0.0  ;;  %v5120_v16 = vadd.f32 %v11248_v54, %v4767_v52  ;;  %v4769_v22 = vadd.f32 %v4768_v7, %v11503_v34  ;;  %5819 = vmatprep.mubr.bf16.mxu0 %v13607_v14  ;;  %v6418_v12 = vmul.f32 %v11521_v13, %v6140_v48  ;;  %v13608_v14 = vld [vmem:[#allocation108_spill] sm:$0xff] }
 0x4ae   : > { %v4772_v42 = vpop.f32.mrf.mxu1  ;;  %5011 = vmatmul.mubr.bf16.gmra.mxu1 %v11535_v17  ;;  %v11553_v19 = vpop.f32.mrf.mxu0  ;;  %v3775_v31 = vmax.f32 %v3159_v30, 0.0  ;;  %13609 = vst [vmem:[#allocation35_spill] sm:$0xff] %v11564_v9 }
 0x4af   : > { %v6419_v39 = vmul.f32 %v11532_v50, %v6141_v2  ;;  %v6144_v3 = vmax.f32 %v5120_v16, 0.0  ;;  %v5122_v54 = vadd.f32 %v11256_v1, %v4769_v22  ;;  %v4773_v53 = vadd.f32 %v4772_v42, %v11484_v49  ;;  %5020 = vmatprep.mubr.bf16.mxu1 %v11542_v10  ;;  %v13610_v2 = vld [vmem:[#allocation109_spill] sm:$0xff] }
 0x4b0   : > { %v4774_v52 = vpop.f32.mrf.mxu1  ;;  %v11559_v37 = vpop.f32.mrf.mxu0  ;;  %v3153_v16 = vadd.f32 %v13610_v2, %v10295_v47  ;;  %v13612_v2 = vld [vmem:[#allocation38_spill] sm:$0xff] }
 0x4b1   : > { %v11561_v48 = vadd.f32 %v6419_v39, %v6418_v12  ;;  %v6145_v7 = vmax.f32 %v5122_v54, 0.0  ;;  %v5126_v17 = vadd.f32 %v13608_v14, %v4773_v53  ;;  %v4775_v1 = vadd.f32 %v4774_v52, %v11503_v34  ;;  %v13611_v53 = vld [vmem:[#allocation110_spill] sm:$0xff] }
 0x4b2   : > { %v4776_v22 = vpop.f32.mrf.mxu1  ;;  %v11569_v42 = vpop.f32.mrf.mxu0  ;;  %v6422_v10 = vmul.f32 %v11521_v13, %v6144_v3  ;;  %v3157_v39 = vadd.f32 %v11298_v29, %v10295_v47  ;;  %v11587_v29 = vpack.c.bf16 %v3775_v31, %v3771_v4 }
 0x4b3   : > { %v6423_v30 = vmul.f32 %v11532_v50, %v6145_v7  ;;  %v4777_v12 = vadd.f32 %v4776_v22, %v11484_v49  ;;  %v6148_v54 = vmax.f32 %v5126_v17, 0.0  ;;  %v5128_v24 = vadd.f32 %v13611_v53, %v4775_v1  ;;  %v13613_v22 = vld [vmem:[#allocation39_spill] sm:$0xff] }
 0x4b4   : > { %v4778_v52 = vpop.f32.mrf.mxu1  ;;  %v11579_v14 = vpop.f32.mrf.mxu0  ;;  %5820 = vmatmul.mubr.bf16.vlgmr.msra.gmra.mxu0 %v13612_v2  ;;  %13614 = vst [vmem:[#allocation108_spill] sm:$0xff] %v11587_v29 }
 0x4b5   : > { %v11582_v51 = vadd.f32 %v6423_v30, %v6422_v10  ;;  %v5130_v3 = vadd.f32 %v11292_v18, %v4777_v12  ;;  %v4779_v7 = vadd.f32 %v4778_v52, %v11503_v34  ;;  %5829 = vmatprep.mubr.bf16.mxu0 %v13613_v22  ;;  %v6149_v17 = vmax.f32 %v5128_v24, 0.0 }
 0x4b6   : > { %v4782_v1 = vpop.f32.mrf.mxu1  ;;  %5021 = vmatmul.mubr.bf16.gmra.mxu1 %v11564_v9  ;;  %v11592_v53 = vpop.f32.mrf.mxu0  ;;  %v3774_v30 = vmax.f32 %v3157_v39, 0.0  ;;  %v3783_v12 = vmax.f32 %v3169_v5, 0.0  ;;  %v6426_v31 = vmul.f32 %v11521_v13, %v6148_v54  ;;  %v3770_v52 = vmax.f32 %v3153_v16, 0.0 }
 0x4b7   : > { %v6152_v2 = vmax.f32 %v5130_v3, 0.0  ;;  %v5132_v10 = vadd.f32 %v11300_v33, %v4779_v7  ;;  %v4783_v18 = vadd.f32 %v4782_v1, %v11484_v49  ;;  %5030 = vmatprep.mubr.bf16.mxu1 %v11587_v29  ;;  %v6427_v4 = vmul.f32 %v11532_v50, %v6149_v17 }
 0x4b8   : > { %v4784_v44 = vpop.f32.mrf.mxu1  ;;  %v11599_v24 = vpop.f32.mrf.mxu0  ;;  %v3779_v33 = vmax.f32 %v3165_v45, 0.0  ;;  %v3167_v7 = vadd.f32 %v11342_v28, %v10295_v47  ;;  %v13615_v45 = vld [vmem:[#allocation113_spill] sm:$0xff] }
 0x4b9   : > { %v6153_v22 = vmax.f32 %v5132_v10, 0.0  ;;  %v5136_v9 = vadd.f32 %v11314_v15, %v4783_v18  ;;  %v4785_v3 = vadd.f32 %v4784_v44, %v11503_v34  ;;  %v11605_v1 = vadd.f32 %v6427_v4, %v6426_v31  ;;  %v13616_v4 = vld [vmem:[#allocation42_spill] sm:$0xff] }
 0x4ba   : > { %v6430_v39 = vmul.f32 %v11521_v13, %v6152_v2  ;;  %v4786_v5 = vpop.f32.mrf.mxu1  ;;  %v11608_v54 = vpop.f32.mrf.mxu0  ;;  %v11613_v10 = vpack.c.bf16 %v3774_v30, %v3770_v52  ;;  %v3163_v18 = vadd.f32 %v13615_v45, %v10295_v47  ;;  %v11620_v2 = vpack.c.bf16 %v3783_v12, %v3779_v33  ;;  %v13618_v30 = vld [vmem:[#allocation44_spill] sm:$0xff] }
 0x4bb   : > { %v6431_v17 = vmul.f32 %v11532_v50, %v6153_v22  ;;  %v6156_v29 = vmax.f32 %v5136_v9, 0.0  ;;  %v5138_v16 = vadd.f32 %v11329_v23, %v4785_v3  ;;  %v4787_v15 = vadd.f32 %v4786_v5, %v11484_v49 }
 0x4bc   : > { %v4788_v28 = vpop.f32.mrf.mxu1  ;;  %v11617_v31 = vpop.f32.mrf.mxu0  ;;  %5830 = vmatmul.mubr.bf16.gmra.mxu0 %v13616_v4  ;;  %13617 = vst [vmem:[#allocation109_spill] sm:$0xff] %v11620_v2  ;;  %v3179_v44 = vadd.f32 %v11400_v27, %v10255_v25  ;;  %v3782_v52 = vmax.f32 %v3167_v7, 0.0  ;;  %v3175_v12 = vadd.f32 %v11378_v56, %v10255_v25 }
 0x4bd   : > { %v11624_v9 = vadd.f32 %v6431_v17, %v6430_v39  ;;  %v6157_v23 = vmax.f32 %v5138_v16, 0.0  ;;  %v5140_v22 = vadd.f32 %v11336_v46, %v4787_v15  ;;  %5839 = vmatprep.mubr.bf16.mxu0 %v13618_v30  ;;  %v4789_v3 = vadd.f32 %v4788_v28, %v11503_v34 }
 0x4be   : > { %v4792_v5 = vpop.f32.mrf.mxu1  ;;  %5031 = vmatmul.mubr.bf16.gmra.mxu1 %v11613_v10  ;;  %v11630_v45 = vpop.f32.mrf.mxu0  ;;  %v6434_v27 = vmul.f32 %v11521_v13, %v6156_v29  ;;  %v3778_v46 = vmax.f32 %v3163_v18, 0.0  ;;  %v3791_v28 = vmax.f32 %v3179_v44, 0.0 }
 0x4bf   : > { %v6435_v33 = vmul.f32 %v11532_v50, %v6157_v23  ;;  %v4793_v39 = vadd.f32 %v4792_v5, %v11484_v49  ;;  %5040 = vmatprep.mubr.bf16.mxu1 %v11620_v2  ;;  %v6160_v7 = vmax.f32 %v5140_v22, 0.0  ;;  %v5142_v17 = vadd.f32 %v11344_v61, %v4789_v3 }
 0x4c0   : > { %v4794_v16 = vpop.f32.mrf.mxu1  ;;  %v11639_v15 = vpop.f32.mrf.mxu0  ;;  %v11645_v30 = vpack.c.bf16 %v3782_v52, %v3778_v46  ;;  %v3177_v23 = vadd.f32 %v11386_v6, %v10295_v47  ;;  %v3787_v61 = vmax.f32 %v3175_v12, 0.0  ;;  %v3189_v52 = vadd.f32 %v11444_v40, %v10255_v25 }
 0x4c1   : > { %v11641_v4 = vadd.f32 %v6435_v33, %v6434_v27  ;;  %v5146_v56 = vadd.f32 %v11358_v26, %v4793_v39  ;;  %v4795_v29 = vadd.f32 %v4794_v16, %v11503_v34  ;;  %v6161_v5 = vmax.f32 %v5142_v17, 0.0  ;;  %v13620_v27 = vld [vmem:[#allocation117_spill] sm:$0xff]  ;;  %v13621_v17 = vld [vmem:[#allocation46_spill] sm:$0xff] }
 0x4c2   : > { %13619 = vst [vmem:[#allocation110_spill] sm:$0xff] %v11645_v30  ;;  %v4796_v18 = vpop.f32.mrf.mxu1  ;;  %v11649_v22 = vpop.f32.mrf.mxu0  ;;  %v3173_v26 = vadd.f32 %v13620_v27, %v10295_v47  ;;  %v6438_v33 = vmul.f32 %v11521_v13, %v6160_v7  ;;  %v3185_v40 = vadd.f32 %v11422_v43, %v10255_v25 }
 0x4c3   : > { %v6164_v3 = vmax.f32 %v5146_v56, 0.0  ;;  %v5148_v2 = vadd.f32 %v11373_v63, %v4795_v29  ;;  %v4797_v44 = vadd.f32 %v4796_v18, %v11484_v49  ;;  %v6439_v6 = vmul.f32 %v11532_v50, %v6161_v5  ;;  %v13622_v56 = vld [vmem:[#allocation47_spill] sm:$0xff] }
 0x4c4   : > { %v4798_v39 = vpop.f32.mrf.mxu1  ;;  %v11659_v46 = vpop.f32.mrf.mxu0  ;;  %5840 = vmatmul.mubr.bf16.gmra.mxu0 %v13621_v17  ;;  %v11665_v29 = vpack.c.bf16 %v3791_v28, %v3787_v61  ;;  %v3790_v18 = vmax.f32 %v3177_v23, 0.0  ;;  %v3799_v23 = vmax.f32 %v3189_v52, 0.0 }
 0x4c5   : > { %v6165_v12 = vmax.f32 %v5148_v2, 0.0  ;;  %v5150_v63 = vadd.f32 %v11380_v60, %v4797_v44  ;;  %v4799_v16 = vadd.f32 %v4798_v39, %v11503_v34  ;;  %5849 = vmatprep.mubr.bf16.mxu0 %v13622_v56  ;;  %v11669_v7 = vadd.f32 %v6439_v6, %v6438_v33 }
 0x4c6   : > { %v6442_v5 = vmul.f32 %v11521_v13, %v6164_v3  ;;  %v4802_v27 = vpop.f32.mrf.mxu1  ;;  %5041 = vmatmul.mubr.bf16.gmra.mxu1 %v11645_v30  ;;  %v11673_v2 = vpop.f32.mrf.mxu0  ;;  %v3786_v33 = vmax.f32 %v3173_v26, 0.0  ;;  %v3795_v56 = vmax.f32 %v3185_v40, 0.0  ;;  %v3187_v26 = vadd.f32 %v11430_v55, %v10295_v47  ;;  %v13624_v55 = vld [vmem:[#allocation50_spill] sm:$0xff] }
 0x4c7   : > { %v6443_v60 = vmul.f32 %v11532_v50, %v6165_v12  ;;  %v6168_v44 = vmax.f32 %v5150_v63, 0.0  ;;  %v5152_v39 = vadd.f32 %v11388_v38, %v4799_v16  ;;  %v4803_v28 = vadd.f32 %v4802_v27, %v11484_v49  ;;  %5050 = vmatprep.mubr.bf16.mxu1 %v11665_v29 }
 0x4c8   : > { %v4804_v43 = vpop.f32.mrf.mxu1  ;;  %v11679_v61 = vpop.f32.mrf.mxu0  ;;  %v11687_v38 = vpack.c.bf16 %v3790_v18, %v3786_v33  ;;  %v3199_v18 = vadd.f32 %v11494_v8, %v10255_v25 }
 0x4c9   : > { %v11681_v3 = vadd.f32 %v6443_v60, %v6442_v5  ;;  %v6169_v6 = vmax.f32 %v5152_v39, 0.0  ;;  %v5156_v17 = vadd.f32 %v11402_v41, %v4803_v28  ;;  %v4805_v12 = vadd.f32 %v4804_v43, %v11503_v34  ;;  %v13623_v39 = vld [vmem:[#allocation49_spill] sm:$0xff] }
 0x4ca   : > { %v4806_v63 = vpop.f32.mrf.mxu1  ;;  %v11685_v30 = vpop.f32.mrf.mxu0  ;;  %v6446_v16 = vmul.f32 %v11521_v13, %v6168_v44  ;;  %v11698_v28 = vpack.c.bf16 %v3799_v23, %v3795_v56 }
 0x4cb   : > { %v6447_v52 = vmul.f32 %v11532_v50, %v6169_v6  ;;  %v4807_v27 = vadd.f32 %v4806_v63, %v11484_v49  ;;  %v6172_v5 = vmax.f32 %v5156_v17, 0.0  ;;  %v5158_v41 = vadd.f32 %v11417_v11, %v4805_v12 }
 0x4cc   : > { %v4808_v40 = vpop.f32.mrf.mxu1  ;;  %v11695_v60 = vpop.f32.mrf.mxu0  ;;  %5850 = vmatmul.mubr.bf16.gmra.mxu0 %v13623_v39  ;;  %v3183_v11 = vadd.f32 %v11414_v58, %v10295_v47  ;;  %v3195_v6 = vadd.f32 %v11466_v20, %v10255_v25  ;;  %v3798_v63 = vmax.f32 %v3187_v26, 0.0  ;;  %v3807_v20 = vmax.f32 %v3199_v18, 0.0 }
 0x4cd   : > { %v11702_v44 = vadd.f32 %v6447_v52, %v6446_v16  ;;  %v5160_v43 = vadd.f32 %v11424_v36, %v4807_v27  ;;  %v4809_v33 = vadd.f32 %v4808_v40, %v11503_v34  ;;  %5859 = vmatprep.mubr.bf16.mxu0 %v13624_v55  ;;  %v6173_v17 = vmax.f32 %v5158_v41, 0.0 }
 0x4ce   : > { %v4812_v23 = vpop.f32.mrf.mxu1  ;;  %5051 = vmatmul.mubr.bf16.gmra.mxu1 %v11687_v38  ;;  %v11712_v56 = vpop.f32.mrf.mxu0  ;;  %v6450_v16 = vmul.f32 %v11521_v13, %v6172_v5  ;;  %v3794_v39 = vmax.f32 %v3183_v11, 0.0 }
 0x4cf   : > { %v6176_v8 = vmax.f32 %v5160_v43, 0.0  ;;  %v5162_v12 = vadd.f32 %v11432_v57, %v4809_v33  ;;  %v4813_v36 = vadd.f32 %v4812_v23, %v11484_v49  ;;  %5060 = vmatprep.mubr.bf16.mxu1 %v11698_v28  ;;  %v6451_v58 = vmul.f32 %v11532_v50, %v6173_v17 }
 0x4d0   : > { %v4814_v52 = vpop.f32.mrf.mxu1  ;;  %v11719_v25 = vpop.f32.mrf.mxu0  ;;  %v3803_v57 = vmax.f32 %v3195_v6, 0.0 }
 0x4d1   : > { %v6177_v27 = vmax.f32 %v5162_v12, 0.0  ;;  %v5166_v41 = vadd.f32 %v11446_v35, %v4813_v36  ;;  %v4815_v40 = vadd.f32 %v4814_v52, %v11503_v34  ;;  %v11723_v43 = vadd.f32 %v6451_v58, %v6450_v16  ;;  %v13626_v36 = vld [vmem:[#allocation52_spill] sm:$0xff]  ;;  %v13628_v58 = vld [vmem:[#allocation127_spill] sm:$0xff] }
 0x4d2   : > { %v6454_v33 = vmul.f32 %v11521_v13, %v6176_v8  ;;  %v4816_v26 = vpop.f32.mrf.mxu1  ;;  %v11726_v55 = vpop.f32.mrf.mxu0  ;;  %v11731_v12 = vpack.c.bf16 %v3798_v63, %v3794_v39  ;;  %v3197_v35 = vadd.f32 %v11477_v62, %v10295_v47  ;;  %v13631_v63 = vld [vmem:[#allocation126_spill] sm:$0xff] }
 0x4d3   : > { %v6455_v5 = vmul.f32 %v11532_v50, %v6177_v27  ;;  %v6180_v17 = vmax.f32 %v5166_v41, 0.0  ;;  %v5168_v23 = vadd.f32 %v11461_v0, %v4815_v40  ;;  %v4817_v18 = vadd.f32 %v4816_v26, %v11484_v49  ;;  %v13629_v27 = vld [vmem:[#allocation54_spill] sm:$0xff] }
 0x4d4   : > { %13625 = vst [vmem:[#allocation38_spill] sm:$0xff] %v11731_v12  ;;  %v4818_v11 = vpop.f32.mrf.mxu1  ;;  %v11735_v6 = vpop.f32.mrf.mxu0  ;;  %5860 = vmatmul.mubr.bf16.gmra.mxu0 %v13626_v36  ;;  %v11742_v0 = vpack.c.bf16 %v3807_v20, %v3803_v57  ;;  %v3193_v41 = vadd.f32 %v13631_v63, %v10295_v47  ;;  %v3806_v20 = vmax.f32 %v3197_v35, 0.0 }
 0x4d5   : > { %v11738_v8 = vadd.f32 %v6455_v5, %v6454_v33  ;;  %v6181_v16 = vmax.f32 %v5168_v23, 0.0  ;;  %v5170_v52 = vadd.f32 %v13628_v58, %v4817_v18  ;;  %5869 = vmatprep.mubr.bf16.mxu0 %v13629_v27  ;;  %v4819_v40 = vadd.f32 %v4818_v11, %v11503_v34  ;;  %v13632_v23 = vld [vmem:[#allocation129_spill] sm:$0xff] }
 0x4d6   : > { %13630 = vst [vmem:[#allocation113_spill] sm:$0xff] %v11742_v0  ;;  %v4822_v62 = vpop.f32.mrf.mxu1  ;;  %5061 = vmatmul.mubr.bf16.gmra.mxu1 %v11731_v12  ;;  %v11748_v39 = vpop.f32.mrf.mxu0  ;;  %v6458_v33 = vmul.f32 %v11521_v13, %v6180_v17  ;;  %v13634_v58 = vld [vmem:[#allocation77_spill] sm:$0xff]  ;;  %v3802_v17 = vmax.f32 %v3193_v41, 0.0 }
 0x4d7   : > { %13627 = vst [vmem:[#allocation39_spill] sm:$0xff] %v11738_v8  ;;  %v6459_v26 = vmul.f32 %v11532_v50, %v6181_v16  ;;  %v4823_v5 = vadd.f32 %v4822_v62, %v11484_v49  ;;  %5070 = vmatprep.mubr.bf16.mxu1 %v11742_v0  ;;  %v6184_v57 = vmax.f32 %v5170_v52, 0.0  ;;  %v5172_v18 = vadd.f32 %v13632_v23, %v4819_v40  ;;  %v13635_v0 = vld [vmem:[#allocation4_spill] sm:$0xff] }
 0x4d8   : > { %v4824_v47 = vpop.f32.mrf.mxu1  ;;  %v11755_v36 = vpop.f32.mrf.mxu0  ;;  %v11765_v40 = vpack.c.bf16 %v3806_v20, %v3802_v17 }
 0x4d9   : > { %v11757_v11 = vadd.f32 %v6459_v26, %v6458_v33  ;;  %v5176_v27 = vadd.f32 %v13634_v58, %v4823_v5  ;;  %v4825_v63 = vadd.f32 %v4824_v47, %v11503_v34  ;;  %v6185_v12 = vmax.f32 %v5172_v18, 0.0  ;;  %v13637_v47 = vld [vmem:[#allocation57_spill] sm:$0xff] }
 0x4da   : > { %v4826_v16 = vpop.f32.mrf.mxu1  ;;  %v11761_v8 = vpop.f32.mrf.mxu0  ;;  %13636 = vst [vmem:[#allocation44_spill] sm:$0xff] %v11765_v40  ;;  %v6462_v23 = vmul.f32 %v11521_v13, %v6184_v57 }
 0x4db   : > { %13633 = vst [vmem:[#allocation42_spill] sm:$0xff] %v11757_v11  ;;  %v6188_v62 = vmax.f32 %v5176_v27, 0.0  ;;  %v5178_v35 = vadd.f32 %v13635_v0, %v4825_v63  ;;  %v4827_v52 = vadd.f32 %v4826_v16, %v11484_v49  ;;  %v6463_v33 = vmul.f32 %v11532_v50, %v6185_v12  ;;  %v13638_v27 = vld [vmem:[#allocation58_spill] sm:$0xff]  ;;  %v13791_v11 = vld [vmem:[#allocation131_spill] sm:$0xff] }
 0x4dc   : > { %v4828_v26 = vpop.f32.mrf.mxu1  ;;  %v11769_v5 = vpop.f32.mrf.mxu0  ;;  %5870 = vmatmul.mubr.bf16.gmra.mxu0 %v13637_v47 }
 0x4dd   : > { %v6189_v41 = vmax.f32 %v5178_v35, 0.0  ;;  %v5180_v18 = vadd.f32 %v11517_v59, %v4827_v52  ;;  %v4829_v58 = vadd.f32 %v4828_v26, %v11503_v34  ;;  %5879 = vmatprep.mubr.bf16.mxu0 %v13638_v27  ;;  %v11775_v0 = vadd.f32 %v6463_v33, %v6462_v23  ;;  %v13640_v35 = vld [vmem:[#allocation59_spill] sm:$0xff] }
 0x4de   : > { %v6466_v20 = vmul.f32 %v11521_v13, %v6188_v62  ;;  %v4832_v63 = vpop.f32.mrf.mxu1  ;;  %5071 = vmatmul.mubr.bf16.gmra.mxu1 %v11765_v40  ;;  %v11779_v12 = vpop.f32.mrf.mxu0 }
 0x4df   : > { %13639 = vst [vmem:[#allocation117_spill] sm:$0xff] %v11775_v0  ;;  %v6467_v57 = vmul.f32 %v11532_v50, %v6189_v41  ;;  %v6192_v17 = vmax.f32 %v5180_v18, 0.0  ;;  %v5182_v16 = vadd.f32 %v11528_v32, %v4829_v58  ;;  %v4833_v59 = vadd.f32 %v4832_v63, %v11484_v49  ;;  %5466 = vmatprep.mubr.bf16.mxu1 %v13640_v35 }
 0x4e0   : > { %v4834_v52 = vpop.f32.mrf.mxu1  ;;  %v11785_v26 = vpop.f32.mrf.mxu0 }
 0x4e1   : > { %v11787_v23 = vadd.f32 %v6467_v57, %v6466_v20  ;;  %v6193_v62 = vmax.f32 %v5182_v16, 0.0  ;;  %v5186_v33 = vadd.f32 %v11539_v21, %v4833_v59  ;;  %v4835_v47 = vadd.f32 %v4834_v52, %v11503_v34  ;;  %v13642_v57 = vld [vmem:[#allocation61_spill] sm:$0xff]  ;;  %v13644_v52 = vld [vmem:[#allocation63_spill] sm:$0xff] }
 0x4e2   : > { %v4836_v27 = vpop.f32.mrf.mxu1  ;;  %v11791_v40 = vpop.f32.mrf.mxu0  ;;  %v6470_v41 = vmul.f32 %v11521_v13, %v6192_v17 }
 0x4e3   : > { %13641 = vst [vmem:[#allocation46_spill] sm:$0xff] %v11787_v23  ;;  %v6471_v32 = vmul.f32 %v11532_v50, %v6193_v62  ;;  %v4837_v18 = vadd.f32 %v4836_v27, %v11484_v49  ;;  %v6196_v58 = vmax.f32 %v5186_v33, 0.0  ;;  %v5188_v63 = vadd.f32 %v11553_v19, %v4835_v47  ;;  %v13645_v33 = vld [vmem:[#allocation64_spill] sm:$0xff] }
 0x4e4   : > { %v4838_v35 = vpop.f32.mrf.mxu1  ;;  %v11797_v20 = vpop.f32.mrf.mxu0  ;;  %5880 = vmatmul.mubr.bf16.gmra.mxu0 %v13642_v57  ;;  %v13646_v57 = vld [vmem:[#allocation65_spill] sm:$0xff] }
 0x4e5   : > { %v11800_v21 = vadd.f32 %v6471_v32, %v6470_v41  ;;  %v5190_v16 = vadd.f32 %v11559_v37, %v4837_v18  ;;  %v4839_v59 = vadd.f32 %v4838_v35, %v11503_v34  ;;  %5889 = vmatprep.mubr.bf16.mxu0 %v13644_v52  ;;  %v6197_v17 = vmax.f32 %v5188_v63, 0.0 }
 0x4e6   : > { %v4842_v62 = vpop.f32.mrf.mxu1  ;;  %v11805_v23 = vpop.f32.mrf.mxu0  ;;  %5467 = vmatmul.mubr.bf16.vlgmr.msra.gmra.mxu1 %v13645_v33  ;;  %v6474_v41 = vmul.f32 %v11521_v13, %v6196_v58 }
 0x4e7   : > { %13643 = vst [vmem:[#allocation47_spill] sm:$0xff] %v11800_v21  ;;  %v6200_v19 = vmax.f32 %v5190_v16, 0.0  ;;  %v5192_v47 = vadd.f32 %v11569_v42, %v4839_v59  ;;  %v4843_v27 = vadd.f32 %v4842_v62, %v11484_v49  ;;  %5476 = vmatprep.mubr.bf16.mxu1 %v13646_v57  ;;  %v6475_v37 = vmul.f32 %v11532_v50, %v6197_v17 }
 0x4e8   : > { %v4844_v32 = vpop.f32.mrf.mxu1  ;;  %v11813_v18 = vpop.f32.mrf.mxu0 }
 0x4e9   : > { %v6201_v63 = vmax.f32 %v5192_v47, 0.0  ;;  %v5196_v35 = vadd.f32 %v11579_v14, %v4843_v27  ;;  %v4845_v52 = vadd.f32 %v4844_v32, %v11503_v34  ;;  %v11817_v33 = vadd.f32 %v6475_v37, %v6474_v41  ;;  %v13648_v14 = vld [vmem:[#allocation67_spill] sm:$0xff] }
 0x4ea   : > { %v6478_v42 = vmul.f32 %v11521_v13, %v6200_v19  ;;  %v4846_v16 = vpop.f32.mrf.mxu1  ;;  %v11820_v59 = vpop.f32.mrf.mxu0  ;;  %v13650_v37 = vld [vmem:[#allocation19_spill] sm:$0xff] }
 0x4eb   : > { %13647 = vst [vmem:[#allocation49_spill] sm:$0xff] %v11817_v33  ;;  %v6479_v62 = vmul.f32 %v11532_v50, %v6201_v63  ;;  %v6204_v58 = vmax.f32 %v5196_v35, 0.0  ;;  %v5198_v17 = vadd.f32 %v11592_v53, %v4845_v52  ;;  %v4847_v57 = vadd.f32 %v4846_v16, %v11484_v49  ;;  %v13651_v53 = vld [vmem:[#allocation18_spill] sm:$0xff] }
 0x4ec   : > { %v4848_v21 = vpop.f32.mrf.mxu1  ;;  %v11825_v47 = vpop.f32.mrf.mxu0  ;;  %5890 = vmatmul.mubr.bf16.gmra.mxu0 %v13648_v14 }
 0x4ed   : > { %v11828_v27 = vadd.f32 %v6479_v62, %v6478_v42  ;;  %v6205_v41 = vmax.f32 %v5198_v17, 0.0  ;;  %v5200_v19 = vadd.f32 %v11599_v24, %v4847_v57  ;;  %5899 = vmatprep.mubr.bf16.mxu0 %v13650_v37  ;;  %v4849_v32 = vadd.f32 %v4848_v21, %v11503_v34  ;;  %v13652_v42 = vld [vmem:[#allocation68_spill] sm:$0xff] }
 0x4ee   : > { %v4852_v63 = vpop.f32.mrf.mxu1  ;;  %v11833_v35 = vpop.f32.mrf.mxu0  ;;  %5477 = vmatmul.mubr.bf16.gmra.mxu1 %v13651_v53  ;;  %v6482_v52 = vmul.f32 %v11521_v13, %v6204_v58 }
 0x4ef   : > { %13649 = vst [vmem:[#allocation50_spill] sm:$0xff] %v11828_v27  ;;  %v6483_v16 = vmul.f32 %v11532_v50, %v6205_v41  ;;  %v4853_v14 = vadd.f32 %v4852_v63, %v11484_v49  ;;  %5486 = vmatprep.mubr.bf16.mxu1 %v13652_v42  ;;  %v6208_v62 = vmax.f32 %v5200_v19, 0.0  ;;  %v5202_v24 = vadd.f32 %v11608_v54, %v4849_v32 }
 0x4f0   : > { %v4854_v17 = vpop.f32.mrf.mxu1  ;;  %v11841_v57 = vpop.f32.mrf.mxu0 }
 0x4f1   : > { %v11843_v21 = vadd.f32 %v6483_v16, %v6482_v52  ;;  %v5206_v37 = vadd.f32 %v11617_v31, %v4853_v14  ;;  %v4855_v53 = vadd.f32 %v4854_v17, %v11503_v34  ;;  %v6209_v27 = vmax.f32 %v5202_v24, 0.0  ;;  %v13654_v16 = vld [vmem:[#allocation69_spill] sm:$0xff]  ;;  %v13655_v17 = vld [vmem:[#allocation70_spill] sm:$0xff] }
 0x4f2   : > { %v4856_v58 = vpop.f32.mrf.mxu1  ;;  %v11847_v33 = vpop.f32.mrf.mxu0  ;;  %v6486_v54 = vmul.f32 %v11521_v13, %v6208_v62 }
 0x4f3   : > { %13653 = vst [vmem:[#allocation52_spill] sm:$0xff] %v11843_v21  ;;  %v6212_v41 = vmax.f32 %v5206_v37, 0.0  ;;  %v5208_v63 = vadd.f32 %v11630_v45, %v4855_v53  ;;  %v4857_v19 = vadd.f32 %v4856_v58, %v11484_v49  ;;  %v6487_v32 = vmul.f32 %v11532_v50, %v6209_v27  ;;  %v13657_v27 = vld [vmem:[#allocation6_spill] sm:$0xff] }
 0x4f4   : > { %v4858_v42 = vpop.f32.mrf.mxu1  ;;  %v11853_v52 = vpop.f32.mrf.mxu0  ;;  %5900 = vmatmul.mubr.bf16.gmra.mxu0 %v13654_v16 }
 0x4f5   : > { %v6213_v31 = vmax.f32 %v5208_v63, 0.0  ;;  %v5210_v14 = vadd.f32 %v11639_v15, %v4857_v19  ;;  %v4859_v24 = vadd.f32 %v4858_v42, %v11503_v34  ;;  %5909 = vmatprep.mubr.bf16.mxu0 %v13655_v17  ;;  %v11859_v37 = vadd.f32 %v6487_v32, %v6486_v54  ;;  %v13658_v19 = vld [vmem:[#allocation21_spill] sm:$0xff] }
 0x4f6   : > { %v6490_v45 = vmul.f32 %v11521_v13, %v6212_v41  ;;  %v4862_v53 = vpop.f32.mrf.mxu1  ;;  %v11862_v62 = vpop.f32.mrf.mxu0  ;;  %5487 = vmatmul.mubr.bf16.gmra.mxu1 %v13657_v27 }
 0x4f7   : > { %13656 = vst [vmem:[#allocation127_spill] sm:$0xff] %v11859_v37  ;;  %v6491_v58 = vmul.f32 %v11532_v50, %v6213_v31  ;;  %v6216_v21 = vmax.f32 %v5210_v14, 0.0  ;;  %v5212_v63 = vadd.f32 %v11649_v22, %v4859_v24  ;;  %v4863_v15 = vadd.f32 %v4862_v53, %v11484_v49  ;;  %5496 = vmatprep.mubr.bf16.mxu1 %v13658_v19 }
 0x4f8   : > { %v4864_v42 = vpop.f32.mrf.mxu1  ;;  %v11869_v16 = vpop.f32.mrf.mxu0 }
 0x4f9   : > { %v11871_v54 = vadd.f32 %v6491_v58, %v6490_v45  ;;  %v6217_v41 = vmax.f32 %v5212_v63, 0.0  ;;  %v5216_v32 = vadd.f32 %v11659_v46, %v4863_v15  ;;  %v4865_v17 = vadd.f32 %v4864_v42, %v11503_v34  ;;  %v13660_v58 = vld [vmem:[#allocation72_spill] sm:$0xff]  ;;  %v13662_v42 = vld [vmem:[#allocation73_spill] sm:$0xff] }
 0x4fa   : > { %v4866_v27 = vpop.f32.mrf.mxu1  ;;  %v11875_v37 = vpop.f32.mrf.mxu0  ;;  %v6494_v31 = vmul.f32 %v11521_v13, %v6216_v21 }
 0x4fb   : > { %13659 = vst [vmem:[#allocation54_spill] sm:$0xff] %v11871_v54  ;;  %v6495_v22 = vmul.f32 %v11532_v50, %v6217_v41  ;;  %v4867_v14 = vadd.f32 %v4866_v27, %v11484_v49  ;;  %v6220_v24 = vmax.f32 %v5216_v32, 0.0  ;;  %v5218_v53 = vadd.f32 %v11673_v2, %v4865_v17  ;;  %v13663_v32 = vld [vmem:[#allocation20_spill] sm:$0xff] }
 0x4fc   : > { %v4868_v19 = vpop.f32.mrf.mxu1  ;;  %v11881_v45 = vpop.f32.mrf.mxu0  ;;  %5910 = vmatmul.mubr.bf16.gmra.mxu0 %v13660_v58  ;;  %v13664_v58 = vld [vmem:[#allocation74_spill] sm:$0xff] }
 0x4fd   : > { %v11884_v46 = vadd.f32 %v6495_v22, %v6494_v31  ;;  %v5220_v63 = vadd.f32 %v11679_v61, %v4867_v14  ;;  %v4869_v15 = vadd.f32 %v4868_v19, %v11503_v34  ;;  %5919 = vmatprep.mubr.bf16.mxu0 %v13662_v42  ;;  %v6221_v21 = vmax.f32 %v5218_v53, 0.0 }
 0x4fe   : > { %v4872_v41 = vpop.f32.mrf.mxu1  ;;  %v11889_v54 = vpop.f32.mrf.mxu0  ;;  %5497 = vmatmul.mubr.bf16.gmra.mxu1 %v13663_v32  ;;  %v6498_v31 = vmul.f32 %v11521_v13, %v6220_v24 }
 0x4ff   : > { %13661 = vst [vmem:[#allocation126_spill] sm:$0xff] %v11884_v46  ;;  %v6224_v2 = vmax.f32 %v5220_v63, 0.0  ;;  %v5222_v17 = vadd.f32 %v11685_v30, %v4869_v15  ;;  %v4873_v27 = vadd.f32 %v4872_v41, %v11484_v49  ;;  %5506 = vmatprep.mubr.bf16.mxu1 %v13664_v58  ;;  %v6499_v61 = vmul.f32 %v11532_v50, %v6221_v21 }
 0x500   : > { %v4874_v22 = vpop.f32.mrf.mxu1  ;;  %v11897_v14 = vpop.f32.mrf.mxu0 }
 0x501   : > { %v6225_v53 = vmax.f32 %v5222_v17, 0.0  ;;  %v5226_v19 = vadd.f32 %v11695_v60, %v4873_v27  ;;  %v4875_v42 = vadd.f32 %v4874_v22, %v11503_v34  ;;  %v11901_v32 = vadd.f32 %v6499_v61, %v6498_v31  ;;  %v13666_v60 = vld [vmem:[#allocation75_spill] sm:$0xff] }
 0x502   : > { %v6502_v30 = vmul.f32 %v11521_v13, %v6224_v2  ;;  %v4876_v63 = vpop.f32.mrf.mxu1  ;;  %v11904_v15 = vpop.f32.mrf.mxu0  ;;  %v13668_v61 = vld [vmem:[#allocation23_spill] sm:$0xff] }
 0x503   : > { %13665 = vst [vmem:[#allocation129_spill] sm:$0xff] %v11901_v32  ;;  %v6503_v41 = vmul.f32 %v11532_v50, %v6225_v53  ;;  %v6228_v24 = vmax.f32 %v5226_v19, 0.0  ;;  %v5228_v21 = vadd.f32 %v11712_v56, %v4875_v42  ;;  %v4877_v58 = vadd.f32 %v4876_v63, %v11484_v49  ;;  %v13669_v56 = vld [vmem:[#allocation22_spill] sm:$0xff] }
 0x504   : > { %v4878_v46 = vpop.f32.mrf.mxu1  ;;  %v11909_v17 = vpop.f32.mrf.mxu0  ;;  %5920 = vmatmul.mubr.bf16.gmra.mxu0 %v13666_v60 }
 0x505   : > { %v11912_v27 = vadd.f32 %v6503_v41, %v6502_v30  ;;  %v6229_v31 = vmax.f32 %v5228_v21, 0.0  ;;  %v5230_v2 = vadd.f32 %v11719_v25, %v4877_v58  ;;  %5929 = vmatprep.mubr.bf16.mxu0 %v13668_v61  ;;  %v4879_v22 = vadd.f32 %v4878_v46, %v11503_v34  ;;  %v13670_v30 = vld [vmem:[#allocation76_spill] sm:$0xff] }
 0x506   : > { %v4882_v53 = vpop.f32.mrf.mxu1  ;;  %v11917_v19 = vpop.f32.mrf.mxu0  ;;  %5507 = vmatmul.mubr.bf16.gmra.mxu1 %v13669_v56  ;;  %v6506_v42 = vmul.f32 %v11521_v13, %v6228_v24 }
 0x507   : > { %13667 = vst [vmem:[#allocation77_spill] sm:$0xff] %v11912_v27  ;;  %v6507_v63 = vmul.f32 %v11532_v50, %v6229_v31  ;;  %v4883_v60 = vadd.f32 %v4882_v53, %v11484_v49  ;;  %5516 = vmatprep.mubr.bf16.mxu1 %v13670_v30  ;;  %v6232_v41 = vmax.f32 %v5230_v2, 0.0  ;;  %v5232_v25 = vadd.f32 %v11726_v55, %v4879_v22 }
 0x508   : > { %v4884_v21 = vpop.f32.mrf.mxu1  ;;  %v11925_v58 = vpop.f32.mrf.mxu0 }
 0x509   : > { %v11927_v46 = vadd.f32 %v6507_v63, %v6506_v42  ;;  %v5236_v61 = vadd.f32 %v11735_v6, %v4883_v60  ;;  %v4885_v56 = vadd.f32 %v4884_v21, %v11503_v34  ;;  %v6233_v27 = vmax.f32 %v5232_v25, 0.0  ;;  %v13672_v63 = vld [vmem:[#allocation78_spill] sm:$0xff]  ;;  %v13673_v21 = vld [vmem:[#allocation25_spill] sm:$0xff] }
 0x50a   : > { %v4886_v24 = vpop.f32.mrf.mxu1  ;;  %v11931_v32 = vpop.f32.mrf.mxu0  ;;  %v6510_v55 = vmul.f32 %v11521_v13, %v6232_v41 }
 0x50b   : > { %13671 = vst [vmem:[#allocation4_spill] sm:$0xff] %v11927_v46  ;;  %v6236_v31 = vmax.f32 %v5236_v61, 0.0  ;;  %v5238_v53 = vadd.f32 %v11748_v39, %v4885_v56  ;;  %v4887_v2 = vadd.f32 %v4886_v24, %v11484_v49  ;;  %v6511_v22 = vmul.f32 %v11532_v50, %v6233_v27  ;;  %v13675_v27 = vld [vmem:[#allocation30_spill] sm:$0xff] }
 0x50c   : > { %v4888_v30 = vpop.f32.mrf.mxu1  ;;  %v11937_v42 = vpop.f32.mrf.mxu0  ;;  %5930 = vmatmul.mubr.bf16.gmra.mxu0 %v13672_v63 }
 0x50d   : > { %v6237_v6 = vmax.f32 %v5238_v53, 0.0  ;;  %v5240_v60 = vadd.f32 %v11755_v36, %v4887_v2  ;;  %v4889_v25 = vadd.f32 %v4888_v30, %v11503_v34  ;;  %5939 = vmatprep.mubr.bf16.mxu0 %v13673_v21  ;;  %v11943_v61 = vadd.f32 %v6511_v22, %v6510_v55  ;;  %v13676_v2 = vld [vmem:[#allocation27_spill] sm:$0xff] }
 0x50e   : > { %v6514_v39 = vmul.f32 %v11521_v13, %v6236_v31  ;;  %v4892_v56 = vpop.f32.mrf.mxu1  ;;  %v11946_v41 = vpop.f32.mrf.mxu0  ;;  %5517 = vmatmul.mubr.bf16.gmra.mxu1 %v13675_v27 }
 0x50f   : > { %13674 = vst [vmem:[#allocation57_spill] sm:$0xff] %v11943_v61  ;;  %v6515_v24 = vmul.f32 %v11532_v50, %v6237_v6  ;;  %v6240_v46 = vmax.f32 %v5240_v60, 0.0  ;;  %v5242_v53 = vadd.f32 %v11761_v8, %v4889_v25  ;;  %v4893_v36 = vadd.f32 %v4892_v56, %v11484_v49  ;;  %5526 = vmatprep.mubr.bf16.mxu1 %v13676_v2 }
 0x510   : > { %v4894_v30 = vpop.f32.mrf.mxu1  ;;  %v11953_v63 = vpop.f32.mrf.mxu0 }
 0x511   : > { %v11955_v55 = vadd.f32 %v6515_v24, %v6514_v39  ;;  %v6241_v31 = vmax.f32 %v5242_v53, 0.0  ;;  %v5246_v22 = vadd.f32 %v11769_v5, %v4893_v36  ;;  %v4895_v21 = vadd.f32 %v4894_v30, %v11503_v34  ;;  %v13678_v24 = vld [vmem:[#allocation80_spill] sm:$0xff] }
 0x512   : > { %v4896_v27 = vpop.f32.mrf.mxu1  ;;  %v11959_v61 = vpop.f32.mrf.mxu0  ;;  %v6518_v6 = vmul.f32 %v11521_v13, %v6240_v46  ;;  %v13680_v30 = vld [vmem:[#allocation28_spill] sm:$0xff] }
 0x513   : > { %13677 = vst [vmem:[#allocation58_spill] sm:$0xff] %v11955_v55  ;;  %v6519_v8 = vmul.f32 %v11532_v50, %v6241_v31  ;;  %v4897_v60 = vadd.f32 %v4896_v27, %v11484_v49  ;;  %v6244_v25 = vmax.f32 %v5246_v22, 0.0  ;;  %v5248_v56 = vadd.f32 %v11779_v12, %v4895_v21  ;;  %v13681_v22 = vld [vmem:[#allocation36_spill] sm:$0xff] }
 0x514   : > { %v4898_v2 = vpop.f32.mrf.mxu1  ;;  %v11965_v39 = vpop.f32.mrf.mxu0  ;;  %5940 = vmatmul.mubr.bf16.gmra.mxu0 %v13678_v24  ;;  %v13682_v24 = vld [vmem:[#allocation26_spill] sm:$0xff] }
 0x515   : > { %v11968_v5 = vadd.f32 %v6519_v8, %v6518_v6  ;;  %v5250_v53 = vadd.f32 %v11785_v26, %v4897_v60  ;;  %v4899_v36 = vadd.f32 %v4898_v2, %v11503_v34  ;;  %5949 = vmatprep.mubr.bf16.mxu0 %v13680_v30  ;;  %v6245_v46 = vmax.f32 %v5248_v56, 0.0 }
 0x516   : > { %v4902_v31 = vpop.f32.mrf.mxu1  ;;  %v11973_v55 = vpop.f32.mrf.mxu0  ;;  %5527 = vmatmul.mubr.bf16.gmra.mxu1 %v13681_v22  ;;  %v6522_v6 = vmul.f32 %v11521_v13, %v6244_v25 }
 0x517   : > { %13679 = vst [vmem:[#allocation59_spill] sm:$0xff] %v11968_v5  ;;  %v6248_v12 = vmax.f32 %v5250_v53, 0.0  ;;  %v5252_v21 = vadd.f32 %v11791_v40, %v4899_v36  ;;  %v4903_v27 = vadd.f32 %v4902_v31, %v11484_v49  ;;  %5536 = vmatprep.mubr.bf16.mxu1 %v13682_v24  ;;  %v6523_v26 = vmul.f32 %v11532_v50, %v6245_v46 }
 0x518   : > { %v4904_v8 = vpop.f32.mrf.mxu1  ;;  %v11981_v60 = vpop.f32.mrf.mxu0 }
 0x519   : > { %v6249_v56 = vmax.f32 %v5252_v21, 0.0  ;;  %v5256_v2 = vadd.f32 %v11797_v20, %v4903_v27  ;;  %v4905_v30 = vadd.f32 %v4904_v8, %v11503_v34  ;;  %v11985_v22 = vadd.f32 %v6523_v26, %v6522_v6  ;;  %v13684_v20 = vld [vmem:[#allocation81_spill] sm:$0xff]  ;;  %v13686_v26 = vld [vmem:[#allocation34_spill] sm:$0xff] }
 0x51a   : > { %v6526_v40 = vmul.f32 %v11521_v13, %v6248_v12  ;;  %v4906_v53 = vpop.f32.mrf.mxu1  ;;  %v11988_v36 = vpop.f32.mrf.mxu0 }
 0x51b   : > { %13683 = vst [vmem:[#allocation61_spill] sm:$0xff] %v11985_v22  ;;  %v6527_v31 = vmul.f32 %v11532_v50, %v6249_v56  ;;  %v6252_v25 = vmax.f32 %v5256_v2, 0.0  ;;  %v5258_v46 = vadd.f32 %v11805_v23, %v4905_v30  ;;  %v4907_v24 = vadd.f32 %v4906_v53, %v11484_v49  ;;  %v13687_v23 = vld [vmem:[#allocation7_spill] sm:$0xff] }
 0x51c   : > { %v4908_v5 = vpop.f32.mrf.mxu1  ;;  %v11993_v21 = vpop.f32.mrf.mxu0  ;;  %5950 = vmatmul.mubr.bf16.gmra.mxu0 %v13684_v20 }
 0x51d   : > { %v11996_v27 = vadd.f32 %v6527_v31, %v6526_v40  ;;  %v6253_v6 = vmax.f32 %v5258_v46, 0.0  ;;  %v5260_v12 = vadd.f32 %v11813_v18, %v4907_v24  ;;  %5959 = vmatprep.mubr.bf16.mxu0 %v13686_v26  ;;  %v4909_v8 = vadd.f32 %v4908_v5, %v11503_v34  ;;  %v13688_v40 = vld [vmem:[#allocation37_spill] sm:$0xff] }
 0x51e   : > { %v4912_v56 = vpop.f32.mrf.mxu1  ;;  %v12001_v2 = vpop.f32.mrf.mxu0  ;;  %5537 = vmatmul.mubr.bf16.gmra.mxu1 %v13687_v23  ;;  %v6530_v30 = vmul.f32 %v11521_v13, %v6252_v25 }
 0x51f   : > { %13685 = vst [vmem:[#allocation63_spill] sm:$0xff] %v11996_v27  ;;  %v6531_v53 = vmul.f32 %v11532_v50, %v6253_v6  ;;  %v4913_v20 = vadd.f32 %v4912_v56, %v11484_v49  ;;  %5546 = vmatprep.mubr.bf16.mxu1 %v13688_v40  ;;  %v6256_v31 = vmax.f32 %v5260_v12, 0.0  ;;  %v5262_v18 = vadd.f32 %v11820_v59, %v4909_v8 }
 0x520   : > { %v4914_v46 = vpop.f32.mrf.mxu1  ;;  %v12009_v24 = vpop.f32.mrf.mxu0 }
 0x521   : > { %v12011_v5 = vadd.f32 %v6531_v53, %v6530_v30  ;;  %v5266_v26 = vadd.f32 %v11825_v47, %v4913_v20  ;;  %v4915_v23 = vadd.f32 %v4914_v46, %v11503_v34  ;;  %v6257_v27 = vmax.f32 %v5262_v18, 0.0  ;;  %v13690_v53 = vld [vmem:[#allocation83_spill] sm:$0xff]  ;;  %v13691_v46 = vld [vmem:[#allocation9_spill] sm:$0xff] }
 0x522   : > { %v4916_v25 = vpop.f32.mrf.mxu1  ;;  %v12015_v22 = vpop.f32.mrf.mxu0  ;;  %v6534_v59 = vmul.f32 %v11521_v13, %v6256_v31 }
 0x523   : > { %13689 = vst [vmem:[#allocation64_spill] sm:$0xff] %v12011_v5  ;;  %v6260_v6 = vmax.f32 %v5266_v26, 0.0  ;;  %v5268_v56 = vadd.f32 %v11833_v35, %v4915_v23  ;;  %v4917_v12 = vadd.f32 %v4916_v25, %v11484_v49  ;;  %v6535_v8 = vmul.f32 %v11532_v50, %v6257_v27  ;;  %v13693_v27 = vld [vmem:[#allocation10_spill] sm:$0xff] }
 0x524   : > { %v4918_v40 = vpop.f32.mrf.mxu1  ;;  %v12021_v30 = vpop.f32.mrf.mxu0  ;;  %5960 = vmatmul.mubr.bf16.gmra.mxu0 %v13690_v53 }
 0x525   : > { %v6261_v47 = vmax.f32 %v5268_v56, 0.0  ;;  %v5270_v20 = vadd.f32 %v11841_v57, %v4917_v12  ;;  %v4919_v18 = vadd.f32 %v4918_v40, %v11503_v34  ;;  %5969 = vmatprep.mubr.bf16.mxu0 %v13691_v46  ;;  %v12027_v26 = vadd.f32 %v6535_v8, %v6534_v59  ;;  %v13694_v12 = vld [vmem:[#allocation41_spill] sm:$0xff] }
 0x526   : > { %v6538_v35 = vmul.f32 %v11521_v13, %v6260_v6  ;;  %v4922_v23 = vpop.f32.mrf.mxu1  ;;  %v12030_v31 = vpop.f32.mrf.mxu0  ;;  %5547 = vmatmul.mubr.bf16.gmra.mxu1 %v13693_v27 }
 0x527   : > { %13692 = vst [vmem:[#allocation65_spill] sm:$0xff] %v12027_v26  ;;  %v6539_v25 = vmul.f32 %v11532_v50, %v6261_v47  ;;  %v6264_v5 = vmax.f32 %v5270_v20, 0.0  ;;  %v5272_v56 = vadd.f32 %v11847_v33, %v4919_v18  ;;  %v4923_v57 = vadd.f32 %v4922_v23, %v11484_v49  ;;  %5556 = vmatprep.mubr.bf16.mxu1 %v13694_v12 }
 0x528   : > { %v4924_v40 = vpop.f32.mrf.mxu1  ;;  %v12037_v53 = vpop.f32.mrf.mxu0 }
 0x529   : > { %v12039_v59 = vadd.f32 %v6539_v25, %v6538_v35  ;;  %v6265_v6 = vmax.f32 %v5272_v56, 0.0  ;;  %v5276_v8 = vadd.f32 %v11853_v52, %v4923_v57  ;;  %v4925_v46 = vadd.f32 %v4924_v40, %v11503_v34  ;;  %v13696_v25 = vld [vmem:[#allocation85_spill] sm:$0xff]  ;;  %v13698_v40 = vld [vmem:[#allocation43_spill] sm:$0xff] }
 0x52a   : > { %v4926_v27 = vpop.f32.mrf.mxu1  ;;  %v12043_v26 = vpop.f32.mrf.mxu0  ;;  %v6542_v47 = vmul.f32 %v11521_v13, %v6264_v5 }
 0x52b   : > { %13695 = vst [vmem:[#allocation67_spill] sm:$0xff] %v12039_v59  ;;  %v6543_v33 = vmul.f32 %v11532_v50, %v6265_v6  ;;  %v4927_v20 = vadd.f32 %v4926_v27, %v11484_v49  ;;  %v6268_v18 = vmax.f32 %v5276_v8, 0.0  ;;  %v5278_v23 = vadd.f32 %v11862_v62, %v4925_v46  ;;  %v13699_v8 = vld [vmem:[#allocation11_spill] sm:$0xff] }
 0x52c   : > { %v4928_v12 = vpop.f32.mrf.mxu1  ;;  %v12049_v35 = vpop.f32.mrf.mxu0  ;;  %5970 = vmatmul.mubr.bf16.gmra.mxu0 %v13696_v25  ;;  %v13700_v25 = vld [vmem:[#allocation40_spill] sm:$0xff] }
 0x52d   : > { %v12052_v52 = vadd.f32 %v6543_v33, %v6542_v47  ;;  %v5280_v56 = vadd.f32 %v11869_v16, %v4927_v20  ;;  %v4929_v57 = vadd.f32 %v4928_v12, %v11503_v34  ;;  %5979 = vmatprep.mubr.bf16.mxu0 %v13698_v40  ;;  %v6269_v5 = vmax.f32 %v5278_v23, 0.0 }
 0x52e   : > { %v4932_v6 = vpop.f32.mrf.mxu1  ;;  %v12057_v59 = vpop.f32.mrf.mxu0  ;;  %5557 = vmatmul.mubr.bf16.gmra.mxu1 %v13699_v8  ;;  %v6546_v47 = vmul.f32 %v11521_v13, %v6268_v18 }
 0x52f   : > { %13697 = vst [vmem:[#allocation19_spill] sm:$0xff] %v12052_v52  ;;  %v6272_v62 = vmax.f32 %v5280_v56, 0.0  ;;  %v5282_v46 = vadd.f32 %v11875_v37, %v4929_v57  ;;  %v4933_v27 = vadd.f32 %v4932_v6, %v11484_v49  ;;  %5566 = vmatprep.mubr.bf16.mxu1 %v13700_v25  ;;  %v6547_v16 = vmul.f32 %v11532_v50, %v6269_v5 }
 0x530   : > { %v4934_v33 = vpop.f32.mrf.mxu1  ;;  %v12065_v20 = vpop.f32.mrf.mxu0 }
 0x531   : > { %v6273_v23 = vmax.f32 %v5282_v46, 0.0  ;;  %v5286_v12 = vadd.f32 %v11881_v45, %v4933_v27  ;;  %v4935_v40 = vadd.f32 %v4934_v33, %v11503_v34  ;;  %v12069_v8 = vadd.f32 %v6547_v16, %v6546_v47  ;;  %v13702_v45 = vld [vmem:[#allocation45_spill] sm:$0xff] }
 0x532   : > { %v6550_v37 = vmul.f32 %v11521_v13, %v6272_v62  ;;  %v4936_v56 = vpop.f32.mrf.mxu1  ;;  %v12072_v57 = vpop.f32.mrf.mxu0  ;;  %v13704_v16 = vld [vmem:[#allocation13_spill] sm:$0xff] }
 0x533   : > { %13701 = vst [vmem:[#allocation18_spill] sm:$0xff] %v12069_v8  ;;  %v6551_v6 = vmul.f32 %v11532_v50, %v6273_v23  ;;  %v6276_v18 = vmax.f32 %v5286_v12, 0.0  ;;  %v5288_v5 = vadd.f32 %v11889_v54, %v4935_v40  ;;  %v4937_v25 = vadd.f32 %v4936_v56, %v11484_v49  ;;  %v13705_v54 = vld [vmem:[#allocation12_spill] sm:$0xff] }
 0x534   : > { %v4938_v52 = vpop.f32.mrf.mxu1  ;;  %v12077_v46 = vpop.f32.mrf.mxu0  ;;  %5980 = vmatmul.mubr.bf16.gmra.mxu0 %v13702_v45 }
 0x535   : > { %v12080_v27 = vadd.f32 %v6551_v6, %v6550_v37  ;;  %v6277_v47 = vmax.f32 %v5288_v5, 0.0  ;;  %v5290_v62 = vadd.f32 %v11897_v14, %v4937_v25  ;;  %5989 = vmatprep.mubr.bf16.mxu0 %v13704_v16  ;;  %v4939_v33 = vadd.f32 %v4938_v52, %v11503_v34  ;;  %v13706_v37 = vld [vmem:[#allocation48_spill] sm:$0xff] }
 0x536   : > { %v4942_v23 = vpop.f32.mrf.mxu1  ;;  %v12085_v12 = vpop.f32.mrf.mxu0  ;;  %5567 = vmatmul.mubr.bf16.gmra.mxu1 %v13705_v54  ;;  %v6554_v40 = vmul.f32 %v11521_v13, %v6276_v18 }
 0x537   : > { %13703 = vst [vmem:[#allocation68_spill] sm:$0xff] %v12080_v27  ;;  %v6555_v56 = vmul.f32 %v11532_v50, %v6277_v47  ;;  %v4943_v45 = vadd.f32 %v4942_v23, %v11484_v49  ;;  %5576 = vmatprep.mubr.bf16.mxu1 %v13706_v37  ;;  %v6280_v6 = vmax.f32 %v5290_v62, 0.0  ;;  %v5292_v14 = vadd.f32 %v11904_v15, %v4939_v33 }
 0x538   : > { %v4944_v5 = vpop.f32.mrf.mxu1  ;;  %v12093_v25 = vpop.f32.mrf.mxu0 }
 0x539   : > { %v12095_v52 = vadd.f32 %v6555_v56, %v6554_v40  ;;  %v5296_v16 = vadd.f32 %v11909_v17, %v4943_v45  ;;  %v4945_v54 = vadd.f32 %v4944_v5, %v11503_v34  ;;  %v6281_v27 = vmax.f32 %v5292_v14, 0.0  ;;  %v13708_v56 = vld [vmem:[#allocation88_spill] sm:$0xff] }
 0x53a   : > { %v4946_v18 = vpop.f32.mrf.mxu1  ;;  %v12099_v8 = vpop.f32.mrf.mxu0  ;;  %v6558_v15 = vmul.f32 %v11521_v13, %v6280_v6  ;;  %v13709_v5 = vld [vmem:[#allocation16_spill] sm:$0xff] }
 0x53b   : > { %13707 = vst [vmem:[#allocation69_spill] sm:$0xff] %v12095_v52  ;;  %v6284_v47 = vmax.f32 %v5296_v16, 0.0  ;;  %v5298_v23 = vadd.f32 %v11917_v19, %v4945_v54  ;;  %v4947_v62 = vadd.f32 %v4946_v18, %v11484_v49  ;;  %v6559_v33 = vmul.f32 %v11532_v50, %v6281_v27  ;;  %v13711_v27 = vld [vmem:[#allocation17_spill] sm:$0xff] }
 0x53c   : > { %v4948_v37 = vpop.f32.mrf.mxu1  ;;  %v12105_v40 = vpop.f32.mrf.mxu0  ;;  %5990 = vmatmul.mubr.bf16.gmra.mxu0 %v13708_v56 }
 0x53d   : > { %v6285_v17 = vmax.f32 %v5298_v23, 0.0  ;;  %v5300_v45 = vadd.f32 %v11925_v58, %v4947_v62  ;;  %v4949_v14 = vadd.f32 %v4948_v37, %v11503_v34  ;;  %5999 = vmatprep.mubr.bf16.mxu0 %v13709_v5  ;;  %v12111_v16 = vadd.f32 %v6559_v33, %v6558_v15  ;;  %v13712_v62 = vld [vmem:[#allocation51_spill] sm:$0xff] }
 0x53e   : > { %v6562_v19 = vmul.f32 %v11521_v13, %v6284_v47  ;;  %v4952_v54 = vpop.f32.mrf.mxu1  ;;  %v12114_v6 = vpop.f32.mrf.mxu0  ;;  %5577 = vmatmul.mubr.bf16.gmra.mxu1 %v13711_v27 }
 0x53f   : > { %13710 = vst [vmem:[#allocation70_spill] sm:$0xff] %v12111_v16  ;;  %v6563_v18 = vmul.f32 %v11532_v50, %v6285_v17  ;;  %v6288_v52 = vmax.f32 %v5300_v45, 0.0  ;;  %v5302_v23 = vadd.f32 %v11931_v32, %v4949_v14  ;;  %v4953_v58 = vadd.f32 %v4952_v54, %v11484_v49  ;;  %5586 = vmatprep.mubr.bf16.mxu1 %v13712_v62 }
 0x540   : > { %v4954_v37 = vpop.f32.mrf.mxu1  ;;  %v12121_v56 = vpop.f32.mrf.mxu0 }
 0x541   : > { %v12123_v15 = vadd.f32 %v6563_v18, %v6562_v19  ;;  %v6289_v47 = vmax.f32 %v5302_v23, 0.0  ;;  %v5306_v33 = vadd.f32 %v11937_v42, %v4953_v58  ;;  %v4955_v5 = vadd.f32 %v4954_v37, %v11503_v34  ;;  %v13714_v18 = vld [vmem:[#allocation89_spill] sm:$0xff]  ;;  %v13716_v37 = vld [vmem:[#allocation90_spill] sm:$0xff] }
 0x542   : > { %v4956_v27 = vpop.f32.mrf.mxu1  ;;  %v12127_v16 = vpop.f32.mrf.mxu0  ;;  %v6566_v17 = vmul.f32 %v11521_v13, %v6288_v52 }
 0x543   : > { %13713 = vst [vmem:[#allocation6_spill] sm:$0xff] %v12123_v15  ;;  %v6567_v32 = vmul.f32 %v11532_v50, %v6289_v47  ;;  %v4957_v45 = vadd.f32 %v4956_v27, %v11484_v49  ;;  %v6292_v14 = vmax.f32 %v5306_v33, 0.0  ;;  %v5308_v54 = vadd.f32 %v11946_v41, %v4955_v5  ;;  %v13717_v33 = vld [vmem:[#allocation14_spill] sm:$0xff] }
 0x544   : > { %v4958_v62 = vpop.f32.mrf.mxu1  ;;  %v12133_v19 = vpop.f32.mrf.mxu0  ;;  %6000 = vmatmul.mubr.bf16.gmra.mxu0 %v13714_v18  ;;  %v13718_v18 = vld [vmem:[#allocation56_spill] sm:$0xff] }
 0x545   : > { %v12136_v42 = vadd.f32 %v6567_v32, %v6566_v17  ;;  %v5310_v23 = vadd.f32 %v11953_v63, %v4957_v45  ;;  %v4959_v58 = vadd.f32 %v4958_v62, %v11503_v34  ;;  %6009 = vmatprep.mubr.bf16.mxu0 %v13716_v37  ;;  %v6293_v52 = vmax.f32 %v5308_v54, 0.0 }
 0x546   : > { %v4962_v47 = vpop.f32.mrf.mxu1  ;;  %v12141_v15 = vpop.f32.mrf.mxu0  ;;  %5587 = vmatmul.mubr.bf16.gmra.mxu1 %v13717_v33  ;;  %v6570_v17 = vmul.f32 %v11521_v13, %v6292_v14 }
 0x547   : > { %13715 = vst [vmem:[#allocation21_spill] sm:$0xff] %v12136_v42  ;;  %v6296_v41 = vmax.f32 %v5310_v23, 0.0  ;;  %v5312_v5 = vadd.f32 %v11959_v61, %v4959_v58  ;;  %v4963_v27 = vadd.f32 %v4962_v47, %v11484_v49  ;;  %5596 = vmatprep.mubr.bf16.mxu1 %v13718_v18  ;;  %v6571_v63 = vmul.f32 %v11532_v50, %v6293_v52 }
 0x548   : > { %v4964_v32 = vpop.f32.mrf.mxu1  ;;  %v12149_v45 = vpop.f32.mrf.mxu0 }
 0x549   : > { %v6297_v54 = vmax.f32 %v5312_v5, 0.0  ;;  %v5316_v62 = vadd.f32 %v11965_v39, %v4963_v27  ;;  %v4965_v37 = vadd.f32 %v4964_v32, %v11503_v34  ;;  %v12153_v33 = vadd.f32 %v6571_v63, %v6570_v17  ;;  %v13720_v39 = vld [vmem:[#allocation91_spill] sm:$0xff]  ;;  %v13722_v63 = vld [vmem:[#allocation92_spill] sm:$0xff] }
 0x54a   : > { %v6574_v61 = vmul.f32 %v11521_v13, %v6296_v41  ;;  %v4966_v23 = vpop.f32.mrf.mxu1  ;;  %v12156_v58 = vpop.f32.mrf.mxu0 }
 0x54b   : > { %13719 = vst [vmem:[#allocation72_spill] sm:$0xff] %v12153_v33  ;;  %v6575_v47 = vmul.f32 %v11532_v50, %v6297_v54  ;;  %v6300_v14 = vmax.f32 %v5316_v62, 0.0  ;;  %v5318_v52 = vadd.f32 %v11973_v55, %v4965_v37  ;;  %v4967_v18 = vadd.f32 %v4966_v23, %v11484_v49  ;;  %v13723_v55 = vld [vmem:[#allocation55_spill] sm:$0xff] }
 0x54c   : > { %v4968_v42 = vpop.f32.mrf.mxu1  ;;  %v12161_v5 = vpop.f32.mrf.mxu0  ;;  %6010 = vmatmul.mubr.bf16.gmra.mxu0 %v13720_v39 }
 0x54d   : > { %v12164_v27 = vadd.f32 %v6575_v47, %v6574_v61  ;;  %v6301_v17 = vmax.f32 %v5318_v52, 0.0  ;;  %v5320_v41 = vadd.f32 %v11981_v60, %v4967_v18  ;;  %6019 = vmatprep.mubr.bf16.mxu0 %v13722_v63  ;;  %v4969_v32 = vadd.f32 %v4968_v42, %v11503_v34  ;;  %v13724_v61 = vld [vmem:[#allocation93_spill] sm:$0xff] }
 0x54e   : > { %v4972_v54 = vpop.f32.mrf.mxu1  ;;  %v12169_v62 = vpop.f32.mrf.mxu0  ;;  %5597 = vmatmul.mubr.bf16.gmra.mxu1 %v13723_v55  ;;  %v6578_v37 = vmul.f32 %v11521_v13, %v6300_v14 }
 0x54f   : > { %13721 = vst [vmem:[#allocation73_spill] sm:$0xff] %v12164_v27  ;;  %v6579_v23 = vmul.f32 %v11532_v50, %v6301_v17  ;;  %v4973_v39 = vadd.f32 %v4972_v54, %v11484_v49  ;;  %5606 = vmatprep.mubr.bf16.mxu1 %v13724_v61  ;;  %v6304_v47 = vmax.f32 %v5320_v41, 0.0  ;;  %v5322_v60 = vadd.f32 %v11988_v36, %v4969_v32 }
 0x550   : > { %v4974_v52 = vpop.f32.mrf.mxu1  ;;  %v12177_v18 = vpop.f32.mrf.mxu0 }
 0x551   : > { %v12179_v42 = vadd.f32 %v6579_v23, %v6578_v37  ;;  %v5326_v63 = vadd.f32 %v11993_v21, %v4973_v39  ;;  %v4975_v55 = vadd.f32 %v4974_v52, %v11503_v34  ;;  %v6305_v27 = vmax.f32 %v5322_v60, 0.0  ;;  %v13726_v23 = vld [vmem:[#allocation94_spill] sm:$0xff] }
 0x552   : > { %v4976_v14 = vpop.f32.mrf.mxu1  ;;  %v12183_v33 = vpop.f32.mrf.mxu0  ;;  %v6582_v36 = vmul.f32 %v11521_v13, %v6304_v47  ;;  %v13727_v52 = vld [vmem:[#allocation62_spill] sm:$0xff] }
 0x553   : > { %13725 = vst [vmem:[#allocation20_spill] sm:$0xff] %v12179_v42  ;;  %v6308_v17 = vmax.f32 %v5326_v63, 0.0  ;;  %v5328_v54 = vadd.f32 %v12001_v2, %v4975_v55  ;;  %v4977_v41 = vadd.f32 %v4976_v14, %v11484_v49  ;;  %v6583_v32 = vmul.f32 %v11532_v50, %v6305_v27  ;;  %v13729_v27 = vld [vmem:[#allocation60_spill] sm:$0xff] }
 0x554   : > { %v4978_v61 = vpop.f32.mrf.mxu1  ;;  %v12189_v37 = vpop.f32.mrf.mxu0  ;;  %6020 = vmatmul.mubr.bf16.gmra.mxu0 %v13726_v23 }
 0x555   : > { %v6309_v21 = vmax.f32 %v5328_v54, 0.0  ;;  %v5330_v39 = vadd.f32 %v12009_v24, %v4977_v41  ;;  %v4979_v60 = vadd.f32 %v4978_v61, %v11503_v34  ;;  %6029 = vmatprep.mubr.bf16.mxu0 %v13727_v52  ;;  %v12195_v63 = vadd.f32 %v6583_v32, %v6582_v36  ;;  %v13730_v41 = vld [vmem:[#allocation95_spill] sm:$0xff] }
 0x556   : > { %v6586_v2 = vmul.f32 %v11521_v13, %v6308_v17  ;;  %v4982_v55 = vpop.f32.mrf.mxu1  ;;  %v12198_v47 = vpop.f32.mrf.mxu0  ;;  %5607 = vmatmul.mubr.bf16.gmra.mxu1 %v13729_v27 }
 0x557   : > { %13728 = vst [vmem:[#allocation74_spill] sm:$0xff] %v12195_v63  ;;  %v6587_v14 = vmul.f32 %v11532_v50, %v6309_v21  ;;  %v6312_v42 = vmax.f32 %v5330_v39, 0.0  ;;  %v5332_v54 = vadd.f32 %v12015_v22, %v4979_v60  ;;  %v4983_v24 = vadd.f32 %v4982_v55, %v11484_v49  ;;  %5616 = vmatprep.mubr.bf16.mxu1 %v13730_v41 }
 0x558   : > { %v4984_v61 = vpop.f32.mrf.mxu1  ;;  %v12205_v23 = vpop.f32.mrf.mxu0 }
 0x559   : > { %v12207_v36 = vadd.f32 %v6587_v14, %v6586_v2  ;;  %v6313_v17 = vmax.f32 %v5332_v54, 0.0  ;;  %v5336_v32 = vadd.f32 %v12021_v30, %v4983_v24  ;;  %v4985_v52 = vadd.f32 %v4984_v61, %v11503_v34  ;;  %v13732_v14 = vld [vmem:[#allocation96_spill] sm:$0xff]  ;;  %v13734_v61 = vld [vmem:[#allocation97_spill] sm:$0xff] }
 0x55a   : > { %v4986_v27 = vpop.f32.mrf.mxu1  ;;  %v12211_v63 = vpop.f32.mrf.mxu0  ;;  %v6590_v21 = vmul.f32 %v11521_v13, %v6312_v42 }
 0x55b   : > { %13731 = vst [vmem:[#allocation75_spill] sm:$0xff] %v12207_v36  ;;  %v6591_v22 = vmul.f32 %v11532_v50, %v6313_v17  ;;  %v4987_v39 = vadd.f32 %v4986_v27, %v11484_v49  ;;  %v6316_v60 = vmax.f32 %v5336_v32, 0.0  ;;  %v5338_v55 = vadd.f32 %v12030_v31, %v4985_v52  ;;  %v13735_v32 = vld [vmem:[#allocation66_spill] sm:$0xff] }
 0x55c   : > { %v4988_v41 = vpop.f32.mrf.mxu1  ;;  %v12217_v2 = vpop.f32.mrf.mxu0  ;;  %6030 = vmatmul.mubr.bf16.gmra.mxu0 %v13732_v14  ;;  %v13736_v14 = vld [vmem:[#allocation98_spill] sm:$0xff] }
 0x55d   : > { %v12220_v30 = vadd.f32 %v6591_v22, %v6590_v21  ;;  %v5340_v54 = vadd.f32 %v12037_v53, %v4987_v39  ;;  %v4989_v24 = vadd.f32 %v4988_v41, %v11503_v34  ;;  %6039 = vmatprep.mubr.bf16.mxu0 %v13734_v61  ;;  %v6317_v42 = vmax.f32 %v5338_v55, 0.0 }
 0x55e   : > { %v4992_v17 = vpop.f32.mrf.mxu1  ;;  %v12225_v36 = vpop.f32.mrf.mxu0  ;;  %5617 = vmatmul.mubr.bf16.gmra.mxu1 %v13735_v32  ;;  %v6594_v21 = vmul.f32 %v11521_v13, %v6316_v60 }
 0x55f   : > { %13733 = vst [vmem:[#allocation23_spill] sm:$0xff] %v12220_v30  ;;  %v6320_v31 = vmax.f32 %v5340_v54, 0.0  ;;  %v5342_v52 = vadd.f32 %v12043_v26, %v4989_v24  ;;  %v4993_v27 = vadd.f32 %v4992_v17, %v11484_v49  ;;  %5626 = vmatprep.mubr.bf16.mxu1 %v13736_v14  ;;  %v6595_v53 = vmul.f32 %v11532_v50, %v6317_v42 }
 0x560   : > { %v4994_v22 = vpop.f32.mrf.mxu1  ;;  %v12233_v39 = vpop.f32.mrf.mxu0 }
 0x561   : > { %v6321_v55 = vmax.f32 %v5342_v52, 0.0  ;;  %v5346_v41 = vadd.f32 %v12049_v35, %v4993_v27  ;;  %v4995_v61 = vadd.f32 %v4994_v22, %v11503_v34  ;;  %v12237_v32 = vadd.f32 %v6595_v53, %v6594_v21  ;;  %v13738_v35 = vld [vmem:[#allocation99_spill] sm:$0xff]  ;;  %v13740_v53 = vld [vmem:[#allocation100_spill] sm:$0xff] }
 0x562   : > { %v6598_v26 = vmul.f32 %v11521_v13, %v6320_v31  ;;  %v4996_v54 = vpop.f32.mrf.mxu1  ;;  %v12240_v24 = vpop.f32.mrf.mxu0 }
 0x563   : > { %13737 = vst [vmem:[#allocation22_spill] sm:$0xff] %v12237_v32  ;;  %v6599_v17 = vmul.f32 %v11532_v50, %v6321_v55  ;;  %v6324_v60 = vmax.f32 %v5346_v41, 0.0  ;;  %v5348_v42 = vadd.f32 %v12057_v59, %v4995_v61  ;;  %v4997_v14 = vadd.f32 %v4996_v54, %v11484_v49  ;;  %v13741_v59 = vld [vmem:[#allocation71_spill] sm:$0xff] }
 0x564   : > { %v4998_v30 = vpop.f32.mrf.mxu1  ;;  %v12245_v52 = vpop.f32.mrf.mxu0  ;;  %6040 = vmatmul.mubr.bf16.gmra.mxu0 %v13738_v35 }
 0x565   : > { %v12248_v27 = vadd.f32 %v6599_v17, %v6598_v26  ;;  %v6325_v21 = vmax.f32 %v5348_v42, 0.0  ;;  %v5350_v31 = vadd.f32 %v12065_v20, %v4997_v14  ;;  %6049 = vmatprep.mubr.bf16.mxu0 %v13740_v53  ;;  %v4999_v22 = vadd.f32 %v4998_v30, %v11503_v34  ;;  %v13742_v26 = vld [vmem:[#allocation24_spill] sm:$0xff] }
 0x566   : > { %v5002_v55 = vpop.f32.mrf.mxu1  ;;  %v12253_v41 = vpop.f32.mrf.mxu0  ;;  %5627 = vmatmul.mubr.bf16.gmra.mxu1 %v13741_v59  ;;  %v6602_v61 = vmul.f32 %v11521_v13, %v6324_v60 }
 0x567   : > { %13739 = vst [vmem:[#allocation76_spill] sm:$0xff] %v12248_v27  ;;  %v6603_v54 = vmul.f32 %v11532_v50, %v6325_v21  ;;  %v5003_v35 = vadd.f32 %v5002_v55, %v11484_v49  ;;  %5636 = vmatprep.mubr.bf16.mxu1 %v13742_v26  ;;  %v6328_v17 = vmax.f32 %v5350_v31, 0.0  ;;  %v5352_v20 = vadd.f32 %v12072_v57, %v4999_v22 }
 0x568   : > { %v5004_v42 = vpop.f32.mrf.mxu1  ;;  %v12261_v14 = vpop.f32.mrf.mxu0 }
 0x569   : > { %v12263_v30 = vadd.f32 %v6603_v54, %v6602_v61  ;;  %v5356_v53 = vadd.f32 %v12077_v46, %v5003_v35  ;;  %v5005_v59 = vadd.f32 %v5004_v42, %v11503_v34  ;;  %v6329_v27 = vmax.f32 %v5352_v20, 0.0  ;;  %v13744_v54 = vld [vmem:[#allocation101_spill] sm:$0xff]  ;;  %v13745_v42 = vld [vmem:[#allocation79_spill] sm:$0xff] }
 0x56a   : > { %v5006_v60 = vpop.f32.mrf.mxu1  ;;  %v12267_v32 = vpop.f32.mrf.mxu0  ;;  %v6606_v57 = vmul.f32 %v11521_v13, %v6328_v17 }
 0x56b   : > { %13743 = vst [vmem:[#allocation78_spill] sm:$0xff] %v12263_v30  ;;  %v6332_v21 = vmax.f32 %v5356_v53, 0.0  ;;  %v5358_v55 = vadd.f32 %v12085_v12, %v5005_v59  ;;  %v5007_v31 = vadd.f32 %v5006_v60, %v11484_v49  ;;  %v6607_v22 = vmul.f32 %v11532_v50, %v6329_v27  ;;  %v13747_v27 = vld [vmem:[#allocation8_spill] sm:$0xff] }
 0x56c   : > { %v5008_v26 = vpop.f32.mrf.mxu1  ;;  %v12273_v61 = vpop.f32.mrf.mxu0  ;;  %6050 = vmatmul.mubr.bf16.gmra.mxu0 %v13744_v54 }
 0x56d   : > { %v6333_v46 = vmax.f32 %v5358_v55, 0.0  ;;  %v5360_v35 = vadd.f32 %v12093_v25, %v5007_v31  ;;  %v5009_v20 = vadd.f32 %v5008_v26, %v11503_v34  ;;  %6059 = vmatprep.mubr.bf16.mxu0 %v13745_v42  ;;  %v12279_v53 = vadd.f32 %v6607_v22, %v6606_v57  ;;  %v13748_v31 = vld [vmem:[#allocation31_spill] sm:$0xff] }
 0x56e   : > { %v6610_v12 = vmul.f32 %v11521_v13, %v6332_v21  ;;  %v5012_v59 = vpop.f32.mrf.mxu1  ;;  %v12282_v17 = vpop.f32.mrf.mxu0  ;;  %5637 = vmatmul.mubr.bf16.gmra.mxu1 %v13747_v27 }
 0x56f   : > { %13746 = vst [vmem:[#allocation25_spill] sm:$0xff] %v12279_v53  ;;  %v6611_v60 = vmul.f32 %v11532_v50, %v6333_v46  ;;  %v6336_v30 = vmax.f32 %v5360_v35, 0.0  ;;  %v5362_v55 = vadd.f32 %v12099_v8, %v5009_v20  ;;  %v5013_v25 = vadd.f32 %v5012_v59, %v11484_v49  ;;  %5646 = vmatprep.mubr.bf16.mxu1 %v13748_v31 }
 0x570   : > { %v5014_v26 = vpop.f32.mrf.mxu1  ;;  %v12289_v54 = vpop.f32.mrf.mxu0 }
 0x571   : > { %v12291_v57 = vadd.f32 %v6611_v60, %v6610_v12  ;;  %v6337_v21 = vmax.f32 %v5362_v55, 0.0  ;;  %v5366_v22 = vadd.f32 %v12105_v40, %v5013_v25  ;;  %v5015_v42 = vadd.f32 %v5014_v26, %v11503_v34  ;;  %v13750_v60 = vld [vmem:[#allocation103_spill] sm:$0xff]  ;;  %v13752_v26 = vld [vmem:[#allocation82_spill] sm:$0xff] }
 0x572   : > { %v5016_v27 = vpop.f32.mrf.mxu1  ;;  %v12295_v53 = vpop.f32.mrf.mxu0  ;;  %v6614_v46 = vmul.f32 %v11521_v13, %v6336_v30 }
 0x573   : > { %13749 = vst [vmem:[#allocation30_spill] sm:$0xff] %v12291_v57  ;;  %v6615_v8 = vmul.f32 %v11532_v50, %v6337_v21  ;;  %v5017_v35 = vadd.f32 %v5016_v27, %v11484_v49  ;;  %v6340_v20 = vmax.f32 %v5366_v22, 0.0  ;;  %v5368_v59 = vadd.f32 %v12114_v6, %v5015_v42  ;;  %v13753_v57 = vld [vmem:[#allocation33_spill] sm:$0xff] }
 0x574   : > { %v5018_v31 = vpop.f32.mrf.mxu1  ;;  %v12301_v12 = vpop.f32.mrf.mxu0  ;;  %6060 = vmatmul.mubr.bf16.gmra.mxu0 %v13750_v60  ;;  %v13754_v60 = vld [vmem:[#allocation104_spill] sm:$0xff] }
 0x575   : > { %v12304_v40 = vadd.f32 %v6615_v8, %v6614_v46  ;;  %v5370_v55 = vadd.f32 %v12121_v56, %v5017_v35  ;;  %v5019_v25 = vadd.f32 %v5018_v31, %v11503_v34  ;;  %6069 = vmatprep.mubr.bf16.mxu0 %v13752_v26  ;;  %v6341_v30 = vmax.f32 %v5368_v59, 0.0 }
 0x576   : > { %v5022_v21 = vpop.f32.mrf.mxu1  ;;  %5647 = vmatmul.mubr.bf16.gmra.mxu1 %v13753_v57  ;;  %v12310_v22 = vpop.f32.mrf.mxu0  ;;  %v6618_v46 = vmul.f32 %v11521_v13, %v6340_v20 }
 0x577   : > { %13751 = vst [vmem:[#allocation27_spill] sm:$0xff] %v12304_v40  ;;  %v6344_v6 = vmax.f32 %v5370_v55, 0.0  ;;  %v5372_v42 = vadd.f32 %v12127_v16, %v5019_v25  ;;  %v5023_v27 = vadd.f32 %v5022_v21, %v11484_v49  ;;  %5656 = vmatprep.mubr.bf16.mxu1 %v13754_v60  ;;  %v6619_v56 = vmul.f32 %v11532_v50, %v6341_v30 }
 0x578   : > { %v5024_v8 = vpop.f32.mrf.mxu1  ;;  %v12317_v35 = vpop.f32.mrf.mxu0 }
 0x579   : > { %v6345_v59 = vmax.f32 %v5372_v42, 0.0  ;;  %v5376_v31 = vadd.f32 %v12133_v19, %v5023_v27  ;;  %v5025_v57 = vadd.f32 %v5024_v8, %v11503_v34  ;;  %v12321_v26 = vadd.f32 %v6619_v56, %v6618_v46  ;;  %v13756_v19 = vld [vmem:[#allocation106_spill] sm:$0xff]  ;;  %v13758_v56 = vld [vmem:[#allocation107_spill] sm:$0xff] }
 0x57a   : > { %v6622_v16 = vmul.f32 %v11521_v13, %v6344_v6  ;;  %v5026_v55 = vpop.f32.mrf.mxu1  ;;  %v12324_v25 = vpop.f32.mrf.mxu0 }
 0x57b   : > { %13755 = vst [vmem:[#allocation80_spill] sm:$0xff] %v12321_v26  ;;  %v6623_v21 = vmul.f32 %v11532_v50, %v6345_v59  ;;  %v6348_v20 = vmax.f32 %v5376_v31, 0.0  ;;  %v5378_v30 = vadd.f32 %v12141_v15, %v5025_v57  ;;  %v5027_v60 = vadd.f32 %v5026_v55, %v11484_v49  ;;  %v13759_v31 = vld [vmem:[#allocation84_spill] sm:$0xff] }
 0x57c   : > { %v5028_v40 = vpop.f32.mrf.mxu1  ;;  %v12329_v42 = vpop.f32.mrf.mxu0  ;;  %6070 = vmatmul.mubr.bf16.gmra.mxu0 %v13756_v19 }
 0x57d   : > { %v12332_v27 = vadd.f32 %v6623_v21, %v6622_v16  ;;  %v6349_v46 = vmax.f32 %v5378_v30, 0.0  ;;  %v5380_v6 = vadd.f32 %v12149_v45, %v5027_v60  ;;  %6079 = vmatprep.mubr.bf16.mxu0 %v13758_v56  ;;  %v5029_v8 = vadd.f32 %v5028_v40, %v11503_v34  ;;  %v13760_v16 = vld [vmem:[#allocation87_spill] sm:$0xff] }
 0x57e   : > { %v5032_v59 = vpop.f32.mrf.mxu1  ;;  %5657 = vmatmul.mubr.bf16.gmra.mxu1 %v13759_v31  ;;  %v12338_v15 = vpop.f32.mrf.mxu0  ;;  %v6626_v57 = vmul.f32 %v11521_v13, %v6348_v20 }
 0x57f   : > { %13757 = vst [vmem:[#allocation28_spill] sm:$0xff] %v12332_v27  ;;  %v6627_v55 = vmul.f32 %v11532_v50, %v6349_v46  ;;  %v5033_v19 = vadd.f32 %v5032_v59, %v11484_v49  ;;  %5666 = vmatprep.mubr.bf16.mxu1 %v13760_v16  ;;  %v6352_v21 = vmax.f32 %v5380_v6, 0.0  ;;  %v5382_v45 = vadd.f32 %v12156_v58, %v5029_v8 }
 0x580   : > { %v5034_v30 = vpop.f32.mrf.mxu1  ;;  %v12345_v60 = vpop.f32.mrf.mxu0 }
 0x581   : > { %v12347_v40 = vadd.f32 %v6627_v55, %v6626_v57  ;;  %v5386_v56 = vadd.f32 %v12161_v5, %v5033_v19  ;;  %v5035_v31 = vadd.f32 %v5034_v30, %v11503_v34  ;;  %v6353_v27 = vmax.f32 %v5382_v45, 0.0  ;;  %v13762_v55 = vld [vmem:[#allocation111_spill] sm:$0xff] }
 0x582   : > { %v5036_v20 = vpop.f32.mrf.mxu1  ;;  %v12351_v26 = vpop.f32.mrf.mxu0  ;;  %v6630_v58 = vmul.f32 %v11521_v13, %v6352_v21  ;;  %v13763_v30 = vld [vmem:[#allocation15_spill] sm:$0xff]  ;;  %v13765_v21 = vld [vmem:[#allocation86_spill] sm:$0xff] }
 0x583   : > { %13761 = vst [vmem:[#allocation36_spill] sm:$0xff] %v12347_v40  ;;  %v6356_v46 = vmax.f32 %v5386_v56, 0.0  ;;  %v5388_v59 = vadd.f32 %v12169_v62, %v5035_v31  ;;  %v5037_v6 = vadd.f32 %v5036_v20, %v11484_v49  ;;  %v6631_v8 = vmul.f32 %v11532_v50, %v6353_v27 }
 0x584   : > { %v5038_v16 = vpop.f32.mrf.mxu1  ;;  %v12357_v57 = vpop.f32.mrf.mxu0  ;;  %6080 = vmatmul.mubr.bf16.gmra.mxu0 %v13762_v55 }
 0x585   : > { %v6357_v5 = vmax.f32 %v5388_v59, 0.0  ;;  %v5390_v19 = vadd.f32 %v12177_v18, %v5037_v6  ;;  %v5039_v45 = vadd.f32 %v5038_v16, %v11503_v34  ;;  %6089 = vmatprep.mubr.bf16.mxu0 %v13763_v30  ;;  %v12363_v56 = vadd.f32 %v6631_v8, %v6630_v58  ;;  %v13766_v6 = vld [vmem:[#allocation112_spill] sm:$0xff] }
 0x586   : > { %v6634_v62 = vmul.f32 %v11521_v13, %v6356_v46  ;;  %v5042_v31 = vpop.f32.mrf.mxu1  ;;  %5667 = vmatmul.mubr.bf16.gmra.mxu1 %v13765_v21  ;;  %v12367_v27 = vpop.f32.mrf.mxu0 }
 0x587   : > { %13764 = vst [vmem:[#allocation26_spill] sm:$0xff] %v12363_v56  ;;  %v6635_v20 = vmul.f32 %v11532_v50, %v6357_v5  ;;  %v6360_v40 = vmax.f32 %v5390_v19, 0.0  ;;  %v5392_v59 = vadd.f32 %v12183_v33, %v5039_v45  ;;  %v5043_v18 = vadd.f32 %v5042_v31, %v11484_v49  ;;  %5676 = vmatprep.mubr.bf16.mxu1 %v13766_v6 }
 0x588   : > { %v5044_v16 = vpop.f32.mrf.mxu1  ;;  %v12373_v55 = vpop.f32.mrf.mxu0 }
 0x589   : > { %v12375_v58 = vadd.f32 %v6635_v20, %v6634_v62  ;;  %v6361_v46 = vmax.f32 %v5392_v59, 0.0  ;;  %v5396_v8 = vadd.f32 %v12189_v37, %v5043_v18  ;;  %v5045_v30 = vadd.f32 %v5044_v16, %v11503_v34  ;;  %v13768_v20 = vld [vmem:[#allocation114_spill] sm:$0xff]  ;;  %v13770_v16 = vld [vmem:[#allocation115_spill] sm:$0xff] }
 0x58a   : > { %v5046_v21 = vpop.f32.mrf.mxu1  ;;  %v12379_v56 = vpop.f32.mrf.mxu0  ;;  %v6638_v5 = vmul.f32 %v11521_v13, %v6360_v40 }
 0x58b   : > { %13767 = vst [vmem:[#allocation81_spill] sm:$0xff] %v12375_v58  ;;  %v6639_v33 = vmul.f32 %v11532_v50, %v6361_v46  ;;  %v5047_v19 = vadd.f32 %v5046_v21, %v11484_v49  ;;  %v6364_v45 = vmax.f32 %v5396_v8, 0.0  ;;  %v5398_v31 = vadd.f32 %v12198_v47, %v5045_v30  ;;  %v13771_v58 = vld [vmem:[#allocation53_spill] sm:$0xff] }
 0x58c   : > { %v5048_v6 = vpop.f32.mrf.mxu1  ;;  %v12385_v62 = vpop.f32.mrf.mxu0  ;;  %6090 = vmatmul.mubr.bf16.gmra.mxu0 %v13768_v20  ;;  %v13772_v20 = vld [vmem:[#allocation116_spill] sm:$0xff] }
 0x58d   : > { %v12388_v37 = vadd.f32 %v6639_v33, %v6638_v5  ;;  %v5400_v59 = vadd.f32 %v12205_v23, %v5047_v19  ;;  %v5049_v18 = vadd.f32 %v5048_v6, %v11503_v34  ;;  %6099 = vmatprep.mubr.bf16.mxu0 %v13770_v16  ;;  %v6365_v40 = vmax.f32 %v5398_v31, 0.0 }
 0x58e   : > { %v5052_v46 = vpop.f32.mrf.mxu1  ;;  %5677 = vmatmul.mubr.bf16.gmra.mxu1 %v13771_v58  ;;  %v12394_v8 = vpop.f32.mrf.mxu0  ;;  %v6642_v5 = vmul.f32 %v11521_v13, %v6364_v45 }
 0x58f   : > { %13769 = vst [vmem:[#allocation34_spill] sm:$0xff] %v12388_v37  ;;  %v6368_v47 = vmax.f32 %v5400_v59, 0.0  ;;  %v5402_v30 = vadd.f32 %v12211_v63, %v5049_v18  ;;  %v5053_v21 = vadd.f32 %v5052_v46, %v11484_v49  ;;  %5686 = vmatprep.mubr.bf16.mxu1 %v13772_v20  ;;  %v6643_v23 = vmul.f32 %v11532_v50, %v6365_v40 }
 0x590   : > { %v5054_v33 = vpop.f32.mrf.mxu1  ;;  %v12401_v19 = vpop.f32.mrf.mxu0 }
 0x591   : > { %v6369_v31 = vmax.f32 %v5402_v30, 0.0  ;;  %v5406_v6 = vadd.f32 %v12217_v2, %v5053_v21  ;;  %v5055_v58 = vadd.f32 %v5054_v33, %v11503_v34  ;;  %v12405_v16 = vadd.f32 %v6643_v23, %v6642_v5  ;;  %v13774_v2 = vld [vmem:[#allocation118_spill] sm:$0xff]  ;;  %v13776_v23 = vld [vmem:[#allocation119_spill] sm:$0xff] }
 0x592   : > { %v6646_v63 = vmul.f32 %v11521_v13, %v6368_v47  ;;  %v5056_v59 = vpop.f32.mrf.mxu1  ;;  %v12408_v18 = vpop.f32.mrf.mxu0 }
 0x593   : > { %13773 = vst [vmem:[#allocation7_spill] sm:$0xff] %v12405_v16  ;;  %v6647_v46 = vmul.f32 %v11532_v50, %v6369_v31  ;;  %v6372_v45 = vmax.f32 %v5406_v6, 0.0  ;;  %v5408_v40 = vadd.f32 %v12225_v36, %v5055_v58  ;;  %v5057_v20 = vadd.f32 %v5056_v59, %v11484_v49  ;;  %v13777_v6 = vld [vmem:[#allocation120_spill] sm:$0xff] }
 0x594   : > { %v5058_v37 = vpop.f32.mrf.mxu1  ;;  %v12413_v30 = vpop.f32.mrf.mxu0  ;;  %6100 = vmatmul.mubr.bf16.gmra.mxu0 %v13774_v2 }
 0x595   : > { %v12416_v21 = vadd.f32 %v6647_v46, %v6646_v63  ;;  %v6373_v5 = vmax.f32 %v5408_v40, 0.0  ;;  %v5410_v47 = vadd.f32 %v12233_v39, %v5057_v20  ;;  %6109 = vmatprep.mubr.bf16.mxu0 %v13776_v23  ;;  %v5059_v33 = vadd.f32 %v5058_v37, %v11503_v34  ;;  %v13778_v63 = vld [vmem:[#allocation121_spill] sm:$0xff] }
 0x596   : > { %v5062_v31 = vpop.f32.mrf.mxu1  ;;  %5687 = vmatmul.mubr.bf16.gmra.mxu1 %v13777_v6  ;;  %v12422_v36 = vpop.f32.mrf.mxu0  ;;  %v6650_v58 = vmul.f32 %v11521_v13, %v6372_v45 }
 0x597   : > { %13775 = vst [vmem:[#allocation37_spill] sm:$0xff] %v12416_v21  ;;  %v6651_v59 = vmul.f32 %v11532_v50, %v6373_v5  ;;  %v5063_v2 = vadd.f32 %v5062_v31, %v11484_v49  ;;  %5696 = vmatprep.mubr.bf16.mxu1 %v13778_v63  ;;  %v6376_v46 = vmax.f32 %v5410_v47, 0.0  ;;  %v5412_v39 = vadd.f32 %v12240_v24, %v5059_v33 }
 0x598   : > { %v5064_v40 = vpop.f32.mrf.mxu1  ;;  %v12429_v20 = vpop.f32.mrf.mxu0 }
 0x599   : > { %v12431_v37 = vadd.f32 %v6651_v59, %v6650_v58  ;;  %v5416_v23 = vadd.f32 %v12245_v52, %v5063_v2  ;;  %v5065_v6 = vadd.f32 %v5064_v40, %v11503_v34  ;;  %v6377_v21 = vmax.f32 %v5412_v39, 0.0  ;;  %v13780_v59 = vld [vmem:[#allocation122_spill] sm:$0xff]  ;;  %v13781_v40 = vld [vmem:[#allocation123_spill] sm:$0xff] }
 0x59a   : > { %v5066_v45 = vpop.f32.mrf.mxu1  ;;  %v12435_v16 = vpop.f32.mrf.mxu0  ;;  %v6654_v24 = vmul.f32 %v11521_v13, %v6376_v46  ;;  %v13783_v46 = vld [vmem:[#allocation124_spill] sm:$0xff] }
 0x59b   : > { %13779 = vst [vmem:[#allocation83_spill] sm:$0xff] %v12431_v37  ;;  %v6380_v5 = vmax.f32 %v5416_v23, 0.0  ;;  %v5418_v31 = vadd.f32 %v12253_v41, %v5065_v6  ;;  %v5067_v47 = vadd.f32 %v5066_v45, %v11484_v49  ;;  %v6655_v33 = vmul.f32 %v11532_v50, %v6377_v21 }
 0x59c   : > { %v5068_v63 = vpop.f32.mrf.mxu1  ;;  %v12441_v58 = vpop.f32.mrf.mxu0  ;;  %6110 = vmatmul.mubr.bf16.gmra.mxu0 %v13780_v59 }
 0x59d   : > { %v6381_v52 = vmax.f32 %v5418_v31, 0.0  ;;  %v5420_v2 = vadd.f32 %v12261_v14, %v5067_v47  ;;  %v5069_v39 = vadd.f32 %v5068_v63, %v11503_v34  ;;  %6119 = vmatprep.mubr.bf16.mxu0 %v13781_v40  ;;  %v12447_v23 = vadd.f32 %v6655_v33, %v6654_v24  ;;  %v13784_v47 = vld [vmem:[#allocation125_spill] sm:$0xff] }
 0x59e   : > { %v6658_v41 = vmul.f32 %v11521_v13, %v6380_v5  ;;  %v5072_v6 = vpop.f32.mrf.mxu1  ;;  %5697 = vmatmul.mubr.bf16.gmra.mxu1 %v13783_v46  ;;  %v12451_v21 = vpop.f32.mrf.mxu0 }
 0x59f   : > { %13782 = vst [vmem:[#allocation9_spill] sm:$0xff] %v12447_v23  ;;  %v6659_v45 = vmul.f32 %v11532_v50, %v6381_v52  ;;  %v6384_v37 = vmax.f32 %v5420_v2, 0.0  ;;  %v5422_v31 = vadd.f32 %v12267_v32, %v5069_v39  ;;  %v5073_v14 = vadd.f32 %v5072_v6, %v11484_v49  ;;  %5706 = vmatprep.mubr.bf16.mxu1 %v13784_v47  ;;  %v7851_v39 = vld [vmem:[%s13174_s8] sm:$0xf]  ;;  %v13787_v47 = vld [vmem:[#allocation128_spill] sm:$0xff] }
 0x5a0   : > { %v5074_v63 = vpop.f32.mrf.mxu1  ;;  %v12457_v59 = vpop.f32.mrf.mxu0 }
 0x5a1   : > { %v12459_v24 = vadd.f32 %v6659_v45, %v6658_v41  ;;  %v6385_v5 = vmax.f32 %v5422_v31, 0.0  ;;  %v5426_v33 = vadd.f32 %v12273_v61, %v5073_v14  ;;  %v5075_v40 = vadd.f32 %v5074_v63, %v11503_v34  ;;  %v13786_v41 = vld [vmem:[#allocation32_spill] sm:$0xff] }
 0x5a2   : > { %v5076_v46 = vpop.f32.mrf.mxu1  ;;  %v12463_v23 = vpop.f32.mrf.mxu0  ;;  %v6662_v52 = vmul.f32 %v11521_v13, %v6384_v37  ;;  %v12472_v6 = vrot.slane %v7851_v39, %v13786_v41 }
 0x5a3   : > { %13785 = vst [vmem:[#allocation10_spill] sm:$0xff] %v12459_v24  ;;  %v6663_v32 = vmul.f32 %v11532_v50, %v6385_v5  ;;  %v5077_v2 = vadd.f32 %v5076_v46, %v11484_v49  ;;  %v6388_v45 = vmax.f32 %v5426_v33, 0.0  ;;  %v5428_v61 = vadd.f32 %v12282_v17, %v5075_v40  ;;  %v13789_v5 = vld [vmem:[#allocation130_spill] sm:$0xff]  ;;  %v13790_v46 = vld [vmem:[#allocation29_spill] sm:$0xff] }
 0x5a4   : > { %v5078_v31 = vpop.f32.mrf.mxu1  ;;  %v12475_v14 = vpop.f32.mrf.mxu0  ;;  %6120 = vmatmul.mubr.bf16.gmra.mxu0 %v13787_v47  ;;  %v12484_v24 = vrot.slane %v7851_v39, %v13790_v46 }
 0x5a5   : > { %v12478_v37 = vadd.f32 %v6663_v32, %v6662_v52  ;;  %v5430_v63 = vadd.f32 %v12289_v54, %v5077_v2  ;;  %v5079_v49 = vadd.f32 %v5078_v31, %v11503_v34  ;;  %6129 = vmatprep.mubr.bf16.mxu0 %v13789_v5  ;;  %v6389_v0 = vmax.f32 %v5428_v61, 0.0  ;;  %v13792_v32 = vld [vmem:[#allocation132_spill] sm:$0xff] }
 0x5a6   : > { %v5468_v33 = vpop.f32.mrf.mxu1  ;;  %5707 = vmatmul.mubr.bf16.gmra.mxu1 %v13791_v11  ;;  %v12487_v17 = vpop.f32.mrf.mxu0  ;;  %v6666_v34 = vmul.f32 %v11521_v13, %v6388_v45  ;;  %v7852_v11 = vld [vmem:[%s13175_s9] sm:$0xf] }
 0x5a7   : > { %13788 = vst [vmem:[#allocation41_spill] sm:$0xff] %v12478_v37  ;;  %v6392_v40 = vmax.f32 %v5430_v63, 0.0  ;;  %v5432_v47 = vadd.f32 %v12295_v53, %v5079_v49  ;;  %v5469_v52 = vadd.f32 %v5468_v33, %v12472_v6  ;;  %5716 = vmatprep.mubr.bf16.mxu1 %v13792_v32  ;;  %v6667_v54 = vmul.f32 %v11532_v50, %v6389_v0 }
 0x5a8   : > { %v5470_v2 = vpop.f32.mrf.mxu1  ;;  %v12494_v39 = vpop.f32.mrf.mxu0  ;;  %v12501_v53 = vrot.slane %v7852_v11, %v13786_v41  ;;  %v12508_v0 = vrot.slane %v7852_v11, %v13790_v46 }
 0x5a9   : > { %v6393_v61 = vmax.f32 %v5432_v47, 0.0  ;;  %v5822_v31 = vadd.f32 %v12301_v12, %v5469_v52  ;;  %v5471_v63 = vadd.f32 %v5470_v2, %v12484_v24  ;;  %v12504_v49 = vadd.f32 %v6667_v54, %v6666_v34  ;;  %v13793_v34 = vld [vmem:[#allocation102_spill] sm:$0xff] }
 0x5aa   : > { %v6670_v45 = vmul.f32 %v11521_v13, %v6392_v40  ;;  %v5472_v5 = vpop.f32.mrf.mxu1  ;;  %v12510_v33 = vpop.f32.mrf.mxu0 }
 0x5ab   : > { %v6671_v12 = vmul.f32 %v11532_v50, %v6393_v61  ;;  %v6142_v47 = vmax.f32 %v5822_v31, 0.0  ;;  %v5824_v52 = vadd.f32 %v12310_v22, %v5471_v63  ;;  %v5473_v41 = vadd.f32 %v5472_v5, %v12472_v6  ;;  %v13794_v61 = vld [vmem:[#allocation133_spill] sm:$0xff] }
 0x5ac   : > { %v5474_v32 = vpop.f32.mrf.mxu1  ;;  %v12515_v37 = vpop.f32.mrf.mxu0  ;;  %6130 = vmatmul.mubr.bf16.gmra.mxu0 %v13793_v34  ;;  %v13795_v5 = vld [vmem:[#allocation105_spill] sm:$0xff] }
 0x5ad   : > { %v12518_v54 = vadd.f32 %v6671_v12, %v6670_v45  ;;  %v6420_v13 = vmul.f32 %v12501_v53, %v6142_v47  ;;  %v6143_v46 = vmax.f32 %v5824_v52, 0.0  ;;  %v5826_v40 = vadd.f32 %v12317_v35, %v5473_v41 }
 0x5ae   : > { %v5475_v2 = vadd.f32 %v5474_v32, %v12484_v24  ;;  %v5478_v50 = vpop.f32.mrf.mxu1  ;;  %5717 = vmatmul.mubr.bf16.gmra.mxu1 %v13794_v61  ;;  %v12524_v22 = vpop.f32.mrf.mxu0 }
 0x5af   : > { %v6738_v31 = vadd.f32 %v11561_v48, %v6420_v13  ;;  %v6421_v11 = vmul.f32 %v12508_v0, %v6143_v46  ;;  %v6146_v63 = vmax.f32 %v5826_v40, 0.0  ;;  %v5479_v45 = vadd.f32 %v5478_v50, %v12472_v6  ;;  %5726 = vmatprep.mubr.bf16.mxu1 %v13795_v5 }
 0x5b0   : > { %v5828_v12 = vadd.f32 %v12324_v25, %v5475_v2  ;;  %v5480_v47 = vpop.f32.mrf.mxu1  ;;  %v12531_v35 = vpop.f32.mrf.mxu0 }
 0x5b1   : > { %v6802_v52 = vadd.f32 %v6738_v31, %v6421_v11  ;;  %v6424_v41 = vmul.f32 %v12501_v53, %v6146_v63  ;;  %v5832_v32 = vadd.f32 %v12329_v42, %v5479_v45  ;;  %v5481_v34 = vadd.f32 %v5480_v47, %v12484_v24 }
 0x5b2   : > { %v6147_v48 = vmax.f32 %v5828_v12, 0.0  ;;  %v5482_v13 = vpop.f32.mrf.mxu1  ;;  %v12536_v46 = vpop.f32.mrf.mxu0 }
 0x5b3   : > { %v6739_v40 = vadd.f32 %v11582_v51, %v6424_v41  ;;  %v6150_v50 = vmax.f32 %v5832_v32, 0.0  ;;  %v5834_v61 = vadd.f32 %v12338_v15, %v5481_v34  ;;  %v5483_v25 = vadd.f32 %v5482_v13, %v12472_v6  ;;  %6866 = vxpose.xlu1.b32.start [1/16] %v6802_v52, 128  ;;  %v13796_v51 = vld [vmem:[#allocation35_spill] sm:$0xff] }
 0x5b4   : > { %v6425_v2 = vmul.f32 %v12508_v0, %v6147_v48  ;;  %v5484_v31 = vpop.f32.mrf.mxu1  ;;  %v12542_v11 = vpop.f32.mrf.mxu0  ;;  %v13797_v48 = vld [vmem:[#allocation108_spill] sm:$0xff] }
 0x5b5   : > { %v6428_v42 = vmul.f32 %v12501_v53, %v6150_v50  ;;  %v6151_v63 = vmax.f32 %v5834_v61, 0.0  ;;  %v5836_v45 = vadd.f32 %v12345_v60, %v5483_v25  ;;  %v5485_v5 = vadd.f32 %v5484_v31, %v12484_v24 }
 0x5b6   : > { %v5488_v12 = vpop.f32.mrf.mxu1  ;;  %5727 = vmatmul.mubr.bf16.gmra.mxu1 %v13796_v51  ;;  %v12548_v47 = vpop.f32.mrf.mxu0  ;;  %v6803_v15 = vadd.f32 %v6739_v40, %v6425_v2 }
 0x5b7   : > { %v6740_v52 = vadd.f32 %v11605_v1, %v6428_v42  ;;  %v6429_v41 = vmul.f32 %v12508_v0, %v6151_v63  ;;  %v6154_v32 = vmax.f32 %v5836_v45, 0.0  ;;  %v5838_v34 = vadd.f32 %v12351_v26, %v5485_v5  ;;  %5736 = vmatprep.mubr.bf16.mxu1 %v13797_v48 }
 0x5b8   : > { %v5489_v13 = vadd.f32 %v5488_v12, %v12472_v6  ;;  %6867 = vxpose.xlu1.b32.cont [2/16] %v6803_v15, 128  ;;  %v5490_v60 = vpop.f32.mrf.mxu1  ;;  %v12555_v50 = vpop.f32.mrf.mxu0 }
 0x5b9   : > { %v6804_v61 = vadd.f32 %v6740_v52, %v6429_v41  ;;  %v6432_v25 = vmul.f32 %v12501_v53, %v6154_v32  ;;  %v6155_v31 = vmax.f32 %v5838_v34, 0.0  ;;  %v5491_v40 = vadd.f32 %v5490_v60, %v12484_v24 }
 0x5ba   : > { %v5842_v1 = vadd.f32 %v12357_v57, %v5489_v13  ;;  %v5492_v2 = vpop.f32.mrf.mxu1  ;;  %v12560_v42 = vpop.f32.mrf.mxu0 }
 0x5bb   : > { %v6741_v26 = vadd.f32 %v11624_v9, %v6432_v25  ;;  %v6433_v63 = vmul.f32 %v12508_v0, %v6155_v31  ;;  %v5844_v45 = vadd.f32 %v12367_v27, %v5491_v40  ;;  %v5493_v5 = vadd.f32 %v5492_v2, %v12472_v6  ;;  %v13798_v25 = vld [vmem:[#allocation109_spill] sm:$0xff] }
 0x5bc   : > { %v6158_v12 = vmax.f32 %v5842_v1, 0.0  ;;  %6868 = vxpose.xlu1.b32.cont [3/16] %v6804_v61, 128  ;;  %v5494_v51 = vpop.f32.mrf.mxu1  ;;  %v12566_v15 = vpop.f32.mrf.mxu0 }
 0x5bd   : > { %v6159_v52 = vmax.f32 %v5844_v45, 0.0  ;;  %v5846_v41 = vadd.f32 %v12373_v55, %v5493_v5  ;;  %v5495_v57 = vadd.f32 %v5494_v51, %v12484_v24  ;;  %v6805_v32 = vadd.f32 %v6741_v26, %v6433_v63 }
 0x5be   : > { %v6436_v34 = vmul.f32 %v12501_v53, %v6158_v12  ;;  %v5498_v9 = vpop.f32.mrf.mxu1  ;;  %5737 = vmatmul.mubr.bf16.gmra.mxu1 %v11613_v10  ;;  %v12572_v48 = vpop.f32.mrf.mxu0 }
 0x5bf   : > { %v6437_v27 = vmul.f32 %v12508_v0, %v6159_v52  ;;  %v6162_v13 = vmax.f32 %v5846_v41, 0.0  ;;  %v5848_v60 = vadd.f32 %v12379_v56, %v5495_v57  ;;  %v5499_v61 = vadd.f32 %v5498_v9, %v12472_v6  ;;  %5746 = vmatprep.mubr.bf16.mxu1 %v13798_v25 }
 0x5c0   : > { %v6742_v55 = vadd.f32 %v11641_v4, %v6436_v34  ;;  %6869 = vxpose.xlu1.b32.cont [4/16] %v6805_v32, 128  ;;  %v5500_v31 = vpop.f32.mrf.mxu1  ;;  %v12579_v40 = vpop.f32.mrf.mxu0 }
 0x5c1   : > { %v6440_v1 = vmul.f32 %v12501_v53, %v6162_v13  ;;  %v6163_v10 = vmax.f32 %v5848_v60, 0.0  ;;  %v5852_v2 = vadd.f32 %v12385_v62, %v5499_v61  ;;  %v5501_v26 = vadd.f32 %v5500_v31, %v12484_v24  ;;  %v13799_v13 = vld [vmem:[#allocation110_spill] sm:$0xff] }
 0x5c2   : > { %v6806_v63 = vadd.f32 %v6742_v55, %v6437_v27  ;;  %v5502_v45 = vpop.f32.mrf.mxu1  ;;  %v12584_v56 = vpop.f32.mrf.mxu0 }
 0x5c3   : > { %v6743_v5 = vadd.f32 %v11669_v7, %v6440_v1  ;;  %v6441_v12 = vmul.f32 %v12508_v0, %v6163_v10  ;;  %v6166_v4 = vmax.f32 %v5852_v2, 0.0  ;;  %v5854_v51 = vadd.f32 %v12394_v8, %v5501_v26 }
 0x5c4   : > { %v5503_v52 = vadd.f32 %v5502_v45, %v12472_v6  ;;  %6870 = vxpose.xlu1.b32.cont [5/16] %v6806_v63, 128  ;;  %v5504_v41 = vpop.f32.mrf.mxu1  ;;  %v12590_v57 = vpop.f32.mrf.mxu0 }
 0x5c5   : > { %v6444_v62 = vmul.f32 %v12501_v53, %v6166_v4  ;;  %v6167_v32 = vmax.f32 %v5854_v51, 0.0  ;;  %v5505_v34 = vadd.f32 %v5504_v41, %v12484_v24  ;;  %v6807_v9 = vadd.f32 %v6743_v5, %v6441_v12 }
 0x5c6   : > { %v5856_v27 = vadd.f32 %v12401_v19, %v5503_v52  ;;  %v5508_v7 = vpop.f32.mrf.mxu1  ;;  %5747 = vmatmul.mubr.bf16.gmra.mxu1 %v13799_v13  ;;  %v12596_v60 = vpop.f32.mrf.mxu0 }
 0x5c7   : > { %v6744_v8 = vadd.f32 %v11681_v3, %v6444_v62  ;;  %v6445_v61 = vmul.f32 %v12508_v0, %v6167_v32  ;;  %v5858_v25 = vadd.f32 %v12408_v18, %v5505_v34  ;;  %v5509_v55 = vadd.f32 %v5508_v7, %v12472_v6  ;;  %5756 = vmatprep.mubr.bf16.mxu1 %v11665_v29 }
 0x5c8   : > { %v6170_v31 = vmax.f32 %v5856_v27, 0.0  ;;  %6871 = vxpose.xlu1.b32.cont [6/16] %v6807_v9, 128  ;;  %v5510_v1 = vpop.f32.mrf.mxu1  ;;  %v12603_v10 = vpop.f32.mrf.mxu0 }
 0x5c9   : > { %v6808_v19 = vadd.f32 %v6744_v8, %v6445_v61  ;;  %v6171_v2 = vmax.f32 %v5858_v25, 0.0  ;;  %v5862_v26 = vadd.f32 %v12413_v30, %v5509_v55  ;;  %v5511_v63 = vadd.f32 %v5510_v1, %v12484_v24 }
 0x5ca   : > { %v6448_v3 = vmul.f32 %v12501_v53, %v6170_v31  ;;  %v5512_v45 = vpop.f32.mrf.mxu1  ;;  %v12608_v5 = vpop.f32.mrf.mxu0 }
 0x5cb   : > { %v6449_v18 = vmul.f32 %v12508_v0, %v6171_v2  ;;  %v6174_v12 = vmax.f32 %v5862_v26, 0.0  ;;  %v5864_v29 = vadd.f32 %v12422_v36, %v5511_v63  ;;  %v5513_v4 = vadd.f32 %v5512_v45, %v12472_v6 }
 0x5cc   : > { %v6745_v51 = vadd.f32 %v11702_v44, %v6448_v3  ;;  %6872 = vxpose.xlu1.b32.cont [7/16] %v6808_v19, 128  ;;  %v5514_v52 = vpop.f32.mrf.mxu1  ;;  %v12614_v41 = vpop.f32.mrf.mxu0 }
 0x5cd   : > { %v6452_v30 = vmul.f32 %v12501_v53, %v6174_v12  ;;  %v6175_v62 = vmax.f32 %v5864_v29, 0.0  ;;  %v5866_v32 = vadd.f32 %v12429_v20, %v5513_v4  ;;  %v5515_v34 = vadd.f32 %v5514_v52, %v12484_v24 }
 0x5ce   : > { %v5518_v9 = vpop.f32.mrf.mxu1  ;;  %5757 = vmatmul.mubr.bf16.gmra.mxu1 %v11687_v38  ;;  %v12620_v27 = vpop.f32.mrf.mxu0  ;;  %v6809_v36 = vadd.f32 %v6745_v51, %v6449_v18 }
 0x5cf   : > { %v6746_v7 = vadd.f32 %v11723_v43, %v6452_v30  ;;  %v6453_v44 = vmul.f32 %v12508_v0, %v6175_v62  ;;  %v6178_v13 = vmax.f32 %v5866_v32, 0.0  ;;  %v5868_v8 = vadd.f32 %v12435_v16, %v5515_v34  ;;  %5766 = vmatprep.mubr.bf16.mxu1 %v11698_v28  ;;  %v13800_v16 = vld [vmem:[#allocation39_spill] sm:$0xff]  ;;  %v13801_v62 = vld [vmem:[#allocation38_spill] sm:$0xff] }
 0x5d0   : > { %v5519_v61 = vadd.f32 %v5518_v9, %v12472_v6  ;;  %6873 = vxpose.xlu1.b32.cont [8/16] %v6809_v36, 128  ;;  %v5520_v20 = vpop.f32.mrf.mxu1  ;;  %v12627_v25 = vpop.f32.mrf.mxu0 }
 0x5d1   : > { %v6810_v55 = vadd.f32 %v6746_v7, %v6453_v44  ;;  %v6456_v38 = vmul.f32 %v12501_v53, %v6178_v13  ;;  %v6179_v31 = vmax.f32 %v5868_v8, 0.0  ;;  %v5521_v1 = vadd.f32 %v5520_v20, %v12484_v24  ;;  %v13802_v7 = vld [vmem:[#allocation113_spill] sm:$0xff]  ;;  %v13803_v44 = vld [vmem:[#allocation42_spill] sm:$0xff] }
 0x5d2   : > { %v5872_v43 = vadd.f32 %v12441_v58, %v5519_v61  ;;  %v5522_v19 = vpop.f32.mrf.mxu1  ;;  %v12632_v2 = vpop.f32.mrf.mxu0 }
 0x5d3   : > { %v6747_v26 = vadd.f32 %v13800_v16, %v6456_v38  ;;  %v6457_v28 = vmul.f32 %v12508_v0, %v6179_v31  ;;  %v5874_v63 = vadd.f32 %v12451_v21, %v5521_v1  ;;  %v5523_v3 = vadd.f32 %v5522_v19, %v12472_v6 }
 0x5d4   : > { %v6182_v45 = vmax.f32 %v5872_v43, 0.0  ;;  %6874 = vxpose.xlu1.b32.cont [9/16] %v6810_v55, 128  ;;  %v5524_v18 = vpop.f32.mrf.mxu1  ;;  %v12638_v12 = vpop.f32.mrf.mxu0  ;;  %v13804_v43 = vld [vmem:[#allocation117_spill] sm:$0xff] }
 0x5d5   : > { %v6811_v29 = vadd.f32 %v6747_v26, %v6457_v28  ;;  %v6183_v4 = vmax.f32 %v5874_v63, 0.0  ;;  %v5876_v58 = vadd.f32 %v12457_v59, %v5523_v3  ;;  %v5525_v51 = vadd.f32 %v5524_v18, %v12484_v24 }
 0x5d6   : > { %v6460_v52 = vmul.f32 %v12501_v53, %v6182_v45  ;;  %v5528_v30 = vpop.f32.mrf.mxu1  ;;  %5767 = vmatmul.mubr.bf16.gmra.mxu1 %v13801_v62  ;;  %v12644_v32 = vpop.f32.mrf.mxu0 }
 0x5d7   : > { %v6461_v21 = vmul.f32 %v12508_v0, %v6183_v4  ;;  %v6186_v34 = vmax.f32 %v5876_v58, 0.0  ;;  %v5878_v9 = vadd.f32 %v12463_v23, %v5525_v51  ;;  %v5529_v36 = vadd.f32 %v5528_v30, %v12472_v6  ;;  %5776 = vmatprep.mubr.bf16.mxu1 %v13802_v7 }
 0x5d8   : > { %v6748_v59 = vadd.f32 %v13803_v44, %v6460_v52  ;;  %6875 = vxpose.xlu1.b32.cont [10/16] %v6811_v29, 128  ;;  %v5530_v13 = vpop.f32.mrf.mxu1  ;;  %v12651_v8 = vpop.f32.mrf.mxu0  ;;  %v13805_v52 = vld [vmem:[#allocation44_spill] sm:$0xff] }
 0x5d9   : > { %v6464_v61 = vmul.f32 %v12501_v53, %v6186_v34  ;;  %v6187_v20 = vmax.f32 %v5878_v9, 0.0  ;;  %v5882_v55 = vadd.f32 %v12475_v14, %v5529_v36  ;;  %v5531_v38 = vadd.f32 %v5530_v13, %v12484_v24 }
 0x5da   : > { %v6812_v31 = vadd.f32 %v6748_v59, %v6461_v21  ;;  %v5532_v1 = vpop.f32.mrf.mxu1  ;;  %v12656_v23 = vpop.f32.mrf.mxu0 }
 0x5db   : > { %v6749_v19 = vadd.f32 %v13804_v43, %v6464_v61  ;;  %v6465_v16 = vmul.f32 %v12508_v0, %v6187_v20  ;;  %v6190_v26 = vmax.f32 %v5882_v55, 0.0  ;;  %v5884_v28 = vadd.f32 %v12487_v17, %v5531_v38  ;;  %v13806_v17 = vld [vmem:[#allocation46_spill] sm:$0xff] }
 0x5dc   : > { %v5533_v63 = vadd.f32 %v5532_v1, %v12472_v6  ;;  %6876 = vxpose.xlu1.b32.cont [11/16] %v6812_v31, 128  ;;  %v5534_v3 = vpop.f32.mrf.mxu1  ;;  %v12662_v45 = vpop.f32.mrf.mxu0 }
 0x5dd   : > { %v6813_v14 = vadd.f32 %v6749_v19, %v6465_v16  ;;  %v6468_v18 = vmul.f32 %v12501_v53, %v6190_v26  ;;  %v6191_v29 = vmax.f32 %v5884_v28, 0.0  ;;  %v5535_v4 = vadd.f32 %v5534_v3, %v12484_v24  ;;  %v13807_v19 = vld [vmem:[#allocation47_spill] sm:$0xff] }
 0x5de   : > { %v5886_v58 = vadd.f32 %v12494_v39, %v5533_v63  ;;  %v5538_v51 = vpop.f32.mrf.mxu1  ;;  %5777 = vmatmul.mubr.bf16.gmra.mxu1 %v13805_v52  ;;  %v12668_v30 = vpop.f32.mrf.mxu0 }
 0x5df   : > { %v6750_v62 = vadd.f32 %v13806_v17, %v6468_v18  ;;  %v6469_v21 = vmul.f32 %v12508_v0, %v6191_v29  ;;  %v5888_v34 = vadd.f32 %v12510_v33, %v5535_v4  ;;  %v5539_v9 = vadd.f32 %v5538_v51, %v12472_v6 }
 0x5e0   : > { %v6194_v36 = vmax.f32 %v5886_v58, 0.0  ;;  %6877 = vxpose.xlu1.b32.cont [12/16] %v6813_v14, 128  ;;  %v5540_v7 = vpop.f32.mrf.mxu1  ;;  %v12674_v44 = vpop.f32.mrf.mxu0 }
 0x5e1   : > { %v6814_v59 = vadd.f32 %v6750_v62, %v6469_v21  ;;  %v6195_v39 = vmax.f32 %v5888_v34, 0.0  ;;  %v5892_v13 = vadd.f32 %v12515_v37, %v5539_v9  ;;  %v5541_v61 = vadd.f32 %v5540_v7, %v12484_v24 }
 0x5e2   : > { %v6472_v20 = vmul.f32 %v12501_v53, %v6194_v36  ;;  %v5542_v55 = vpop.f32.mrf.mxu1  ;;  %v12679_v38 = vpop.f32.mrf.mxu0 }
 0x5e3   : > { %v6473_v33 = vmul.f32 %v12508_v0, %v6195_v39  ;;  %v6198_v31 = vmax.f32 %v5892_v13, 0.0  ;;  %v5894_v1 = vadd.f32 %v12524_v22, %v5541_v61  ;;  %v5543_v43 = vadd.f32 %v5542_v55, %v12472_v6  ;;  %v13808_v22 = vld [vmem:[#allocation49_spill] sm:$0xff]  ;;  %v13809_v61 = vld [vmem:[#allocation50_spill] sm:$0xff] }
 0x5e4   : > { %v6751_v16 = vadd.f32 %v13807_v19, %v6472_v20  ;;  %6878 = vxpose.xlu1.b32.cont [13/16] %v6814_v59, 128  ;;  %v5544_v26 = vpop.f32.mrf.mxu1  ;;  %v12685_v28 = vpop.f32.mrf.mxu0 }
 0x5e5   : > { %v6476_v37 = vmul.f32 %v12501_v53, %v6198_v31  ;;  %v6199_v63 = vmax.f32 %v5894_v1, 0.0  ;;  %v5896_v3 = vadd.f32 %v12531_v35, %v5543_v43  ;;  %v5545_v14 = vadd.f32 %v5544_v26, %v12484_v24 }
 0x5e6   : > { %v6815_v18 = vadd.f32 %v6751_v16, %v6473_v33  ;;  %v5548_v29 = vpop.f32.mrf.mxu1  ;;  %v12690_v4 = vpop.f32.mrf.mxu0 }
 0x5e7   : > { %v6752_v58 = vadd.f32 %v13808_v22, %v6476_v37  ;;  %v6477_v51 = vmul.f32 %v12508_v0, %v6199_v63  ;;  %v6202_v52 = vmax.f32 %v5896_v3, 0.0  ;;  %v5898_v17 = vadd.f32 %v12536_v46, %v5545_v14  ;;  %v13810_v22 = vld [vmem:[#allocation52_spill] sm:$0xff] }
 0x5e8   : > { %v5549_v62 = vadd.f32 %v5548_v29, %v12472_v6  ;;  %6879 = vxpose.xlu1.b32.cont [14/16] %v6815_v18, 128  ;;  %v5550_v21 = vpop.f32.mrf.mxu1  ;;  %v12696_v34 = vpop.f32.mrf.mxu0 }
 0x5e9   : > { %v6816_v35 = vadd.f32 %v6752_v58, %v6477_v51  ;;  %v6480_v9 = vmul.f32 %v12501_v53, %v6202_v52  ;;  %v6203_v36 = vmax.f32 %v5898_v17, 0.0  ;;  %v5551_v7 = vadd.f32 %v5550_v21, %v12484_v24 }
 0x5ea   : > { %v5902_v59 = vadd.f32 %v12542_v11, %v5549_v62  ;;  %v5552_v39 = vpop.f32.mrf.mxu1  ;;  %v12701_v13 = vpop.f32.mrf.mxu0 }
 0x5eb   : > { %v6753_v20 = vadd.f32 %v13809_v61, %v6480_v9  ;;  %v6481_v46 = vmul.f32 %v12508_v0, %v6203_v36  ;;  %v5904_v55 = vadd.f32 %v12548_v47, %v5551_v7  ;;  %v5553_v33 = vadd.f32 %v5552_v39, %v12472_v6 }
 0x5ec   : > { %v6206_v31 = vmax.f32 %v5902_v59, 0.0  ;;  %6880 = vxpose.xlu1.b32.cont [15/16] %v6816_v35, 128  ;;  %v5554_v1 = vpop.f32.mrf.mxu1  ;;  %v12707_v43 = vpop.f32.mrf.mxu0 }
 0x5ed   : > { %v6817_v19 = vadd.f32 %v6753_v20, %v6481_v46  ;;  %v6207_v16 = vmax.f32 %v5904_v55, 0.0  ;;  %v5906_v11 = vadd.f32 %v12555_v50, %v5553_v33  ;;  %v5555_v26 = vadd.f32 %v5554_v1, %v12484_v24 }
 0x5ee   : > { %v6484_v37 = vmul.f32 %v12501_v53, %v6206_v31  ;;  %v5558_v63 = vpop.f32.mrf.mxu1  ;;  %v12712_v3 = vpop.f32.mrf.mxu0 }
 0x5ef   : > { %v6485_v47 = vmul.f32 %v12508_v0, %v6207_v16  ;;  %v6210_v14 = vmax.f32 %v5906_v11, 0.0  ;;  %v5908_v18 = vadd.f32 %v12560_v42, %v5555_v26  ;;  %v5559_v29 = vadd.f32 %v5558_v63, %v12472_v6  ;;  %v13811_v42 = vld [vmem:[#allocation127_spill] sm:$0xff]  ;;  %v13812_v26 = vld [vmem:[#allocation54_spill] sm:$0xff] }
 0x5f0   : > { %v6754_v58 = vadd.f32 %v13810_v22, %v6484_v37  ;;  %6881 = vxpose.xlu1.b32.end [16/16] %v6817_v19, 128  ;;  %v5560_v51 = vpop.f32.mrf.mxu1  ;;  %v12718_v52 = vpop.f32.mrf.mxu0 }
 0x5f1   : > { %v6488_v50 = vmul.f32 %v12501_v53, %v6210_v14  ;;  %v6211_v17 = vmax.f32 %v5908_v18, 0.0  ;;  %v5912_v62 = vadd.f32 %v12566_v15, %v5559_v29  ;;  %v5561_v21 = vadd.f32 %v5560_v51, %v12484_v24 }
 0x5f2   : > { %v6818_v35 = vadd.f32 %v6754_v58, %v6485_v47  ;;  %v5562_v9 = vpop.f32.mrf.mxu1  ;;  %v12723_v36 = vpop.f32.mrf.mxu0 }
 0x5f3   : > { %v6755_v7 = vadd.f32 %v13811_v42, %v6488_v50  ;;  %v6489_v59 = vmul.f32 %v12508_v0, %v6211_v17  ;;  %v6214_v39 = vmax.f32 %v5912_v62, 0.0  ;;  %v5914_v61 = vadd.f32 %v12572_v48, %v5561_v21  ;;  %v13813_v42 = vld [vmem:[#allocation126_spill] sm:$0xff] }
 0x5f4   : > { %v5563_v20 = vadd.f32 %v5562_v9, %v12472_v6  ;;  %6898 = vxpose.xlu0.b32.start [1/16] %v6818_v35, 128  ;;  %v5564_v46 = vpop.f32.mrf.mxu1  ;;  %v12729_v55 = vpop.f32.mrf.mxu0 }
 0x5f5   : > { %v6819_v15 = vadd.f32 %v6755_v7, %v6489_v59  ;;  %v6492_v33 = vmul.f32 %v12501_v53, %v6214_v39  ;;  %v6215_v31 = vmax.f32 %v5914_v61, 0.0  ;;  %v5565_v1 = vadd.f32 %v5564_v46, %v12484_v24 }
 0x5f6   : > { %v5916_v19 = vadd.f32 %v12579_v40, %v5563_v20  ;;  %v5568_v16 = vpop.f32.mrf.mxu1  ;;  %v12734_v11 = vpop.f32.mrf.mxu0 }
 0x5f7   : > { %v6756_v37 = vadd.f32 %v13812_v26, %v6492_v33  ;;  %v6493_v48 = vmul.f32 %v12508_v0, %v6215_v31  ;;  %v5918_v63 = vadd.f32 %v12584_v56, %v5565_v1  ;;  %v5569_v47 = vadd.f32 %v5568_v16, %v12472_v6 }
 0x5f8   : > { %v6218_v14 = vmax.f32 %v5916_v19, 0.0  ;;  %6899 = vxpose.xlu0.b32.cont [2/16] %v6819_v15, 128  ;;  %v5570_v18 = vpop.f32.mrf.mxu1  ;;  %v12740_v29 = vpop.f32.mrf.mxu0 }
 0x5f9   : > { %v6820_v22 = vadd.f32 %v6756_v37, %v6493_v48  ;;  %v6219_v58 = vmax.f32 %v5918_v63, 0.0  ;;  %v5922_v40 = vadd.f32 %v12590_v57, %v5569_v47  ;;  %v5571_v51 = vadd.f32 %v5570_v18, %v12484_v24 }
 0x5fa   : > { %v6496_v50 = vmul.f32 %v12501_v53, %v6218_v14  ;;  %v5572_v17 = vpop.f32.mrf.mxu1  ;;  %v12745_v62 = vpop.f32.mrf.mxu0 }
 0x5fb   : > { %v6497_v56 = vmul.f32 %v12508_v0, %v6219_v58  ;;  %v6222_v21 = vmax.f32 %v5922_v40, 0.0  ;;  %v5924_v35 = vadd.f32 %v12596_v60, %v5571_v51  ;;  %v5573_v9 = vadd.f32 %v5572_v17, %v12472_v6  ;;  %v13814_v60 = vld [vmem:[#allocation129_spill] sm:$0xff] }
 0x5fc   : > { %v6757_v7 = vadd.f32 %v13813_v42, %v6496_v50  ;;  %6900 = vxpose.xlu0.b32.cont [3/16] %v6820_v22, 128  ;;  %v5574_v59 = vpop.f32.mrf.mxu1  ;;  %v12751_v39 = vpop.f32.mrf.mxu0  ;;  %v13815_v51 = vld [vmem:[#allocation77_spill] sm:$0xff] }
 0x5fd   : > { %v6500_v57 = vmul.f32 %v12501_v53, %v6222_v21  ;;  %v6223_v61 = vmax.f32 %v5924_v35, 0.0  ;;  %v5926_v20 = vadd.f32 %v12603_v10, %v5573_v9  ;;  %v5575_v46 = vadd.f32 %v5574_v59, %v12484_v24 }
 0x5fe   : > { %v6821_v15 = vadd.f32 %v6757_v7, %v6497_v56  ;;  %v5578_v33 = vpop.f32.mrf.mxu1  ;;  %v12756_v31 = vpop.f32.mrf.mxu0 }
 0x5ff   : > { %v6758_v1 = vadd.f32 %v13814_v60, %v6500_v57  ;;  %v6501_v19 = vmul.f32 %v12508_v0, %v6223_v61  ;;  %v6226_v16 = vmax.f32 %v5926_v20, 0.0  ;;  %v5928_v26 = vadd.f32 %v12608_v5, %v5575_v46  ;;  %v13816_v60 = vld [vmem:[#allocation4_spill] sm:$0xff] }
 0x600   : > { %v5579_v37 = vadd.f32 %v5578_v33, %v12472_v6  ;;  %6901 = vxpose.xlu0.b32.cont [4/16] %v6821_v15, 128  ;;  %v5580_v48 = vpop.f32.mrf.mxu1  ;;  %v12762_v63 = vpop.f32.mrf.mxu0 }
 0x601   : > { %v6822_v10 = vadd.f32 %v6758_v1, %v6501_v19  ;;  %v6504_v47 = vmul.f32 %v12501_v53, %v6226_v16  ;;  %v6227_v14 = vmax.f32 %v5928_v26, 0.0  ;;  %v5581_v18 = vadd.f32 %v5580_v48, %v12484_v24 }
 0x602   : > { %v5932_v22 = vadd.f32 %v12614_v41, %v5579_v37  ;;  %v5582_v58 = vpop.f32.mrf.mxu1  ;;  %v12767_v40 = vpop.f32.mrf.mxu0 }
 0x603   : > { %v6759_v50 = vadd.f32 %v13815_v51, %v6504_v47  ;;  %v6505_v5 = vmul.f32 %v12508_v0, %v6227_v14  ;;  %v5934_v17 = vadd.f32 %v12620_v27, %v5581_v18  ;;  %v5583_v56 = vadd.f32 %v5582_v58, %v12472_v6 }
 0x604   : > { %v6230_v21 = vmax.f32 %v5932_v22, 0.0  ;;  %6902 = vxpose.xlu0.b32.cont [5/16] %v6822_v10, 128  ;;  %v5584_v35 = vpop.f32.mrf.mxu1  ;;  %v12773_v9 = vpop.f32.mrf.mxu0 }
 0x605   : > { %v6823_v42 = vadd.f32 %v6759_v50, %v6505_v5  ;;  %v6231_v7 = vmax.f32 %v5934_v17, 0.0  ;;  %v5936_v41 = vadd.f32 %v12627_v25, %v5583_v56  ;;  %v5585_v59 = vadd.f32 %v5584_v35, %v12484_v24 }
 0x606   : > { %v6508_v57 = vmul.f32 %v12501_v53, %v6230_v21  ;;  %v5588_v61 = vpop.f32.mrf.mxu1  ;;  %v12778_v20 = vpop.f32.mrf.mxu0 }
 0x607   : > { %v6509_v27 = vmul.f32 %v12508_v0, %v6231_v7  ;;  %v6234_v46 = vmax.f32 %v5936_v41, 0.0  ;;  %v5938_v15 = vadd.f32 %v12632_v2, %v5585_v59  ;;  %v5589_v33 = vadd.f32 %v5588_v61, %v12472_v6  ;;  %v13817_v2 = vld [vmem:[#allocation57_spill] sm:$0xff]  ;;  %v13818_v59 = vld [vmem:[#allocation58_spill] sm:$0xff] }
 0x608   : > { %v6760_v1 = vadd.f32 %v13816_v60, %v6508_v57  ;;  %6903 = vxpose.xlu0.b32.cont [6/16] %v6823_v42, 128  ;;  %v5590_v19 = vpop.f32.mrf.mxu1  ;;  %v12784_v16 = vpop.f32.mrf.mxu0 }
 0x609   : > { %v6512_v25 = vmul.f32 %v12501_v53, %v6234_v46  ;;  %v6235_v26 = vmax.f32 %v5938_v15, 0.0  ;;  %v5942_v37 = vadd.f32 %v12638_v12, %v5589_v33  ;;  %v5591_v48 = vadd.f32 %v5590_v19, %v12484_v24 }
 0x60a   : > { %v6824_v10 = vadd.f32 %v6760_v1, %v6509_v27  ;;  %v5592_v47 = vpop.f32.mrf.mxu1  ;;  %v12789_v14 = vpop.f32.mrf.mxu0 }
 0x60b   : > { %v6761_v18 = vadd.f32 %v13817_v2, %v6512_v25  ;;  %v6513_v22 = vmul.f32 %v12508_v0, %v6235_v26  ;;  %v6238_v58 = vmax.f32 %v5942_v37, 0.0  ;;  %v5944_v51 = vadd.f32 %v12644_v32, %v5591_v48  ;;  %v13819_v2 = vld [vmem:[#allocation59_spill] sm:$0xff] }
 0x60c   : > { %v5593_v50 = vadd.f32 %v5592_v47, %v12472_v6  ;;  %6904 = vxpose.xlu0.b32.cont [7/16] %v6824_v10, 128  ;;  %v5594_v5 = vpop.f32.mrf.mxu1  ;;  %v12795_v17 = vpop.f32.mrf.mxu0 }
 0x60d   : > { %v6825_v12 = vadd.f32 %v6761_v18, %v6513_v22  ;;  %v6516_v56 = vmul.f32 %v12501_v53, %v6238_v58  ;;  %v6239_v21 = vmax.f32 %v5944_v51, 0.0  ;;  %v5595_v35 = vadd.f32 %v5594_v5, %v12484_v24 }
 0x60e   : > { %v5946_v42 = vadd.f32 %v12651_v8, %v5593_v50  ;;  %v5598_v7 = vpop.f32.mrf.mxu1  ;;  %v12800_v41 = vpop.f32.mrf.mxu0 }
 0x60f   : > { %v6762_v57 = vadd.f32 %v13818_v59, %v6516_v56  ;;  %v6517_v32 = vmul.f32 %v12508_v0, %v6239_v21  ;;  %v5948_v61 = vadd.f32 %v12656_v23, %v5595_v35  ;;  %v5599_v27 = vadd.f32 %v5598_v7, %v12472_v6 }
 0x610   : > { %v6242_v46 = vmax.f32 %v5946_v42, 0.0  ;;  %6905 = vxpose.xlu0.b32.cont [8/16] %v6825_v12, 128  ;;  %v5600_v15 = vpop.f32.mrf.mxu1  ;;  %v12806_v33 = vpop.f32.mrf.mxu0 }
 0x611   : > { %v6826_v60 = vadd.f32 %v6762_v57, %v6517_v32  ;;  %v6243_v1 = vmax.f32 %v5948_v61, 0.0  ;;  %v5952_v8 = vadd.f32 %v12662_v45, %v5599_v27  ;;  %v5601_v19 = vadd.f32 %v5600_v15, %v12484_v24 }
 0x612   : > { %v6520_v25 = vmul.f32 %v12501_v53, %v6242_v46  ;;  %v5602_v26 = vpop.f32.mrf.mxu1  ;;  %v12811_v37 = vpop.f32.mrf.mxu0 }
 0x613   : > { %v6521_v23 = vmul.f32 %v12508_v0, %v6243_v1  ;;  %v6246_v48 = vmax.f32 %v5952_v8, 0.0  ;;  %v5954_v10 = vadd.f32 %v12668_v30, %v5601_v19  ;;  %v5603_v47 = vadd.f32 %v5602_v26, %v12472_v6  ;;  %v13820_v30 = vld [vmem:[#allocation61_spill] sm:$0xff]  ;;  %v13821_v19 = vld [vmem:[#allocation63_spill] sm:$0xff] }
 0x614   : > { %v6763_v18 = vadd.f32 %v13819_v2, %v6520_v25  ;;  %6906 = vxpose.xlu0.b32.cont [9/16] %v6826_v60, 128  ;;  %v5604_v22 = vpop.f32.mrf.mxu1  ;;  %v12817_v58 = vpop.f32.mrf.mxu0 }
 0x615   : > { %v6524_v45 = vmul.f32 %v12501_v53, %v6246_v48  ;;  %v6247_v51 = vmax.f32 %v5954_v10, 0.0  ;;  %v5956_v50 = vadd.f32 %v12674_v44, %v5603_v47  ;;  %v5605_v5 = vadd.f32 %v5604_v22, %v12484_v24 }
 0x616   : > { %v6827_v12 = vadd.f32 %v6763_v18, %v6521_v23  ;;  %v5608_v56 = vpop.f32.mrf.mxu1  ;;  %v12822_v21 = vpop.f32.mrf.mxu0 }
 0x617   : > { %v6764_v35 = vadd.f32 %v13820_v30, %v6524_v45  ;;  %v6525_v42 = vmul.f32 %v12508_v0, %v6247_v51  ;;  %v6250_v7 = vmax.f32 %v5956_v50, 0.0  ;;  %v5958_v59 = vadd.f32 %v12679_v38, %v5605_v5  ;;  %v13822_v30 = vld [vmem:[#allocation64_spill] sm:$0xff] }
 0x618   : > { %v5609_v57 = vadd.f32 %v5608_v56, %v12472_v6  ;;  %6907 = vxpose.xlu0.b32.cont [10/16] %v6827_v12, 128  ;;  %v5610_v32 = vpop.f32.mrf.mxu1  ;;  %v12828_v61 = vpop.f32.mrf.mxu0 }
 0x619   : > { %v6828_v44 = vadd.f32 %v6764_v35, %v6525_v42  ;;  %v6528_v27 = vmul.f32 %v12501_v53, %v6250_v7  ;;  %v6251_v46 = vmax.f32 %v5958_v59, 0.0  ;;  %v5611_v15 = vadd.f32 %v5610_v32, %v12484_v24 }
 0x61a   : > { %v5962_v60 = vadd.f32 %v12685_v28, %v5609_v57  ;;  %v5612_v1 = vpop.f32.mrf.mxu1  ;;  %v12833_v8 = vpop.f32.mrf.mxu0 }
 0x61b   : > { %v6765_v25 = vadd.f32 %v13821_v19, %v6528_v27  ;;  %v6529_v38 = vmul.f32 %v12508_v0, %v6251_v46  ;;  %v5964_v26 = vadd.f32 %v12690_v4, %v5611_v15  ;;  %v5613_v23 = vadd.f32 %v5612_v1, %v12472_v6 }
 0x61c   : > { %v6254_v48 = vmax.f32 %v5962_v60, 0.0  ;;  %6908 = vxpose.xlu0.b32.cont [11/16] %v6828_v44, 128  ;;  %v5614_v10 = vpop.f32.mrf.mxu1  ;;  %v12839_v47 = vpop.f32.mrf.mxu0 }
 0x61d   : > { %v6829_v2 = vadd.f32 %v6765_v25, %v6529_v38  ;;  %v6255_v18 = vmax.f32 %v5964_v26, 0.0  ;;  %v5966_v28 = vadd.f32 %v12696_v34, %v5613_v23  ;;  %v5615_v22 = vadd.f32 %v5614_v10, %v12484_v24 }
 0x61e   : > { %v6532_v45 = vmul.f32 %v12501_v53, %v6254_v48  ;;  %v5618_v51 = vpop.f32.mrf.mxu1  ;;  %v12844_v50 = vpop.f32.mrf.mxu0 }
 0x61f   : > { %v6533_v4 = vmul.f32 %v12508_v0, %v6255_v18  ;;  %v6258_v5 = vmax.f32 %v5966_v28, 0.0  ;;  %v5968_v12 = vadd.f32 %v12701_v13, %v5615_v22  ;;  %v5619_v56 = vadd.f32 %v5618_v51, %v12472_v6  ;;  %v13823_v13 = vld [vmem:[#allocation65_spill] sm:$0xff]  ;;  %v13824_v22 = vld [vmem:[#allocation67_spill] sm:$0xff] }
 0x620   : > { %v6766_v35 = vadd.f32 %v13822_v30, %v6532_v45  ;;  %6909 = vxpose.xlu0.b32.cont [12/16] %v6829_v2, 128  ;;  %v5620_v42 = vpop.f32.mrf.mxu1  ;;  %v12850_v7 = vpop.f32.mrf.mxu0 }
 0x621   : > { %v6536_v34 = vmul.f32 %v12501_v53, %v6258_v5  ;;  %v6259_v59 = vmax.f32 %v5968_v12, 0.0  ;;  %v5972_v57 = vadd.f32 %v12707_v43, %v5619_v56  ;;  %v5621_v32 = vadd.f32 %v5620_v42, %v12484_v24 }
 0x622   : > { %v6830_v44 = vadd.f32 %v6766_v35, %v6533_v4  ;;  %v5622_v27 = vpop.f32.mrf.mxu1  ;;  %v12855_v46 = vpop.f32.mrf.mxu0 }
 0x623   : > { %v6767_v15 = vadd.f32 %v13823_v13, %v6536_v34  ;;  %v6537_v60 = vmul.f32 %v12508_v0, %v6259_v59  ;;  %v6262_v1 = vmax.f32 %v5972_v57, 0.0  ;;  %v5974_v19 = vadd.f32 %v12712_v3, %v5621_v32  ;;  %v13825_v13 = vld [vmem:[#allocation19_spill] sm:$0xff] }
 0x624   : > { %v5623_v25 = vadd.f32 %v5622_v27, %v12472_v6  ;;  %6910 = vxpose.xlu0.b32.cont [13/16] %v6830_v44, 128  ;;  %v5624_v38 = vpop.f32.mrf.mxu1  ;;  %v12861_v26 = vpop.f32.mrf.mxu0 }
 0x625   : > { %v6831_v43 = vadd.f32 %v6767_v15, %v6537_v60  ;;  %v6540_v23 = vmul.f32 %v12501_v53, %v6262_v1  ;;  %v6263_v48 = vmax.f32 %v5974_v19, 0.0  ;;  %v5625_v10 = vadd.f32 %v5624_v38, %v12484_v24 }
 0x626   : > { %v5976_v2 = vadd.f32 %v12718_v52, %v5623_v25  ;;  %v5628_v18 = vpop.f32.mrf.mxu1  ;;  %v12866_v28 = vpop.f32.mrf.mxu0 }
 0x627   : > { %v6768_v45 = vadd.f32 %v13824_v22, %v6540_v23  ;;  %v6541_v3 = vmul.f32 %v12508_v0, %v6263_v48  ;;  %v5978_v51 = vadd.f32 %v12723_v36, %v5625_v10  ;;  %v5629_v4 = vadd.f32 %v5628_v18, %v12472_v6 }
 0x628   : > { %v6266_v5 = vmax.f32 %v5976_v2, 0.0  ;;  %6911 = vxpose.xlu0.b32.cont [14/16] %v6831_v43, 128  ;;  %v5630_v12 = vpop.f32.mrf.mxu1  ;;  %v12872_v56 = vpop.f32.mrf.mxu0 }
 0x629   : > { %v6832_v30 = vadd.f32 %v6768_v45, %v6541_v3  ;;  %v6267_v35 = vmax.f32 %v5978_v51, 0.0  ;;  %v5982_v52 = vadd.f32 %v12729_v55, %v5629_v4  ;;  %v5631_v42 = vadd.f32 %v5630_v12, %v12484_v24 }
 0x62a   : > { %v6544_v34 = vmul.f32 %v12501_v53, %v6266_v5  ;;  %v5632_v59 = vpop.f32.mrf.mxu1  ;;  %v12877_v57 = vpop.f32.mrf.mxu0 }
 0x62b   : > { %v6545_v36 = vmul.f32 %v12508_v0, %v6267_v35  ;;  %v6270_v32 = vmax.f32 %v5982_v52, 0.0  ;;  %v5984_v44 = vadd.f32 %v12734_v11, %v5631_v42  ;;  %v5633_v27 = vadd.f32 %v5632_v59, %v12472_v6  ;;  %v13826_v11 = vld [vmem:[#allocation18_spill] sm:$0xff] }
 0x62c   : > { %v6769_v15 = vadd.f32 %v13825_v13, %v6544_v34  ;;  %6912 = vxpose.xlu0.b32.cont [15/16] %v6832_v30, 128  ;;  %v5634_v60 = vpop.f32.mrf.mxu1  ;;  %v12883_v1 = vpop.f32.mrf.mxu0  ;;  %v13827_v34 = vld [vmem:[#allocation68_spill] sm:$0xff] }
 0x62d   : > { %v6548_v55 = vmul.f32 %v12501_v53, %v6270_v32  ;;  %v6271_v19 = vmax.f32 %v5984_v44, 0.0  ;;  %v5986_v25 = vadd.f32 %v12740_v29, %v5633_v27  ;;  %v5635_v38 = vadd.f32 %v5634_v60, %v12484_v24 }
 0x62e   : > { %v6833_v43 = vadd.f32 %v6769_v15, %v6545_v36  ;;  %v5638_v23 = vpop.f32.mrf.mxu1  ;;  %v12888_v48 = vpop.f32.mrf.mxu0 }
 0x62f   : > { %v6770_v10 = vadd.f32 %v13826_v11, %v6548_v55  ;;  %v6549_v2 = vmul.f32 %v12508_v0, %v6271_v19  ;;  %v6274_v18 = vmax.f32 %v5986_v25, 0.0  ;;  %v5988_v22 = vadd.f32 %v12745_v62, %v5635_v38 }
 0x630   : > { %v5639_v45 = vadd.f32 %v5638_v23, %v12472_v6  ;;  %6913 = vxpose.xlu0.b32.end [16/16] %v6833_v43, 128  ;;  %v5640_v3 = vpop.f32.mrf.mxu1  ;;  %v12894_v51 = vpop.f32.mrf.mxu0 }
 0x631   : > { %v6834_v29 = vadd.f32 %v6770_v10, %v6549_v2  ;;  %v6552_v4 = vmul.f32 %v12501_v53, %v6274_v18  ;;  %v6275_v5 = vmax.f32 %v5988_v22, 0.0  ;;  %v5641_v12 = vadd.f32 %v5640_v3, %v12484_v24  ;;  %v6882_v30 = vpop.trf.xlu1  ;;  %v13828_v18 = vld [vmem:[#allocation69_spill] sm:$0xff] }
 0x632   : > { %v5992_v35 = vadd.f32 %v12751_v39, %v5639_v45  ;;  %v5642_v52 = vpop.f32.mrf.mxu1  ;;  %v12899_v42 = vpop.f32.mrf.mxu0 }
 0x633   : > { %v6771_v62 = vadd.f32 %v13827_v34, %v6552_v4  ;;  %v6553_v59 = vmul.f32 %v12508_v0, %v6275_v5  ;;  %v5994_v36 = vadd.f32 %v12756_v31, %v5641_v12  ;;  %v5643_v32 = vadd.f32 %v5642_v52, %v12472_v6  ;;  %v13829_v34 = vld [vmem:[#allocation70_spill] sm:$0xff] }
 0x634   : > { %v6278_v44 = vmax.f32 %v5992_v35, 0.0  ;;  %6930 = vxpose.xlu0.b32.start [1/16] %v6834_v29, 128  ;;  %v5644_v27 = vpop.f32.mrf.mxu1  ;;  %v12905_v13 = vpop.f32.mrf.mxu0 }
 0x635   : > { %v6835_v15 = vadd.f32 %v6771_v62, %v6553_v59  ;;  %v6279_v60 = vmax.f32 %v5994_v36, 0.0  ;;  %v5996_v39 = vadd.f32 %v12762_v63, %v5643_v32  ;;  %v5645_v55 = vadd.f32 %v5644_v27, %v12484_v24  ;;  %v6883_v19 = vpop.trf.xlu1 }
 0x636   : > { %v6556_v25 = vmul.f32 %v12501_v53, %v6278_v44  ;;  %v5648_v38 = vpop.f32.mrf.mxu1  ;;  %v12910_v43 = vpop.f32.mrf.mxu0  ;;  %v6994_v31 = vadd.f32 %v6883_v19, %v6882_v30 }
 0x637   : > { %v6557_v23 = vmul.f32 %v12508_v0, %v6279_v60  ;;  %v6282_v11 = vmax.f32 %v5996_v39, 0.0  ;;  %v5998_v10 = vadd.f32 %v12767_v40, %v5645_v55  ;;  %v5649_v2 = vadd.f32 %v5648_v38, %v12472_v6 }
 0x638   : > { %v6772_v22 = vadd.f32 %v13828_v18, %v6556_v25  ;;  %6931 = vxpose.xlu0.b32.cont [2/16] %v6835_v15, 128  ;;  %v5650_v63 = vpop.f32.mrf.mxu1  ;;  %v12916_v45 = vpop.f32.mrf.mxu0 }
 0x639   : > { %v6560_v3 = vmul.f32 %v12501_v53, %v6282_v11  ;;  %v6283_v29 = vmax.f32 %v5998_v10, 0.0  ;;  %v6002_v4 = vadd.f32 %v12773_v9, %v5649_v2  ;;  %v5651_v5 = vadd.f32 %v5650_v63, %v12484_v24  ;;  %v6884_v12 = vpop.trf.xlu1 }
 0x63a   : > { %v6836_v30 = vadd.f32 %v6772_v22, %v6557_v23  ;;  %v5652_v35 = vpop.f32.mrf.mxu1  ;;  %v12921_v52 = vpop.f32.mrf.mxu0  ;;  %v6995_v40 = vadd.f32 %v6994_v31, %v6884_v12 }
 0x63b   : > { %v6773_v62 = vadd.f32 %v13829_v34, %v6560_v3  ;;  %v6561_v59 = vmul.f32 %v12508_v0, %v6283_v29  ;;  %v6286_v36 = vmax.f32 %v6002_v4, 0.0  ;;  %v6004_v32 = vadd.f32 %v12778_v20, %v5651_v5  ;;  %v13830_v20 = vld [vmem:[#allocation6_spill] sm:$0xff] }
 0x63c   : > { %v5653_v44 = vadd.f32 %v5652_v35, %v12472_v6  ;;  %6932 = vxpose.xlu0.b32.cont [3/16] %v6836_v30, 128  ;;  %v5654_v27 = vpop.f32.mrf.mxu1  ;;  %v12927_v9 = vpop.f32.mrf.mxu0 }
 0x63d   : > { %v6837_v15 = vadd.f32 %v6773_v62, %v6561_v59  ;;  %v6564_v60 = vmul.f32 %v12501_v53, %v6286_v36  ;;  %v6287_v39 = vmax.f32 %v6004_v32, 0.0  ;;  %v5655_v55 = vadd.f32 %v5654_v27, %v12484_v24  ;;  %v6885_v19 = vpop.trf.xlu1  ;;  %v13831_v36 = vld [vmem:[#allocation21_spill] sm:$0xff] }
 0x63e   : > { %v6006_v25 = vadd.f32 %v12784_v16, %v5653_v44  ;;  %v5658_v38 = vpop.f32.mrf.mxu1  ;;  %v12932_v31 = vpop.f32.mrf.mxu0  ;;  %v6996_v23 = vadd.f32 %v6995_v40, %v6885_v19 }
 0x63f   : > { %v6774_v11 = vadd.f32 %v13830_v20, %v6564_v60  ;;  %v6565_v10 = vmul.f32 %v12508_v0, %v6287_v39  ;;  %v6008_v2 = vadd.f32 %v12789_v14, %v5655_v55  ;;  %v5659_v18 = vadd.f32 %v5658_v38, %v12472_v6 }
 0x640   : > { %v6290_v22 = vmax.f32 %v6006_v25, 0.0  ;;  %6933 = vxpose.xlu0.b32.cont [4/16] %v6837_v15, 128  ;;  %v5660_v63 = vpop.f32.mrf.mxu1  ;;  %v12941_v30 = vpop.f32.mrf.mxu0 }
 0x641   : > { %v6838_v3 = vadd.f32 %v6774_v11, %v6565_v10  ;;  %v6291_v29 = vmax.f32 %v6008_v2, 0.0  ;;  %v6012_v4 = vadd.f32 %v12795_v17, %v5659_v18  ;;  %v5661_v16 = vadd.f32 %v5660_v63, %v12484_v24  ;;  %v6886_v5 = vpop.trf.xlu1 }
 0x642   : > { %v6568_v12 = vmul.f32 %v12501_v53, %v6290_v22  ;;  %v5662_v35 = vpop.f32.mrf.mxu1  ;;  %v6997_v40 = vadd.f32 %v6996_v23, %v6886_v5  ;;  %v12950_v19 = vpop.f32.mrf.mxu0 }
 0x643   : > { %v6569_v14 = vmul.f32 %v12508_v0, %v6291_v29  ;;  %v6294_v34 = vmax.f32 %v6012_v4, 0.0  ;;  %v6014_v62 = vadd.f32 %v12800_v41, %v5661_v16  ;;  %v5663_v59 = vadd.f32 %v5662_v35, %v12472_v6  ;;  %v13832_v41 = vld [vmem:[#allocation72_spill] sm:$0xff]  ;;  %v13833_v35 = vld [vmem:[#allocation73_spill] sm:$0xff] }
 0x644   : > { %v6775_v32 = vadd.f32 %v13831_v36, %v6568_v12  ;;  %6934 = vxpose.xlu0.b32.cont [5/16] %v6838_v3, 128  ;;  %v5664_v17 = vpop.f32.mrf.mxu1  ;;  %v12958_v4 = vpop.f32.mrf.mxu0 }
 0x645   : > { %v6572_v44 = vmul.f32 %v12501_v53, %v6294_v34  ;;  %v6295_v27 = vmax.f32 %v6014_v62, 0.0  ;;  %v6016_v15 = vadd.f32 %v12806_v33, %v5663_v59  ;;  %v5665_v60 = vadd.f32 %v5664_v17, %v12484_v24  ;;  %v6887_v39 = vpop.trf.xlu1 }
 0x646   : > { %v6839_v55 = vadd.f32 %v6775_v32, %v6569_v14  ;;  %v5668_v25 = vpop.f32.mrf.mxu1  ;;  %v6998_v38 = vadd.f32 %v6997_v40, %v6887_v39 }
 0x647   : > { %v6776_v23 = vadd.f32 %v13832_v41, %v6572_v44  ;;  %v6573_v20 = vmul.f32 %v12508_v0, %v6295_v27  ;;  %v6298_v11 = vmax.f32 %v6016_v15, 0.0  ;;  %v6018_v10 = vadd.f32 %v12811_v37, %v5665_v60  ;;  %v12968_v15 = vpop.f32.mrf.mxu0  ;;  %v13834_v41 = vld [vmem:[#allocation20_spill] sm:$0xff] }
 0x648   : > { %v5669_v2 = vadd.f32 %v5668_v25, %v12472_v6  ;;  %6935 = vxpose.xlu0.b32.cont [6/16] %v6839_v55, 128  ;;  %v5670_v18 = vpop.f32.mrf.mxu1 }
 0x649   : > { %v6840_v33 = vadd.f32 %v6776_v23, %v6573_v20  ;;  %v6576_v22 = vmul.f32 %v12501_v53, %v6298_v11  ;;  %v6299_v63 = vmax.f32 %v6018_v10, 0.0  ;;  %v5671_v3 = vadd.f32 %v5670_v18, %v12484_v24  ;;  %v6888_v29 = vpop.trf.xlu1 }
 0x64a   : > { %v6022_v16 = vadd.f32 %v12817_v58, %v5669_v2  ;;  %v5672_v5 = vpop.f32.mrf.mxu1  ;;  %v6999_v12 = vadd.f32 %v6998_v38, %v6888_v29 }
 0x64b   : > { %v6777_v40 = vadd.f32 %v13833_v35, %v6576_v22  ;;  %v6577_v37 = vmul.f32 %v12508_v0, %v6299_v63  ;;  %v6024_v14 = vadd.f32 %v12822_v21, %v5671_v3  ;;  %v5673_v34 = vadd.f32 %v5672_v5, %v12472_v6  ;;  %v12977_v22 = vpop.f32.mrf.mxu0 }
 0x64c   : > { %v6302_v62 = vmax.f32 %v6022_v16, 0.0  ;;  %6936 = vxpose.xlu0.b32.cont [7/16] %v6840_v33, 128  ;;  %v5674_v59 = vpop.f32.mrf.mxu1 }
 0x64d   : > { %v6841_v36 = vadd.f32 %v6777_v40, %v6577_v37  ;;  %v6303_v32 = vmax.f32 %v6024_v14, 0.0  ;;  %v6026_v17 = vadd.f32 %v12828_v61, %v5673_v34  ;;  %v5675_v44 = vadd.f32 %v5674_v59, %v12484_v24  ;;  %v6889_v58 = vpop.trf.xlu1  ;;  %v12985_v59 = vpop.f32.mrf.mxu0 }
 0x64e   : > { %v6580_v27 = vmul.f32 %v12501_v53, %v6302_v62  ;;  %v5678_v60 = vpop.f32.mrf.mxu1  ;;  %v7000_v39 = vadd.f32 %v6999_v12, %v6889_v58 }
 0x64f   : > { %v6581_v21 = vmul.f32 %v12508_v0, %v6303_v32  ;;  %v6306_v55 = vmax.f32 %v6026_v17, 0.0  ;;  %v6028_v25 = vadd.f32 %v12833_v8, %v5675_v44  ;;  %v5679_v38 = vadd.f32 %v5678_v60, %v12472_v6  ;;  %v13835_v8 = vld [vmem:[#allocation74_spill] sm:$0xff]  ;;  %v13836_v44 = vld [vmem:[#allocation75_spill] sm:$0xff] }
 0x650   : > { %v6778_v23 = vadd.f32 %v13834_v41, %v6580_v27  ;;  %6937 = vxpose.xlu0.b32.cont [8/16] %v6841_v36, 128  ;;  %v5680_v61 = vpop.f32.mrf.mxu1 }
 0x651   : > { %v6584_v20 = vmul.f32 %v12501_v53, %v6306_v55  ;;  %v6307_v11 = vmax.f32 %v6028_v25, 0.0  ;;  %v6032_v10 = vadd.f32 %v12839_v47, %v5679_v38  ;;  %v5681_v2 = vadd.f32 %v5680_v61, %v12484_v24  ;;  %v6890_v18 = vpop.trf.xlu1 }
 0x652   : > { %v6842_v33 = vadd.f32 %v6778_v23, %v6581_v21  ;;  %v5682_v63 = vpop.f32.mrf.mxu1  ;;  %v7001_v3 = vadd.f32 %v7000_v39, %v6890_v18  ;;  %v12994_v23 = vpop.f32.mrf.mxu0 }
 0x653   : > { %v6779_v29 = vadd.f32 %v13835_v8, %v6584_v20  ;;  %v6585_v16 = vmul.f32 %v12508_v0, %v6307_v11  ;;  %v6310_v5 = vmax.f32 %v6032_v10, 0.0  ;;  %v6034_v12 = vadd.f32 %v12844_v50, %v5681_v2 }
 0x654   : > { %v5683_v35 = vadd.f32 %v5682_v63, %v12472_v6  ;;  %6938 = vxpose.xlu0.b32.cont [9/16] %v6842_v33, 128  ;;  %v5684_v40 = vpop.f32.mrf.mxu1  ;;  %v13837_v33 = vld [vmem:[#allocation23_spill] sm:$0xff] }
 0x655   : > { %v6843_v47 = vadd.f32 %v6779_v29, %v6585_v16  ;;  %v6588_v37 = vmul.f32 %v12501_v53, %v6310_v5  ;;  %v6311_v14 = vmax.f32 %v6034_v12, 0.0  ;;  %v5685_v34 = vadd.f32 %v5684_v40, %v12484_v24  ;;  %v6891_v62 = vpop.trf.xlu1  ;;  %v13004_v12 = vpop.f32.mrf.mxu0 }
 0x656   : > { %v6036_v36 = vadd.f32 %v12850_v7, %v5683_v35  ;;  %v5688_v32 = vpop.f32.mrf.mxu1  ;;  %v7002_v17 = vadd.f32 %v7001_v3, %v6891_v62 }
 0x657   : > { %v6780_v58 = vadd.f32 %v13836_v44, %v6588_v37  ;;  %v6589_v50 = vmul.f32 %v12508_v0, %v6311_v14  ;;  %v6038_v27 = vadd.f32 %v12855_v46, %v5685_v34  ;;  %v5689_v60 = vadd.f32 %v5688_v32, %v12472_v6 }
 0x658   : > { %v6314_v39 = vmax.f32 %v6036_v36, 0.0  ;;  %6939 = vxpose.xlu0.b32.cont [10/16] %v6843_v47, 128  ;;  %v5690_v21 = vpop.f32.mrf.mxu1 }
 0x659   : > { %v6844_v55 = vadd.f32 %v6780_v58, %v6589_v50  ;;  %v6315_v25 = vmax.f32 %v6038_v27, 0.0  ;;  %v6042_v38 = vadd.f32 %v12861_v26, %v5689_v60  ;;  %v5691_v41 = vadd.f32 %v5690_v21, %v12484_v24  ;;  %v6892_v7 = vpop.trf.xlu1  ;;  %v13012_v27 = vpop.f32.mrf.mxu0 }
 0x65a   : > { %v6592_v61 = vmul.f32 %v12501_v53, %v6314_v39  ;;  %v5692_v20 = vpop.f32.mrf.mxu1  ;;  %v7003_v11 = vadd.f32 %v7002_v17, %v6892_v7 }
 0x65b   : > { %v6593_v46 = vmul.f32 %v12508_v0, %v6315_v25  ;;  %v6318_v10 = vmax.f32 %v6042_v38, 0.0  ;;  %v6044_v2 = vadd.f32 %v12866_v28, %v5691_v41  ;;  %v5693_v18 = vadd.f32 %v5692_v20, %v12472_v6  ;;  %v13838_v28 = vld [vmem:[#allocation22_spill] sm:$0xff] }
 0x65c   : > { %v6781_v63 = vadd.f32 %v13837_v33, %v6592_v61  ;;  %6940 = vxpose.xlu0.b32.cont [11/16] %v6844_v55, 128  ;;  %v5694_v26 = vpop.f32.mrf.mxu1  ;;  %v13839_v55 = vld [vmem:[#allocation76_spill] sm:$0xff] }
 0x65d   : > { %v6596_v3 = vmul.f32 %v12501_v53, %v6318_v10  ;;  %v6319_v8 = vmax.f32 %v6044_v2, 0.0  ;;  %v6046_v29 = vadd.f32 %v12872_v56, %v5693_v18  ;;  %v5695_v16 = vadd.f32 %v5694_v26, %v12484_v24  ;;  %v6893_v5 = vpop.trf.xlu1  ;;  %v13021_v2 = vpop.f32.mrf.mxu0 }
 0x65e   : > { %v6845_v35 = vadd.f32 %v6781_v63, %v6593_v46  ;;  %v5698_v40 = vpop.f32.mrf.mxu1  ;;  %v7004_v47 = vadd.f32 %v7003_v11, %v6893_v5 }
 0x65f   : > { %v6782_v37 = vadd.f32 %v13838_v28, %v6596_v3  ;;  %v6597_v14 = vmul.f32 %v12508_v0, %v6319_v8  ;;  %v6322_v34 = vmax.f32 %v6046_v29, 0.0  ;;  %v6048_v62 = vadd.f32 %v12877_v57, %v5695_v16  ;;  %v13840_v29 = vld [vmem:[#allocation78_spill] sm:$0xff] }
 0x660   : > { %v5699_v36 = vadd.f32 %v5698_v40, %v12472_v6  ;;  %6941 = vxpose.xlu0.b32.cont [12/16] %v6845_v35, 128  ;;  %v5700_v32 = vpop.f32.mrf.mxu1 }
 0x661   : > { %v6846_v56 = vadd.f32 %v6782_v37, %v6597_v14  ;;  %v6600_v17 = vmul.f32 %v12501_v53, %v6322_v34  ;;  %v6323_v44 = vmax.f32 %v6048_v62, 0.0  ;;  %v5701_v58 = vadd.f32 %v5700_v32, %v12484_v24  ;;  %v6894_v50 = vpop.trf.xlu1  ;;  %v13031_v37 = vpop.f32.mrf.mxu0 }
 0x662   : > { %v6052_v60 = vadd.f32 %v12883_v1, %v5699_v36  ;;  %v5702_v39 = vpop.f32.mrf.mxu1  ;;  %v7005_v21 = vadd.f32 %v7004_v47, %v6894_v50 }
 0x663   : > { %v6783_v25 = vadd.f32 %v13839_v55, %v6600_v17  ;;  %v6601_v57 = vmul.f32 %v12508_v0, %v6323_v44  ;;  %v6054_v38 = vadd.f32 %v12888_v48, %v5701_v58  ;;  %v5703_v41 = vadd.f32 %v5702_v39, %v12472_v6  ;;  %v13039_v55 = vpop.f32.mrf.mxu0 }
 0x664   : > { %v6326_v7 = vmax.f32 %v6052_v60, 0.0  ;;  %6942 = vxpose.xlu0.b32.cont [13/16] %v6846_v56, 128  ;;  %v5704_v61 = vpop.f32.mrf.mxu1 }
 0x665   : > { %v6847_v20 = vadd.f32 %v6783_v25, %v6601_v57  ;;  %v6327_v11 = vmax.f32 %v6054_v38, 0.0  ;;  %v6056_v46 = vadd.f32 %v12894_v51, %v5703_v41  ;;  %v5705_v10 = vadd.f32 %v5704_v61, %v12484_v24  ;;  %v6895_v1 = vpop.trf.xlu1  ;;  %v13842_v41 = vld [vmem:[#allocation30_spill] sm:$0xff] }
 0x666   : > { %v6604_v18 = vmul.f32 %v12501_v53, %v6326_v7  ;;  %v5708_v33 = vpop.f32.mrf.mxu1  ;;  %v7006_v63 = vadd.f32 %v7005_v21, %v6895_v1 }
 0x667   : > { %v6605_v48 = vmul.f32 %v12508_v0, %v6327_v11  ;;  %v6330_v26 = vmax.f32 %v6056_v46, 0.0  ;;  %v6058_v3 = vadd.f32 %v12899_v42, %v5705_v10  ;;  %v5709_v8 = vadd.f32 %v5708_v33, %v12472_v6  ;;  %v13841_v42 = vld [vmem:[#allocation25_spill] sm:$0xff] }
 0x668   : > { %v6784_v16 = vadd.f32 %v13840_v29, %v6604_v18  ;;  %6943 = vxpose.xlu0.b32.cont [14/16] %v6847_v20, 128  ;;  %v5710_v51 = vpop.f32.mrf.mxu1 }
 0x669   : > { %v6608_v5 = vmul.f32 %v12501_v53, %v6330_v26  ;;  %v6331_v35 = vmax.f32 %v6058_v3, 0.0  ;;  %v6062_v40 = vadd.f32 %v12905_v13, %v5709_v8  ;;  %v5711_v47 = vadd.f32 %v5710_v51, %v12484_v24  ;;  %v6896_v28 = vpop.trf.xlu1 }
 0x66a   : > { %v6848_v14 = vadd.f32 %v6784_v16, %v6605_v48  ;;  %v5712_v34 = vpop.f32.mrf.mxu1  ;;  %v7007_v62 = vadd.f32 %v7006_v63, %v6896_v28  ;;  %v13050_v63 = vpop.f32.mrf.mxu0  ;;  %v13843_v16 = vld [vmem:[#allocation27_spill] sm:$0xff] }
 0x66b   : > { %v6785_v36 = vadd.f32 %v13841_v42, %v6608_v5  ;;  %v6609_v32 = vmul.f32 %v12508_v0, %v6331_v35  ;;  %v6334_v56 = vmax.f32 %v6062_v40, 0.0  ;;  %v6064_v17 = vadd.f32 %v12910_v43, %v5711_v47 }
 0x66c   : > { %v5713_v44 = vadd.f32 %v5712_v34, %v12472_v6  ;;  %6944 = vxpose.xlu0.b32.cont [15/16] %v6848_v14, 128  ;;  %v5714_v58 = vpop.f32.mrf.mxu1  ;;  %v13060_v14 = vpop.f32.mrf.mxu0 }
 0x66d   : > { %v6849_v13 = vadd.f32 %v6785_v36, %v6609_v32  ;;  %v6612_v50 = vmul.f32 %v12501_v53, %v6334_v56  ;;  %v6335_v60 = vmax.f32 %v6064_v17, 0.0  ;;  %v5715_v39 = vadd.f32 %v5714_v58, %v12484_v24  ;;  %v6897_v21 = vpop.trf.xlu1 }
 0x66e   : > { %v6066_v25 = vadd.f32 %v12916_v45, %v5713_v44  ;;  %v5718_v57 = vpop.f32.mrf.mxu1  ;;  %v13042_v38 = vadd.f32 %v7007_v62, %v6897_v21  ;;  %v13068_v21 = vpop.f32.mrf.mxu0 }
 0x66f   : > { %v6786_v43 = vadd.f32 %v13842_v41, %v6612_v50  ;;  %v6613_v7 = vmul.f32 %v12508_v0, %v6335_v60  ;;  %v6068_v61 = vadd.f32 %v12921_v52, %v5715_v39  ;;  %v5719_v20 = vadd.f32 %v5718_v57, %v12472_v6 }
 0x670   : > { %v6338_v11 = vmax.f32 %v6066_v25, 0.0  ;;  %6945 = vxpose.xlu0.b32.end [16/16] %v6849_v13, 128  ;;  %v5720_v46 = vpop.f32.mrf.mxu1  ;;  %v6914_v33 = vpop.trf.xlu0 }
 0x671   : > { %v6850_v10 = vadd.f32 %v6786_v43, %v6613_v7  ;;  %v6339_v1 = vmax.f32 %v6068_v61, 0.0  ;;  %v6072_v18 = vadd.f32 %v12927_v9, %v5719_v20  ;;  %v5721_v45 = vadd.f32 %v5720_v46, %v12484_v24  ;;  %v13845_v43 = vld [vmem:[#allocation28_spill] sm:$0xff] }
 0x672   : > { %v6616_v48 = vmul.f32 %v12501_v53, %v6338_v11  ;;  %v5722_v26 = vpop.f32.mrf.mxu1 }
 0x673   : > { %v6617_v3 = vmul.f32 %v12508_v0, %v6339_v1  ;;  %v6342_v52 = vmax.f32 %v6072_v18, 0.0  ;;  %v6074_v8 = vadd.f32 %v12932_v31, %v5721_v45  ;;  %v5723_v29 = vadd.f32 %v5722_v26, %v12472_v6  ;;  %6962 = vxpose.xlu1.b32.start [1/16] %v6850_v10, 128  ;;  %v13844_v31 = vld [vmem:[#allocation80_spill] sm:$0xff] }
 0x674   : > { %v6787_v51 = vadd.f32 %v13843_v16, %v6616_v48  ;;  %v5724_v5 = vpop.f32.mrf.mxu1  ;;  %v6915_v28 = vpop.trf.xlu0  ;;  %v13846_v16 = vld [vmem:[#allocation36_spill] sm:$0xff] }
 0x675   : > { %v6620_v9 = vmul.f32 %v12501_v53, %v6342_v52  ;;  %v6343_v35 = vmax.f32 %v6074_v8, 0.0  ;;  %v6076_v40 = vadd.f32 %v12941_v30, %v5723_v29  ;;  %v5725_v47 = vadd.f32 %v5724_v5, %v12484_v24 }
 0x676   : > { %v6851_v34 = vadd.f32 %v6787_v51, %v6617_v3  ;;  %v5728_v62 = vpop.f32.mrf.mxu1  ;;  %v7015_v42 = vadd.f32 %v6915_v28, %v6914_v33  ;;  %v13077_v33 = vpop.f32.mrf.mxu0 }
 0x677   : > { %v6788_v36 = vadd.f32 %v13844_v31, %v6620_v9  ;;  %v6621_v32 = vmul.f32 %v12508_v0, %v6343_v35  ;;  %v6346_v56 = vmax.f32 %v6076_v40, 0.0  ;;  %v6078_v17 = vadd.f32 %v12950_v19, %v5725_v47 }
 0x678   : > { %v5729_v44 = vadd.f32 %v5728_v62, %v12472_v6  ;;  %6963 = vxpose.xlu1.b32.cont [2/16] %v6851_v34, 128  ;;  %v5730_v58 = vpop.f32.mrf.mxu1  ;;  %v6916_v39 = vpop.trf.xlu0 }
 0x679   : > { %v6852_v30 = vadd.f32 %v6788_v36, %v6621_v32  ;;  %v6624_v13 = vmul.f32 %v12501_v53, %v6346_v56  ;;  %v6347_v50 = vmax.f32 %v6078_v17, 0.0  ;;  %v5731_v60 = vadd.f32 %v5730_v58, %v12484_v24  ;;  %v13087_v28 = vpop.f32.mrf.mxu0 }
 0x67a   : > { %v6082_v25 = vadd.f32 %v12958_v4, %v5729_v44  ;;  %v5732_v57 = vpop.f32.mrf.mxu1  ;;  %v7016_v41 = vadd.f32 %v7015_v42, %v6916_v39 }
 0x67b   : > { %v6789_v7 = vadd.f32 %v13845_v43, %v6624_v13  ;;  %v6625_v19 = vmul.f32 %v12508_v0, %v6347_v50  ;;  %v6084_v61 = vadd.f32 %v12968_v15, %v5731_v60  ;;  %v5733_v20 = vadd.f32 %v5732_v57, %v12472_v6  ;;  %v13095_v60 = vpop.f32.mrf.mxu0 }
 0x67c   : > { %v6350_v11 = vmax.f32 %v6082_v25, 0.0  ;;  %6964 = vxpose.xlu1.b32.cont [3/16] %v6852_v30, 128  ;;  %v5734_v46 = vpop.f32.mrf.mxu1  ;;  %v6917_v4 = vpop.trf.xlu0 }
 0x67d   : > { %v6853_v10 = vadd.f32 %v6789_v7, %v6625_v19  ;;  %v6351_v1 = vmax.f32 %v6084_v61, 0.0  ;;  %v6086_v18 = vadd.f32 %v12977_v22, %v5733_v20  ;;  %v5735_v45 = vadd.f32 %v5734_v46, %v12484_v24 }
 0x67e   : > { %v6628_v48 = vmul.f32 %v12501_v53, %v6350_v11  ;;  %v5738_v26 = vpop.f32.mrf.mxu1  ;;  %v7017_v3 = vadd.f32 %v7016_v41, %v6917_v4  ;;  %v13848_v41 = vld [vmem:[#allocation81_spill] sm:$0xff] }
 0x67f   : > { %v6629_v15 = vmul.f32 %v12508_v0, %v6351_v1  ;;  %v6354_v52 = vmax.f32 %v6086_v18, 0.0  ;;  %v6088_v8 = vadd.f32 %v12985_v59, %v5735_v45  ;;  %v5739_v29 = vadd.f32 %v5738_v26, %v12472_v6  ;;  %v13847_v59 = vld [vmem:[#allocation26_spill] sm:$0xff]  ;;  %v6121_v18 = vpop.f32.mrf.mxu0 }
 0x680   : > { %v6790_v51 = vadd.f32 %v13846_v16, %v6628_v48  ;;  %6965 = vxpose.xlu1.b32.cont [4/16] %v6853_v10, 128  ;;  %v5740_v22 = vpop.f32.mrf.mxu1  ;;  %v6918_v47 = vpop.trf.xlu0 }
 0x681   : > { %v6632_v5 = vmul.f32 %v12501_v53, %v6354_v52  ;;  %v6355_v9 = vmax.f32 %v6088_v8, 0.0  ;;  %v6092_v35 = vadd.f32 %v12994_v23, %v5739_v29  ;;  %v5741_v40 = vadd.f32 %v5740_v22, %v12484_v24  ;;  %v13849_v52 = vld [vmem:[#allocation34_spill] sm:$0xff] }
 0x682   : > { %v6854_v34 = vadd.f32 %v6790_v51, %v6629_v15  ;;  %v5742_v62 = vpop.f32.mrf.mxu1  ;;  %v7018_v42 = vadd.f32 %v7017_v3, %v6918_v47 }
 0x683   : > { %v6791_v31 = vadd.f32 %v13847_v59, %v6632_v5  ;;  %v6633_v36 = vmul.f32 %v12508_v0, %v6355_v9  ;;  %v6358_v32 = vmax.f32 %v6092_v35, 0.0  ;;  %v6094_v56 = vadd.f32 %v13004_v12, %v5741_v40  ;;  %v6123_v9 = vpop.f32.mrf.mxu0 }
 0x684   : > { %v5743_v17 = vadd.f32 %v5742_v62, %v12472_v6  ;;  %6966 = vxpose.xlu1.b32.cont [5/16] %v6854_v34, 128  ;;  %v5744_v44 = vpop.f32.mrf.mxu1  ;;  %v6919_v50 = vpop.trf.xlu0  ;;  %v13850_v34 = vld [vmem:[#allocation7_spill] sm:$0xff] }
 0x685   : > { %v6855_v23 = vadd.f32 %v6791_v31, %v6633_v36  ;;  %v6636_v58 = vmul.f32 %v12501_v53, %v6358_v32  ;;  %v6359_v30 = vmax.f32 %v6094_v56, 0.0  ;;  %v5745_v13 = vadd.f32 %v5744_v44, %v12484_v24 }
 0x686   : > { %v6096_v39 = vadd.f32 %v13012_v27, %v5743_v17  ;;  %v5748_v25 = vpop.f32.mrf.mxu1  ;;  %v7019_v57 = vadd.f32 %v7018_v42, %v6919_v50  ;;  %v13851_v50 = vld [vmem:[#allocation37_spill] sm:$0xff] }
 0x687   : > { %v6792_v43 = vadd.f32 %v13848_v41, %v6636_v58  ;;  %v6637_v12 = vmul.f32 %v12508_v0, %v6359_v30  ;;  %v6098_v7 = vadd.f32 %v13021_v2, %v5745_v13  ;;  %v5749_v19 = vadd.f32 %v5748_v25, %v12472_v6 }
 0x688   : > { %v6362_v61 = vmax.f32 %v6096_v39, 0.0  ;;  %6967 = vxpose.xlu1.b32.cont [6/16] %v6855_v23, 128  ;;  %v5750_v20 = vpop.f32.mrf.mxu1  ;;  %v6920_v27 = vpop.trf.xlu0 }
 0x689   : > { %v6856_v11 = vadd.f32 %v6792_v43, %v6637_v12  ;;  %v6363_v46 = vmax.f32 %v6098_v7, 0.0  ;;  %v6102_v10 = vadd.f32 %v13031_v37, %v5749_v19  ;;  %v5751_v1 = vadd.f32 %v5750_v20, %v12484_v24  ;;  %v6125_v23 = vpop.f32.mrf.mxu0 }
 0x68a   : > { %v6640_v45 = vmul.f32 %v12501_v53, %v6362_v61  ;;  %v5752_v4 = vpop.f32.mrf.mxu1  ;;  %v7020_v48 = vadd.f32 %v7019_v57, %v6920_v27 }
 0x68b   : > { %v6641_v26 = vmul.f32 %v12508_v0, %v6363_v46  ;;  %v6366_v2 = vmax.f32 %v6102_v10, 0.0  ;;  %v6104_v3 = vadd.f32 %v13039_v55, %v5751_v1  ;;  %v5753_v15 = vadd.f32 %v5752_v4, %v12472_v6  ;;  %v6127_v20 = vpop.f32.mrf.mxu0  ;;  %v7078_v4 = vld [vmem:[#allocation2] sm:$0x1] }
 0x68c   : > { %v6793_v8 = vadd.f32 %v13849_v52, %v6640_v45  ;;  %6968 = vxpose.xlu1.b32.cont [7/16] %v6856_v11, 128  ;;  %v5754_v29 = vpop.f32.mrf.mxu1  ;;  %v6921_v5 = vpop.trf.xlu0 }
 0x68d   : > { %v6644_v37 = vmul.f32 %v12501_v53, %v6366_v2  ;;  %v6367_v16 = vmax.f32 %v6104_v3, 0.0  ;;  %v6106_v51 = vadd.f32 %v13050_v63, %v5753_v15  ;;  %v5755_v22 = vadd.f32 %v5754_v29, %v12484_v24 }
 0x68e   : > { %v6857_v35 = vadd.f32 %v6793_v8, %v6641_v26  ;;  %v5758_v40 = vpop.f32.mrf.mxu1  ;;  %v7021_v47 = vadd.f32 %v7020_v48, %v6921_v5  ;;  %v13852_v48 = vld [vmem:[#allocation83_spill] sm:$0xff]  ;;  %v13853_v8 = vmov 0  }
 0x68f   : > { %v6794_v55 = vadd.f32 %v13850_v34, %v6644_v37  ;;  %v6645_v62 = vmul.f32 %v12508_v0, %v6367_v16  ;;  %v6370_v42 = vmax.f32 %v6106_v51, 0.0  ;;  %v6108_v59 = vadd.f32 %v13060_v14, %v5755_v22  ;;  %v6131_v37 = vpop.f32.mrf.mxu0  ;;  %v13854_v22 = vld [vmem:[#allocation9_spill] sm:$0xff] }
 0x690   : > { %v5759_v31 = vadd.f32 %v5758_v40, %v12472_v6  ;;  %6969 = vxpose.xlu1.b32.cont [8/16] %v6857_v35, 128  ;;  %v5760_v36 = vpop.f32.mrf.mxu1  ;;  %v6922_v44 = vpop.trf.xlu0 }
 0x691   : > { %v6858_v32 = vadd.f32 %v6794_v55, %v6645_v62  ;;  %v6648_v63 = vmul.f32 %v12501_v53, %v6370_v42  ;;  %v6371_v56 = vmax.f32 %v6108_v59, 0.0  ;;  %v5761_v17 = vadd.f32 %v5760_v36, %v12484_v24  ;;  %v6133_v36 = vpop.f32.mrf.mxu0 }
 0x692   : > { %v6112_v58 = vadd.f32 %v13068_v21, %v5759_v31  ;;  %v5762_v30 = vpop.f32.mrf.mxu1  ;;  %v7022_v13 = vadd.f32 %v7021_v47, %v6922_v44 }
 0x693   : > { %v6795_v39 = vadd.f32 %v13851_v50, %v6648_v63  ;;  %v6649_v14 = vmul.f32 %v12508_v0, %v6371_v56  ;;  %v6114_v25 = vadd.f32 %v13077_v33, %v5761_v17  ;;  %v5763_v57 = vadd.f32 %v5762_v30, %v12472_v6  ;;  %v13855_v17 = vld [vmem:[#allocation10_spill] sm:$0xff] }
 0x694   : > { %v6374_v41 = vmax.f32 %v6112_v58, 0.0  ;;  %6970 = vxpose.xlu1.b32.cont [9/16] %v6858_v32, 128  ;;  %v5764_v43 = vpop.f32.mrf.mxu1  ;;  %v6923_v21 = vpop.trf.xlu0 }
 0x695   : > { %v6859_v12 = vadd.f32 %v6795_v39, %v6649_v14  ;;  %v6375_v7 = vmax.f32 %v6114_v25, 0.0  ;;  %v6116_v19 = vadd.f32 %v13087_v28, %v5763_v57  ;;  %v5765_v61 = vadd.f32 %v5764_v43, %v12484_v24  ;;  %v6135_v43 = vpop.f32.mrf.mxu0 }
 0x696   : > { %v6652_v11 = vmul.f32 %v12501_v53, %v6374_v41  ;;  %v5768_v46 = vpop.f32.mrf.mxu1  ;;  %v7023_v10 = vadd.f32 %v7022_v13, %v6923_v21 }
 0x697   : > { %v6653_v1 = vmul.f32 %v12508_v0, %v6375_v7  ;;  %v6378_v33 = vmax.f32 %v6116_v19, 0.0  ;;  %v6118_v27 = vadd.f32 %v13095_v60, %v5765_v61  ;;  %v5769_v45 = vadd.f32 %v5768_v46, %v12472_v6 }
 0x698   : > { %v6796_v26 = vadd.f32 %v13852_v48, %v6652_v11  ;;  %6971 = vxpose.xlu1.b32.cont [10/16] %v6859_v12, 128  ;;  %v5770_v28 = vpop.f32.mrf.mxu1  ;;  %v6924_v29 = vpop.trf.xlu0  ;;  %v13856_v11 = vld [vmem:[#allocation41_spill] sm:$0xff] }
 0x699   : > { %v6656_v2 = vmul.f32 %v12501_v53, %v6378_v33  ;;  %v6379_v3 = vmax.f32 %v6118_v27, 0.0  ;;  %v6122_v15 = vadd.f32 %v6121_v18, %v5769_v45  ;;  %v5771_v52 = vadd.f32 %v5770_v28, %v12484_v24  ;;  %7523 = vset.pattern.permute.xlu0 %v13853_v8  ;;  %v6137_v48 = vpop.f32.mrf.mxu0 }
 0x69a   : > { %v6860_v16 = vadd.f32 %v6796_v26, %v6653_v1  ;;  %7081 = vperm.xlu0 %7523, %v7078_v4   ;;  %v5772_v60 = vpop.f32.mrf.mxu1  ;;  %v7024_v51 = vadd.f32 %v7023_v10, %v6924_v29 }
 0x69b   : > { %v6797_v5 = vadd.f32 %v13854_v22, %v6656_v2  ;;  %v6657_v35 = vmul.f32 %v12508_v0, %v6379_v3  ;;  %v6382_v40 = vmax.f32 %v6122_v15, 0.0  ;;  %v6124_v47 = vadd.f32 %v6123_v9, %v5771_v52 }
 0x69c   : > { %v5773_v34 = vadd.f32 %v5772_v60, %v12472_v6  ;;  %6972 = vxpose.xlu1.b32.cont [11/16] %v6860_v16, 128  ;;  %v5774_v18 = vpop.f32.mrf.mxu1  ;;  %v6925_v31 = vpop.trf.xlu0 }
 0x69d   : > { %v6861_v55 = vadd.f32 %v6797_v5, %v6657_v35  ;;  %v6660_v62 = vmul.f32 %v12501_v53, %v6382_v40  ;;  %v6383_v42 = vmax.f32 %v6124_v47, 0.0  ;;  %v5775_v59 = vadd.f32 %v5774_v18, %v12484_v24 }
 0x69e   : > { %v6126_v32 = vadd.f32 %v6125_v23, %v5773_v34  ;;  %v5778_v63 = vpop.f32.mrf.mxu1  ;;  %v7025_v56 = vadd.f32 %v7024_v51, %v6925_v31 }
 0x69f   : > { %v6798_v44 = vadd.f32 %v13855_v17, %v6660_v62  ;;  %v6661_v58 = vmul.f32 %v12508_v0, %v6383_v42  ;;  %v6128_v9 = vadd.f32 %v6127_v20, %v5775_v59  ;;  %v5779_v30 = vadd.f32 %v5778_v63, %v12472_v6 }
 0x6a0   : > { %v6386_v13 = vmax.f32 %v6126_v32, 0.0  ;;  %6973 = vxpose.xlu1.b32.cont [12/16] %v6861_v55, 128  ;;  %v5780_v50 = vpop.f32.mrf.mxu1  ;;  %v6926_v41 = vpop.trf.xlu0 }
 0x6a1   : > { %v6862_v39 = vadd.f32 %v6798_v44, %v6661_v58  ;;  %v6387_v14 = vmax.f32 %v6128_v9, 0.0  ;;  %v6132_v25 = vadd.f32 %v6131_v37, %v5779_v30  ;;  %v5781_v57 = vadd.f32 %v5780_v50, %v12484_v24 }
 0x6a2   : > { %v6664_v23 = vmul.f32 %v12501_v53, %v6386_v13  ;;  %v5782_v12 = vpop.f32.mrf.mxu1  ;;  %v7026_v7 = vadd.f32 %v7025_v56, %v6926_v41 }
 0x6a3   : > { %v6665_v19 = vmul.f32 %v12508_v0, %v6387_v14  ;;  %v6390_v61 = vmax.f32 %v6132_v25, 0.0  ;;  %v6134_v21 = vadd.f32 %v6133_v36, %v5781_v57  ;;  %v5783_v20 = vadd.f32 %v5782_v12, %v12472_v6 }
 0x6a4   : > { %v6799_v46 = vadd.f32 %v13856_v11, %v6664_v23  ;;  %6974 = vxpose.xlu1.b32.cont [13/16] %v6862_v39, 128  ;;  %v5784_v10 = vpop.f32.mrf.mxu1  ;;  %v6927_v4 = vpop.trf.xlu0  ;;  %v7009_v14 = vrot.slane %v13042_v38, 4 }
 0x6a5   : > { %v6668_v1 = vmul.f32 %v12501_v53, %v6390_v61  ;;  %v6391_v33 = vmax.f32 %v6134_v21, 0.0  ;;  %v6136_v27 = vadd.f32 %v6135_v43, %v5783_v20  ;;  %v5785_v45 = vadd.f32 %v5784_v10, %v12484_v24 }
 0x6a6   : > { %v6863_v26 = vadd.f32 %v6799_v46, %v6665_v19  ;;  %v7027_v28 = vadd.f32 %v7026_v7, %v6927_v4  ;;  %v7010_v23 = vadd.f32 %v7009_v14, %v13042_v38 }
 0x6a7   : > { %v6800_v2 = vadd.f32 %v12504_v49, %v6668_v1  ;;  %v6669_v3 = vmul.f32 %v12508_v0, %v6391_v33  ;;  %v6394_v15 = vmax.f32 %v6136_v27, 0.0  ;;  %v6138_v6 = vadd.f32 %v6137_v48, %v5785_v45 }
 0x6a8   : > { %6975 = vxpose.xlu1.b32.cont [14/16] %v6863_v26, 128  ;;  %v6928_v37 = vpop.trf.xlu0  ;;  %v7011_v61 = vrot.slane %v7010_v23, 2 }
 0x6a9   : > { %v6864_v52 = vadd.f32 %v6800_v2, %v6669_v3  ;;  %v6672_v8 = vmul.f32 %v12501_v53, %v6394_v15  ;;  %v6395_v29 = vmax.f32 %v6138_v6, 0.0  ;;  %v7028_v16 = vadd.f32 %v7027_v28, %v6928_v37 }
 0x6aa   : > { %v7012_v10 = vadd.f32 %v7011_v61, %v7010_v23  ;;  %v13858_v23 = vld [vmem:[#allocation3_spill] sm:$0xff] }
 0x6ab   : > { %v6801_v60 = vadd.f32 %v12518_v54, %v6672_v8  ;;  %v6673_v24 = vmul.f32 %v12508_v0, %v6395_v29 }
 0x6ac   : > { %6976 = vxpose.xlu1.b32.cont [15/16] %v6864_v52, 128  ;;  %v6929_v22 = vpop.trf.xlu0  ;;  %v7013_v48 = vrot.slane %v7012_v10, 1  ;;  %v13857_v52 = vld [vmem:[#allocation5_spill] sm:$0xff] }
 0x6ad   : > { %v6865_v51 = vadd.f32 %v6801_v60, %v6673_v24  ;;  %v7029_v5 = vadd.f32 %v7028_v16, %v6929_v22 }
 0x6ae   : > { %v7014_v6 = vadd.f32 %v7013_v48, %v7012_v10 }
 0x6af   : > { %v7030_v39 = vrot.slane %v7029_v5, 4 }
 0x6b0   : > { %6977 = vxpose.xlu1.b32.end [16/16] %v6865_v51, 128  ;;  %v6946_v49 = vpop.trf.xlu0 }
 0x6b1   : > { %v7031_v43 = vadd.f32 %v7030_v39, %v7029_v5 }
 0x6b3   : > { %v7032_v19 = vrot.slane %v7031_v43, 2 }
 0x6b4   : > { %v6947_v35 = vpop.trf.xlu0 }
 0x6b5   : > { %v7036_v42 = vadd.f32 %v6947_v35, %v6946_v49  ;;  %v7033_v46 = vadd.f32 %v7032_v19, %v7031_v43 }
 0x6b7   : > { %v7034_v4 = vrot.slane %v7033_v46, 1 }
 0x6b8   : > { %v6948_v40 = vpop.trf.xlu0 }
 0x6b9   : > { %v7037_v59 = vadd.f32 %v7036_v42, %v6948_v40  ;;  %v7035_v15 = vadd.f32 %v7034_v4, %v7033_v46  ;;  %v13859_v46 = vlaneseq }
 0x6bb   : > { %vm7123_vm0 = vcmp.lt.s32.totalorder %v13859_v46, 512 }
 0x6bc   : > { %v6949_v47 = vpop.trf.xlu0 }
 0x6bd   : > { %v7038_v36 = vadd.f32 %v7037_v59, %v6949_v47 }
 0x6c0   : > { %v6950_v34 = vpop.trf.xlu0 }
 0x6c1   : > { %v7039_v63 = vadd.f32 %v7038_v36, %v6950_v34 }
 0x6c4   : > { %v6951_v18 = vpop.trf.xlu0 }
 0x6c5   : > { %v7040_v17 = vadd.f32 %v7039_v63, %v6951_v18 }
 0x6c8   : > { %v6952_v55 = vpop.trf.xlu0 }
 0x6c9   : > { %v7041_v9 = vadd.f32 %v7040_v17, %v6952_v55 }
 0x6cc   : > { %v6953_v53 = vpop.trf.xlu0 }
 0x6cd   : > { %v7042_v50 = vadd.f32 %v7041_v9, %v6953_v53 }
 0x6d0   : > { %v6954_v62 = vpop.trf.xlu0 }
 0x6d1   : > { %v7043_v57 = vadd.f32 %v7042_v50, %v6954_v62 }
 0x6d4   : > { %v6955_v31 = vpop.trf.xlu0 }
 0x6d5   : > { %v7044_v7 = vadd.f32 %v7043_v57, %v6955_v31 }
 0x6d8   : > { %v6956_v0 = vpop.trf.xlu0 }
 0x6d9   : > { %v7045_v11 = vadd.f32 %v7044_v7, %v6956_v0 }
 0x6dc   : > { %v6957_v44 = vpop.trf.xlu0 }
 0x6dd   : > { %v7046_v27 = vadd.f32 %v7045_v11, %v6957_v44 }
 0x6e0   : > { %v6958_v30 = vpop.trf.xlu0 }
 0x6e1   : > { %v7047_v2 = vadd.f32 %v7046_v27, %v6958_v30  ;;  %v7864_v30 = vmov 1966171168  }
 0x6e4   : > { %v6959_v41 = vpop.trf.xlu0 }
 0x6e5   : > { %v7048_v24 = vadd.f32 %v7047_v2, %v6959_v41 }
 0x6e8   : > { %v6960_v21 = vpop.trf.xlu0 }
 0x6e9   : > { %v7049_v35 = vadd.f32 %v7048_v24, %v6960_v21 }
 0x6ec   : > { %v6961_v45 = vpop.trf.xlu0 }
 0x6ed   : > { %v7050_v18 = vadd.f32 %v7049_v35, %v6961_v45 }
 0x6ef   : > { %v7051_v42 = vrot.slane %v7050_v18, 4 }
 0x6f0   : > { %v6978_v54 = vpop.trf.xlu1 }
 0x6f1   : > { %v7052_v36 = vadd.f32 %v7051_v42, %v7050_v18 }
 0x6f4   : > { %v6979_v32 = vpop.trf.xlu1 }
 0x6f5   : > { %v7057_v33 = vadd.f32 %v6979_v32, %v6978_v54 }
 0x6f8   : > { %v6980_v56 = vpop.trf.xlu1 }
 0x6f9   : > { %v7058_v26 = vadd.f32 %v7057_v33, %v6980_v56  ;;  %v7053_v56 = vrot.slane %v7052_v36, 2 }
 0x6fc   : > { %v6981_v58 = vpop.trf.xlu1 }
 0x6fd   : > { %v7059_v3 = vadd.f32 %v7058_v26, %v6981_v58  ;;  %v7054_v58 = vadd.f32 %v7053_v56, %v7052_v36 }
 0x6ff   : > { %v7055_v39 = vrot.slane %v7054_v58, 1 }
 0x700   : > { %v6982_v13 = vpop.trf.xlu1 }
 0x701   : > { %v7060_v29 = vadd.f32 %v7059_v3, %v6982_v13  ;;  %v7099_v13 = vunpack.c.l.s4 %v7864_v30  ;;  %v7056_v41 = vadd.f32 %v7055_v39, %v7054_v58 }
 0x704   : > { %v6983_v25 = vpop.trf.xlu1 }
 0x705   : > { %v7061_v51 = vadd.f32 %v7060_v29, %v6983_v25  ;;  %v7100_v25 = vunpack.c.0.s8 %v7099_v13 }
 0x708   : > { %v6984_v12 = vpop.trf.xlu1 }
 0x709   : > { %v7062_v5 = vadd.f32 %v7061_v51, %v6984_v12  ;;  %v7103_v12 = vsub.s32 %v7100_v25, %v13858_v23 }
 0x70c   : > { %v6985_v20 = vpop.trf.xlu1 }
 0x70d   : > { %v7063_v40 = vadd.f32 %v7062_v5, %v6985_v20 }
 0x710   : > { %v6986_v1 = vpop.trf.xlu1 }
 0x711   : > { %v7064_v47 = vadd.f32 %v7063_v40, %v6986_v1 }
 0x714   : > { %v6987_v28 = vpop.trf.xlu1 }
 0x715   : > { %v7082_v38 = vpop.permute.xlu0 %7081  ;;  %v7065_v55 = vadd.f32 %v7064_v47, %v6987_v28 }
 0x716   : > { %v7087_v8 = vrot.slane %v7082_v38, %v13857_v52 }
 0x718   : > { %v7088_v37 = vadd.f32 %v7087_v8, %v7014_v6  ;;  %v7089_v16 = vadd.f32 %v7087_v8, %v7035_v15  ;;  %v6988_v60 = vpop.trf.xlu1  ;;  %v7090_v7 = vadd.f32 %v7087_v8, %v7056_v41 }
 0x719   : > { %v7066_v53 = vadd.f32 %v7065_v55, %v6988_v60 }
 0x71a   : > { %v7096_v22 = vcombine.low %v7088_v37, %v7089_v16 }
 0x71c   : > { %v6989_v49 = vpop.trf.xlu1  ;;  %v7104_v21 = vrot.slane %v7096_v22, %v7103_v12 }
 0x71d   : > { %v7067_v59 = vadd.f32 %v7066_v53, %v6989_v49 }
 0x720   : > { %v6990_v34 = vpop.trf.xlu1 }
 0x721   : > { %v7068_v31 = vadd.f32 %v7067_v59, %v6990_v34 }
 0x724   : > { %v6991_v62 = vpop.trf.xlu1 }
 0x725   : > { %v7069_v0 = vadd.f32 %v7068_v31, %v6991_v62 }
 0x728   : > { %v6992_v54 = vpop.trf.xlu1 }
 0x729   : > { %v7070_v32 = vadd.f32 %v7069_v0, %v6992_v54 }
 0x72c   : > { %v6993_v63 = vpop.trf.xlu1 }
 0x72d   : > { %v7071_v17 = vadd.f32 %v7070_v32, %v6993_v63 }
 0x72f   : > { %v7072_v44 = vrot.slane %v7071_v17, 4 }
 0x731   : > { %v7073_v9 = vadd.f32 %v7072_v44, %v7071_v17 }
 0x733   : > { %v7074_v50 = vrot.slane %v7073_v9, 2 }
 0x735   : > { %v7075_v14 = vadd.f32 %v7074_v50, %v7073_v9 }
 0x737   : > { %v7076_v57 = vrot.slane %v7075_v14, 1 }
 0x739   : > { %v7077_v43 = vadd.f32 %v7076_v57, %v7075_v14 }
 0x73b   : > { %v7091_v19 = vadd.f32 %v7087_v8, %v7077_v43 }
 0x73d   : > { %v7097_v61 = vcombine.low %v7090_v7, %v7091_v19 }
 0x73f   : > { %v7111_v20 = vrot.slane %v7097_v61, %v7103_v12 }
 0x741   : > { %v7112_v11 = vcombine.low %v7104_v21, %v7111_v20 }
 0x743   : > { %v7119_v10 = vrot.slane %v7112_v11, %v7103_v12 }
 0x745   : > { %7125 = vst.msk [vmem:[%s388_s16] sm:$0xf] %vm7123_vm0, %v7119_v10 }
 0x746 PF: > { %s23_s19 = sadd.s32 1, %s7859_s19  }
 0x747   : > { %p20_p5 = scmp.ge.s32.totalorder %s23_s19, 4  }
 0x749   :  { %22 = sbr.rel (!%p20_p5) target bundleno = 3 (0x3), region = 94 }

</bundles_post_ra>
